<compile_context>
chip_gen: v7x
topology: tpu7x:2x2x1
jax: 0.10.0
libtpu: 0.0.40
codegen_flags: <defaults>
</compile_context>

<pallas_src>
import functools

import jax
import jax.numpy as jnp
from jax.experimental import pallas as pl
from jax.experimental.pallas import tpu as pltpu


def _round_up(x, m):
    return ((x + m - 1) // m) * m


def _tap_group(num_taps):
    # 3x3 convs (9 taps) are processed 3 taps per K grid step; plain matmuls
    # (1 tap) take the whole K in one step.
    return 3 if num_taps == 9 else 1


# ----------------------------------------------------------------------------
# Pallas kernel:  out = maybe_relu( sum_taps(A_t @ W_t) + shift (+ residual) )
# f32 accumulation in a VMEM scratch across the K ("arbitrary") grid axis,
# bf16/f32 cast + epilogue on the last K step only.
# ----------------------------------------------------------------------------
def _fused_matmul_kernel(*refs, tg, kp, relu, has_res):
    a_ref, w_ref, shift_ref = refs[0], refs[1], refs[2]
    nxt = 3
    res_ref = None
    if has_res:
        res_ref = refs[nxt]
        nxt += 1
    o_ref, acc_ref = refs[nxt], refs[nxt + 1]

    kk = pl.program_id(2)

    @pl.when(kk == 0)
    def _():
        acc_ref[...] = jnp.zeros_like(acc_ref)

    acc = acc_ref[...]
    for t in range(tg):  # static unroll: tg MXU matmuls per grid step
        acc = acc + jnp.dot(a_ref[t], w_ref[0, pl.ds(t * kp, kp), :],
                            preferred_element_type=jnp.float32)
    acc_ref[...] = acc

    @pl.when(kk == pl.num_programs(2) - 1)
    def _():
        z = acc_ref[...] + shift_ref[...]
        if has_res:
            z = z + res_ref[...].astype(jnp.float32)
        if relu:
            z = jnp.maximum(z, 0.0)
        o_ref[...] = z.astype(o_ref.dtype)


def fused_matmul(a_taps, layer, *, n_out, relu, residual=None,
                 out_dtype=jnp.bfloat16):
    """out = maybe_relu(sum_t a_taps[t] @ W_t + shift (+ residual)).

    a_taps : (T, M, K) activation taps (cast to bf16, padded here).
    layer  : dict(w=(Np//tn, T*Kp, tn) bf16 tile-major weight (BN scale folded),
                  shift=(1, Np) f32).
    residual: optional (M, n_out), streamed as bf16, added before the ReLU.
    Returns (M, n_out) in `out_dtype`.
    """
    w, shift = layer["w"], layer["shift"]
    Nt, t_kp, tn = w.shape
    Np = Nt * tn
    T, M, K = a_taps.shape
    Kp = t_kp // T
    tg = _tap_group(T)
    TG = T // tg
    assert K <= Kp and n_out <= Np and shift.shape == (1, Np)

    # Row tiling: cap tm at 256 (prefer batching >=4 boards per forward so the
    # big-MXU generations see more than a handful of rows).
    Mp0 = max(8, _round_up(M, 8))
    tm = Mp0 if Mp0 <= 256 else 256
    Mp = _round_up(Mp0, tm)

    a_p = a_taps.astype(jnp.bfloat16)
    if (Mp, Kp) != (M, K):
        a_p = jnp.pad(a_p, ((0, 0), (0, Mp - M), (0, Kp - K)))

    operands = [a_p, w, shift]
    in_specs = [
        pl.BlockSpec((tg, tm, Kp), lambda i, j, kk: (kk, i, 0)),
        pl.BlockSpec((1, tg * Kp, tn), lambda i, j, kk: (j, kk, 0)),
        pl.BlockSpec((1, tn), lambda i, j, kk: (0, j)),
    ]
    has_res = residual is not None
    if has_res:
        r = residual.astype(jnp.bfloat16)
        if r.shape != (Mp, Np):
            r = jnp.pad(r, ((0, Mp - r.shape[0]), (0, Np - r.shape[1])))
        operands.append(r)
        in_specs.append(pl.BlockSpec((tm, tn), lambda i, j, kk: (i, j)))

    # Per-call VMEM sizing (double-buffered operands + out + f32 scratch),
    # clamped with headroom under v7x's 64 MiB per-TC VMEM.
    out_isz = jnp.dtype(out_dtype).itemsize
    blk = (2 * (tg * tm * Kp * 2) + 2 * (tg * Kp * tn * 2) + 2 * (tn * 4)
           + 2 * (tm * tn * out_isz) + tm * tn * 4)
    if has_res:
        blk += 2 * (tm * tn * 2)
    vmem_limit = int(min(56 * 1024 * 1024, max(32 * 1024 * 1024, 2 * blk)))

    grid = (Mp // tm, Nt, TG)

    out = pl.pallas_call(
        functools.partial(_fused_matmul_kernel, tg=tg, kp=Kp,
                          relu=relu, has_res=has_res),
        out_shape=jax.ShapeDtypeStruct((Mp, Np), out_dtype),
        grid_spec=pltpu.PrefetchScalarGridSpec(
            num_scalar_prefetch=0,
            grid=grid,
            in_specs=in_specs,
            out_specs=pl.BlockSpec((tm, tn), lambda i, j, kk: (i, j)),
            scratch_shapes=[pltpu.VMEM((tm, tn), jnp.float32)]),
        compiler_params=pltpu.CompilerParams(
            dimension_semantics=("parallel", "parallel", "arbitrary"),
            vmem_limit_bytes=vmem_limit),
    )(*operands)

    return out[:M, :n_out]


# ----------------------------------------------------------------------------
# Conv glue: stack the nine 3x3 taps as (9, B*H*W, C) (no im2col concat).
# ----------------------------------------------------------------------------
def stack_taps_3x3(x_nhwc):
    B, H, W, C = x_nhwc.shape
    xp = jnp.pad(x_nhwc.astype(jnp.bfloat16), ((0, 0), (1, 1), (1, 1), (0, 0)))
    taps = [xp[:, ky:ky + H, kx:kx + W, :]
            for ky in range(3) for kx in range(3)]
    return jnp.stack(taps, axis=0).reshape(9, B * H * W, C)


# ----------------------------------------------------------------------------
# One-time weight packing (outside jit): fold BN scale INTO the weight,
# pre-tile to (N/tn, T*Kp, tn) bf16 (contiguous per-block DMA), pad shift.
# Packed layer dicts hold only arrays (jit-friendly).
# ----------------------------------------------------------------------------
def _bn_fold(w_tkn, bnp, conv_bias=None, eps=1e-5):
    s = bnp["gamma"] / jnp.sqrt(bnp["var"] + eps)
    shift = bnp["beta"] - bnp["mean"] * s
    if conv_bias is not None:
        shift = conv_bias * s + shift
    return w_tkn * s[None, None, :], shift


def _pack_layer(w_tkn, shift, *, tn):
    T, K, N = w_tkn.shape
    Kp = _round_up(K, 128)
    Np = _round_up(N, tn)
    Nt = Np // tn
    w = jnp.pad(w_tkn.astype(jnp.float32), ((0, 0), (0, Kp - K), (0, Np - N)))
    # (T, Kp, Np) -> (T*Kp, Nt, tn) -> tile-major (Nt, T*Kp, tn): each
    # (tg*Kp, tn) block read by the kernel is contiguous in HBM.
    w = w.reshape(T * Kp, Nt, tn).transpose(1, 0, 2).astype(jnp.bfloat16)
    shift_p = jnp.pad(shift.reshape(1, N).astype(jnp.float32),
                      ((0, 0), (0, Np - N)))
    return dict(w=w, shift=shift_p)


def pack_params(params):
    pk = {}

    p0 = params["conv"]
    w = jnp.transpose(p0["w"], (2, 3, 1, 0)).reshape(9, 22, 256)
    w, sh = _bn_fold(w, p0["bn"], p0["b"])
    pk["conv"] = _pack_layer(w, sh, tn=128)          # j grid = 2 -> megacore

    for i in range(4):
        pr = params[f"res_{i}"]
        w1 = jnp.transpose(pr["w1"], (2, 3, 1, 0)).reshape(9, 256, 256)
        w1, sh1 = _bn_fold(w1, pr["bn1"])
        w2 = jnp.transpose(pr["w2"], (2, 3, 1, 0)).reshape(9, 256, 256)
        w2, sh2 = _bn_fold(w2, pr["bn2"])
        pk[f"res_{i}"] = dict(c1=_pack_layer(w1, sh1, tn=128),
                              c2=_pack_layer(w2, sh2, tn=128))

    po = params["out"]

    # policy-head 1x1 conv 256 -> 128
    wp = po["conv1_w"].reshape(128, 256).T[None]     # (1, 256, 128)
    wp, shp = _bn_fold(wp, po["bn1"], po["conv1_b"])
    pk["p_conv"] = _pack_layer(wp, shp, tn=128)

    # policy FC 8192 -> 4672.  PyTorch flattens NCHW (idx = c*64 + s); we feed
    # the NHWC flatten (idx = s*128 + c), so permute the weight's input axis
    # once here.  tn=256 (N padded to 4864) -> 19 big contiguous weight tiles.
    fc_w = po["fc_w"].reshape(4672, 128, 64).transpose(0, 2, 1).reshape(4672, 8192)
    pk["p_fc"] = _pack_layer(fc_w.T[None], po["fc_b"], tn=256)

    # value head stays in plain XLA (tiny matmuls); fold BN once here.
    s = po["bn"]["gamma"] / jnp.sqrt(po["bn"]["var"] + 1e-5)
    shv = po["conv_b"] * s + (po["bn"]["beta"] - po["bn"]["mean"] * s)
    pk["v_conv_w"] = (po["conv_w"].reshape(1, 256).T * s[None, :]).astype(jnp.float32)
    pk["v_conv_shift"] = shv.astype(jnp.float32)
    pk["v_fc1_w"] = po["fc1_w"].astype(jnp.float32)
    pk["v_fc1_b"] = po["fc1_b"].astype(jnp.float32)
    pk["v_fc2_w"] = po["fc2_w"].astype(jnp.float32)
    pk["v_fc2_b"] = po["fc2_b"].astype(jnp.float32)
    return pk


# ----------------------------------------------------------------------------
# Parameters (deterministic, synthetic, PyTorch layouts)
# ----------------------------------------------------------------------------
def init_params(key):
    keys = iter(jax.random.split(key, 256))

    def nk():
        return next(keys)

    def conv_w(cout, cin, kh, kw):
        fan_in = cin * kh * kw
        return jax.random.normal(nk(), (cout, cin, kh, kw),
                                 jnp.float32) / jnp.sqrt(fan_in)

    def lin_wb(out_f, in_f):
        w = jax.random.normal(nk(), (out_f, in_f), jnp.float32) / jnp.sqrt(in_f)
        b = 0.1 * jax.random.normal(nk(), (out_f,), jnp.float32)
        return w, b

    def bn(c):
        return dict(
            gamma=1.0 + 0.1 * jax.random.normal(nk(), (c,), jnp.float32),
            beta=0.1 * jax.random.normal(nk(), (c,), jnp.float32),
            mean=0.1 * jax.random.normal(nk(), (c,), jnp.float32),
            var=jax.random.uniform(nk(), (c,), jnp.float32, 0.5, 1.5),
        )

    params = {}
    params["conv"] = dict(
        w=conv_w(256, 22, 3, 3),
        b=0.1 * jax.random.normal(nk(), (256,), jnp.float32),
        bn=bn(256),
    )
    # Note: ChessNet.__init__ builds 19 ResBlocks but forward() only uses 4.
    for i in range(4):
        params[f"res_{i}"] = dict(
            w1=conv_w(256, 256, 3, 3), bn1=bn(256),
            w2=conv_w(256, 256, 3, 3), bn2=bn(256),
        )

    fc1_w, fc1_b = lin_wb(64, 64)
    fc2_w, fc2_b = lin_wb(1, 64)
    fc_w, fc_b = lin_wb(8 * 8 * 73, 8 * 8 * 128)
    params["out"] = dict(
        conv_w=conv_w(1, 256, 1, 1),
        conv_b=0.1 * jax.random.normal(nk(), (1,), jnp.float32),
        bn=bn(1),
        conv1_w=conv_w(128, 256, 1, 1),
        conv1_b=0.1 * jax.random.normal(nk(), (128,), jnp.float32),
        bn1=bn(128),
        fc1_w=fc1_w, fc1_b=fc1_b,
        fc2_w=fc2_w, fc2_b=fc2_b,
        fc_w=fc_w, fc_b=fc_b,
    )
    return params


# ----------------------------------------------------------------------------
# Forward pass (matches ChessNet.forward)
# ----------------------------------------------------------------------------
def chessnet_forward(pk, s):
    # ConvBlock: reshape(-1, 22, 8, 8), conv+bn+relu.  NCHW -> NHWC.
    x = jnp.transpose(s.reshape(-1, 22, 8, 8), (0, 2, 3, 1)).astype(jnp.bfloat16)
    B = x.shape[0]

    x = fused_matmul(stack_taps_3x3(x), pk["conv"], n_out=256,
                     relu=True).reshape(B, 8, 8, 256)

    # 4 ResBlocks; the residual add + ReLU is fused into conv2's epilogue.
    for i in range(4):
        blk = pk[f"res_{i}"]
        h = fused_matmul(stack_taps_3x3(x), blk["c1"], n_out=256,
                         relu=True).reshape(B, 8, 8, 256)
        x = fused_matmul(stack_taps_3x3(h), blk["c2"], n_out=256, relu=True,
                         residual=x.reshape(B * 64, 256)).reshape(B, 8, 8, 256)

    xf = x.reshape(B * 64, 256)

    # value head: conv1x1(256->1)+bn+relu, flatten, fc1+relu, fc2+relu.
    # (Reference forward() uses F.relu after fc2, so ReLU is correct here.)
    xf32 = xf.astype(jnp.float32)
    v = jnp.maximum(xf32 @ pk["v_conv_w"] + pk["v_conv_shift"], 0.0)
    v = v.reshape(B, 64)                               # == NCHW flatten (C=1)
    v = jnp.maximum(v @ pk["v_fc1_w"].T + pk["v_fc1_b"], 0.0)
    v = jnp.maximum(v @ pk["v_fc2_w"].T + pk["v_fc2_b"], 0.0)     # (B, 1)

    # policy head: conv1x1(256->128)+bn+relu, flatten, fc, exp(logSoftmax).
    p = fused_matmul(xf[None], pk["p_conv"], n_out=128, relu=True)  # (B*64,128)
    p = p.reshape(B, 8 * 8 * 128)                      # fc weight is permuted
    logits = fused_matmul(p[None], pk["p_fc"], n_out=8 * 8 * 73,
                          relu=False, out_dtype=jnp.float32)        # (B, 4672)
    p = jax.nn.softmax(logits, axis=-1)                # == logSoftmax(.).exp()

    return {"p": p, "v": v}


if __name__ == "__main__":
    key = jax.random.PRNGKey(0)
    kparam, kx = jax.random.split(key)
    params = init_params(kparam)
    packed = pack_params(params)          # one-time weight packing, outside jit
    x = jax.random.normal(kx, (2, 22, 8, 8), jnp.float32)   # small batch = 2

    fwd = jax.jit(chessnet_forward)
    res = fwd(packed, x)
    res = jax.block_until_ready(res)

    assert res["p"].shape == (2, 8 * 8 * 73)
    assert res["v"].shape == (2, 1)
    assert bool(jnp.all(jnp.isfinite(res["p"])))
    # policy rows are softmax -> sum to 1
    assert jnp.allclose(jnp.sum(res["p"], axis=1), 1.0, atol=1e-3)
    print("KERNEL_OK")
</pallas_src>

<mosaic_0001>
module attributes {stable_mosaic.version = 11 : i64} {
  func.func @_fused_matmul_kernel(%arg0: i32, %arg1: i32, %arg2: i32, %arg3: memref<3x128x128xbf16, #tpu.memory_space<vmem>>, %arg4: memref<1x384x128xbf16, #tpu.memory_space<vmem>>, %arg5: memref<1x128xf32, #tpu.memory_space<vmem>>, %arg6: memref<128x128xbf16, #tpu.memory_space<vmem>>, %arg7: memref<128x128xf32, #tpu.memory_space<vmem>>) attributes {dimension_semantics = [#tpu.dimension_semantics<parallel>, #tpu.dimension_semantics<parallel>, #tpu.dimension_semantics<arbitrary>], iteration_bounds = array<i64: 1, 2, 3>, scalar_prefetch = 0 : i64, scratch_operands = 1 : i64, tpu.core_type = #tpu.core_type<tc>, window_params = [{transform_indices = @transform_0, window_bounds = array<i64: 3, 128, 128>}, {transform_indices = @transform_1, window_bounds = array<i64: 1, 384, 128>}, {transform_indices = @transform_2, window_bounds = array<i64: 1, 128>}, {transform_indices = @transform_3, window_bounds = array<i64: 128, 128>}]} {
    %c0_i32 = arith.constant 0 : i32
    %0 = arith.cmpi eq, %arg2, %c0_i32 : i32
    %1 = arith.extui %0 : i1 to i32
    %c0_i32_0 = arith.constant 0 : i32
    %2 = arith.cmpi ne, %1, %c0_i32_0 : i32
    scf.if %2 {
      %cst_21 = arith.constant 0.000000e+00 : f32
      %26 = vector.broadcast %cst_21 : f32 to vector<128x128xf32>
      %c0_22 = arith.constant 0 : index
      %c0_23 = arith.constant 0 : index
      %27 = vector.load %arg7[%c0_22, %c0_23] : memref<128x128xf32, #tpu.memory_space<vmem>>, vector<128x128xf32>
      tpu.vector_store %arg7[%c0_22, %c0_23], %26 {strides = array<i32>} : memref<128x128xf32, #tpu.memory_space<vmem>>, vector<128x128xf32>,
    } else {
    }
    %c0 = arith.constant 0 : index
    %c0_1 = arith.constant 0 : index
    %3 = vector.load %arg7[%c0, %c0_1] : memref<128x128xf32, #tpu.memory_space<vmem>>, vector<128x128xf32>
    %c0_2 = arith.constant 0 : index
    %c0_3 = arith.constant 0 : index
    %c0_4 = arith.constant 0 : index
    %4 = vector.load %arg3[%c0_2, %c0_3, %c0_4] : memref<3x128x128xbf16, #tpu.memory_space<vmem>>, vector<1x128x128xbf16>
    %5 = vector.shape_cast %4 : vector<1x128x128xbf16> to vector<128x128xbf16>
    %c0_5 = arith.constant 0 : index
    %c0_6 = arith.constant 0 : index
    %c0_7 = arith.constant 0 : index
    %6 = vector.load %arg4[%c0_5, %c0_6, %c0_7] : memref<1x384x128xbf16, #tpu.memory_space<vmem>>, vector<1x128x128xbf16>
    %7 = vector.shape_cast %6 : vector<1x128x128xbf16> to vector<128x128xbf16>
    %cst = arith.constant dense<0.000000e+00> : vector<128x128xf32>
    %8 = tpu.matmul %5, %7, %cst {dimension_numbers = #tpu.dot_dimension_numbers<[1], [0], [0], [1], [0, 0, 1, 1], [], []>} : vector<128x128xbf16>, vector<128x128xbf16>, vector<128x128xf32> -> vector<128x128xf32>
    %9 = arith.addf %3, %8 : vector<128x128xf32>
    %c1 = arith.constant 1 : index
    %c0_8 = arith.constant 0 : index
    %c0_9 = arith.constant 0 : index
    %10 = vector.load %arg3[%c1, %c0_8, %c0_9] : memref<3x128x128xbf16, #tpu.memory_space<vmem>>, vector<1x128x128xbf16>
    %11 = vector.shape_cast %10 : vector<1x128x128xbf16> to vector<128x128xbf16>
    %c0_10 = arith.constant 0 : index
    %c128 = arith.constant 128 : index
    %c0_11 = arith.constant 0 : index
    %12 = vector.load %arg4[%c0_10, %c128, %c0_11] : memref<1x384x128xbf16, #tpu.memory_space<vmem>>, vector<1x128x128xbf16>
    %13 = vector.shape_cast %12 : vector<1x128x128xbf16> to vector<128x128xbf16>
    %cst_12 = arith.constant dense<0.000000e+00> : vector<128x128xf32>
    %14 = tpu.matmul %11, %13, %cst_12 {dimension_numbers = #tpu.dot_dimension_numbers<[1], [0], [0], [1], [0, 0, 1, 1], [], []>} : vector<128x128xbf16>, vector<128x128xbf16>, vector<128x128xf32> -> vector<128x128xf32>
    %15 = arith.addf %9, %14 : vector<128x128xf32>
    %c2 = arith.constant 2 : index
    %c0_13 = arith.constant 0 : index
    %c0_14 = arith.constant 0 : index
    %16 = vector.load %arg3[%c2, %c0_13, %c0_14] : memref<3x128x128xbf16, #tpu.memory_space<vmem>>, vector<1x128x128xbf16>
    %17 = vector.shape_cast %16 : vector<1x128x128xbf16> to vector<128x128xbf16>
    %c0_15 = arith.constant 0 : index
    %c256 = arith.constant 256 : index
    %c0_16 = arith.constant 0 : index
    %18 = vector.load %arg4[%c0_15, %c256, %c0_16] : memref<1x384x128xbf16, #tpu.memory_space<vmem>>, vector<1x128x128xbf16>
    %19 = vector.shape_cast %18 : vector<1x128x128xbf16> to vector<128x128xbf16>
    %cst_17 = arith.constant dense<0.000000e+00> : vector<128x128xf32>
    %20 = tpu.matmul %17, %19, %cst_17 {dimension_numbers = #tpu.dot_dimension_numbers<[1], [0], [0], [1], [0, 0, 1, 1], [], []>} : vector<128x128xbf16>, vector<128x128xbf16>, vector<128x128xf32> -> vector<128x128xf32>
    %21 = arith.addf %15, %20 : vector<128x128xf32>
    %c0_18 = arith.constant 0 : index
    %c0_19 = arith.constant 0 : index
    %22 = vector.load %arg7[%c0_18, %c0_19] : memref<128x128xf32, #tpu.memory_space<vmem>>, vector<128x128xf32>
    tpu.vector_store %arg7[%c0_18, %c0_19], %21 {strides = array<i32>} : memref<128x128xf32, #tpu.memory_space<vmem>>, vector<128x128xf32>,
    %c2_i32 = arith.constant 2 : i32
    %23 = arith.cmpi eq, %arg2, %c2_i32 : i32
    %24 = arith.extui %23 : i1 to i32
    %c0_i32_20 = arith.constant 0 : i32
    %25 = arith.cmpi ne, %24, %c0_i32_20 : i32
    scf.if %25 {
      %c0_21 = arith.constant 0 : index
      %c0_22 = arith.constant 0 : index
      %26 = vector.load %arg7[%c0_21, %c0_22] : memref<128x128xf32, #tpu.memory_space<vmem>>, vector<128x128xf32>
      %c0_23 = arith.constant 0 : index
      %c0_24 = arith.constant 0 : index
      %27 = vector.load %arg5[%c0_23, %c0_24] : memref<1x128xf32, #tpu.memory_space<vmem>>, vector<1x128xf32>
      %28 = vector.broadcast %27 : vector<1x128xf32> to vector<128x128xf32>
      %29 = arith.addf %26, %28 : vector<128x128xf32>
      %cst_25 = arith.constant 0.000000e+00 : f32
      %30 = vector.broadcast %cst_25 : f32 to vector<128x128xf32>
      %31 = arith.maximumf %29, %30 : vector<128x128xf32>
      %32 = arith.truncf %31 : vector<128x128xf32> to vector<128x128xbf16>
      %c0_26 = arith.constant 0 : index
      %c0_27 = arith.constant 0 : index
      %33 = vector.load %arg6[%c0_26, %c0_27] : memref<128x128xbf16, #tpu.memory_space<vmem>>, vector<128x128xbf16>
      tpu.vector_store %arg6[%c0_26, %c0_27], %32 {strides = array<i32>} : memref<128x128xbf16, #tpu.memory_space<vmem>>, vector<128x128xbf16>,
    } else {
    }
    return
  }
  func.func @transform_0(%arg0: i32, %arg1: i32, %arg2: i32) -> (i32, i32, i32) {
    %c0_i32 = arith.constant 0 : i32
    %c0_i32_0 = arith.constant 0 : i32
    return %arg2, %arg0, %c0_i32 : i32, i32, i32
  }
  func.func @transform_1(%arg0: i32, %arg1: i32, %arg2: i32) -> (i32, i32, i32) {
    %c0_i32 = arith.constant 0 : i32
    %c0_i32_0 = arith.constant 0 : i32
    return %arg1, %arg2, %c0_i32 : i32, i32, i32
  }
  func.func @transform_2(%arg0: i32, %arg1: i32, %arg2: i32) -> (i32, i32) {
    %c0_i32 = arith.constant 0 : i32
    %c0_i32_0 = arith.constant 0 : i32
    return %c0_i32, %arg1 : i32, i32
  }
  func.func @transform_3(%arg0: i32, %arg1: i32, %arg2: i32) -> (i32, i32) {
    %c0_i32 = arith.constant 0 : i32
    return %arg0, %arg1 : i32, i32
  }
}

module attributes {stable_mosaic.version = 11 : i64} {
  func.func @_fused_matmul_kernel(%arg0: i32, %arg1: i32, %arg2: i32, %arg3: memref<3x128x256xbf16, #tpu.memory_space<vmem>>, %arg4: memref<1x768x128xbf16, #tpu.memory_space<vmem>>, %arg5: memref<1x128xf32, #tpu.memory_space<vmem>>, %arg6: memref<128x128xbf16, #tpu.memory_space<vmem>>, %arg7: memref<128x128xbf16, #tpu.memory_space<vmem>>, %arg8: memref<128x128xf32, #tpu.memory_space<vmem>>) attributes {dimension_semantics = [#tpu.dimension_semantics<parallel>, #tpu.dimension_semantics<parallel>, #tpu.dimension_semantics<arbitrary>], iteration_bounds = array<i64: 1, 2, 3>, scalar_prefetch = 0 : i64, scratch_operands = 1 : i64, tpu.core_type = #tpu.core_type<tc>, window_params = [{transform_indices = @transform_0, window_bounds = array<i64: 3, 128, 256>}, {transform_indices = @transform_1, window_bounds = array<i64: 1, 768, 128>}, {transform_indices = @transform_2, window_bounds = array<i64: 1, 128>}, {transform_indices = @transform_3, window_bounds = array<i64: 128, 128>}, {transform_indices = @transform_4, window_bounds = array<i64: 128, 128>}]} {
    %c0_i32 = arith.constant 0 : i32
    %0 = arith.cmpi eq, %arg2, %c0_i32 : i32
    %1 = arith.extui %0 : i1 to i32
    %c0_i32_0 = arith.constant 0 : i32
    %2 = arith.cmpi ne, %1, %c0_i32_0 : i32
    scf.if %2 {
      %cst_21 = arith.constant 0.000000e+00 : f32
      %26 = vector.broadcast %cst_21 : f32 to vector<128x128xf32>
      %c0_22 = arith.constant 0 : index
      %c0_23 = arith.constant 0 : index
      %27 = vector.load %arg8[%c0_22, %c0_23] : memref<128x128xf32, #tpu.memory_space<vmem>>, vector<128x128xf32>
      tpu.vector_store %arg8[%c0_22, %c0_23], %26 {strides = array<i32>} : memref<128x128xf32, #tpu.memory_space<vmem>>, vector<128x128xf32>,
    } else {
    }
    %c0 = arith.constant 0 : index
    %c0_1 = arith.constant 0 : index
    %3 = vector.load %arg8[%c0, %c0_1] : memref<128x128xf32, #tpu.memory_space<vmem>>, vector<128x128xf32>
    %c0_2 = arith.constant 0 : index
    %c0_3 = arith.constant 0 : index
    %c0_4 = arith.constant 0 : index
    %4 = vector.load %arg3[%c0_2, %c0_3, %c0_4] : memref<3x128x256xbf16, #tpu.memory_space<vmem>>, vector<1x128x256xbf16>
    %5 = vector.shape_cast %4 : vector<1x128x256xbf16> to vector<128x256xbf16>
    %c0_5 = arith.constant 0 : index
    %c0_6 = arith.constant 0 : index
    %c0_7 = arith.constant 0 : index
    %6 = vector.load %arg4[%c0_5, %c0_6, %c0_7] : memref<1x768x128xbf16, #tpu.memory_space<vmem>>, vector<1x256x128xbf16>
    %7 = vector.shape_cast %6 : vector<1x256x128xbf16> to vector<256x128xbf16>
    %cst = arith.constant dense<0.000000e+00> : vector<128x128xf32>
    %8 = tpu.matmul %5, %7, %cst {dimension_numbers = #tpu.dot_dimension_numbers<[1], [0], [0], [1], [0, 0, 1, 1], [], []>} : vector<128x256xbf16>, vector<256x128xbf16>, vector<128x128xf32> -> vector<128x128xf32>
    %9 = arith.addf %3, %8 : vector<128x128xf32>
    %c1 = arith.constant 1 : index
    %c0_8 = arith.constant 0 : index
    %c0_9 = arith.constant 0 : index
    %10 = vector.load %arg3[%c1, %c0_8, %c0_9] : memref<3x128x256xbf16, #tpu.memory_space<vmem>>, vector<1x128x256xbf16>
    %11 = vector.shape_cast %10 : vector<1x128x256xbf16> to vector<128x256xbf16>
    %c0_10 = arith.constant 0 : index
    %c256 = arith.constant 256 : index
    %c0_11 = arith.constant 0 : index
    %12 = vector.load %arg4[%c0_10, %c256, %c0_11] : memref<1x768x128xbf16, #tpu.memory_space<vmem>>, vector<1x256x128xbf16>
    %13 = vector.shape_cast %12 : vector<1x256x128xbf16> to vector<256x128xbf16>
    %cst_12 = arith.constant dense<0.000000e+00> : vector<128x128xf32>
    %14 = tpu.matmul %11, %13, %cst_12 {dimension_numbers = #tpu.dot_dimension_numbers<[1], [0], [0], [1], [0, 0, 1, 1], [], []>} : vector<128x256xbf16>, vector<256x128xbf16>, vector<128x128xf32> -> vector<128x128xf32>
    %15 = arith.addf %9, %14 : vector<128x128xf32>
    %c2 = arith.constant 2 : index
    %c0_13 = arith.constant 0 : index
    %c0_14 = arith.constant 0 : index
    %16 = vector.load %arg3[%c2, %c0_13, %c0_14] : memref<3x128x256xbf16, #tpu.memory_space<vmem>>, vector<1x128x256xbf16>
    %17 = vector.shape_cast %16 : vector<1x128x256xbf16> to vector<128x256xbf16>
    %c0_15 = arith.constant 0 : index
    %c512 = arith.constant 512 : index
    %c0_16 = arith.constant 0 : index
    %18 = vector.load %arg4[%c0_15, %c512, %c0_16] : memref<1x768x128xbf16, #tpu.memory_space<vmem>>, vector<1x256x128xbf16>
    %19 = vector.shape_cast %18 : vector<1x256x128xbf16> to vector<256x128xbf16>
    %cst_17 = arith.constant dense<0.000000e+00> : vector<128x128xf32>
    %20 = tpu.matmul %17, %19, %cst_17 {dimension_numbers = #tpu.dot_dimension_numbers<[1], [0], [0], [1], [0, 0, 1, 1], [], []>} : vector<128x256xbf16>, vector<256x128xbf16>, vector<128x128xf32> -> vector<128x128xf32>
    %21 = arith.addf %15, %20 : vector<128x128xf32>
    %c0_18 = arith.constant 0 : index
    %c0_19 = arith.constant 0 : index
    %22 = vector.load %arg8[%c0_18, %c0_19] : memref<128x128xf32, #tpu.memory_space<vmem>>, vector<128x128xf32>
    tpu.vector_store %arg8[%c0_18, %c0_19], %21 {strides = array<i32>} : memref<128x128xf32, #tpu.memory_space<vmem>>, vector<128x128xf32>,
    %c2_i32 = arith.constant 2 : i32
    %23 = arith.cmpi eq, %arg2, %c2_i32 : i32
    %24 = arith.extui %23 : i1 to i32
    %c0_i32_20 = arith.constant 0 : i32
    %25 = arith.cmpi ne, %24, %c0_i32_20 : i32
    scf.if %25 {
      %c0_21 = arith.constant 0 : index
      %c0_22 = arith.constant 0 : index
      %26 = vector.load %arg8[%c0_21, %c0_22] : memref<128x128xf32, #tpu.memory_space<vmem>>, vector<128x128xf32>
      %c0_23 = arith.constant 0 : index
      %c0_24 = arith.constant 0 : index
      %27 = vector.load %arg5[%c0_23, %c0_24] : memref<1x128xf32, #tpu.memory_space<vmem>>, vector<1x128xf32>
      %28 = vector.broadcast %27 : vector<1x128xf32> to vector<128x128xf32>
      %29 = arith.addf %26, %28 : vector<128x128xf32>
      %c0_25 = arith.constant 0 : index
      %c0_26 = arith.constant 0 : index
      %30 = vector.load %arg6[%c0_25, %c0_26] : memref<128x128xbf16, #tpu.memory_space<vmem>>, vector<128x128xbf16>
      %31 = arith.extf %30 : vector<128x128xbf16> to vector<128x128xf32>
      %32 = arith.addf %29, %31 : vector<128x128xf32>
      %cst_27 = arith.constant 0.000000e+00 : f32
      %33 = vector.broadcast %cst_27 : f32 to vector<128x128xf32>
      %34 = arith.maximumf %32, %33 : vector<128x128xf32>
      %35 = arith.truncf %34 : vector<128x128xf32> to vector<128x128xbf16>
      %c0_28 = arith.constant 0 : index
      %c0_29 = arith.constant 0 : index
      %36 = vector.load %arg7[%c0_28, %c0_29] : memref<128x128xbf16, #tpu.memory_space<vmem>>, vector<128x128xbf16>
      tpu.vector_store %arg7[%c0_28, %c0_29], %35 {strides = array<i32>} : memref<128x128xbf16, #tpu.memory_space<vmem>>, vector<128x128xbf16>,
    } else {
    }
    return
  }
  func.func @transform_0(%arg0: i32, %arg1: i32, %arg2: i32) -> (i32, i32, i32) {
    %c0_i32 = arith.constant 0 : i32
    %c0_i32_0 = arith.constant 0 : i32
    return %arg2, %arg0, %c0_i32 : i32, i32, i32
  }
  func.func @transform_1(%arg0: i32, %arg1: i32, %arg2: i32) -> (i32, i32, i32) {
    %c0_i32 = arith.constant 0 : i32
    %c0_i32_0 = arith.constant 0 : i32
    return %arg1, %arg2, %c0_i32 : i32, i32, i32
  }
  func.func @transform_2(%arg0: i32, %arg1: i32, %arg2: i32) -> (i32, i32) {
    %c0_i32 = arith.constant 0 : i32
    %c0_i32_0 = arith.constant 0 : i32
    return %c0_i32, %arg1 : i32, i32
  }
  func.func @transform_3(%arg0: i32, %arg1: i32, %arg2: i32) -> (i32, i32) {
    %c0_i32 = arith.constant 0 : i32
    return %arg0, %arg1 : i32, i32
  }
  func.func @transform_4(%arg0: i32, %arg1: i32, %arg2: i32) -> (i32, i32) {
    %c0_i32 = arith.constant 0 : i32
    return %arg0, %arg1 : i32, i32
  }
}

module attributes {stable_mosaic.version = 11 : i64} {
  func.func @_fused_matmul_kernel(%arg0: i32, %arg1: i32, %arg2: i32, %arg3: memref<1x128x256xbf16, #tpu.memory_space<vmem>>, %arg4: memref<1x256x128xbf16, #tpu.memory_space<vmem>>, %arg5: memref<1x128xf32, #tpu.memory_space<vmem>>, %arg6: memref<128x128xbf16, #tpu.memory_space<vmem>>, %arg7: memref<128x128xf32, #tpu.memory_space<vmem>>) attributes {dimension_semantics = [#tpu.dimension_semantics<parallel>, #tpu.dimension_semantics<parallel>, #tpu.dimension_semantics<arbitrary>], iteration_bounds = array<i64: 1, 1, 1>, scalar_prefetch = 0 : i64, scratch_operands = 1 : i64, tpu.core_type = #tpu.core_type<tc>, window_params = [{transform_indices = @transform_0, window_bounds = array<i64: 1, 128, 256>}, {transform_indices = @transform_1, window_bounds = array<i64: 1, 256, 128>}, {transform_indices = @transform_2, window_bounds = array<i64: 1, 128>}, {transform_indices = @transform_3, window_bounds = array<i64: 128, 128>}]} {
    %c0_i32 = arith.constant 0 : i32
    %0 = arith.cmpi eq, %arg2, %c0_i32 : i32
    %1 = arith.extui %0 : i1 to i32
    %c0_i32_0 = arith.constant 0 : i32
    %2 = arith.cmpi ne, %1, %c0_i32_0 : i32
    scf.if %2 {
      %cst_12 = arith.constant 0.000000e+00 : f32
      %14 = vector.broadcast %cst_12 : f32 to vector<128x128xf32>
      %c0_13 = arith.constant 0 : index
      %c0_14 = arith.constant 0 : index
      %15 = vector.load %arg7[%c0_13, %c0_14] : memref<128x128xf32, #tpu.memory_space<vmem>>, vector<128x128xf32>
      tpu.vector_store %arg7[%c0_13, %c0_14], %14 {strides = array<i32>} : memref<128x128xf32, #tpu.memory_space<vmem>>, vector<128x128xf32>,
    } else {
    }
    %c0 = arith.constant 0 : index
    %c0_1 = arith.constant 0 : index
    %3 = vector.load %arg7[%c0, %c0_1] : memref<128x128xf32, #tpu.memory_space<vmem>>, vector<128x128xf32>
    %c0_2 = arith.constant 0 : index
    %c0_3 = arith.constant 0 : index
    %c0_4 = arith.constant 0 : index
    %4 = vector.load %arg3[%c0_2, %c0_3, %c0_4] : memref<1x128x256xbf16, #tpu.memory_space<vmem>>, vector<1x128x256xbf16>
    %5 = vector.shape_cast %4 : vector<1x128x256xbf16> to vector<128x256xbf16>
    %c0_5 = arith.constant 0 : index
    %c0_6 = arith.constant 0 : index
    %c0_7 = arith.constant 0 : index
    %6 = vector.load %arg4[%c0_5, %c0_6, %c0_7] : memref<1x256x128xbf16, #tpu.memory_space<vmem>>, vector<1x256x128xbf16>
    %7 = vector.shape_cast %6 : vector<1x256x128xbf16> to vector<256x128xbf16>
    %cst = arith.constant dense<0.000000e+00> : vector<128x128xf32>
    %8 = tpu.matmul %5, %7, %cst {dimension_numbers = #tpu.dot_dimension_numbers<[1], [0], [0], [1], [0, 0, 1, 1], [], []>} : vector<128x256xbf16>, vector<256x128xbf16>, vector<128x128xf32> -> vector<128x128xf32>
    %9 = arith.addf %3, %8 : vector<128x128xf32>
    %c0_8 = arith.constant 0 : index
    %c0_9 = arith.constant 0 : index
    %10 = vector.load %arg7[%c0_8, %c0_9] : memref<128x128xf32, #tpu.memory_space<vmem>>, vector<128x128xf32>
    tpu.vector_store %arg7[%c0_8, %c0_9], %9 {strides = array<i32>} : memref<128x128xf32, #tpu.memory_space<vmem>>, vector<128x128xf32>,
    %c0_i32_10 = arith.constant 0 : i32
    %11 = arith.cmpi eq, %arg2, %c0_i32_10 : i32
    %12 = arith.extui %11 : i1 to i32
    %c0_i32_11 = arith.constant 0 : i32
    %13 = arith.cmpi ne, %12, %c0_i32_11 : i32
    scf.if %13 {
      %c0_12 = arith.constant 0 : index
      %c0_13 = arith.constant 0 : index
      %14 = vector.load %arg7[%c0_12, %c0_13] : memref<128x128xf32, #tpu.memory_space<vmem>>, vector<128x128xf32>
      %c0_14 = arith.constant 0 : index
      %c0_15 = arith.constant 0 : index
      %15 = vector.load %arg5[%c0_14, %c0_15] : memref<1x128xf32, #tpu.memory_space<vmem>>, vector<1x128xf32>
      %16 = vector.broadcast %15 : vector<1x128xf32> to vector<128x128xf32>
      %17 = arith.addf %14, %16 : vector<128x128xf32>
      %cst_16 = arith.constant 0.000000e+00 : f32
      %18 = vector.broadcast %cst_16 : f32 to vector<128x128xf32>
      %19 = arith.maximumf %17, %18 : vector<128x128xf32>
      %20 = arith.truncf %19 : vector<128x128xf32> to vector<128x128xbf16>
      %c0_17 = arith.constant 0 : index
      %c0_18 = arith.constant 0 : index
      %21 = vector.load %arg6[%c0_17, %c0_18] : memref<128x128xbf16, #tpu.memory_space<vmem>>, vector<128x128xbf16>
      tpu.vector_store %arg6[%c0_17, %c0_18], %20 {strides = array<i32>} : memref<128x128xbf16, #tpu.memory_space<vmem>>, vector<128x128xbf16>,
    } else {
    }
    return
  }
  func.func @transform_0(%arg0: i32, %arg1: i32, %arg2: i32) -> (i32, i32, i32) {
    %c0_i32 = arith.constant 0 : i32
    %c0_i32_0 = arith.constant 0 : i32
    return %arg2, %arg0, %c0_i32 : i32, i32, i32
  }
  func.func @transform_1(%arg0: i32, %arg1: i32, %arg2: i32) -> (i32, i32, i32) {
    %c0_i32 = arith.constant 0 : i32
    %c0_i32_0 = arith.constant 0 : i32
    return %arg1, %arg2, %c0_i32 : i32, i32, i32
  }
  func.func @transform_2(%arg0: i32, %arg1: i32, %arg2: i32) -> (i32, i32) {
    %c0_i32 = arith.constant 0 : i32
    %c0_i32_0 = arith.constant 0 : i32
    return %c0_i32, %arg1 : i32, i32
  }
  func.func @transform_3(%arg0: i32, %arg1: i32, %arg2: i32) -> (i32, i32) {
    %c0_i32 = arith.constant 0 : i32
    return %arg0, %arg1 : i32, i32
  }
}

module attributes {stable_mosaic.version = 11 : i64} {
  func.func @_fused_matmul_kernel(%arg0: i32, %arg1: i32, %arg2: i32, %arg3: memref<3x128x256xbf16, #tpu.memory_space<vmem>>, %arg4: memref<1x768x128xbf16, #tpu.memory_space<vmem>>, %arg5: memref<1x128xf32, #tpu.memory_space<vmem>>, %arg6: memref<128x128xbf16, #tpu.memory_space<vmem>>, %arg7: memref<128x128xf32, #tpu.memory_space<vmem>>) attributes {dimension_semantics = [#tpu.dimension_semantics<parallel>, #tpu.dimension_semantics<parallel>, #tpu.dimension_semantics<arbitrary>], iteration_bounds = array<i64: 1, 2, 3>, scalar_prefetch = 0 : i64, scratch_operands = 1 : i64, tpu.core_type = #tpu.core_type<tc>, window_params = [{transform_indices = @transform_0, window_bounds = array<i64: 3, 128, 256>}, {transform_indices = @transform_1, window_bounds = array<i64: 1, 768, 128>}, {transform_indices = @transform_2, window_bounds = array<i64: 1, 128>}, {transform_indices = @transform_3, window_bounds = array<i64: 128, 128>}]} {
    %c0_i32 = arith.constant 0 : i32
    %0 = arith.cmpi eq, %arg2, %c0_i32 : i32
    %1 = arith.extui %0 : i1 to i32
    %c0_i32_0 = arith.constant 0 : i32
    %2 = arith.cmpi ne, %1, %c0_i32_0 : i32
    scf.if %2 {
      %cst_21 = arith.constant 0.000000e+00 : f32
      %26 = vector.broadcast %cst_21 : f32 to vector<128x128xf32>
      %c0_22 = arith.constant 0 : index
      %c0_23 = arith.constant 0 : index
      %27 = vector.load %arg7[%c0_22, %c0_23] : memref<128x128xf32, #tpu.memory_space<vmem>>, vector<128x128xf32>
      tpu.vector_store %arg7[%c0_22, %c0_23], %26 {strides = array<i32>} : memref<128x128xf32, #tpu.memory_space<vmem>>, vector<128x128xf32>,
    } else {
    }
    %c0 = arith.constant 0 : index
    %c0_1 = arith.constant 0 : index
    %3 = vector.load %arg7[%c0, %c0_1] : memref<128x128xf32, #tpu.memory_space<vmem>>, vector<128x128xf32>
    %c0_2 = arith.constant 0 : index
    %c0_3 = arith.constant 0 : index
    %c0_4 = arith.constant 0 : index
    %4 = vector.load %arg3[%c0_2, %c0_3, %c0_4] : memref<3x128x256xbf16, #tpu.memory_space<vmem>>, vector<1x128x256xbf16>
    %5 = vector.shape_cast %4 : vector<1x128x256xbf16> to vector<128x256xbf16>
    %c0_5 = arith.constant 0 : index
    %c0_6 = arith.constant 0 : index
    %c0_7 = arith.constant 0 : index
    %6 = vector.load %arg4[%c0_5, %c0_6, %c0_7] : memref<1x768x128xbf16, #tpu.memory_space<vmem>>, vector<1x256x128xbf16>
    %7 = vector.shape_cast %6 : vector<1x256x128xbf16> to vector<256x128xbf16>
    %cst = arith.constant dense<0.000000e+00> : vector<128x128xf32>
    %8 = tpu.matmul %5, %7, %cst {dimension_numbers = #tpu.dot_dimension_numbers<[1], [0], [0], [1], [0, 0, 1, 1], [], []>} : vector<128x256xbf16>, vector<256x128xbf16>, vector<128x128xf32> -> vector<128x128xf32>
    %9 = arith.addf %3, %8 : vector<128x128xf32>
    %c1 = arith.constant 1 : index
    %c0_8 = arith.constant 0 : index
    %c0_9 = arith.constant 0 : index
    %10 = vector.load %arg3[%c1, %c0_8, %c0_9] : memref<3x128x256xbf16, #tpu.memory_space<vmem>>, vector<1x128x256xbf16>
    %11 = vector.shape_cast %10 : vector<1x128x256xbf16> to vector<128x256xbf16>
    %c0_10 = arith.constant 0 : index
    %c256 = arith.constant 256 : index
    %c0_11 = arith.constant 0 : index
    %12 = vector.load %arg4[%c0_10, %c256, %c0_11] : memref<1x768x128xbf16, #tpu.memory_space<vmem>>, vector<1x256x128xbf16>
    %13 = vector.shape_cast %12 : vector<1x256x128xbf16> to vector<256x128xbf16>
    %cst_12 = arith.constant dense<0.000000e+00> : vector<128x128xf32>
    %14 = tpu.matmul %11, %13, %cst_12 {dimension_numbers = #tpu.dot_dimension_numbers<[1], [0], [0], [1], [0, 0, 1, 1], [], []>} : vector<128x256xbf16>, vector<256x128xbf16>, vector<128x128xf32> -> vector<128x128xf32>
    %15 = arith.addf %9, %14 : vector<128x128xf32>
    %c2 = arith.constant 2 : index
    %c0_13 = arith.constant 0 : index
    %c0_14 = arith.constant 0 : index
    %16 = vector.load %arg3[%c2, %c0_13, %c0_14] : memref<3x128x256xbf16, #tpu.memory_space<vmem>>, vector<1x128x256xbf16>
    %17 = vector.shape_cast %16 : vector<1x128x256xbf16> to vector<128x256xbf16>
    %c0_15 = arith.constant 0 : index
    %c512 = arith.constant 512 : index
    %c0_16 = arith.constant 0 : index
    %18 = vector.load %arg4[%c0_15, %c512, %c0_16] : memref<1x768x128xbf16, #tpu.memory_space<vmem>>, vector<1x256x128xbf16>
    %19 = vector.shape_cast %18 : vector<1x256x128xbf16> to vector<256x128xbf16>
    %cst_17 = arith.constant dense<0.000000e+00> : vector<128x128xf32>
    %20 = tpu.matmul %17, %19, %cst_17 {dimension_numbers = #tpu.dot_dimension_numbers<[1], [0], [0], [1], [0, 0, 1, 1], [], []>} : vector<128x256xbf16>, vector<256x128xbf16>, vector<128x128xf32> -> vector<128x128xf32>
    %21 = arith.addf %15, %20 : vector<128x128xf32>
    %c0_18 = arith.constant 0 : index
    %c0_19 = arith.constant 0 : index
    %22 = vector.load %arg7[%c0_18, %c0_19] : memref<128x128xf32, #tpu.memory_space<vmem>>, vector<128x128xf32>
    tpu.vector_store %arg7[%c0_18, %c0_19], %21 {strides = array<i32>} : memref<128x128xf32, #tpu.memory_space<vmem>>, vector<128x128xf32>,
    %c2_i32 = arith.constant 2 : i32
    %23 = arith.cmpi eq, %arg2, %c2_i32 : i32
    %24 = arith.extui %23 : i1 to i32
    %c0_i32_20 = arith.constant 0 : i32
    %25 = arith.cmpi ne, %24, %c0_i32_20 : i32
    scf.if %25 {
      %c0_21 = arith.constant 0 : index
      %c0_22 = arith.constant 0 : index
      %26 = vector.load %arg7[%c0_21, %c0_22] : memref<128x128xf32, #tpu.memory_space<vmem>>, vector<128x128xf32>
      %c0_23 = arith.constant 0 : index
      %c0_24 = arith.constant 0 : index
      %27 = vector.load %arg5[%c0_23, %c0_24] : memref<1x128xf32, #tpu.memory_space<vmem>>, vector<1x128xf32>
      %28 = vector.broadcast %27 : vector<1x128xf32> to vector<128x128xf32>
      %29 = arith.addf %26, %28 : vector<128x128xf32>
      %cst_25 = arith.constant 0.000000e+00 : f32
      %30 = vector.broadcast %cst_25 : f32 to vector<128x128xf32>
      %31 = arith.maximumf %29, %30 : vector<128x128xf32>
      %32 = arith.truncf %31 : vector<128x128xf32> to vector<128x128xbf16>
      %c0_26 = arith.constant 0 : index
      %c0_27 = arith.constant 0 : index
      %33 = vector.load %arg6[%c0_26, %c0_27] : memref<128x128xbf16, #tpu.memory_space<vmem>>, vector<128x128xbf16>
      tpu.vector_store %arg6[%c0_26, %c0_27], %32 {strides = array<i32>} : memref<128x128xbf16, #tpu.memory_space<vmem>>, vector<128x128xbf16>,
    } else {
    }
    return
  }
  func.func @transform_0(%arg0: i32, %arg1: i32, %arg2: i32) -> (i32, i32, i32) {
    %c0_i32 = arith.constant 0 : i32
    %c0_i32_0 = arith.constant 0 : i32
    return %arg2, %arg0, %c0_i32 : i32, i32, i32
  }
  func.func @transform_1(%arg0: i32, %arg1: i32, %arg2: i32) -> (i32, i32, i32) {
    %c0_i32 = arith.constant 0 : i32
    %c0_i32_0 = arith.constant 0 : i32
    return %arg1, %arg2, %c0_i32 : i32, i32, i32
  }
  func.func @transform_2(%arg0: i32, %arg1: i32, %arg2: i32) -> (i32, i32) {
    %c0_i32 = arith.constant 0 : i32
    %c0_i32_0 = arith.constant 0 : i32
    return %c0_i32, %arg1 : i32, i32
  }
  func.func @transform_3(%arg0: i32, %arg1: i32, %arg2: i32) -> (i32, i32) {
    %c0_i32 = arith.constant 0 : i32
    return %arg0, %arg1 : i32, i32
  }
}

module attributes {stable_mosaic.version = 11 : i64} {
  func.func @_fused_matmul_kernel(%arg0: i32, %arg1: i32, %arg2: i32, %arg3: memref<1x8x8192xbf16, #tpu.memory_space<vmem>>, %arg4: memref<1x8192x256xbf16, #tpu.memory_space<vmem>>, %arg5: memref<1x256xf32, #tpu.memory_space<vmem>>, %arg6: memref<8x256xf32, #tpu.memory_space<vmem>>, %arg7: memref<8x256xf32, #tpu.memory_space<vmem>>) attributes {dimension_semantics = [#tpu.dimension_semantics<parallel>, #tpu.dimension_semantics<parallel>, #tpu.dimension_semantics<arbitrary>], iteration_bounds = array<i64: 1, 19, 1>, scalar_prefetch = 0 : i64, scratch_operands = 1 : i64, tpu.core_type = #tpu.core_type<tc>, window_params = [{transform_indices = @transform_0, window_bounds = array<i64: 1, 8, 8192>}, {transform_indices = @transform_1, window_bounds = array<i64: 1, 8192, 256>}, {transform_indices = @transform_2, window_bounds = array<i64: 1, 256>}, {transform_indices = @transform_3, window_bounds = array<i64: 8, 256>}]} {
    %c0_i32 = arith.constant 0 : i32
    %0 = arith.cmpi eq, %arg2, %c0_i32 : i32
    %1 = arith.extui %0 : i1 to i32
    %c0_i32_0 = arith.constant 0 : i32
    %2 = arith.cmpi ne, %1, %c0_i32_0 : i32
    scf.if %2 {
      %cst_12 = arith.constant 0.000000e+00 : f32
      %14 = vector.broadcast %cst_12 : f32 to vector<8x256xf32>
      %c0_13 = arith.constant 0 : index
      %c0_14 = arith.constant 0 : index
      %15 = vector.load %arg7[%c0_13, %c0_14] : memref<8x256xf32, #tpu.memory_space<vmem>>, vector<8x256xf32>
      tpu.vector_store %arg7[%c0_13, %c0_14], %14 {strides = array<i32>} : memref<8x256xf32, #tpu.memory_space<vmem>>, vector<8x256xf32>,
    } else {
    }
    %c0 = arith.constant 0 : index
    %c0_1 = arith.constant 0 : index
    %3 = vector.load %arg7[%c0, %c0_1] : memref<8x256xf32, #tpu.memory_space<vmem>>, vector<8x256xf32>
    %c0_2 = arith.constant 0 : index
    %c0_3 = arith.constant 0 : index
    %c0_4 = arith.constant 0 : index
    %4 = vector.load %arg3[%c0_2, %c0_3, %c0_4] : memref<1x8x8192xbf16, #tpu.memory_space<vmem>>, vector<1x8x8192xbf16>
    %5 = vector.shape_cast %4 : vector<1x8x8192xbf16> to vector<8x8192xbf16>
    %c0_5 = arith.constant 0 : index
    %c0_6 = arith.constant 0 : index
    %c0_7 = arith.constant 0 : index
    %6 = vector.load %arg4[%c0_5, %c0_6, %c0_7] : memref<1x8192x256xbf16, #tpu.memory_space<vmem>>, vector<1x8192x256xbf16>
    %7 = vector.shape_cast %6 : vector<1x8192x256xbf16> to vector<8192x256xbf16>
    %cst = arith.constant dense<0.000000e+00> : vector<8x256xf32>
    %8 = tpu.matmul %5, %7, %cst {dimension_numbers = #tpu.dot_dimension_numbers<[1], [0], [0], [1], [0, 0, 1, 1], [], []>} : vector<8x8192xbf16>, vector<8192x256xbf16>, vector<8x256xf32> -> vector<8x256xf32>
    %9 = arith.addf %3, %8 : vector<8x256xf32>
    %c0_8 = arith.constant 0 : index
    %c0_9 = arith.constant 0 : index
    %10 = vector.load %arg7[%c0_8, %c0_9] : memref<8x256xf32, #tpu.memory_space<vmem>>, vector<8x256xf32>
    tpu.vector_store %arg7[%c0_8, %c0_9], %9 {strides = array<i32>} : memref<8x256xf32, #tpu.memory_space<vmem>>, vector<8x256xf32>,
    %c0_i32_10 = arith.constant 0 : i32
    %11 = arith.cmpi eq, %arg2, %c0_i32_10 : i32
    %12 = arith.extui %11 : i1 to i32
    %c0_i32_11 = arith.constant 0 : i32
    %13 = arith.cmpi ne, %12, %c0_i32_11 : i32
    scf.if %13 {
      %c0_12 = arith.constant 0 : index
      %c0_13 = arith.constant 0 : index
      %14 = vector.load %arg7[%c0_12, %c0_13] : memref<8x256xf32, #tpu.memory_space<vmem>>, vector<8x256xf32>
      %c0_14 = arith.constant 0 : index
      %c0_15 = arith.constant 0 : index
      %15 = vector.load %arg5[%c0_14, %c0_15] : memref<1x256xf32, #tpu.memory_space<vmem>>, vector<1x256xf32>
      %16 = vector.broadcast %15 : vector<1x256xf32> to vector<8x256xf32>
      %17 = arith.addf %14, %16 : vector<8x256xf32>
      %c0_16 = arith.constant 0 : index
      %c0_17 = arith.constant 0 : index
      %18 = vector.load %arg6[%c0_16, %c0_17] : memref<8x256xf32, #tpu.memory_space<vmem>>, vector<8x256xf32>
      tpu.vector_store %arg6[%c0_16, %c0_17], %17 {strides = array<i32>} : memref<8x256xf32, #tpu.memory_space<vmem>>, vector<8x256xf32>,
    } else {
    }
    return
  }
  func.func @transform_0(%arg0: i32, %arg1: i32, %arg2: i32) -> (i32, i32, i32) {
    %c0_i32 = arith.constant 0 : i32
    %c0_i32_0 = arith.constant 0 : i32
    return %arg2, %arg0, %c0_i32 : i32, i32, i32
  }
  func.func @transform_1(%arg0: i32, %arg1: i32, %arg2: i32) -> (i32, i32, i32) {
    %c0_i32 = arith.constant 0 : i32
    %c0_i32_0 = arith.constant 0 : i32
    return %arg1, %arg2, %c0_i32 : i32, i32, i32
  }
  func.func @transform_2(%arg0: i32, %arg1: i32, %arg2: i32) -> (i32, i32) {
    %c0_i32 = arith.constant 0 : i32
    %c0_i32_0 = arith.constant 0 : i32
    return %c0_i32, %arg1 : i32, i32
  }
  func.func @transform_3(%arg0: i32, %arg1: i32, %arg2: i32) -> (i32, i32) {
    %c0_i32 = arith.constant 0 : i32
    return %arg0, %arg1 : i32, i32
  }
}

</mosaic_0001>

<bundles_post_ra>
// kernel: chessnet_forward.11
= control target key start
LH: loop header
LB: loop body
LE: loop exit
PB: predicated region body
PF: predicated region fallthrough
CT: control target
= control target key end

     0   :  { %s1953_s12 = smov 0   ;;  %s1955_s13 = smov 0   ;;  %s2148_s0 = inlined_call_operand.vmem [shape: bf16[9,128,128], index: 0, kind: input, shape index: {}]   ;;  %s2149_s1 = inlined_call_operand.vmem [shape: bf16[2,1152,128], index: 1, kind: input, shape index: {}]   ;;  %s2150_s2 = inlined_call_operand.vmem [shape: f32[1,256], index: 2, kind: input, shape index: {}]   ;;  %s2151_s3 = inlined_call_operand.vmem [shape: bf16[128,256], index: 3, kind: output, shape index: {}]  }
   0x1   :  { %s1957_s14 = smov 0   ;;  %s1959_s15 = smov 0  }
   0x2   :  { %s1961_s16 = smov 0   ;;  %s1963_s17 = smov 0  }
   0x3   :  { %s1965_s18 = smov 0  }
   0x4 LB: > { %s25_s19 = sadd.s32 1, %s1922_s16  ;;  %s28_s20 = sadd.s32 1, %s1926_s17  ;;  %s1930_s18 = sphi %s1965_s18, %s13_s18   ;;  %s1926_s17 = sphi %s1963_s17, %s2161_s17   ;;  %s1922_s16 = sphi %s1961_s16, %s2160_s16   ;;  %s1918_s15 = sphi %s1959_s15, %s2159_s15   ;;  %s1914_s14 = sphi %s1957_s14, %s2158_s14   ;;  %s1910_s13 = sphi %s1955_s13, %s2157_s13   ;;  %s1906_s12 = sphi %s1953_s12, %s2156_s12  }
   0x5   : > { %p26_p0 = scmp.ge.s32.totalorder %s25_s19, 3  ;;  %s1386_s21 = sadd.s32 4294967295, %s1930_s18  }
   0x6   : > { %p133_p1 = scmp.ne.s32.totalorder %s1910_s13, %s1906_s12  ;;  %p134_p2 = scmp.eq.s32.totalorder %s1386_s21, 5 }
   0x7   : > { %s2163_s19 = smov (%p26_p0, %s25_s19), 0  ;;  %s2165_s20 = smov (!%p26_p0, %s28_s20), %s1926_s17 }
   0x8   : > { %p1390_p3 = scmp.ge.s32.totalorder %s1930_s18, 1  ;;  %p30_p4 = scmp.ge.s32.totalorder %s2165_s20, 2 }
   0x9   : > { %p192_p5 = scmp.lt.s32.totalorder %s1930_s18, 7  ;;  %p1995_p6 = por %p134_p2, %p133_p1 }
   0xa   : > { %s2167_s20 = smov (%p30_p4, %s2165_s20), 0  ;;  %s123_s24 = sadd.s32 1, %s1910_s13 }
   0xb   : > { %2154 = sst [smem:[#allocation4_spill]] %s2167_s20  ;;  %p193_p7 = pnand %p1390_p3, %p192_p5 }
   0xc   : > { %s119_s23 = ssub.s32 %s1926_s17, %s2167_s20  ;;  %s229_s26 = sand.u32 (!%p193_p7), 1, %s1906_s12  }
   0xd   : > { %p121_p8 = scmp.eq.s32.totalorder %s119_s23, 0  ;;  %196 = sbr.rel (%p193_p7) target bundleno = 349 (0x15d), region = 32 }
   0xe   : > { %s232_s27 = smul.u32 (!%p193_p7), 3, %s1914_s14  ;;  %s1391_s28 = sshll.u32 (!%p193_p7), %s229_s26, 6 }
   0xf   : > { %s2005_s25 = scalar_select %p121_p8, %s1910_s13, %s123_s24  }
  0x10   : > { %s244_s29 = smul.u32 (!%p193_p7), 48, %s1914_s14  ;;  %p234_p9 = scmp.lt.s32.totalorder (!%p193_p7), %s232_s27, 8 }
  0x11   : > { %p245_p10 = scmp.lt.s32.totalorder (!%p193_p7), %s1918_s15, 1  ;;  %s2028_s20 = scalar_lea.vmem (!%p193_p7), [#allocation3], %s1391_s28 }
  0x12   : > { %p247_p11 = scmp.lt.s32.totalorder (!%p193_p7), %s244_s29, 143  ;;  %p1395_p12 = scmp.ne.s32.totalorder (!%p193_p7), %s1914_s14, 0 }
  0x14   : > { %s2169_s27 = smov (!%p234_p9, %s232_s27), 8  ;;  %s2171_s29 = smov (!%p247_p11, %s244_s29), 143 }
  0x15   : > { %s2011_s30 = scalar_select %p245_p10, %s1918_s15, 1 }
  0x16   : > { %s1498_s4 = sshll.u32 %s2169_s27, 6  ;;  %262 = sbr.rel (%p1395_p12) target bundleno = 31 (0x1f), region = 36  ;;  %v1932_v0 = vmov (!%p1395_p12), 0.0  }
  0x17   : > { %s2016_s7 = scalar_lea.vmem %s2148_s0, %s1498_s4  ;;  %s1770_s8 = smul.u32 144, %s2011_s30  ;;  %263 = vst [vmem:[#allocation2] sm:$0xff] (!%p1395_p12), %v1932_v0  ;;  %264 = vst [vmem:[#allocation2 + $0x8] sm:$0xff] (!%p1395_p12), %v1932_v0 }
  0x18   : > { %s256_s11 = scalar_lea.vmem %s2150_s2, %s2011_s30  ;;  %265 = vst [vmem:[#allocation2 + $0x10] sm:$0xff] (!%p1395_p12), %v1932_v0  ;;  %266 = vst [vmem:[#allocation2 + $0x18] sm:$0xff] (!%p1395_p12), %v1932_v0 }
  0x19   : > { %s250_s12 = sadd.s32 %s1770_s8, %s2171_s29  ;;  %267 = vst [vmem:[#allocation2 + $0x20] sm:$0xff] (!%p1395_p12), %v1932_v0  ;;  %268 = vst [vmem:[#allocation2 + $0x28] sm:$0xff] (!%p1395_p12), %v1932_v0 }
  0x1a   : > { %s1394_s21 = sshll.u32 %s250_s12, 2  ;;  %269 = vst [vmem:[#allocation2 + $0x30] sm:$0xff] (!%p1395_p12), %v1932_v0  ;;  %270 = vst [vmem:[#allocation2 + $0x38] sm:$0xff] (!%p1395_p12), %v1932_v0 }
  0x1b   : > { %s2026_s26 = scalar_lea.vmem %s2149_s1, %s1394_s21  ;;  %271 = vst [vmem:[#allocation2 + $0x40] sm:$0xff] (!%p1395_p12), %v1932_v0  ;;  %272 = vst [vmem:[#allocation2 + $0x48] sm:$0xff] (!%p1395_p12), %v1932_v0 }
  0x1c   : > { %273 = vst [vmem:[#allocation2 + $0x50] sm:$0xff] (!%p1395_p12), %v1932_v0  ;;  %274 = vst [vmem:[#allocation2 + $0x58] sm:$0xff] (!%p1395_p12), %v1932_v0 }
  0x1d   : > { %275 = vst [vmem:[#allocation2 + $0x60] sm:$0xff] %v1932_v0  ;;  %276 = vst [vmem:[#allocation2 + $0x68] sm:$0xff] %v1932_v0 }
  0x1e   : > { %277 = vst [vmem:[#allocation2 + $0x70] sm:$0xff] %v1932_v0  ;;  %278 = vst [vmem:[#allocation2 + $0x78] sm:$0xff] %v1932_v0 }
  0x1f PF: > { %v1828_v1 = vld [vmem:[%s2026_s26] sm:$0xff]   ;;  %v1830_v3 = vld [vmem:[%s2026_s26 + $0x8] sm:$0xff]   ;;  %v1832_v5 = vld [vmem:[%s2026_s26 + $0x10] sm:$0xff]   ;;  %p1476_p13 = scmp.ne.s32.totalorder %s1914_s14, 2 }
  0x20   : > { %v1829_v2 = vld [vmem:[%s2026_s26 + $0x40] sm:$0xff]   ;;  %1610 = vmatprep.subr.bf16.mxu1 %v1828_v1  ;;  %v1831_v4 = vld [vmem:[%s2026_s26 + $0x48] sm:$0xff]   ;;  %v1833_v6 = vld [vmem:[%s2026_s26 + $0x50] sm:$0xff]  }
  0x21   : > { %1642 = vmatprep.subr.bf16.mxu0 %v1829_v2  ;;  %1611 = vmatpush3.bf16.msra.mxu1 %v1828_v1  ;;  %v1834_v7 = vld [vmem:[%s2026_s26 + $0x18] sm:$0xff]   ;;  %v1836_v9 = vld [vmem:[%s2026_s26 + $0x20] sm:$0xff]   ;;  %v1838_v11 = vld [vmem:[%s2026_s26 + $0x28] sm:$0xff]  }
  0x22   : > { %1643 = vmatpush3.bf16.msra.mxu0 %v1829_v2  ;;  %1612 = vmatprep.subr.bf16.mxu1 %v1830_v3  ;;  %v1835_v8 = vld [vmem:[%s2026_s26 + $0x58] sm:$0xff]   ;;  %v1837_v10 = vld [vmem:[%s2026_s26 + $0x60] sm:$0xff]   ;;  %v1839_v12 = vld [vmem:[%s2026_s26 + $0x68] sm:$0xff]  }
  0x23   : > { %1644 = vmatprep.subr.bf16.mxu0 %v1831_v4  ;;  %v1844_v13 = vld [vmem:[%s2016_s7] sm:$0xff]   ;;  %v1840_v15 = vld [vmem:[%s2026_s26 + $0x30] sm:$0xff]   ;;  %v1842_v17 = vld [vmem:[%s2026_s26 + $0x38] sm:$0xff]  }
  0x24   : > { %v1845_v14 = vld [vmem:[%s2016_s7 + $0x40] sm:$0xff]   ;;  %1626 = vmatprep.mubr.bf16.mxu1 %v1844_v13  ;;  %v1841_v16 = vld [vmem:[%s2026_s26 + $0x70] sm:$0xff]   ;;  %v1843_v18 = vld [vmem:[%s2026_s26 + $0x78] sm:$0xff]  }
  0x25   : > { %1613 = vmatpush3.bf16.msra.mxu1 %v1830_v3  ;;  %1658 = vmatprep.mubr.bf16.mxu0 %v1845_v14  ;;  %v1848_v19 = vld [vmem:[%s2026_s26 + $0x80] sm:$0xff]   ;;  %v1846_v20 = vld [vmem:[%s2016_s7 + $0x8] sm:$0xff]   ;;  %v1850_v23 = vld [vmem:[%s2016_s7 + $0x10] sm:$0xff]  }
  0x26   : > { %1645 = vmatpush3.bf16.msra.mxu0 %v1831_v4  ;;  %1614 = vmatprep.subr.bf16.mxu1 %v1832_v5  ;;  %v1847_v21 = vld [vmem:[%s2016_s7 + $0x48] sm:$0xff]   ;;  %v1851_v24 = vld [vmem:[%s2016_s7 + $0x50] sm:$0xff]   ;;  %v1852_v26 = vld [vmem:[%s2016_s7 + $0x18] sm:$0xff]  }
  0x27   : > { %1646 = vmatprep.subr.bf16.mxu0 %v1833_v6  ;;  %v1849_v22 = vld [vmem:[%s2026_s26 + $0x88] sm:$0xff]   ;;  %v1854_v25 = vld [vmem:[%s2026_s26 + $0x90] sm:$0xff]   ;;  %v1853_v27 = vld [vmem:[%s2016_s7 + $0x58] sm:$0xff]  }
  0x28   : > { %v1855_v28 = vld [vmem:[%s2026_s26 + $0x98] sm:$0xff]   ;;  %v1856_v29 = vld [vmem:[%s2016_s7 + $0x20] sm:$0xff]   ;;  %v1858_v32 = vld [vmem:[%s2016_s7 + $0x28] sm:$0xff]  }
  0x29   : > { %1615 = vmatpush3.bf16.msra.mxu1 %v1832_v5  ;;  %v1857_v30 = vld [vmem:[%s2016_s7 + $0x60] sm:$0xff]   ;;  %v1859_v33 = vld [vmem:[%s2016_s7 + $0x68] sm:$0xff]   ;;  %v1862_v35 = vld [vmem:[%s2016_s7 + $0x30] sm:$0xff]  }
  0x2a   : > { %1647 = vmatpush3.bf16.msra.mxu0 %v1833_v6  ;;  %1616 = vmatprep.subr.bf16.mxu1 %v1834_v7  ;;  %v1860_v31 = vld [vmem:[%s2026_s26 + $0xa0] sm:$0xff]   ;;  %v1861_v34 = vld [vmem:[%s2026_s26 + $0xa8] sm:$0xff]   ;;  %v1863_v36 = vld [vmem:[%s2016_s7 + $0x70] sm:$0xff]  }
  0x2b   : > { %1648 = vmatprep.subr.bf16.mxu0 %v1835_v8  ;;  %v1866_v37 = vld [vmem:[%s2026_s26 + $0xb0] sm:$0xff]   ;;  %v1864_v38 = vld [vmem:[%s2016_s7 + $0x38] sm:$0xff]   ;;  %v1868_v41 = vld [vmem:[%s2016_s7 + $0x80] sm:$0xff]  }
  0x2c   : > { %v1865_v39 = vld [vmem:[%s2016_s7 + $0x78] sm:$0xff]   ;;  %v1869_v42 = vld [vmem:[%s2016_s7 + $0xa0] sm:$0xff]   ;;  %v1871_v43 = vld [vmem:[%s2016_s7 + $0xa8] sm:$0xff]  }
  0x2d   : > { %1617 = vmatpush3.bf16.msra.mxu1 %v1834_v7  ;;  %v1867_v40 = vld [vmem:[%s2026_s26 + $0xb8] sm:$0xff]   ;;  %v1870_v44 = vld [vmem:[%s2016_s7 + $0x88] sm:$0xff]   ;;  %v1873_v45 = vld [vmem:[%s2016_s7 + $0xb0] sm:$0xff]  }
  0x2e   : > { %1649 = vmatpush3.bf16.msra.mxu0 %v1835_v8  ;;  %1618 = vmatprep.subr.bf16.mxu1 %v1836_v9  ;;  %v1872_v46 = vld [vmem:[%s2016_s7 + $0x90] sm:$0xff]   ;;  %v1875_v47 = vld [vmem:[%s2016_s7 + $0xb8] sm:$0xff]   ;;  %v287_v58 = vld [vmem:[#allocation2 + $0x40] sm:$0xff] }
  0x2f   : > { %1650 = vmatprep.subr.bf16.mxu0 %v1837_v10  ;;  %v1874_v48 = vld [vmem:[%s2016_s7 + $0x98] sm:$0xff]   ;;  %v289_v57 = vld [vmem:[#allocation2 + $0x50] sm:$0xff]  ;;  %v288_v0 = vld [vmem:[#allocation2 + $0x48] sm:$0xff] }
  0x30   : > { %v290_v60 = vld [vmem:[#allocation2 + $0x58] sm:$0xff]  ;;  %v293_v13 = vld [vmem:[#allocation2 + $0x70] sm:$0xff]  ;;  %v291_v14 = vld [vmem:[#allocation2 + $0x60] sm:$0xff] }
  0x31   : > { %1619 = vmatpush3.bf16.msra.mxu1 %v1836_v9 }
  0x32   : > { %1651 = vmatpush3.bf16.msra.mxu0 %v1837_v10  ;;  %1620 = vmatprep.subr.bf16.mxu1 %v1838_v11 }
  0x33   : > { %1652 = vmatprep.subr.bf16.mxu0 %v1839_v12 }
  0x35   : > { %1621 = vmatpush3.bf16.msra.mxu1 %v1838_v11 }
  0x36   : > { %1653 = vmatpush3.bf16.msra.mxu0 %v1839_v12  ;;  %1622 = vmatprep.subr.bf16.mxu1 %v1840_v15 }
  0x37   : > { %1654 = vmatprep.subr.bf16.mxu0 %v1841_v16 }
  0x39   : > { %1623 = vmatpush3.bf16.msra.mxu1 %v1840_v15 }
  0x3a   : > { %1655 = vmatpush3.bf16.msra.mxu0 %v1841_v16  ;;  %1624 = vmatprep.subr.bf16.mxu1 %v1842_v17  ;;  %v294_v16 = vld [vmem:[#allocation2 + $0x78] sm:$0xff] }
  0x3b   : > { %1656 = vmatprep.subr.bf16.mxu0 %v1843_v18 }
  0x3d   : > { %1625 = vmatpush3.bf16.msra.mxu1 %v1842_v17 }
  0x3e   : > { %1657 = vmatpush3.bf16.msra.mxu0 %v1843_v18  ;;  %1706 = vmatprep.subr.bf16.mxu1 %v1848_v19 }
  0x3f   : > { %1674 = vmatprep.subr.bf16.mxu0 %v1848_v19 }
  0x40   : > { %1627 = vmatmul.mubr.bf16.vlgmr.msra.gmra.mrb[0].mxu1 %v1846_v20  ;;  %v292_v20 = vld [vmem:[#allocation2 + $0x68] sm:$0xff] }
  0x41   : > { %1659 = vmatmul.mubr.bf16.vlgmr.msra.gmra.mrb[0].mxu0 %v1847_v21  ;;  %1714 = vmatpush3.bf16.msra.mxu1 %v1848_v19 }
  0x42   : > { %1675 = vmatpush3.bf16.msra.mxu0 %v1848_v19  ;;  %1707 = vmatprep.subr.bf16.mxu1 %v1849_v22 }
  0x43   : > { %1676 = vmatprep.subr.bf16.mxu0 %v1849_v22  ;;  %1630 = vmatprep.mubr.bf16.mxu1 %v1850_v23 }
  0x44   : > { %1662 = vmatprep.mubr.bf16.mxu0 %v1851_v24 }
  0x45   : > { %1715 = vmatpush3.bf16.msra.mxu1 %v1849_v22 }
  0x46   : > { %1677 = vmatpush3.bf16.msra.mxu0 %v1849_v22  ;;  %1708 = vmatprep.subr.bf16.mxu1 %v1854_v25 }
  0x47   : > { %1678 = vmatprep.subr.bf16.mxu0 %v1854_v25 }
  0x48   : > { %1631 = vmatmul.mubr.bf16.gmra.mrb[4].mxu1 %v1852_v26 }
  0x49   : > { %1663 = vmatmul.mubr.bf16.gmra.mrb[4].mxu0 %v1853_v27  ;;  %1716 = vmatpush3.bf16.msra.mxu1 %v1854_v25 }
  0x4a   : > { %1679 = vmatpush3.bf16.msra.mxu0 %v1854_v25  ;;  %1709 = vmatprep.subr.bf16.mxu1 %v1855_v28 }
  0x4b   : > { %1680 = vmatprep.subr.bf16.mxu0 %v1855_v28  ;;  %1634 = vmatprep.mubr.bf16.mxu1 %v1856_v29 }
  0x4c   : > { %1666 = vmatprep.mubr.bf16.mxu0 %v1857_v30 }
  0x4d   : > { %1717 = vmatpush3.bf16.msra.mxu1 %v1855_v28 }
  0x4e   : > { %1681 = vmatpush3.bf16.msra.mxu0 %v1855_v28  ;;  %1710 = vmatprep.subr.bf16.mxu1 %v1860_v31 }
  0x4f   : > { %1682 = vmatprep.subr.bf16.mxu0 %v1860_v31 }
  0x50   : > { %1635 = vmatmul.mubr.bf16.gmra.mrb[8].mxu1 %v1858_v32 }
  0x51   : > { %1667 = vmatmul.mubr.bf16.gmra.mrb[8].mxu0 %v1859_v33  ;;  %1718 = vmatpush3.bf16.msra.mxu1 %v1860_v31  ;;  %v279_v33 = vld [vmem:[#allocation2] sm:$0xff] }
  0x52   : > { %1683 = vmatpush3.bf16.msra.mxu0 %v1860_v31  ;;  %1711 = vmatprep.subr.bf16.mxu1 %v1861_v34  ;;  %v281_v31 = vld [vmem:[#allocation2 + $0x10] sm:$0xff] }
  0x53   : > { %1684 = vmatprep.subr.bf16.mxu0 %v1861_v34  ;;  %1638 = vmatprep.mubr.bf16.mxu1 %v1862_v35  ;;  %v282_v35 = vld [vmem:[#allocation2 + $0x18] sm:$0xff] }
  0x54   : > { %1670 = vmatprep.mubr.bf16.mxu0 %v1863_v36 }
  0x55   : > { %1719 = vmatpush3.bf16.msra.mxu1 %v1861_v34 }
  0x56   : > { %1685 = vmatpush3.bf16.msra.mxu0 %v1861_v34  ;;  %1712 = vmatprep.subr.bf16.mxu1 %v1866_v37 }
  0x57   : > { %1686 = vmatprep.subr.bf16.mxu0 %v1866_v37 }
  0x58   : > { %1639 = vmatmul.mubr.bf16.gmra.mrb[12].mxu1 %v1864_v38 }
  0x59   : > { %1671 = vmatmul.mubr.bf16.gmra.mrb[12].mxu0 %v1865_v39  ;;  %1720 = vmatpush3.bf16.msra.mxu1 %v1866_v37 }
  0x5a   : > { %1687 = vmatpush3.bf16.msra.mxu0 %v1866_v37  ;;  %1713 = vmatprep.subr.bf16.mxu1 %v1867_v40  ;;  %v280_v37 = vld [vmem:[#allocation2 + $0x8] sm:$0xff] }
  0x5b   : > { %1688 = vmatprep.subr.bf16.mxu0 %v1867_v40  ;;  %1690 = vmatprep.mubr.bf16.mxu0 %v1868_v41 }
  0x5c   : > { %1698 = vmatprep.mubr.bf16.mxu1 %v1869_v42 }
  0x5d   : > { %1721 = vmatpush3.bf16.msra.mxu1 %v1867_v40 }
  0x5e   : > { %1689 = vmatpush3.bf16.msra.mxu0 %v1867_v40 }
  0x60   : > { %1699 = vmatmul.mubr.bf16.vlgmr.msra.gmra.mrb[16].mxu1 %v1871_v43 }
  0x61   : > { %1691 = vmatmul.mubr.bf16.vlgmr.msra.gmra.mrb[0].mxu0 %v1870_v44  ;;  %1702 = vmatprep.mubr.bf16.mxu1 %v1873_v45 }
  0x62   : > { %1694 = vmatprep.mubr.bf16.mxu0 %v1872_v46 }
  0x68   : > { %1703 = vmatmul.mubr.bf16.gmra.mrb[20].mxu1 %v1875_v47 }
  0x69   : > { %1695 = vmatmul.mubr.bf16.gmra.mrb[4].mxu0 %v1874_v48 }
 0x113   : > { %v1628_v49 = vpop.f32.mrb[0].mxu1 }
 0x114   : > { %v457_v50 = vpop.f32.mrb[1].mxu1  ;;  %v522_v36 = vadd.f32 %v1628_v49, %v281_v31 }
 0x115   : > { %v1629_v51 = vpop.f32.mrb[2].mxu1  ;;  %v520_v39 = vadd.f32 %v457_v50, %v279_v33  ;;  %v285_v50 = vld [vmem:[#allocation2 + $0x30] sm:$0xff] }
 0x116   : > { %v460_v52 = vpop.f32.mrb[3].mxu1  ;;  %v523_v43 = vadd.f32 %v1629_v51, %v282_v35  ;;  %v283_v51 = vld [vmem:[#allocation2 + $0x20] sm:$0xff] }
 0x117   : > { %v521_v48 = vadd.f32 %v460_v52, %v280_v37 }
 0x11b   : > { %v2079_v53 = vpop.f32.mrb[4].mxu1 }
 0x11c   : > { %v2081_v54 = vpop.f32.mrb[5].mxu1  ;;  %v526_v52 = vadd.f32 %v2079_v53, %v285_v50 }
 0x11d   : > { %v2083_v55 = vpop.f32.mrb[6].mxu1 }
 0x11e   : > { %v2085_v56 = vpop.f32.mrb[7].mxu1 }
 0x123   : > { %v1636_v59 = vpop.f32.mrb[8].mxu1 }
 0x124   : > { %v530_v61 = vadd.f32 %v1636_v59, %v289_v57  ;;  %v1668_v62 = vpop.f32.mrb[8].mxu0  ;;  %v489_v63 = vpop.f32.mrb[9].mxu1 }
 0x125   : > { %v528_v1 = vadd.f32 %v489_v63, %v287_v58  ;;  %v731_v2 = vpop.f32.mrb[9].mxu0  ;;  %v1637_v3 = vpop.f32.mrb[10].mxu1 }
 0x126   : > { %v772_v4 = vadd.f32 %v1668_v62, %v530_v61  ;;  %v531_v5 = vadd.f32 %v1637_v3, %v290_v60  ;;  %v1669_v6 = vpop.f32.mrb[10].mxu0  ;;  %v492_v7 = vpop.f32.mrb[11].mxu1  ;;  %v524_v3 = vadd.f32 %v2081_v54, %v283_v51 }
 0x127   : > { %v770_v8 = vadd.f32 %v731_v2, %v528_v1  ;;  %v529_v9 = vadd.f32 %v492_v7, %v288_v0  ;;  %v734_v10 = vpop.f32.mrb[11].mxu0  ;;  %v286_v0 = vld [vmem:[#allocation2 + $0x38] sm:$0xff]  ;;  %v284_v1 = vld [vmem:[#allocation2 + $0x28] sm:$0xff] }
 0x128   : > { %v773_v11 = vadd.f32 %v1669_v6, %v531_v5  ;;  %v527_v7 = vadd.f32 %v2083_v55, %v286_v0 }
 0x129   : > { %v771_v12 = vadd.f32 %v734_v10, %v529_v9 }
 0x12b   : > { %v1640_v15 = vpop.f32.mrb[12].mxu1 }
 0x12c   : > { %v534_v17 = vadd.f32 %v1640_v15, %v293_v13  ;;  %v1672_v18 = vpop.f32.mrb[12].mxu0  ;;  %v505_v19 = vpop.f32.mrb[13].mxu1 }
 0x12d   : > { %v532_v21 = vadd.f32 %v505_v19, %v291_v14  ;;  %v747_v22 = vpop.f32.mrb[13].mxu0  ;;  %v1641_v23 = vpop.f32.mrb[14].mxu1  ;;  %v1477_v19 = vld [vmem:[%s256_s11] ss:$0 sm:$0xff] (!%p1476_p13) }
 0x12e   : > { %v776_v24 = vadd.f32 %v1672_v18, %v534_v17  ;;  %v535_v25 = vadd.f32 %v1641_v23, %v294_v16  ;;  %v1673_v26 = vpop.f32.mrb[14].mxu0  ;;  %v508_v27 = vpop.f32.mrb[15].mxu1 }
 0x12f   : > { %v774_v28 = vadd.f32 %v747_v22, %v532_v21  ;;  %v533_v29 = vadd.f32 %v508_v27, %v292_v20  ;;  %v750_v30 = vpop.f32.mrb[15].mxu0 }
 0x130   : > { %v777_v32 = vadd.f32 %v1673_v26, %v535_v25 }
 0x131   : > { %v775_v34 = vadd.f32 %v750_v30, %v533_v29 }
 0x133   : > { %v1700_v38 = vpop.f32.mrb[16].mxu1 }
 0x134   : > { %v1692_v40 = vpop.f32.mrb[0].mxu0  ;;  %v1014_v41 = vadd.f32 %v1700_v38, %v772_v4  ;;  %v973_v42 = vpop.f32.mrb[17].mxu1 }
 0x135   : > { %v1723_v44 = vadd.f32 %v1692_v40, %v522_v36  ;;  %v941_v45 = vpop.f32.mrb[1].mxu0  ;;  %v1012_v46 = vadd.f32 %v973_v42, %v770_v8  ;;  %v1701_v47 = vpop.f32.mrb[18].mxu1 }
 0x136   : > { %1030 = vst [vmem:[#allocation2 + $0x50] sm:$0xff] %v1014_v41  ;;  %v1725_v57 = vadd.f32 %v941_v45, %v520_v39  ;;  %v1693_v58 = vpop.f32.mrb[2].mxu0  ;;  %v1015_v59 = vadd.f32 %v1701_v47, %v773_v11  ;;  %v976_v60 = vpop.f32.mrb[19].mxu1 }
 0x137   : > { %1022 = vst [vmem:[#allocation2 + $0x10] sm:$0xff] %v1723_v44  ;;  %1028 = vst [vmem:[#allocation2 + $0x40] sm:$0xff] %v1012_v46  ;;  %v1727_v49 = vadd.f32 %v1693_v58, %v523_v43  ;;  %v944_v61 = vpop.f32.mrb[3].mxu0  ;;  %v1013_v62 = vadd.f32 %v976_v60, %v771_v12  ;;  %v525_v12 = vadd.f32 %v2085_v56, %v284_v1 }
 0x138   : > { %1020 = vst [vmem:[#allocation2] sm:$0xff] %v1725_v57  ;;  %1031 = vst [vmem:[#allocation2 + $0x58] sm:$0xff] %v1015_v59  ;;  %v1729_v63 = vadd.f32 %v944_v61, %v521_v48 }
 0x139   : > { %1023 = vst [vmem:[#allocation2 + $0x18] sm:$0xff] %v1727_v49  ;;  %1029 = vst [vmem:[#allocation2 + $0x48] sm:$0xff] %v1013_v62 }
 0x13a   : > { %1021 = vst [vmem:[#allocation2 + $0x8] sm:$0xff] %v1729_v63 }
 0x13b   : > { %v1704_v2 = vpop.f32.mrb[20].mxu1 }
 0x13c   : > { %v1696_v4 = vpop.f32.mrb[4].mxu0  ;;  %v1018_v5 = vadd.f32 %v1704_v2, %v776_v24  ;;  %v989_v6 = vpop.f32.mrb[21].mxu1  ;;  %1039 = sbr.rel (%p1476_p13) target bundleno = 337 (0x151), region = 40 }
 0x13d   : > { %v1731_v8 = vadd.f32 %v1696_v4, %v526_v52  ;;  %v957_v9 = vpop.f32.mrb[5].mxu0  ;;  %v1016_v10 = vadd.f32 %v989_v6, %v774_v28  ;;  %v1705_v11 = vpop.f32.mrb[22].mxu1  ;;  %v1050_v37 = vld [vmem:[#allocation2 + $0x50] sm:$0xff] (!%p1476_p13) }
 0x13e   : > { %1034 = vst [vmem:[#allocation2 + $0x70] sm:$0xff] %v1018_v5  ;;  %v1733_v13 = vadd.f32 %v957_v9, %v524_v3  ;;  %v1697_v14 = vpop.f32.mrb[6].mxu0  ;;  %v1019_v15 = vadd.f32 %v1705_v11, %v777_v32  ;;  %v992_v53 = vpop.f32.mrb[23].mxu1  ;;  %v1042_v22 = vld [vmem:[#allocation2 + $0x10] sm:$0xff] (!%p1476_p13)  ;;  %v1048_v35 = vld [vmem:[#allocation2 + $0x40] sm:$0xff] (!%p1476_p13)  ;;  %v1073_v60 = vadd.f32 (!%p1476_p13), %v1477_v19, %v1050_v37 }
 0x13f   : > { %1026 = vst [vmem:[#allocation2 + $0x30] sm:$0xff] %v1731_v8  ;;  %1032 = vst [vmem:[#allocation2 + $0x60] sm:$0xff] %v1016_v10  ;;  %v1735_v16 = vadd.f32 %v1697_v14, %v527_v7  ;;  %v960_v54 = vpop.f32.mrb[7].mxu0  ;;  %v1017_v17 = vadd.f32 %v992_v53, %v775_v34  ;;  %v1040_v55 = vld [vmem:[#allocation2] sm:$0xff] (!%p1476_p13)  ;;  %v1065_v25 = vadd.f32 (!%p1476_p13), %v1477_v19, %v1042_v22  ;;  %v1051_v42 = vld [vmem:[#allocation2 + $0x58] sm:$0xff] (!%p1476_p13) }
 0x140   : > { %1024 = vst [vmem:[#allocation2 + $0x20] sm:$0xff] %v1733_v13  ;;  %1035 = vst [vmem:[#allocation2 + $0x78] sm:$0xff] %v1019_v15  ;;  %v1737_v18 = vadd.f32 %v960_v54, %v525_v12  ;;  %v1063_v20 = vadd.f32 (!%p1476_p13), %v1477_v19, %v1040_v55  ;;  %v1043_v23 = vld [vmem:[#allocation2 + $0x18] sm:$0xff] (!%p1476_p13)  ;;  %v1049_v36 = vld [vmem:[#allocation2 + $0x48] sm:$0xff] (!%p1476_p13)  ;;  %v1071_v47 = vadd.f32 (!%p1476_p13), %v1477_v19, %v1048_v35  ;;  %v1089_v1 = vmax.f32 (!%p1476_p13), %v1073_v60, 0.0 }
 0x141   : > { %1027 = vst [vmem:[#allocation2 + $0x38] sm:$0xff] %v1735_v16  ;;  %1033 = vst [vmem:[#allocation2 + $0x68] sm:$0xff] %v1017_v17  ;;  %v1041_v56 = vld [vmem:[#allocation2 + $0x8] sm:$0xff] (!%p1476_p13)  ;;  %v1066_v26 = vadd.f32 (!%p1476_p13), %v1477_v19, %v1043_v23  ;;  %v1081_v38 = vmax.f32 (!%p1476_p13), %v1065_v25, 0.0  ;;  %v1072_v59 = vadd.f32 (!%p1476_p13), %v1477_v19, %v1049_v36  ;;  %v1074_v63 = vadd.f32 (!%p1476_p13), %v1477_v19, %v1051_v42 }
 0x142   : > { %1025 = vst [vmem:[#allocation2 + $0x28] sm:$0xff] %v1737_v18  ;;  %v1064_v21 = vadd.f32 (!%p1476_p13), %v1477_v19, %v1041_v56  ;;  %v1079_v31 = vmax.f32 (!%p1476_p13), %v1063_v20, 0.0  ;;  %v1087_v50 = vmax.f32 (!%p1476_p13), %v1071_v47, 0.0 }
 0x143   : > { %v1082_v39 = vmax.f32 %v1066_v26, 0.0  ;;  %v1088_v52 = vmax.f32 %v1072_v59, 0.0  ;;  %v1090_v3 = vmax.f32 %v1074_v63, 0.0 }
 0x144   : > { %v1080_v32 = vmax.f32 %v1064_v21, 0.0 }
 0x145   : > { %v1523_v57 = vpack.c.bf16 %v1082_v39, %v1081_v38  ;;  %v1054_v49 = vld [vmem:[#allocation2 + $0x70] sm:$0xff]  ;;  %v1538_v7 = vpack.c.bf16 %v1088_v52, %v1087_v50  ;;  %v1543_v9 = vpack.c.bf16 %v1090_v3, %v1089_v1 }
 0x146   : > { %v1046_v29 = vld [vmem:[#allocation2 + $0x30] sm:$0xff]  ;;  %v1052_v43 = vld [vmem:[#allocation2 + $0x60] sm:$0xff]  ;;  %v1518_v44 = vpack.c.bf16 %v1080_v32, %v1079_v31  ;;  %v1077_v5 = vadd.f32 %v1477_v19, %v1054_v49 }
 0x147   : > { %v1044_v24 = vld [vmem:[#allocation2 + $0x20] sm:$0xff]  ;;  %v1069_v34 = vadd.f32 %v1477_v19, %v1046_v29  ;;  %v1055_v61 = vld [vmem:[#allocation2 + $0x78] sm:$0xff]  ;;  %v1075_v51 = vadd.f32 %v1477_v19, %v1052_v43  ;;  %1555 = vst [vmem:[%s2028_s20 + $0x8] sm:$0xff] %v1523_v57   ;;  %1558 = vst [vmem:[%s2028_s20 + $0x20] sm:$0xff] %v1538_v7  }
 0x148   : > { %v1067_v28 = vadd.f32 %v1477_v19, %v1044_v24  ;;  %v1047_v30 = vld [vmem:[#allocation2 + $0x38] sm:$0xff]  ;;  %v1053_v48 = vld [vmem:[#allocation2 + $0x68] sm:$0xff]  ;;  %1519 = vst [vmem:[%s2028_s20] sm:$0xff] %v1518_v44   ;;  %v1078_v6 = vadd.f32 %v1477_v19, %v1055_v61  ;;  %v1093_v10 = vmax.f32 %v1077_v5, 0.0  ;;  %1559 = vst [vmem:[%s2028_s20 + $0x28] sm:$0xff] %v1543_v9  }
 0x149   : > { %v1045_v27 = vld [vmem:[#allocation2 + $0x28] sm:$0xff]  ;;  %v1070_v41 = vadd.f32 %v1477_v19, %v1047_v30  ;;  %v1085_v46 = vmax.f32 %v1069_v34, 0.0  ;;  %v1076_v2 = vadd.f32 %v1477_v19, %v1053_v48  ;;  %v1091_v4 = vmax.f32 %v1075_v51, 0.0 }
 0x14a   : > { %v1068_v33 = vadd.f32 %v1477_v19, %v1045_v27  ;;  %v1083_v40 = vmax.f32 %v1067_v28, 0.0  ;;  %v1094_v11 = vmax.f32 %v1078_v6, 0.0 }
 0x14b   : > { %v1086_v58 = vmax.f32 %v1070_v41, 0.0  ;;  %v1092_v8 = vmax.f32 %v1076_v2, 0.0 }
 0x14c   : > { %v1084_v45 = vmax.f32 %v1068_v33, 0.0  ;;  %v1553_v13 = vpack.c.bf16 %v1094_v11, %v1093_v10 }
 0x14d   : > { %v1533_v0 = vpack.c.bf16 %v1086_v58, %v1085_v46  ;;  %v1548_v12 = vpack.c.bf16 %v1092_v8, %v1091_v4 }
 0x14e   : > { %v1528_v62 = vpack.c.bf16 %v1084_v45, %v1083_v40  ;;  %1561 = vst [vmem:[%s2028_s20 + $0x38] sm:$0xff] %v1553_v13  }
 0x14f   : > { %1557 = vst [vmem:[%s2028_s20 + $0x18] sm:$0xff] %v1533_v0   ;;  %1560 = vst [vmem:[%s2028_s20 + $0x30] sm:$0xff] %v1548_v12  }
 0x150   : > { %1556 = vst [vmem:[%s2028_s20 + $0x10] sm:$0xff] %v1528_v62  }
 0x151 PF: > { %1181 = sbr.rel (!%p1995_p6) target bundleno = 349 (0x15d), region = 44  ;;  %s1495_s14 = sshll.u32 (%p1995_p6), %s1918_s15, 2  ;;  %v1202_v14 = vld [vmem:[%s2028_s20] sm:$0xf] (%p1995_p6)  ;;  %v1204_v15 = vld [vmem:[%s2028_s20 + $0x4] sm:$0xf] (%p1995_p6) }
 0x152   : > { %s1186_s4 = scalar_lea.vmem (%p1995_p6), %s2151_s3, %s1495_s14  ;;  %v1206_v53 = vld [vmem:[%s2028_s20 + $0x8] sm:$0xf] (%p1995_p6)  ;;  %v1208_v16 = vld [vmem:[%s2028_s20 + $0xc] sm:$0xf] (%p1995_p6)  ;;  %v1218_v56 = vld [vmem:[%s2028_s20 + $0x20] sm:$0xf] (%p1995_p6) }
 0x153   : > { %1203 = vst [vmem:[%s1186_s4] sm:$0xf] (%p1995_p6), %v1202_v14  ;;  %1205 = vst [vmem:[%s1186_s4 + $0x8] sm:$0xf] (%p1995_p6), %v1204_v15  ;;  %v1220_v19 = vld [vmem:[%s2028_s20 + $0x24] sm:$0xf] (%p1995_p6) }
 0x154   : > { %1207 = vst [vmem:[%s1186_s4 + $0x10] sm:$0xf] (%p1995_p6), %v1206_v53  ;;  %1209 = vst [vmem:[%s1186_s4 + $0x18] sm:$0xf] (%p1995_p6), %v1208_v16  ;;  %v1222_v20 = vld [vmem:[%s2028_s20 + $0x28] sm:$0xf] (%p1995_p6) }
 0x155   : > { %1219 = vst [vmem:[%s1186_s4 + $0x40] sm:$0xf] (%p1995_p6), %v1218_v56  ;;  %1221 = vst [vmem:[%s1186_s4 + $0x48] sm:$0xf] (%p1995_p6), %v1220_v19  ;;  %v1224_v21 = vld [vmem:[%s2028_s20 + $0x2c] sm:$0xf] (%p1995_p6) }
 0x156   : > { %v1214_v18 = vld [vmem:[%s2028_s20 + $0x18] sm:$0xf] (%p1995_p6)  ;;  %v1216_v55 = vld [vmem:[%s2028_s20 + $0x1c] sm:$0xf] (%p1995_p6)  ;;  %1223 = vst [vmem:[%s1186_s4 + $0x50] sm:$0xf] (%p1995_p6), %v1222_v20 }
 0x157   : > { %v1210_v54 = vld [vmem:[%s2028_s20 + $0x10] sm:$0xf] (%p1995_p6)  ;;  %v1212_v17 = vld [vmem:[%s2028_s20 + $0x14] sm:$0xf] (%p1995_p6)  ;;  %1215 = vst [vmem:[%s1186_s4 + $0x30] sm:$0xf] (%p1995_p6), %v1214_v18 }
 0x158   : > { %1211 = vst [vmem:[%s1186_s4 + $0x20] sm:$0xf] %v1210_v54  ;;  %1213 = vst [vmem:[%s1186_s4 + $0x28] sm:$0xf] %v1212_v17  ;;  %v1226_v22 = vld [vmem:[%s2028_s20 + $0x30] sm:$0xf] }
 0x159   : > { %1217 = vst [vmem:[%s1186_s4 + $0x38] sm:$0xf] %v1216_v55  ;;  %v1228_v23 = vld [vmem:[%s2028_s20 + $0x34] sm:$0xf]  ;;  %1225 = vst [vmem:[%s1186_s4 + $0x58] sm:$0xf] %v1224_v21 }
 0x15a   : > { %1227 = vst [vmem:[%s1186_s4 + $0x60] sm:$0xf] %v1226_v22  ;;  %1229 = vst [vmem:[%s1186_s4 + $0x68] sm:$0xf] %v1228_v23  ;;  %v1230_v24 = vld [vmem:[%s2028_s20 + $0x38] sm:$0xf] }
 0x15b   : > { %v1232_v25 = vld [vmem:[%s2028_s20 + $0x3c] sm:$0xf]  ;;  %1231 = vst [vmem:[%s1186_s4 + $0x70] sm:$0xf] %v1230_v24 }
 0x15c   : > { %1233 = vst [vmem:[%s1186_s4 + $0x78] sm:$0xf] %v1232_v25 }
 0x15d PF: > { %s13_s18 = sadd.s32 1, %s1930_s18   ;;  %s2155_s22 = sld [smem:[#allocation4_spill]] }
 0x15e   : > { %p10_p0 = scmp.ge.s32.totalorder %s13_s18, 8   ;;  %s2156_s12 = smov %s1910_s13 }
 0x15f   : > { %s2157_s13 = smov %s2005_s25  ;;  %s2158_s14 = smov %s1922_s16 }
 0x160   : > { %s2159_s15 = smov %s1926_s17  ;;  %s2160_s16 = smov %s2163_s19 }
 0x161   :  { %12 = sbr.rel (!%p10_p0) target bundleno = 4 (0x4), region = 119 }
 0x163   : > { %s2161_s17 = smov %s2155_s22 }

// kernel: chessnet_forward.20
= control target key start
LH: loop header
LB: loop body
LE: loop exit
PB: predicated region body
PF: predicated region fallthrough
CT: control target
= control target key end

     0   :  { %s939_s1 = inlined_call_operand.vmem [shape: bf16[1,256,128], index: 1, kind: input, shape index: {}]   ;;  %s940_s0 = inlined_call_operand.vmem [shape: bf16[1,128,256], index: 0, kind: input, shape index: {}]   ;;  %s941_s2 = inlined_call_operand.vmem [shape: f32[1,128], index: 2, kind: input, shape index: {}]   ;;  %s942_s3 = inlined_call_operand.vmem [shape: bf16[128,128], index: 3, kind: output, shape index: {}]  }
   0x1   :  { %v738_v0 = vld [vmem:[%s939_s1 + $0x40] sm:$0xff]   ;;  %v740_v2 = vld [vmem:[%s939_s1 + $0x48] sm:$0xff]   ;;  %v742_v4 = vld [vmem:[%s939_s1 + $0x50] sm:$0xff]  }
   0x2   :  { %v739_v1 = vld [vmem:[%s939_s1] sm:$0xff]   ;;  %658 = vmatprep.subr.bf16.mxu0 %v738_v0  ;;  %722 = vmatprep.subr.bf16.mxu1 %v738_v0  ;;  %v741_v3 = vld [vmem:[%s939_s1 + $0x8] sm:$0xff]   ;;  %v743_v5 = vld [vmem:[%s939_s1 + $0x10] sm:$0xff]  }
   0x3   :  { %659 = vmatpush3.bf16.msra.mxu0 %v739_v1  ;;  %730 = vmatpush3.bf16.msra.mxu1 %v739_v1  ;;  %v744_v6 = vld [vmem:[%s939_s1 + $0x58] sm:$0xff]   ;;  %v746_v8 = vld [vmem:[%s939_s1 + $0x60] sm:$0xff]   ;;  %v748_v10 = vld [vmem:[%s939_s1 + $0x68] sm:$0xff]  }
   0x4   :  { %660 = vmatprep.subr.bf16.mxu0 %v740_v2  ;;  %723 = vmatprep.subr.bf16.mxu1 %v740_v2  ;;  %v745_v7 = vld [vmem:[%s939_s1 + $0x18] sm:$0xff]   ;;  %v747_v9 = vld [vmem:[%s939_s1 + $0x20] sm:$0xff]   ;;  %v749_v13 = vld [vmem:[%s939_s1 + $0x28] sm:$0xff]  }
   0x5   :  { %v756_v11 = vld [vmem:[%s940_s0 + $0x4] ss:$8 sps:$4 sm:$0xff]   ;;  %v750_v14 = vld [vmem:[%s939_s1 + $0x70] sm:$0xff]   ;;  %v752_v16 = vld [vmem:[%s939_s1 + $0x78] sm:$0xff]  }
   0x6   :  { %v759_v12 = vld [vmem:[%s940_s0 + $0x44] ss:$8 sps:$4 sm:$0xff]   ;;  %307 = vmatprep.mubr.bf16.mxu0 %v756_v11  ;;  %v751_v15 = vld [vmem:[%s939_s1 + $0x30] sm:$0xff]   ;;  %v753_v17 = vld [vmem:[%s939_s1 + $0x38] sm:$0xff]  }
   0x7   :  { %661 = vmatpush3.bf16.msra.mxu0 %v741_v3  ;;  %731 = vmatpush3.bf16.msra.mxu1 %v741_v3  ;;  %v754_v18 = vld [vmem:[%s940_s0] ss:$8 sps:$4 sm:$0xff]   ;;  %v760_v20 = vld [vmem:[%s940_s0 + $0x14] ss:$8 sps:$4 sm:$0xff]   ;;  %v764_v22 = vld [vmem:[%s940_s0 + $0x10] ss:$8 sps:$4 sm:$0xff]  }
   0x8   :  { %662 = vmatprep.subr.bf16.mxu0 %v742_v4  ;;  %724 = vmatprep.subr.bf16.mxu1 %v742_v4  ;;  %v757_v19 = vld [vmem:[%s940_s0 + $0x40] ss:$8 sps:$4 sm:$0xff]   ;;  %v762_v21 = vld [vmem:[%s940_s0 + $0x54] ss:$8 sps:$4 sm:$0xff]   ;;  %v765_v23 = vld [vmem:[%s940_s0 + $0x50] ss:$8 sps:$4 sm:$0xff]  }
   0x9   :  { %339 = vmatprep.mubr.bf16.mxu1 %v759_v12  ;;  %v766_v24 = vld [vmem:[%s940_s0 + $0x24] ss:$8 sps:$4 sm:$0xff]   ;;  %v770_v26 = vld [vmem:[%s940_s0 + $0x20] ss:$8 sps:$4 sm:$0xff]   ;;  %v772_v28 = vld [vmem:[%s940_s0 + $0x34] ss:$8 sps:$4 sm:$0xff]  }
   0xa   :  { %v768_v25 = vld [vmem:[%s940_s0 + $0x64] ss:$8 sps:$4 sm:$0xff]   ;;  %v771_v27 = vld [vmem:[%s940_s0 + $0x60] ss:$8 sps:$4 sm:$0xff]   ;;  %v774_v29 = vld [vmem:[%s940_s0 + $0x74] ss:$8 sps:$4 sm:$0xff]  }
   0xb   :  { %663 = vmatpush3.bf16.msra.mxu0 %v743_v5  ;;  %732 = vmatpush3.bf16.msra.mxu1 %v743_v5  ;;  %v776_v30 = vld [vmem:[%s940_s0 + $0x30] ss:$8 sps:$4 sm:$0xff]   ;;  %v897_v35 = vld [vmem:[%s941_s2] ss:$0 sm:$0xff] }
   0xc   :  { %664 = vmatprep.subr.bf16.mxu0 %v744_v6  ;;  %725 = vmatprep.subr.bf16.mxu1 %v744_v6  ;;  %v777_v31 = vld [vmem:[%s940_s0 + $0x70] ss:$8 sps:$4 sm:$0xff]  }
   0xf   :  { %665 = vmatpush3.bf16.msra.mxu0 %v745_v7  ;;  %733 = vmatpush3.bf16.msra.mxu1 %v745_v7 }
  0x10   :  { %666 = vmatprep.subr.bf16.mxu0 %v746_v8  ;;  %726 = vmatprep.subr.bf16.mxu1 %v746_v8 }
  0x13   :  { %667 = vmatpush3.bf16.msra.mxu0 %v747_v9  ;;  %734 = vmatpush3.bf16.msra.mxu1 %v747_v9 }
  0x14   :  { %668 = vmatprep.subr.bf16.mxu0 %v748_v10  ;;  %727 = vmatprep.subr.bf16.mxu1 %v748_v10 }
  0x17   :  { %669 = vmatpush3.bf16.msra.mxu0 %v749_v13  ;;  %735 = vmatpush3.bf16.msra.mxu1 %v749_v13 }
  0x18   :  { %670 = vmatprep.subr.bf16.mxu0 %v750_v14  ;;  %728 = vmatprep.subr.bf16.mxu1 %v750_v14 }
  0x1b   :  { %671 = vmatpush3.bf16.msra.mxu0 %v751_v15  ;;  %736 = vmatpush3.bf16.msra.mxu1 %v751_v15 }
  0x1c   :  { %672 = vmatprep.subr.bf16.mxu0 %v752_v16  ;;  %729 = vmatprep.subr.bf16.mxu1 %v752_v16 }
  0x1f   :  { %673 = vmatpush3.bf16.msra.mxu0 %v753_v17  ;;  %737 = vmatpush3.bf16.msra.mxu1 %v753_v17 }
  0x22   :  { %308 = vmatmul.mubr.bf16.vlgmr.msra.gmra.mrb[0].mxu0 %v754_v18  ;;  %340 = vmatmul.mubr.bf16.vlgmr.msra.gmra.mrb[0].mxu1 %v757_v19 }
  0x23   :  { %315 = vmatprep.mubr.bf16.mxu0 %v760_v20  ;;  %347 = vmatprep.mubr.bf16.mxu1 %v762_v21 }
  0x2a   :  { %316 = vmatmul.mubr.bf16.gmra.mrb[4].mxu0 %v764_v22  ;;  %348 = vmatmul.mubr.bf16.gmra.mrb[4].mxu1 %v765_v23 }
  0x2b   :  { %323 = vmatprep.mubr.bf16.mxu0 %v766_v24  ;;  %355 = vmatprep.mubr.bf16.mxu1 %v768_v25 }
  0x32   :  { %324 = vmatmul.mubr.bf16.gmra.mrb[8].mxu0 %v770_v26  ;;  %356 = vmatmul.mubr.bf16.gmra.mrb[8].mxu1 %v771_v27 }
  0x33   :  { %331 = vmatprep.mubr.bf16.mxu0 %v772_v28  ;;  %363 = vmatprep.mubr.bf16.mxu1 %v774_v29 }
  0x3a   :  { %332 = vmatmul.mubr.bf16.gmra.mrb[12].mxu0 %v776_v30  ;;  %364 = vmatmul.mubr.bf16.gmra.mrb[12].mxu1 %v777_v31 }
  0xf5   :  { %v674_v32 = vpop.f32.mrb[0].mxu0  ;;  %v698_v33 = vpop.f32.mrb[0].mxu1 }
  0xf6   :  { %v675_v34 = vpop.f32.mrb[1].mxu0  ;;  %v699_v36 = vpop.f32.mrb[1].mxu1 }
  0xf7   :  { %v676_v37 = vadd.f32 %v675_v34, %v674_v32  ;;  %v700_v38 = vadd.f32 %v699_v36, %v698_v33  ;;  %v677_v39 = vpop.f32.mrb[2].mxu0  ;;  %v701_v40 = vpop.f32.mrb[2].mxu1 }
  0xf8   :  { %v678_v41 = vpop.f32.mrb[3].mxu0  ;;  %v702_v42 = vpop.f32.mrb[3].mxu1 }
  0xf9   :  { %v430_v43 = vadd.f32 %v676_v37, %v897_v35  ;;  %v438_v44 = vadd.f32 %v700_v38, %v897_v35  ;;  %v679_v45 = vadd.f32 %v678_v41, %v677_v39  ;;  %v703_v46 = vadd.f32 %v702_v42, %v701_v40 }
  0xfb   :  { %v431_v47 = vadd.f32 %v679_v45, %v897_v35  ;;  %v439_v48 = vadd.f32 %v703_v46, %v897_v35  ;;  %v446_v49 = vmax.f32 %v430_v43, 0.0  ;;  %v454_v50 = vmax.f32 %v438_v44, 0.0 }
  0xfd   :  { %v447_v51 = vmax.f32 %v431_v47, 0.0  ;;  %v455_v52 = vmax.f32 %v439_v48, 0.0  ;;  %v680_v53 = vpop.f32.mrb[4].mxu0  ;;  %v704_v54 = vpop.f32.mrb[4].mxu1 }
  0xfe   :  { %v681_v55 = vpop.f32.mrb[5].mxu0  ;;  %v705_v56 = vpop.f32.mrb[5].mxu1 }
  0xff   :  { %v614_v57 = vpack.c.bf16 %v447_v51, %v446_v49  ;;  %v634_v58 = vpack.c.bf16 %v455_v52, %v454_v50  ;;  %v682_v59 = vadd.f32 %v681_v55, %v680_v53  ;;  %v706_v60 = vadd.f32 %v705_v56, %v704_v54  ;;  %v683_v61 = vpop.f32.mrb[6].mxu0  ;;  %v707_v62 = vpop.f32.mrb[6].mxu1 }
 0x100   :  { %v684_v63 = vpop.f32.mrb[7].mxu0  ;;  %v708_v0 = vpop.f32.mrb[7].mxu1 }
 0x101   :  { %615 = vst [vmem:[%s942_s3] sm:$0xff] %v614_v57   ;;  %654 = vst [vmem:[%s942_s3 + $0x20] sm:$0xff] %v634_v58   ;;  %v432_v1 = vadd.f32 %v682_v59, %v897_v35  ;;  %v440_v2 = vadd.f32 %v706_v60, %v897_v35  ;;  %v685_v3 = vadd.f32 %v684_v63, %v683_v61 }
 0x102   :  { %v709_v4 = vadd.f32 %v708_v0, %v707_v62 }
 0x103   :  { %v433_v5 = vadd.f32 %v685_v3, %v897_v35  ;;  %v448_v7 = vmax.f32 %v432_v1, 0.0  ;;  %v456_v8 = vmax.f32 %v440_v2, 0.0 }
 0x104   :  { %v441_v6 = vadd.f32 %v709_v4, %v897_v35 }
 0x105   :  { %v449_v9 = vmax.f32 %v433_v5, 0.0  ;;  %v686_v11 = vpop.f32.mrb[8].mxu0  ;;  %v710_v12 = vpop.f32.mrb[8].mxu1 }
 0x106   :  { %v457_v10 = vmax.f32 %v441_v6, 0.0  ;;  %v687_v13 = vpop.f32.mrb[9].mxu0  ;;  %v711_v14 = vpop.f32.mrb[9].mxu1 }
 0x107   :  { %v619_v15 = vpack.c.bf16 %v449_v9, %v448_v7  ;;  %v688_v17 = vadd.f32 %v687_v13, %v686_v11  ;;  %v712_v18 = vadd.f32 %v711_v14, %v710_v12  ;;  %v689_v19 = vpop.f32.mrb[10].mxu0  ;;  %v713_v20 = vpop.f32.mrb[10].mxu1 }
 0x108   :  { %v639_v16 = vpack.c.bf16 %v457_v10, %v456_v8  ;;  %v690_v21 = vpop.f32.mrb[11].mxu0  ;;  %v714_v22 = vpop.f32.mrb[11].mxu1 }
 0x109   :  { %651 = vst [vmem:[%s942_s3 + $0x8] sm:$0xff] %v619_v15   ;;  %v434_v23 = vadd.f32 %v688_v17, %v897_v35  ;;  %v442_v24 = vadd.f32 %v712_v18, %v897_v35  ;;  %v691_v25 = vadd.f32 %v690_v21, %v689_v19  ;;  %v715_v26 = vadd.f32 %v714_v22, %v713_v20 }
 0x10a   :  { %655 = vst [vmem:[%s942_s3 + $0x28] sm:$0xff] %v639_v16  }
 0x10b   :  { %v435_v27 = vadd.f32 %v691_v25, %v897_v35  ;;  %v443_v28 = vadd.f32 %v715_v26, %v897_v35  ;;  %v450_v29 = vmax.f32 %v434_v23, 0.0  ;;  %v458_v30 = vmax.f32 %v442_v24, 0.0 }
 0x10d   :  { %v451_v31 = vmax.f32 %v435_v27, 0.0  ;;  %v459_v32 = vmax.f32 %v443_v28, 0.0  ;;  %v692_v33 = vpop.f32.mrb[12].mxu0  ;;  %v716_v34 = vpop.f32.mrb[12].mxu1 }
 0x10e   :  { %v693_v36 = vpop.f32.mrb[13].mxu0  ;;  %v717_v37 = vpop.f32.mrb[13].mxu1 }
 0x10f   :  { %v624_v38 = vpack.c.bf16 %v451_v31, %v450_v29  ;;  %v644_v39 = vpack.c.bf16 %v459_v32, %v458_v30  ;;  %v694_v40 = vadd.f32 %v693_v36, %v692_v33  ;;  %v718_v41 = vadd.f32 %v717_v37, %v716_v34  ;;  %v695_v42 = vpop.f32.mrb[14].mxu0  ;;  %v719_v43 = vpop.f32.mrb[14].mxu1 }
 0x110   :  { %v696_v44 = vpop.f32.mrb[15].mxu0  ;;  %v720_v45 = vpop.f32.mrb[15].mxu1 }
 0x111   :  { %652 = vst [vmem:[%s942_s3 + $0x10] sm:$0xff] %v624_v38   ;;  %656 = vst [vmem:[%s942_s3 + $0x30] sm:$0xff] %v644_v39   ;;  %v436_v46 = vadd.f32 %v694_v40, %v897_v35  ;;  %v444_v47 = vadd.f32 %v718_v41, %v897_v35  ;;  %v697_v48 = vadd.f32 %v696_v44, %v695_v42 }
 0x112   :  { %v721_v49 = vadd.f32 %v720_v45, %v719_v43 }
 0x113   :  { %v437_v50 = vadd.f32 %v697_v48, %v897_v35  ;;  %v452_v52 = vmax.f32 %v436_v46, 0.0  ;;  %v460_v53 = vmax.f32 %v444_v47, 0.0 }
 0x114   :  { %v445_v51 = vadd.f32 %v721_v49, %v897_v35 }
 0x115   :  { %v453_v54 = vmax.f32 %v437_v50, 0.0 }
 0x116   :  { %v461_v55 = vmax.f32 %v445_v51, 0.0 }
 0x117   :  { %v629_v56 = vpack.c.bf16 %v453_v54, %v452_v52 }
 0x118   :  { %v649_v57 = vpack.c.bf16 %v461_v55, %v460_v53 }
 0x119   :  { %653 = vst [vmem:[%s942_s3 + $0x18] sm:$0xff] %v629_v56  }
 0x11a   :  { %657 = vst [vmem:[%s942_s3 + $0x38] sm:$0xff] %v649_v57  }

// kernel: chessnet_forward.13
= control target key start
LH: loop header
LB: loop body
LE: loop exit
PB: predicated region body
PF: predicated region fallthrough
CT: control target
= control target key end

     0   :  { %s2960_s0 = inlined_call_operand.vmem [shape: bf16[9,128,256], index: 0, kind: input, shape index: {}]   ;;  %s2961_s1 = inlined_call_operand.vmem [shape: bf16[2,2304,128], index: 1, kind: input, shape index: {}]   ;;  %s2962_s2 = inlined_call_operand.vmem [shape: f32[1,256], index: 2, kind: input, shape index: {}]   ;;  %s2963_s3 = inlined_call_operand.vmem [shape: bf16[128,256], index: 3, kind: input, shape index: {}]   ;;  %s2964_s4 = inlined_call_operand.vmem [shape: bf16[128,256], index: 4, kind: output, shape index: {}]  }
   0x1   :  { %2966 = sst [smem:[#allocation6_spill]] %s2963_s3 }
   0x2   :  { %s2636_s15 = smov 0   ;;  %s2638_s16 = smov 0  }
   0x3   :  { %s2640_s17 = smov 0   ;;  %s2642_s18 = smov 0  }
   0x4   :  { %s2644_s19 = smov 0   ;;  %s2646_s20 = smov 0  }
   0x5   :  { %s2648_s21 = smov 0  }
   0x6 LB: > { %s26_s22 = sadd.s32 1, %s2600_s19  ;;  %s29_s23 = sadd.s32 1, %s2604_s20  ;;  %s2608_s21 = sphi %s2648_s21, %s14_s21   ;;  %s2604_s20 = sphi %s2646_s20, %s2976_s20   ;;  %s2600_s19 = sphi %s2644_s19, %s2975_s19   ;;  %s2596_s18 = sphi %s2642_s18, %s2974_s18   ;;  %s2592_s17 = sphi %s2640_s17, %s2973_s17   ;;  %s2588_s16 = sphi %s2638_s16, %s2972_s16   ;;  %s2584_s15 = sphi %s2636_s15, %s2971_s15  }
   0x7   : > { %p27_p0 = scmp.ge.s32.totalorder %s26_s22, 3  ;;  %s1902_s24 = sadd.s32 4294967295, %s2608_s21  }
   0x8   : > { %p131_p1 = scmp.ne.s32.totalorder %s2588_s16, %s2584_s15  ;;  %p132_p2 = scmp.eq.s32.totalorder %s2608_s21, 0 }
   0x9   : > { %s2978_s22 = smov (%p27_p0, %s26_s22), 0  ;;  %s2980_s23 = smov (!%p27_p0, %s29_s23), %s2604_s20 }
   0xa   : > { %p163_p3 = scmp.eq.s32.totalorder %s1902_s24, 5  ;;  %p31_p4 = scmp.ge.s32.totalorder %s2980_s23, 2 }
   0xb   : > { %p133_p5 = por %p132_p2, %p131_p1  ;;  %s124_s27 = sadd.s32 1, %s2588_s16 }
   0xc   : > { %p2680_p6 = por %p163_p3, %p131_p1  ;;  %s2982_s23 = smov (%p31_p4, %s2980_s23), 0 }
   0xd   : > { %2968 = sst [smem:[#allocation5_spill]] %s2982_s23  ;;  %s120_s26 = ssub.s32 %s2604_s20, %s2982_s23 }
   0xe   : > { %p122_p7 = scmp.eq.s32.totalorder %s120_s26, 0  ;;  %p1905_p8 = scmp.ge.s32.totalorder %s2608_s21, 6 }
  0x10   : > { %s2690_s28 = scalar_select %p122_p7, %s2588_s16, %s124_s27  }
  0x11   : > { %185 = sbr.rel (%p1905_p8) target bundleno = 44 (0x2c), region = 16 }
  0x18   : > { %223 = sbr.rel (!%p133_p5) target bundleno = 44 (0x2c), region = 32  ;;  %s225_s29 = sand.u32 (%p133_p5), 1, %s2588_s16  }
  0x19   : > { %s1907_s30 = sshll.u32 (%p133_p5), %s2604_s20, 2  ;;  %s1906_s5 = sshll.u32 (%p133_p5), %s225_s29, 6 }
  0x1a   : > { %s2969_s3 = sld [smem:[#allocation6_spill]] (%p133_p5)  ;;  %s227_s9 = scalar_lea.vmem (%p133_p5), [#allocation3], %s1906_s5 }
  0x20   : > { %s2698_s8 = scalar_lea.vmem %s2969_s3, %s1907_s30 }
  0x21   : > { %v248_v0 = vld [vmem:[%s2698_s8] sm:$0xf]  ;;  %v250_v1 = vld [vmem:[%s2698_s8 + $0x8] sm:$0xf]  ;;  %v252_v2 = vld [vmem:[%s2698_s8 + $0x10] sm:$0xf] }
  0x22   : > { %249 = vst [vmem:[%s227_s9] sm:$0xf] %v248_v0  ;;  %251 = vst [vmem:[%s227_s9 + $0x4] sm:$0xf] %v250_v1  ;;  %v254_v3 = vld [vmem:[%s2698_s8 + $0x18] sm:$0xf] }
  0x23   : > { %v256_v4 = vld [vmem:[%s2698_s8 + $0x20] sm:$0xf]  ;;  %253 = vst [vmem:[%s227_s9 + $0x8] sm:$0xf] %v252_v2  ;;  %255 = vst [vmem:[%s227_s9 + $0xc] sm:$0xf] %v254_v3 }
  0x24   : > { %257 = vst [vmem:[%s227_s9 + $0x10] sm:$0xf] %v256_v4  ;;  %v258_v5 = vld [vmem:[%s2698_s8 + $0x28] sm:$0xf]  ;;  %v260_v6 = vld [vmem:[%s2698_s8 + $0x30] sm:$0xf] }
  0x25   : > { %v262_v7 = vld [vmem:[%s2698_s8 + $0x38] sm:$0xf]  ;;  %259 = vst [vmem:[%s227_s9 + $0x14] sm:$0xf] %v258_v5  ;;  %261 = vst [vmem:[%s227_s9 + $0x18] sm:$0xf] %v260_v6 }
  0x26   : > { %263 = vst [vmem:[%s227_s9 + $0x1c] sm:$0xf] %v262_v7  ;;  %v264_v8 = vld [vmem:[%s2698_s8 + $0x40] sm:$0xf]  ;;  %v266_v9 = vld [vmem:[%s2698_s8 + $0x48] sm:$0xf] }
  0x27   : > { %v268_v10 = vld [vmem:[%s2698_s8 + $0x50] sm:$0xf]  ;;  %265 = vst [vmem:[%s227_s9 + $0x20] sm:$0xf] %v264_v8  ;;  %267 = vst [vmem:[%s227_s9 + $0x24] sm:$0xf] %v266_v9 }
  0x28   : > { %269 = vst [vmem:[%s227_s9 + $0x28] sm:$0xf] %v268_v10  ;;  %v270_v11 = vld [vmem:[%s2698_s8 + $0x58] sm:$0xf]  ;;  %v272_v12 = vld [vmem:[%s2698_s8 + $0x60] sm:$0xf] }
  0x29   : > { %v274_v13 = vld [vmem:[%s2698_s8 + $0x68] sm:$0xf]  ;;  %271 = vst [vmem:[%s227_s9 + $0x2c] sm:$0xf] %v270_v11  ;;  %273 = vst [vmem:[%s227_s9 + $0x30] sm:$0xf] %v272_v12 }
  0x2a   : > { %275 = vst [vmem:[%s227_s9 + $0x34] sm:$0xf] %v274_v13  ;;  %v276_v14 = vld [vmem:[%s2698_s8 + $0x70] sm:$0xf]  ;;  %v278_v15 = vld [vmem:[%s2698_s8 + $0x78] sm:$0xf] }
  0x2b   : > { %277 = vst [vmem:[%s227_s9 + $0x38] sm:$0xf] %v276_v14  ;;  %279 = vst [vmem:[%s227_s9 + $0x3c] sm:$0xf] %v278_v15 }
  0x2c PF: > { %p1908_p9 = scmp.ge.s32.totalorder %s2608_s21, 1  ;;  %p333_p10 = scmp.lt.s32.totalorder %s2608_s21, 7 }
  0x2e   : > { %p334_p11 = pnand %p1908_p9, %p333_p10 }
  0x2f   : > { %s340_s10 = sand.u32 (!%p334_p11), 1, %s2584_s15   ;;  %s387_s11 = smul.u32 (!%p334_p11), 3, %s2592_s17 }
  0x30   : > { %337 = sbr.rel (%p334_p11) target bundleno = 437 (0x1b5), region = 73  ;;  %s1909_s12 = sshll.u32 (!%p334_p11), %s340_s10, 6 }
  0x31   : > { %s400_s13 = smul.u32 (!%p334_p11), 96, %s2592_s17  ;;  %p389_p12 = scmp.lt.s32.totalorder (!%p334_p11), %s387_s11, 8 }
  0x32   : > { %p401_p13 = scmp.lt.s32.totalorder (!%p334_p11), %s2596_s18, 1  ;;  %s2740_s23 = scalar_lea.vmem (!%p334_p11), [#allocation3], %s1909_s12 }
  0x33   : > { %p403_p0 = scmp.lt.s32.totalorder (!%p334_p11), %s400_s13, 287  ;;  %p1914_p1 = scmp.ne.s32.totalorder (!%p334_p11), %s2592_s17, 0 }
  0x37   : > { %s2984_s11 = smov (!%p389_p12, %s387_s11), 8  ;;  %s2986_s13 = smov (!%p403_p0, %s400_s13), 287 }
  0x38   : > { %s2723_s14 = scalar_select %p401_p13, %s2596_s18, 1 }
  0x39   : > { %s2065_s24 = sshll.u32 %s2984_s11, 7  ;;  %s2742_s11 = scalar_lea.vmem [#allocation4], %s1909_s12  ;;  %v2610_v16 = vmov (!%p1914_p1), 0.0  }
  0x3a   : > { %s2728_s29 = scalar_lea.vmem %s2960_s0, %s2065_s24  ;;  %s2376_s30 = smul.u32 288, %s2723_s14  ;;  %420 = vst [vmem:[#allocation2] sm:$0xff] (!%p1914_p1), %v2610_v16  ;;  %421 = vst [vmem:[#allocation2 + $0x8] sm:$0xff] (!%p1914_p1), %v2610_v16 }
  0x3b   : > { %s412_s6 = scalar_lea.vmem %s2962_s2, %s2723_s14  ;;  %419 = sbr.rel (%p1914_p1) target bundleno = 66 (0x42), region = 81  ;;  %422 = vst [vmem:[#allocation2 + $0x10] sm:$0xff] (!%p1914_p1), %v2610_v16  ;;  %423 = vst [vmem:[#allocation2 + $0x18] sm:$0xff] (!%p1914_p1), %v2610_v16 }
  0x3c   : > { %s406_s7 = sadd.s32 %s2376_s30, %s2986_s13  ;;  %424 = vst [vmem:[#allocation2 + $0x20] sm:$0xff] (!%p1914_p1), %v2610_v16  ;;  %425 = vst [vmem:[#allocation2 + $0x28] sm:$0xff] (!%p1914_p1), %v2610_v16 }
  0x3d   : > { %s1913_s8 = sshll.u32 %s406_s7, 2  ;;  %426 = vst [vmem:[#allocation2 + $0x30] sm:$0xff] (!%p1914_p1), %v2610_v16  ;;  %427 = vst [vmem:[#allocation2 + $0x38] sm:$0xff] (!%p1914_p1), %v2610_v16 }
  0x3e   : > { %s2738_s3 = scalar_lea.vmem %s2961_s1, %s1913_s8  ;;  %428 = vst [vmem:[#allocation2 + $0x40] sm:$0xff] (!%p1914_p1), %v2610_v16  ;;  %429 = vst [vmem:[#allocation2 + $0x48] sm:$0xff] (!%p1914_p1), %v2610_v16 }
  0x3f   : > { %430 = vst [vmem:[#allocation2 + $0x50] sm:$0xff] (!%p1914_p1), %v2610_v16  ;;  %431 = vst [vmem:[#allocation2 + $0x58] sm:$0xff] (!%p1914_p1), %v2610_v16 }
  0x40   : > { %432 = vst [vmem:[#allocation2 + $0x60] sm:$0xff] (!%p1914_p1), %v2610_v16  ;;  %433 = vst [vmem:[#allocation2 + $0x68] sm:$0xff] (!%p1914_p1), %v2610_v16 }
  0x41   : > { %434 = vst [vmem:[#allocation2 + $0x70] sm:$0xff] (!%p1914_p1), %v2610_v16  ;;  %435 = vst [vmem:[#allocation2 + $0x78] sm:$0xff] (!%p1914_p1), %v2610_v16 }
  0x42 PF: > { %v2434_v17 = vld [vmem:[%s2738_s3 + $0x40] sm:$0xff]   ;;  %v2436_v19 = vld [vmem:[%s2738_s3 + $0x48] sm:$0xff]   ;;  %v2438_v21 = vld [vmem:[%s2738_s3 + $0x50] sm:$0xff]   ;;  %p2043_p2 = scmp.ne.s32.totalorder %s2592_s17, 2 }
  0x43   : > { %v2435_v18 = vld [vmem:[%s2738_s3] sm:$0xff]   ;;  %2168 = vmatprep.subr.bf16.mxu0 %v2434_v17  ;;  %2360 = vmatprep.subr.bf16.mxu1 %v2434_v17  ;;  %v2437_v20 = vld [vmem:[%s2738_s3 + $0x8] sm:$0xff]   ;;  %v2439_v22 = vld [vmem:[%s2738_s3 + $0x10] sm:$0xff]  }
  0x44   : > { %2169 = vmatpush3.bf16.msra.mxu0 %v2435_v18  ;;  %2368 = vmatpush3.bf16.msra.mxu1 %v2435_v18  ;;  %v2440_v23 = vld [vmem:[%s2738_s3 + $0x58] sm:$0xff]   ;;  %v2442_v25 = vld [vmem:[%s2738_s3 + $0x60] sm:$0xff]   ;;  %v2444_v27 = vld [vmem:[%s2738_s3 + $0x68] sm:$0xff]  }
  0x45   : > { %2170 = vmatprep.subr.bf16.mxu0 %v2436_v19  ;;  %2361 = vmatprep.subr.bf16.mxu1 %v2436_v19  ;;  %v2441_v24 = vld [vmem:[%s2738_s3 + $0x18] sm:$0xff]   ;;  %v2443_v26 = vld [vmem:[%s2738_s3 + $0x20] sm:$0xff]   ;;  %v2445_v30 = vld [vmem:[%s2738_s3 + $0x28] sm:$0xff]  }
  0x46   : > { %v2452_v28 = vld [vmem:[%s2728_s29 + $0x4] ss:$8 sps:$4 sm:$0xff]   ;;  %v2446_v31 = vld [vmem:[%s2738_s3 + $0x70] sm:$0xff]   ;;  %v2448_v33 = vld [vmem:[%s2738_s3 + $0x78] sm:$0xff]  }
  0x47   : > { %v2455_v29 = vld [vmem:[%s2728_s29 + $0x44] ss:$8 sps:$4 sm:$0xff]   ;;  %708 = vmatprep.mubr.bf16.mxu0 %v2452_v28  ;;  %v2447_v32 = vld [vmem:[%s2738_s3 + $0x30] sm:$0xff]   ;;  %v2449_v34 = vld [vmem:[%s2738_s3 + $0x38] sm:$0xff]  }
  0x48   : > { %2171 = vmatpush3.bf16.msra.mxu0 %v2437_v20  ;;  %2369 = vmatpush3.bf16.msra.mxu1 %v2437_v20  ;;  %v2450_v35 = vld [vmem:[%s2728_s29] ss:$8 sps:$4 sm:$0xff]   ;;  %v2464_v43 = vld [vmem:[%s2728_s29 + $0x14] ss:$8 sps:$4 sm:$0xff]   ;;  %v2468_v48 = vld [vmem:[%s2728_s29 + $0x10] ss:$8 sps:$4 sm:$0xff]  }
  0x49   : > { %2172 = vmatprep.subr.bf16.mxu0 %v2438_v21  ;;  %2362 = vmatprep.subr.bf16.mxu1 %v2438_v21  ;;  %v2453_v36 = vld [vmem:[%s2728_s29 + $0x40] ss:$8 sps:$4 sm:$0xff]   ;;  %v2466_v45 = vld [vmem:[%s2728_s29 + $0x54] ss:$8 sps:$4 sm:$0xff]   ;;  %v2469_v50 = vld [vmem:[%s2728_s29 + $0x50] ss:$8 sps:$4 sm:$0xff]  }
  0x4a   : > { %740 = vmatprep.mubr.bf16.mxu1 %v2455_v29  ;;  %v2456_v37 = vld [vmem:[%s2738_s3 + $0xc0] sm:$0xff]   ;;  %v2460_v41 = vld [vmem:[%s2738_s3 + $0xc8] sm:$0xff]   ;;  %v2470_v47 = vld [vmem:[%s2738_s3 + $0xd0] sm:$0xff]  }
  0x4b   : > { %v2457_v38 = vld [vmem:[%s2738_s3 + $0x140] sm:$0xff]   ;;  %v2461_v42 = vld [vmem:[%s2738_s3 + $0x148] sm:$0xff]   ;;  %v2471_v49 = vld [vmem:[%s2738_s3 + $0x150] sm:$0xff]  }
  0x4c   : > { %2173 = vmatpush3.bf16.msra.mxu0 %v2439_v22  ;;  %2370 = vmatpush3.bf16.msra.mxu1 %v2439_v22  ;;  %v2458_v39 = vld [vmem:[%s2738_s3 + $0x80] sm:$0xff]   ;;  %v2462_v44 = vld [vmem:[%s2738_s3 + $0x88] sm:$0xff]   ;;  %v2472_v51 = vld [vmem:[%s2738_s3 + $0x90] sm:$0xff]  }
  0x4d   : > { %2174 = vmatprep.subr.bf16.mxu0 %v2440_v23  ;;  %2363 = vmatprep.subr.bf16.mxu1 %v2440_v23  ;;  %v2459_v40 = vld [vmem:[%s2738_s3 + $0x100] sm:$0xff]   ;;  %v2463_v46 = vld [vmem:[%s2738_s3 + $0x108] sm:$0xff]   ;;  %v2473_v52 = vld [vmem:[%s2738_s3 + $0x110] sm:$0xff]  }
  0x4e   : > { %v2474_v53 = vld [vmem:[%s2738_s3 + $0xd8] sm:$0xff]   ;;  %v2478_v55 = vld [vmem:[%s2728_s29 + $0x24] ss:$8 sps:$4 sm:$0xff]   ;;  %v2482_v60 = vld [vmem:[%s2728_s29 + $0x20] ss:$8 sps:$4 sm:$0xff]  }
  0x4f   : > { %v2475_v54 = vld [vmem:[%s2738_s3 + $0x158] sm:$0xff]   ;;  %v2480_v57 = vld [vmem:[%s2728_s29 + $0x64] ss:$8 sps:$4 sm:$0xff]   ;;  %v2483_v61 = vld [vmem:[%s2728_s29 + $0x60] ss:$8 sps:$4 sm:$0xff]  }
  0x50   : > { %2175 = vmatpush3.bf16.msra.mxu0 %v2441_v24  ;;  %2371 = vmatpush3.bf16.msra.mxu1 %v2441_v24  ;;  %v2476_v56 = vld [vmem:[%s2738_s3 + $0x98] sm:$0xff]   ;;  %v2484_v59 = vld [vmem:[%s2738_s3 + $0xe0] sm:$0xff]   ;;  %v2488_v1 = vld [vmem:[%s2738_s3 + $0xe8] sm:$0xff]  }
  0x51   : > { %2176 = vmatprep.subr.bf16.mxu0 %v2442_v25  ;;  %2364 = vmatprep.subr.bf16.mxu1 %v2442_v25  ;;  %v2477_v58 = vld [vmem:[%s2738_s3 + $0x118] sm:$0xff]   ;;  %v2485_v62 = vld [vmem:[%s2738_s3 + $0x160] sm:$0xff]   ;;  %v2489_v2 = vld [vmem:[%s2738_s3 + $0x168] sm:$0xff]  }
  0x52   : > { %v2486_v63 = vld [vmem:[%s2738_s3 + $0xa0] sm:$0xff]   ;;  %v2492_v3 = vld [vmem:[%s2728_s29 + $0x34] ss:$8 sps:$4 sm:$0xff]   ;;  %v2490_v5 = vld [vmem:[%s2738_s3 + $0xa8] sm:$0xff]  }
  0x53   : > { %v2487_v0 = vld [vmem:[%s2738_s3 + $0x120] sm:$0xff]   ;;  %v2494_v4 = vld [vmem:[%s2728_s29 + $0x74] ss:$8 sps:$4 sm:$0xff]   ;;  %v2491_v6 = vld [vmem:[%s2738_s3 + $0x128] sm:$0xff]  }
  0x54   : > { %2177 = vmatpush3.bf16.msra.mxu0 %v2443_v26  ;;  %2372 = vmatpush3.bf16.msra.mxu1 %v2443_v26  ;;  %v2498_v7 = vld [vmem:[%s2738_s3 + $0xf0] sm:$0xff]   ;;  %v2502_v13 = vld [vmem:[%s2738_s3 + $0xf8] sm:$0xff]   ;;  %v2508_v17 = vld [vmem:[%s2728_s29 + $0x84] ss:$8 sps:$4 sm:$0xff]  }
  0x55   : > { %2178 = vmatprep.subr.bf16.mxu0 %v2444_v27  ;;  %2365 = vmatprep.subr.bf16.mxu1 %v2444_v27  ;;  %v2496_v8 = vld [vmem:[%s2728_s29 + $0x30] ss:$8 sps:$4 sm:$0xff]   ;;  %v2506_v18 = vld [vmem:[%s2728_s29 + $0x80] ss:$8 sps:$4 sm:$0xff]   ;;  %v2511_v19 = vld [vmem:[%s2728_s29 + $0x104] ss:$8 sps:$4 sm:$0xff]  }
  0x56   : > { %v2497_v9 = vld [vmem:[%s2728_s29 + $0x70] ss:$8 sps:$4 sm:$0xff]   ;;  %v2509_v20 = vld [vmem:[%s2728_s29 + $0x100] ss:$8 sps:$4 sm:$0xff]   ;;  %v2512_v21 = vld [vmem:[%s2728_s29 + $0x94] ss:$8 sps:$4 sm:$0xff]  }
  0x57   : > { %v2499_v10 = vld [vmem:[%s2738_s3 + $0x170] sm:$0xff]   ;;  %v2503_v14 = vld [vmem:[%s2738_s3 + $0x178] sm:$0xff]   ;;  %v2518_v25 = vld [vmem:[%s2728_s29 + $0xa4] ss:$8 sps:$4 sm:$0xff]  }
  0x58   : > { %2179 = vmatpush3.bf16.msra.mxu0 %v2445_v30  ;;  %2373 = vmatpush3.bf16.msra.mxu1 %v2445_v30  ;;  %v2500_v11 = vld [vmem:[%s2738_s3 + $0xb0] sm:$0xff]   ;;  %v2504_v15 = vld [vmem:[%s2738_s3 + $0xb8] sm:$0xff]   ;;  %v2520_v26 = vld [vmem:[%s2728_s29 + $0x124] ss:$8 sps:$4 sm:$0xff]  }
  0x59   : > { %2180 = vmatprep.subr.bf16.mxu0 %v2446_v31  ;;  %2366 = vmatprep.subr.bf16.mxu1 %v2446_v31  ;;  %v2501_v12 = vld [vmem:[%s2738_s3 + $0x130] sm:$0xff]   ;;  %v2505_v16 = vld [vmem:[%s2738_s3 + $0x138] sm:$0xff]   ;;  %v2522_v27 = vld [vmem:[%s2728_s29 + $0xa0] ss:$8 sps:$4 sm:$0xff]  }
  0x5a   : > { %v2514_v22 = vld [vmem:[%s2728_s29 + $0x114] ss:$8 sps:$4 sm:$0xff]   ;;  %v2516_v23 = vld [vmem:[%s2728_s29 + $0x90] ss:$8 sps:$4 sm:$0xff]   ;;  %v2523_v28 = vld [vmem:[%s2728_s29 + $0x120] ss:$8 sps:$4 sm:$0xff]  }
  0x5b   : > { %v2517_v24 = vld [vmem:[%s2728_s29 + $0x110] ss:$8 sps:$4 sm:$0xff]   ;;  %v2524_v29 = vld [vmem:[%s2728_s29 + $0xb4] ss:$8 sps:$4 sm:$0xff]  }
  0x5c   : > { %2181 = vmatpush3.bf16.msra.mxu0 %v2447_v32  ;;  %2374 = vmatpush3.bf16.msra.mxu1 %v2447_v32  ;;  %v2526_v30 = vld [vmem:[%s2728_s29 + $0x134] ss:$8 sps:$4 sm:$0xff]   ;;  %v2528_v31 = vld [vmem:[%s2728_s29 + $0xb0] ss:$8 sps:$4 sm:$0xff]  }
  0x5d   : > { %2182 = vmatprep.subr.bf16.mxu0 %v2448_v33  ;;  %2367 = vmatprep.subr.bf16.mxu1 %v2448_v33  ;;  %v2529_v32 = vld [vmem:[%s2728_s29 + $0x130] ss:$8 sps:$4 sm:$0xff]   ;;  %v2530_v33 = vld [vmem:[%s2728_s29 + $0xc4] ss:$8 sps:$4 sm:$0xff]  }
  0x60   : > { %2183 = vmatpush3.bf16.msra.mxu0 %v2449_v34  ;;  %2375 = vmatpush3.bf16.msra.mxu1 %v2449_v34  ;;  %v2532_v34 = vld [vmem:[%s2728_s29 + $0x144] ss:$8 sps:$4 sm:$0xff]  }
  0x61   : > { %2232 = vmatprep.subr.bf16.mxu1 %v2456_v37  ;;  %2296 = vmatprep.subr.bf16.mxu0 %v2457_v38  ;;  %v2536_v37 = vld [vmem:[%s2728_s29 + $0xd4] ss:$8 sps:$4 sm:$0xff]  }
  0x62   : > { %v2538_v38 = vld [vmem:[%s2728_s29 + $0x154] ss:$8 sps:$4 sm:$0xff]  }
  0x63   : > { %709 = vmatmul.mubr.bf16.vlgmr.msra.gmra.mrb[0].mxu0 %v2450_v35  ;;  %741 = vmatmul.mubr.bf16.vlgmr.msra.gmra.mrb[0].mxu1 %v2453_v36  ;;  %v2534_v35 = vld [vmem:[%s2728_s29 + $0xc0] ss:$8 sps:$4 sm:$0xff]  }
  0x64   : > { %2233 = vmatpush3.bf16.msra.mxu1 %v2458_v39  ;;  %2297 = vmatpush3.bf16.msra.mxu0 %v2459_v40  ;;  %v2535_v36 = vld [vmem:[%s2728_s29 + $0x140] ss:$8 sps:$4 sm:$0xff]   ;;  %v2540_v39 = vld [vmem:[%s2728_s29 + $0xd0] ss:$8 sps:$4 sm:$0xff]  }
  0x65   : > { %2234 = vmatprep.subr.bf16.mxu1 %v2460_v41  ;;  %2298 = vmatprep.subr.bf16.mxu0 %v2461_v42  ;;  %v2541_v40 = vld [vmem:[%s2728_s29 + $0x150] ss:$8 sps:$4 sm:$0xff]   ;;  %v2542_v41 = vld [vmem:[%s2728_s29 + $0xe4] ss:$8 sps:$4 sm:$0xff]  }
  0x66   : > { %716 = vmatprep.mubr.bf16.mxu0 %v2464_v43  ;;  %748 = vmatprep.mubr.bf16.mxu1 %v2466_v45  ;;  %v2544_v42 = vld [vmem:[%s2728_s29 + $0x164] ss:$8 sps:$4 sm:$0xff]   ;;  %v2546_v43 = vld [vmem:[%s2728_s29 + $0xe0] ss:$8 sps:$4 sm:$0xff]   ;;  %v2548_v45 = vld [vmem:[%s2728_s29 + $0xf4] ss:$8 sps:$4 sm:$0xff]  }
  0x68   : > { %2235 = vmatpush3.bf16.msra.mxu1 %v2462_v44  ;;  %2299 = vmatpush3.bf16.msra.mxu0 %v2463_v46  ;;  %v2547_v44 = vld [vmem:[%s2728_s29 + $0x160] ss:$8 sps:$4 sm:$0xff]   ;;  %v2550_v46 = vld [vmem:[%s2728_s29 + $0x174] ss:$8 sps:$4 sm:$0xff]  }
  0x69   : > { %2236 = vmatprep.subr.bf16.mxu1 %v2470_v47  ;;  %2300 = vmatprep.subr.bf16.mxu0 %v2471_v49  ;;  %v2552_v47 = vld [vmem:[%s2728_s29 + $0xf0] ss:$8 sps:$4 sm:$0xff]  }
  0x6b   : > { %717 = vmatmul.mubr.bf16.gmra.mrb[4].mxu0 %v2468_v48  ;;  %749 = vmatmul.mubr.bf16.gmra.mrb[4].mxu1 %v2469_v50  ;;  %v2553_v48 = vld [vmem:[%s2728_s29 + $0x170] ss:$8 sps:$4 sm:$0xff]  }
  0x6c   : > { %2237 = vmatpush3.bf16.msra.mxu1 %v2472_v51  ;;  %2301 = vmatpush3.bf16.msra.mxu0 %v2473_v52 }
  0x6d   : > { %2238 = vmatprep.subr.bf16.mxu1 %v2474_v53  ;;  %2302 = vmatprep.subr.bf16.mxu0 %v2475_v54 }
  0x6e   : > { %724 = vmatprep.mubr.bf16.mxu0 %v2478_v55  ;;  %756 = vmatprep.mubr.bf16.mxu1 %v2480_v57 }
  0x70   : > { %2239 = vmatpush3.bf16.msra.mxu1 %v2476_v56  ;;  %2303 = vmatpush3.bf16.msra.mxu0 %v2477_v58 }
  0x71   : > { %2240 = vmatprep.subr.bf16.mxu1 %v2484_v59  ;;  %2304 = vmatprep.subr.bf16.mxu0 %v2485_v62 }
  0x73   : > { %725 = vmatmul.mubr.bf16.gmra.mrb[8].mxu0 %v2482_v60  ;;  %757 = vmatmul.mubr.bf16.gmra.mrb[8].mxu1 %v2483_v61 }
  0x74   : > { %2241 = vmatpush3.bf16.msra.mxu1 %v2486_v63  ;;  %2305 = vmatpush3.bf16.msra.mxu0 %v2487_v0 }
  0x75   : > { %2242 = vmatprep.subr.bf16.mxu1 %v2488_v1  ;;  %2306 = vmatprep.subr.bf16.mxu0 %v2489_v2 }
  0x76   : > { %732 = vmatprep.mubr.bf16.mxu0 %v2492_v3  ;;  %764 = vmatprep.mubr.bf16.mxu1 %v2494_v4 }
  0x78   : > { %2243 = vmatpush3.bf16.msra.mxu1 %v2490_v5  ;;  %2307 = vmatpush3.bf16.msra.mxu0 %v2491_v6 }
  0x79   : > { %2244 = vmatprep.subr.bf16.mxu1 %v2498_v7  ;;  %2308 = vmatprep.subr.bf16.mxu0 %v2499_v10 }
  0x7b   : > { %733 = vmatmul.mubr.bf16.gmra.mrb[12].mxu0 %v2496_v8  ;;  %765 = vmatmul.mubr.bf16.gmra.mrb[12].mxu1 %v2497_v9 }
  0x7c   : > { %2245 = vmatpush3.bf16.msra.mxu1 %v2500_v11  ;;  %2309 = vmatpush3.bf16.msra.mxu0 %v2501_v12 }
  0x7d   : > { %2246 = vmatprep.subr.bf16.mxu1 %v2502_v13  ;;  %2310 = vmatprep.subr.bf16.mxu0 %v2503_v14 }
  0x7e   : > { %1046 = vmatprep.mubr.bf16.mxu1 %v2508_v17  ;;  %1384 = vmatprep.mubr.bf16.mxu0 %v2511_v19 }
  0x80   : > { %2247 = vmatpush3.bf16.msra.mxu1 %v2504_v15  ;;  %2311 = vmatpush3.bf16.msra.mxu0 %v2505_v16 }
  0x83   : > { %1047 = vmatmul.mubr.bf16.vlgmr.msra.gmra.mrb[16].mxu1 %v2506_v18  ;;  %1385 = vmatmul.mubr.bf16.vlgmr.msra.gmra.mrb[16].mxu0 %v2509_v20 }
  0x84   : > { %1054 = vmatprep.mubr.bf16.mxu1 %v2512_v21  ;;  %1392 = vmatprep.mubr.bf16.mxu0 %v2514_v22 }
  0x8b   : > { %1055 = vmatmul.mubr.bf16.gmra.mrb[20].mxu1 %v2516_v23  ;;  %1393 = vmatmul.mubr.bf16.gmra.mrb[20].mxu0 %v2517_v24 }
  0x8c   : > { %1062 = vmatprep.mubr.bf16.mxu1 %v2518_v25  ;;  %1400 = vmatprep.mubr.bf16.mxu0 %v2520_v26 }
  0x93   : > { %1063 = vmatmul.mubr.bf16.gmra.mrb[24].mxu1 %v2522_v27  ;;  %1401 = vmatmul.mubr.bf16.gmra.mrb[24].mxu0 %v2523_v28 }
  0x94   : > { %1070 = vmatprep.mubr.bf16.mxu1 %v2524_v29  ;;  %1408 = vmatprep.mubr.bf16.mxu0 %v2526_v30 }
  0x9b   : > { %1071 = vmatmul.mubr.bf16.gmra.mrb[28].mxu1 %v2528_v31  ;;  %1409 = vmatmul.mubr.bf16.gmra.mrb[28].mxu0 %v2529_v32 }
  0x9c   : > { %1078 = vmatprep.mubr.bf16.mxu1 %v2530_v33  ;;  %1416 = vmatprep.mubr.bf16.mxu0 %v2532_v34  ;;  %v436_v33 = vld [vmem:[#allocation2] sm:$0xff] }
  0xa3   : > { %1079 = vmatmul.mubr.bf16.gmra.mrb[32].mxu1 %v2534_v35  ;;  %1417 = vmatmul.mubr.bf16.gmra.mrb[32].mxu0 %v2535_v36  ;;  %v437_v36 = vld [vmem:[#allocation2 + $0x8] sm:$0xff] }
  0xa4   : > { %1086 = vmatprep.mubr.bf16.mxu1 %v2536_v37  ;;  %1424 = vmatprep.mubr.bf16.mxu0 %v2538_v38 }
  0xab   : > { %1087 = vmatmul.mubr.bf16.gmra.mrb[36].mxu1 %v2540_v39  ;;  %1425 = vmatmul.mubr.bf16.gmra.mrb[36].mxu0 %v2541_v40 }
  0xac   : > { %1094 = vmatprep.mubr.bf16.mxu1 %v2542_v41  ;;  %1432 = vmatprep.mubr.bf16.mxu0 %v2544_v42 }
  0xb3   : > { %1095 = vmatmul.mubr.bf16.gmra.mrb[40].mxu1 %v2546_v43  ;;  %1433 = vmatmul.mubr.bf16.gmra.mrb[40].mxu0 %v2547_v44 }
  0xb4   : > { %1102 = vmatprep.mubr.bf16.mxu1 %v2548_v45  ;;  %1440 = vmatprep.mubr.bf16.mxu0 %v2550_v46 }
  0xbb   : > { %1103 = vmatmul.mubr.bf16.gmra.mrb[44].mxu1 %v2552_v47  ;;  %1441 = vmatmul.mubr.bf16.gmra.mrb[44].mxu0 %v2553_v48 }
 0x136   : > { %v2184_v49 = vpop.f32.mrb[0].mxu0  ;;  %v2208_v50 = vpop.f32.mrb[0].mxu1 }
 0x137   : > { %v2185_v51 = vpop.f32.mrb[1].mxu0  ;;  %v2209_v52 = vpop.f32.mrb[1].mxu1 }
 0x138   : > { %v2186_v53 = vadd.f32 %v2185_v51, %v2184_v49  ;;  %v2841_v54 = vadd.f32 %v2209_v52, %v2208_v50  ;;  %v2187_v55 = vpop.f32.mrb[2].mxu0  ;;  %v2211_v56 = vpop.f32.mrb[2].mxu1  ;;  %v438_v52 = vld [vmem:[#allocation2 + $0x10] sm:$0xff] }
 0x139   : > { %v2188_v57 = vpop.f32.mrb[3].mxu0  ;;  %v2212_v58 = vpop.f32.mrb[3].mxu1 }
 0x13a   : > { %v2189_v59 = vadd.f32 %v2188_v57, %v2187_v55  ;;  %v2843_v60 = vadd.f32 %v2212_v58, %v2211_v56  ;;  %v773_v39 = vadd.f32 %v2186_v53, %v436_v33  ;;  %v439_v58 = vld [vmem:[#allocation2 + $0x18] sm:$0xff] }
 0x13c   : > { %v774_v46 = vadd.f32 %v2189_v59, %v437_v36 }
 0x13e   : > { %v2190_v61 = vpop.f32.mrb[4].mxu0  ;;  %v2214_v62 = vpop.f32.mrb[4].mxu1 }
 0x13f   : > { %v2191_v63 = vpop.f32.mrb[5].mxu0  ;;  %v2215_v0 = vpop.f32.mrb[5].mxu1 }
 0x140   : > { %v2192_v1 = vadd.f32 %v2191_v63, %v2190_v61  ;;  %v2845_v2 = vadd.f32 %v2215_v0, %v2214_v62  ;;  %v2193_v3 = vpop.f32.mrb[6].mxu0  ;;  %v2217_v4 = vpop.f32.mrb[6].mxu1 }
 0x141   : > { %v2194_v5 = vpop.f32.mrb[7].mxu0  ;;  %v2218_v6 = vpop.f32.mrb[7].mxu1 }
 0x142   : > { %v2195_v7 = vadd.f32 %v2194_v5, %v2193_v3  ;;  %v2847_v8 = vadd.f32 %v2218_v6, %v2217_v4  ;;  %v775_v62 = vadd.f32 %v2192_v1, %v438_v52 }
 0x144   : > { %v776_v6 = vadd.f32 %v2195_v7, %v439_v58 }
 0x146   : > { %v2196_v9 = vpop.f32.mrb[8].mxu0  ;;  %v2220_v10 = vpop.f32.mrb[8].mxu1 }
 0x147   : > { %v2197_v11 = vpop.f32.mrb[9].mxu0  ;;  %v2221_v12 = vpop.f32.mrb[9].mxu1 }
 0x148   : > { %v2849_v13 = vadd.f32 %v2197_v11, %v2196_v9  ;;  %v2851_v14 = vadd.f32 %v2221_v12, %v2220_v10  ;;  %v2199_v15 = vpop.f32.mrb[10].mxu0  ;;  %v2223_v16 = vpop.f32.mrb[10].mxu1 }
 0x149   : > { %v2200_v17 = vpop.f32.mrb[11].mxu0  ;;  %v2224_v18 = vpop.f32.mrb[11].mxu1 }
 0x14a   : > { %v2853_v19 = vadd.f32 %v2200_v17, %v2199_v15  ;;  %v2855_v20 = vadd.f32 %v2224_v18, %v2223_v16  ;;  %v440_v16 = vld [vmem:[#allocation2 + $0x20] sm:$0xff] }
 0x14e   : > { %v2202_v21 = vpop.f32.mrb[12].mxu0  ;;  %v2226_v22 = vpop.f32.mrb[12].mxu1 }
 0x14f   : > { %v2203_v23 = vpop.f32.mrb[13].mxu0  ;;  %v2227_v24 = vpop.f32.mrb[13].mxu1 }
 0x150   : > { %v2857_v25 = vadd.f32 %v2203_v23, %v2202_v21  ;;  %v2859_v26 = vadd.f32 %v2227_v24, %v2226_v22  ;;  %v2205_v27 = vpop.f32.mrb[14].mxu0  ;;  %v2229_v28 = vpop.f32.mrb[14].mxu1  ;;  %v441_v22 = vld [vmem:[#allocation2 + $0x28] sm:$0xff]  ;;  %v777_v24 = vadd.f32 %v2849_v13, %v440_v16  ;;  %v443_v13 = vld [vmem:[#allocation2 + $0x38] sm:$0xff] }
 0x151   : > { %v2206_v29 = vpop.f32.mrb[15].mxu0  ;;  %v2230_v30 = vpop.f32.mrb[15].mxu1 }
 0x152   : > { %v2861_v31 = vadd.f32 %v2206_v29, %v2205_v27  ;;  %v2863_v32 = vadd.f32 %v2230_v30, %v2229_v28 }
 0x154   : > { %v780_v52 = vadd.f32 %v2861_v31, %v443_v13 }
 0x156   : > { %v2248_v34 = vpop.f32.mrb[16].mxu1  ;;  %v2312_v35 = vpop.f32.mrb[16].mxu0 }
 0x157   : > { %v2249_v37 = vpop.f32.mrb[17].mxu1  ;;  %v2313_v38 = vpop.f32.mrb[17].mxu0 }
 0x158   : > { %v2250_v40 = vadd.f32 %v2249_v37, %v2248_v34  ;;  %v2314_v41 = vadd.f32 %v2313_v38, %v2312_v35  ;;  %v2251_v42 = vpop.f32.mrb[18].mxu1  ;;  %v2315_v43 = vpop.f32.mrb[18].mxu0  ;;  %v778_v34 = vadd.f32 %v2853_v19, %v441_v22  ;;  %v446_v22 = vld [vmem:[#allocation2 + $0x50] sm:$0xff] }
 0x159   : > { %v2252_v44 = vpop.f32.mrb[19].mxu1  ;;  %v2316_v45 = vpop.f32.mrb[19].mxu0 }
 0x15a   : > { %v1111_v47 = vadd.f32 %v2250_v40, %v773_v39  ;;  %v2253_v48 = vadd.f32 %v2252_v44, %v2251_v42  ;;  %v2317_v49 = vadd.f32 %v2316_v45, %v2315_v43  ;;  %v442_v40 = vld [vmem:[#allocation2 + $0x30] sm:$0xff] }
 0x15c   : > { %v1449_v50 = vadd.f32 %v2314_v41, %v1111_v47  ;;  %v1112_v51 = vadd.f32 %v2253_v48, %v774_v46  ;;  %v779_v46 = vadd.f32 %v2857_v25, %v442_v40  ;;  %v445_v25 = vld [vmem:[#allocation2 + $0x48] sm:$0xff] }
 0x15e   : > { %1465 = vst [vmem:[#allocation2] sm:$0xff] %v1449_v50  ;;  %v1450_v55 = vadd.f32 %v2317_v49, %v1112_v51  ;;  %v2254_v56 = vpop.f32.mrb[20].mxu1  ;;  %v2318_v57 = vpop.f32.mrb[20].mxu0 }
 0x15f   : > { %v2255_v61 = vpop.f32.mrb[21].mxu1  ;;  %v2319_v53 = vpop.f32.mrb[21].mxu0 }
 0x160   : > { %1466 = vst [vmem:[#allocation2 + $0x8] sm:$0xff] %v1450_v55  ;;  %v2256_v63 = vadd.f32 %v2255_v61, %v2254_v56  ;;  %v2320_v0 = vadd.f32 %v2319_v53, %v2318_v57  ;;  %v2257_v3 = vpop.f32.mrb[22].mxu1  ;;  %v2321_v4 = vpop.f32.mrb[22].mxu0  ;;  %v444_v53 = vld [vmem:[#allocation2 + $0x40] sm:$0xff] }
 0x161   : > { %v2258_v59 = vpop.f32.mrb[23].mxu1  ;;  %v2322_v5 = vpop.f32.mrb[23].mxu0 }
 0x162   : > { %v1113_v9 = vadd.f32 %v2256_v63, %v775_v62  ;;  %v2259_v10 = vadd.f32 %v2258_v59, %v2257_v3  ;;  %v2323_v11 = vadd.f32 %v2322_v5, %v2321_v4  ;;  %v781_v59 = vadd.f32 %v2841_v54, %v444_v53  ;;  %v447_v54 = vld [vmem:[#allocation2 + $0x58] sm:$0xff]  ;;  %v450_v53 = vld [vmem:[#allocation2 + $0x70] sm:$0xff] }
 0x164   : > { %v1451_v12 = vadd.f32 %v2320_v0, %v1113_v9  ;;  %v1114_v15 = vadd.f32 %v2259_v10, %v776_v6 }
 0x166   : > { %1467 = vst [vmem:[#allocation2 + $0x10] sm:$0xff] %v1451_v12  ;;  %v1452_v17 = vadd.f32 %v2323_v11, %v1114_v15  ;;  %v2260_v18 = vpop.f32.mrb[24].mxu1  ;;  %v2324_v21 = vpop.f32.mrb[24].mxu0  ;;  %v782_v12 = vadd.f32 %v2843_v60, %v445_v25 }
 0x167   : > { %v2261_v1 = vpop.f32.mrb[25].mxu1  ;;  %v2325_v23 = vpop.f32.mrb[25].mxu0 }
 0x168   : > { %1468 = vst [vmem:[#allocation2 + $0x18] sm:$0xff] %v1452_v17  ;;  %v2262_v27 = vadd.f32 %v2261_v1, %v2260_v18  ;;  %v2326_v28 = vadd.f32 %v2325_v23, %v2324_v21  ;;  %v2263_v29 = vpop.f32.mrb[26].mxu1  ;;  %v2327_v7 = vpop.f32.mrb[26].mxu0 }
 0x169   : > { %v2264_v30 = vpop.f32.mrb[27].mxu1  ;;  %v2328_v33 = vpop.f32.mrb[27].mxu0 }
 0x16a   : > { %v1115_v35 = vadd.f32 %v2262_v27, %v777_v24  ;;  %v2265_v36 = vadd.f32 %v2264_v30, %v2263_v29  ;;  %v2329_v37 = vadd.f32 %v2328_v33, %v2327_v7  ;;  %v783_v29 = vadd.f32 %v2845_v2, %v446_v22  ;;  %v449_v2 = vld [vmem:[#allocation2 + $0x68] sm:$0xff] }
 0x16c   : > { %v1453_v38 = vadd.f32 %v2326_v28, %v1115_v35  ;;  %v1116_v39 = vadd.f32 %v2265_v36, %v778_v34  ;;  %v784_v36 = vadd.f32 %v2847_v8, %v447_v54 }
 0x16e   : > { %1469 = vst [vmem:[#allocation2 + $0x20] sm:$0xff] %v1453_v38  ;;  %v1454_v41 = vadd.f32 %v2329_v37, %v1116_v39  ;;  %v2266_v42 = vpop.f32.mrb[28].mxu1  ;;  %v2330_v43 = vpop.f32.mrb[28].mxu0 }
 0x16f   : > { %v2267_v44 = vpop.f32.mrb[29].mxu1  ;;  %v2331_v45 = vpop.f32.mrb[29].mxu0  ;;  %v1488_v54 = vld [vmem:[#allocation2 + $0x18] sm:$0xff] (!%p2043_p2) }
 0x170   : > { %1470 = vst [vmem:[#allocation2 + $0x28] sm:$0xff] %v1454_v41  ;;  %v2268_v47 = vadd.f32 %v2267_v44, %v2266_v42  ;;  %v2332_v48 = vadd.f32 %v2331_v45, %v2330_v43  ;;  %v2269_v49 = vpop.f32.mrb[30].mxu1  ;;  %v2333_v19 = vpop.f32.mrb[30].mxu0  ;;  %v448_v42 = vld [vmem:[#allocation2 + $0x60] sm:$0xff] }
 0x171   : > { %v2270_v50 = vpop.f32.mrb[31].mxu1  ;;  %v2334_v51 = vpop.f32.mrb[31].mxu0 }
 0x172   : > { %v1117_v55 = vadd.f32 %v2268_v47, %v779_v46  ;;  %v2271_v56 = vadd.f32 %v2270_v50, %v2269_v49  ;;  %v2335_v57 = vadd.f32 %v2334_v51, %v2333_v19  ;;  %v785_v47 = vadd.f32 %v2851_v14, %v448_v42  ;;  %v451_v14 = vld [vmem:[#allocation2 + $0x78] sm:$0xff] }
 0x174   : > { %v1455_v58 = vadd.f32 %v2332_v48, %v1117_v55  ;;  %v1118_v61 = vadd.f32 %v2271_v56, %v780_v52  ;;  %v786_v52 = vadd.f32 %v2855_v20, %v449_v2 }
 0x176   : > { %1471 = vst [vmem:[#allocation2 + $0x30] sm:$0xff] %v1455_v58  ;;  %v1456_v62 = vadd.f32 %v2335_v57, %v1118_v61  ;;  %v2272_v63 = vpop.f32.mrb[32].mxu1  ;;  %v2336_v0 = vpop.f32.mrb[32].mxu0 }
 0x177   : > { %v2273_v3 = vpop.f32.mrb[33].mxu1  ;;  %v2337_v4 = vpop.f32.mrb[33].mxu0 }
 0x178   : > { %1472 = vst [vmem:[#allocation2 + $0x38] sm:$0xff] %v1456_v62  ;;  %v2274_v5 = vadd.f32 %v2273_v3, %v2272_v63  ;;  %v2338_v6 = vadd.f32 %v2337_v4, %v2336_v0  ;;  %v2275_v9 = vpop.f32.mrb[34].mxu1  ;;  %v2339_v31 = vpop.f32.mrb[34].mxu0  ;;  %v787_v4 = vadd.f32 %v2859_v26, %v450_v53  ;;  %v1485_v26 = vld [vmem:[#allocation2] sm:$0xff] (!%p2043_p2) }
 0x179   : > { %v2276_v10 = vpop.f32.mrb[35].mxu1  ;;  %v2340_v11 = vpop.f32.mrb[35].mxu0 }
 0x17a   : > { %v1119_v15 = vadd.f32 %v2274_v5, %v781_v59  ;;  %v2277_v16 = vadd.f32 %v2276_v10, %v2275_v9  ;;  %v2341_v17 = vadd.f32 %v2340_v11, %v2339_v31  ;;  %v788_v10 = vadd.f32 %v2863_v32, %v451_v14  ;;  %v2883_v32 = vld [vmem:[%s412_s6] ss:$0 sm:$0xff] (!%p2043_p2) }
 0x17b   : > { %v1508_v22 = vadd.f32 (!%p2043_p2), %v2883_v32, %v1485_v26 }
 0x17c   : > { %v1457_v18 = vadd.f32 %v2338_v6, %v1119_v15  ;;  %v1120_v21 = vadd.f32 %v2277_v16, %v782_v12 }
 0x17e   : > { %1473 = vst [vmem:[#allocation2 + $0x40] sm:$0xff] %v1457_v18  ;;  %v1458_v1 = vadd.f32 %v2341_v17, %v1120_v21  ;;  %v2278_v23 = vpop.f32.mrb[36].mxu1  ;;  %v2342_v24 = vpop.f32.mrb[36].mxu0  ;;  %v1486_v21 = vld [vmem:[#allocation2 + $0x8] sm:$0xff] (!%p2043_p2) }
 0x17f   : > { %v2279_v27 = vpop.f32.mrb[37].mxu1  ;;  %v2343_v28 = vpop.f32.mrb[37].mxu0 }
 0x180   : > { %1474 = vst [vmem:[#allocation2 + $0x48] sm:$0xff] %v1458_v1  ;;  %v2280_v7 = vadd.f32 %v2279_v27, %v2278_v23  ;;  %v2344_v30 = vadd.f32 %v2343_v28, %v2342_v24  ;;  %v2281_v33 = vpop.f32.mrb[38].mxu1  ;;  %v2345_v60 = vpop.f32.mrb[38].mxu0  ;;  %v1509_v1 = vadd.f32 (!%p2043_p2), %v2883_v32, %v1486_v21  ;;  %v2083_v23 = vld [vmem:[%s2740_s23] sm:$0xff] (!%p2043_p2)   ;;  %v1487_v24 = vld [vmem:[#allocation2 + $0x10] sm:$0xff] (!%p2043_p2) }
 0x181   : > { %v2282_v34 = vpop.f32.mrb[39].mxu1  ;;  %v2346_v35 = vpop.f32.mrb[39].mxu0  ;;  %v2084_v27 = vunpack.c.l.bf16 (!%p2043_p2), %v2083_v23  ;;  %v2085_v28 = vunpack.c.h.bf16 (!%p2043_p2), %v2083_v23 }
 0x182   : > { %v1121_v37 = vadd.f32 %v2280_v7, %v783_v29  ;;  %v2283_v38 = vadd.f32 %v2282_v34, %v2281_v33  ;;  %v2347_v39 = vadd.f32 %v2346_v35, %v2345_v60  ;;  %v1510_v29 = vadd.f32 (!%p2043_p2), %v2883_v32, %v1487_v24  ;;  %v1489_v33 = vld [vmem:[#allocation2 + $0x20] sm:$0xff] (!%p2043_p2)  ;;  %v1490_v60 = vld [vmem:[#allocation2 + $0x28] sm:$0xff] (!%p2043_p2) }
 0x183   : > { %v1511_v7 = vadd.f32 (!%p2043_p2), %v2883_v32, %v1488_v54  ;;  %v1557_v42 = vadd.f32 (!%p2043_p2), %v2085_v28, %v1509_v1 }
 0x184   : > { %v1459_v40 = vadd.f32 %v2344_v30, %v1121_v37  ;;  %v1122_v41 = vadd.f32 %v2283_v38, %v784_v36  ;;  %v2154_v30 = vld [vmem:[%s2740_s23 + $0x8] sm:$0xff] (!%p2043_p2)   ;;  %v1512_v36 = vadd.f32 (!%p2043_p2), %v2883_v32, %v1489_v33  ;;  %v1513_v37 = vadd.f32 (!%p2043_p2), %v2883_v32, %v1490_v60  ;;  %v2155_v38 = vld [vmem:[%s2740_s23 + $0x10] sm:$0xff] (!%p2043_p2)  }
 0x185   : > { %v2088_v34 = vunpack.c.l.bf16 (!%p2043_p2), %v2154_v30  ;;  %v2089_v35 = vunpack.c.h.bf16 (!%p2043_p2), %v2154_v30 }
 0x186   : > { %1475 = vst [vmem:[#allocation2 + $0x50] sm:$0xff] %v1459_v40  ;;  %v1460_v43 = vadd.f32 %v2347_v39, %v1122_v41  ;;  %v2284_v13 = vpop.f32.mrb[40].mxu1  ;;  %v2348_v44 = vpop.f32.mrb[40].mxu0  ;;  %v1491_v39 = vld [vmem:[#allocation2 + $0x30] sm:$0xff] (!%p2043_p2)  ;;  %v1492_v40 = vld [vmem:[#allocation2 + $0x38] sm:$0xff] (!%p2043_p2)  ;;  %v1556_v41 = vadd.f32 (!%p2043_p2), %v2084_v27, %v1508_v22 }
 0x187   : > { %v2285_v45 = vpop.f32.mrb[41].mxu1  ;;  %v2349_v46 = vpop.f32.mrb[41].mxu0  ;;  %v1558_v2 = vadd.f32 (!%p2043_p2), %v2088_v34, %v1510_v29 }
 0x188   : > { %1476 = vst [vmem:[#allocation2 + $0x58] sm:$0xff] %v1460_v43  ;;  %v2286_v48 = vadd.f32 %v2285_v45, %v2284_v13  ;;  %v2350_v49 = vadd.f32 %v2349_v46, %v2348_v44  ;;  %v2287_v19 = vpop.f32.mrb[42].mxu1  ;;  %v2351_v8 = vpop.f32.mrb[42].mxu0  ;;  %v2092_v43 = vunpack.c.l.bf16 (!%p2043_p2), %v2155_v38  ;;  %v2093_v13 = vunpack.c.h.bf16 (!%p2043_p2), %v2155_v38  ;;  %v2156_v44 = vld [vmem:[%s2740_s23 + $0x18] sm:$0xff] (!%p2043_p2)  }
 0x189   : > { %v2288_v50 = vpop.f32.mrb[43].mxu1  ;;  %v2352_v51 = vpop.f32.mrb[43].mxu0  ;;  %v1559_v45 = vadd.f32 (!%p2043_p2), %v2089_v35, %v1511_v7  ;;  %v1514_v46 = vadd.f32 (!%p2043_p2), %v2883_v32, %v1491_v39  ;;  %v2160_v7 = vld [vmem:[%s2740_s23 + $0x38] sm:$0xff] (!%p2043_p2)  }
 0x18a   : > { %v1123_v55 = vadd.f32 %v2286_v48, %v785_v47  ;;  %v2289_v56 = vadd.f32 %v2288_v50, %v2287_v19  ;;  %v2353_v57 = vadd.f32 %v2352_v51, %v2351_v8  ;;  %v1515_v47 = vadd.f32 (!%p2043_p2), %v2883_v32, %v1492_v40  ;;  %v1493_v48 = vld [vmem:[#allocation2 + $0x40] sm:$0xff] (!%p2043_p2)  ;;  %v1494_v51 = vld [vmem:[#allocation2 + $0x48] sm:$0xff] (!%p2043_p2) }
 0x18b   : > { %v1573_v19 = vmax.f32 (!%p2043_p2), %v1557_v42, 0.0  ;;  %v1560_v8 = vadd.f32 (!%p2043_p2), %v2092_v43, %v1512_v36  ;;  %v1561_v50 = vadd.f32 (!%p2043_p2), %v2093_v13, %v1513_v37  ;;  %v2112_v42 = vunpack.c.l.bf16 (!%p2043_p2), %v2160_v7 }
 0x18c   : > { %v1461_v58 = vadd.f32 %v2350_v49, %v1123_v55  ;;  %v1124_v61 = vadd.f32 %v2289_v56, %v786_v52  ;;  %v1572_v49 = vmax.f32 (!%p2043_p2), %v1556_v41, 0.0  ;;  %v1574_v52 = vmax.f32 (!%p2043_p2), %v1558_v2, 0.0 }
 0x18d   : > { %v1575_v55 = vmax.f32 (!%p2043_p2), %v1559_v45, 0.0  ;;  %v2096_v56 = vunpack.c.l.bf16 (!%p2043_p2), %v2156_v44  ;;  %v2113_v13 = vunpack.c.h.bf16 (!%p2043_p2), %v2160_v7 }
 0x18e   : > { %1477 = vst [vmem:[#allocation2 + $0x60] sm:$0xff] %v1461_v58  ;;  %v1462_v62 = vadd.f32 %v2353_v57, %v1124_v61  ;;  %v2290_v63 = vpop.f32.mrb[44].mxu1  ;;  %v2354_v0 = vpop.f32.mrb[44].mxu0  ;;  %v2097_v57 = vunpack.c.h.bf16 (!%p2043_p2), %v2156_v44  ;;  %v2157_v58 = vld [vmem:[%s2740_s23 + $0x20] sm:$0xff] (!%p2043_p2)   ;;  %v1495_v61 = vld [vmem:[#allocation2 + $0x50] sm:$0xff] (!%p2043_p2)  ;;  %v2117_v53 = vpack.c.bf16 (!%p2043_p2), %v1573_v19, %v1572_v49 }
 0x18f   : > { %v2291_v25 = vpop.f32.mrb[45].mxu1  ;;  %v2355_v3 = vpop.f32.mrb[45].mxu0  ;;  %v1496_v14 = vld [vmem:[#allocation2 + $0x58] sm:$0xff] (!%p2043_p2) }
 0x190   : > { %1478 = vst [vmem:[#allocation2 + $0x68] sm:$0xff] %v1462_v62  ;;  %v2292_v59 = vadd.f32 %v2291_v25, %v2290_v63  ;;  %v2356_v5 = vadd.f32 %v2355_v3, %v2354_v0  ;;  %v2293_v6 = vpop.f32.mrb[46].mxu1  ;;  %v2357_v20 = vpop.f32.mrb[46].mxu0  ;;  %v1576_v62 = vmax.f32 (!%p2043_p2), %v1560_v8, 0.0  ;;  %v1577_v63 = vmax.f32 (!%p2043_p2), %v1561_v50, 0.0  ;;  %v2158_v25 = vld [vmem:[%s2740_s23 + $0x28] sm:$0xff] (!%p2043_p2)   ;;  %2118 = vst [vmem:[%s2742_s11] sm:$0xff] (!%p2043_p2), %v2117_v53  }
 0x191   : > { %v2294_v9 = vpop.f32.mrb[47].mxu1  ;;  %v2358_v31 = vpop.f32.mrb[47].mxu0  ;;  %v1516_v0 = vadd.f32 (!%p2043_p2), %v2883_v32, %v1493_v48  ;;  %v2122_v3 = vpack.c.bf16 (!%p2043_p2), %v1575_v55, %v1574_v52  ;;  %v2105_v22 = vunpack.c.h.bf16 (!%p2043_p2), %v2158_v25 }
 0x192   : > { %v1125_v11 = vadd.f32 %v2292_v59, %v787_v4  ;;  %v2295_v12 = vadd.f32 %v2294_v9, %v2293_v6  ;;  %v2359_v15 = vadd.f32 %v2358_v31, %v2357_v20  ;;  %1484 = sbr.rel (%p2043_p2) target bundleno = 425 (0x1a9), region = 85  ;;  %v1562_v4 = vadd.f32 (!%p2043_p2), %v2096_v56, %v1514_v46 }
 0x193   : > { %v1563_v59 = vadd.f32 (!%p2043_p2), %v2097_v57, %v1515_v47  ;;  %v2127_v20 = vpack.c.bf16 (!%p2043_p2), %v1577_v63, %v1576_v62  ;;  %v2100_v9 = vunpack.c.l.bf16 (!%p2043_p2), %v2157_v58  ;;  %v2101_v31 = vunpack.c.h.bf16 (!%p2043_p2), %v2157_v58  ;;  %2161 = vst [vmem:[%s2742_s11 + $0x8] sm:$0xff] (!%p2043_p2), %v2122_v3  }
 0x194   : > { %v1463_v16 = vadd.f32 %v2356_v5, %v1125_v11  ;;  %v1126_v17 = vadd.f32 %v2295_v12, %v788_v10  ;;  %v1517_v5 = vadd.f32 (!%p2043_p2), %v2883_v32, %v1494_v51  ;;  %v1518_v10 = vadd.f32 (!%p2043_p2), %v2883_v32, %v1495_v61  ;;  %v2159_v12 = vld [vmem:[%s2740_s23 + $0x30] sm:$0xff] (!%p2043_p2)  }
 0x195   : > { %v1497_v6 = vld [vmem:[#allocation2 + $0x60] sm:$0xff] (!%p2043_p2)  ;;  %2162 = vst [vmem:[%s2742_s11 + $0x10] sm:$0xff] (!%p2043_p2), %v2127_v20   ;;  %v1564_v26 = vadd.f32 (!%p2043_p2), %v2100_v9, %v1516_v0  ;;  %v2108_v29 = vunpack.c.l.bf16 (!%p2043_p2), %v2159_v12  ;;  %v2109_v34 = vunpack.c.h.bf16 (!%p2043_p2), %v2159_v12 }
 0x196   : > { %1479 = vst [vmem:[#allocation2 + $0x70] sm:$0xff] %v1463_v16  ;;  %v1464_v18 = vadd.f32 %v2359_v15, %v1126_v17  ;;  %v1578_v15 = vmax.f32 (!%p2043_p2), %v1562_v4, 0.0  ;;  %v1579_v16 = vmax.f32 (!%p2043_p2), %v1563_v59, 0.0  ;;  %v1519_v17 = vadd.f32 (!%p2043_p2), %v2883_v32, %v1496_v14 }
 0x197   : > { %v1498_v11 = vld [vmem:[#allocation2 + $0x68] sm:$0xff] (!%p2043_p2)  ;;  %v1565_v21 = vadd.f32 (!%p2043_p2), %v2101_v31, %v1517_v5  ;;  %v1520_v1 = vadd.f32 (!%p2043_p2), %v2883_v32, %v1497_v6  ;;  %v1580_v30 = vmax.f32 (!%p2043_p2), %v1564_v26, 0.0 }
 0x198   : > { %1480 = vst [vmem:[#allocation2 + $0x78] sm:$0xff] %v1464_v18  ;;  %v2104_v18 = vunpack.c.l.bf16 (!%p2043_p2), %v2158_v25  ;;  %v2132_v54 = vpack.c.bf16 (!%p2043_p2), %v1579_v16, %v1578_v15  ;;  %v1521_v28 = vadd.f32 (!%p2043_p2), %v2883_v32, %v1498_v11  ;;  %v1567_v60 = vadd.f32 (!%p2043_p2), %v2105_v22, %v1519_v17 }
 0x199   : > { %v1581_v33 = vmax.f32 %v1565_v21, 0.0  ;;  %v1568_v36 = vadd.f32 %v2108_v29, %v1520_v1 }
 0x19a   : > { %v1566_v27 = vadd.f32 %v2104_v18, %v1518_v10  ;;  %2163 = vst [vmem:[%s2742_s11 + $0x18] sm:$0xff] %v2132_v54   ;;  %v1583_v40 = vmax.f32 %v1567_v60, 0.0  ;;  %v1569_v41 = vadd.f32 %v2109_v34, %v1521_v28 }
 0x19b   : > { %v2137_v39 = vpack.c.bf16 %v1581_v33, %v1580_v30  ;;  %v1584_v43 = vmax.f32 %v1568_v36, 0.0 }
 0x19c   : > { %v1582_v35 = vmax.f32 %v1566_v27, 0.0  ;;  %v1585_v2 = vmax.f32 %v1569_v41, 0.0 }
 0x19d   : > { %v1499_v23 = vld [vmem:[#allocation2 + $0x70] sm:$0xff]  ;;  %2164 = vst [vmem:[%s2742_s11 + $0x20] sm:$0xff] %v2137_v39  }
 0x19e   : > { %v1522_v37 = vadd.f32 %v2883_v32, %v1499_v23  ;;  %v2142_v44 = vpack.c.bf16 %v1583_v40, %v1582_v35  ;;  %v2147_v47 = vpack.c.bf16 %v1585_v2, %v1584_v43 }
 0x19f   : > { %v1500_v24 = vld [vmem:[#allocation2 + $0x78] sm:$0xff] }
 0x1a0   : > { %v1523_v38 = vadd.f32 %v2883_v32, %v1500_v24  ;;  %v1570_v45 = vadd.f32 %v2112_v42, %v1522_v37  ;;  %2165 = vst [vmem:[%s2742_s11 + $0x28] sm:$0xff] %v2142_v44   ;;  %2166 = vst [vmem:[%s2742_s11 + $0x30] sm:$0xff] %v2147_v47  }
 0x1a2   : > { %v1571_v46 = vadd.f32 %v2113_v13, %v1523_v38  ;;  %v1586_v48 = vmax.f32 %v1570_v45, 0.0 }
 0x1a4   : > { %v1587_v49 = vmax.f32 %v1571_v46, 0.0 }
 0x1a6   : > { %v2152_v19 = vpack.c.bf16 %v1587_v49, %v1586_v48 }
 0x1a8   : > { %2167 = vst [vmem:[%s2742_s11 + $0x38] sm:$0xff] %v2152_v19  }
 0x1a9 PF: > { %1674 = sbr.rel (!%p2680_p6) target bundleno = 437 (0x1b5), region = 89  ;;  %s2062_s17 = sshll.u32 (%p2680_p6), %s2596_s18, 2  ;;  %v1695_v32 = vld [vmem:[%s2742_s11] sm:$0xf] (%p2680_p6)  ;;  %v1697_v8 = vld [vmem:[%s2742_s11 + $0x4] sm:$0xf] (%p2680_p6) }
 0x1aa   : > { %s1679_s14 = scalar_lea.vmem (%p2680_p6), %s2964_s4, %s2062_s17  ;;  %v1699_v50 = vld [vmem:[%s2742_s11 + $0x8] sm:$0xf] (%p2680_p6)  ;;  %v1701_v51 = vld [vmem:[%s2742_s11 + $0xc] sm:$0xf] (%p2680_p6)  ;;  %v1707_v56 = vld [vmem:[%s2742_s11 + $0x18] sm:$0xf] (%p2680_p6) }
 0x1ab   : > { %1696 = vst [vmem:[%s1679_s14] sm:$0xf] (%p2680_p6), %v1695_v32  ;;  %1698 = vst [vmem:[%s1679_s14 + $0x8] sm:$0xf] (%p2680_p6), %v1697_v8  ;;  %v1709_v57 = vld [vmem:[%s2742_s11 + $0x1c] sm:$0xf] (%p2680_p6) }
 0x1ac   : > { %v1703_v52 = vld [vmem:[%s2742_s11 + $0x10] sm:$0xf] (%p2680_p6)  ;;  %1700 = vst [vmem:[%s1679_s14 + $0x10] sm:$0xf] (%p2680_p6), %v1699_v50  ;;  %1702 = vst [vmem:[%s1679_s14 + $0x18] sm:$0xf] (%p2680_p6), %v1701_v51 }
 0x1ad   : > { %1704 = vst [vmem:[%s1679_s14 + $0x20] sm:$0xf] (%p2680_p6), %v1703_v52  ;;  %v1705_v55 = vld [vmem:[%s2742_s11 + $0x14] sm:$0xf] (%p2680_p6)  ;;  %1708 = vst [vmem:[%s1679_s14 + $0x30] sm:$0xf] (%p2680_p6), %v1707_v56 }
 0x1ae   : > { %1706 = vst [vmem:[%s1679_s14 + $0x28] sm:$0xf] (%p2680_p6), %v1705_v55  ;;  %1710 = vst [vmem:[%s1679_s14 + $0x38] sm:$0xf] (%p2680_p6), %v1709_v57  ;;  %v1711_v58 = vld [vmem:[%s2742_s11 + $0x20] sm:$0xf] (%p2680_p6) }
 0x1af   : > { %v1713_v61 = vld [vmem:[%s2742_s11 + $0x24] sm:$0xf] (%p2680_p6)  ;;  %v1715_v53 = vld [vmem:[%s2742_s11 + $0x28] sm:$0xf] (%p2680_p6)  ;;  %1712 = vst [vmem:[%s1679_s14 + $0x40] sm:$0xf] (%p2680_p6), %v1711_v58 }
 0x1b0   : > { %1714 = vst [vmem:[%s1679_s14 + $0x48] sm:$0xf] %v1713_v61  ;;  %1716 = vst [vmem:[%s1679_s14 + $0x50] sm:$0xf] %v1715_v53  ;;  %v1717_v62 = vld [vmem:[%s2742_s11 + $0x2c] sm:$0xf] }
 0x1b1   : > { %v1719_v63 = vld [vmem:[%s2742_s11 + $0x30] sm:$0xf]  ;;  %v1721_v0 = vld [vmem:[%s2742_s11 + $0x34] sm:$0xf]  ;;  %1718 = vst [vmem:[%s1679_s14 + $0x58] sm:$0xf] %v1717_v62 }
 0x1b2   : > { %1720 = vst [vmem:[%s1679_s14 + $0x60] sm:$0xf] %v1719_v63  ;;  %1722 = vst [vmem:[%s1679_s14 + $0x68] sm:$0xf] %v1721_v0  ;;  %v1723_v14 = vld [vmem:[%s2742_s11 + $0x38] sm:$0xf] }
 0x1b3   : > { %v1725_v25 = vld [vmem:[%s2742_s11 + $0x3c] sm:$0xf]  ;;  %1724 = vst [vmem:[%s1679_s14 + $0x70] sm:$0xf] %v1723_v14 }
 0x1b4   : > { %1726 = vst [vmem:[%s1679_s14 + $0x78] sm:$0xf] %v1725_v25 }
 0x1b5 PF: > { %s14_s21 = sadd.s32 1, %s2608_s21   ;;  %s2970_s25 = sld [smem:[#allocation5_spill]] }
 0x1b6   : > { %p11_p3 = scmp.ge.s32.totalorder %s14_s21, 8   ;;  %s2971_s15 = smov %s2588_s16 }
 0x1b7   : > { %s2972_s16 = smov %s2690_s28  ;;  %s2973_s17 = smov %s2600_s19 }
 0x1b8   : > { %s2974_s18 = smov %s2604_s20  ;;  %s2975_s19 = smov %s2978_s22 }
 0x1b9   :  { %13 = sbr.rel (!%p11_p3) target bundleno = 6 (0x6), region = 172 }
 0x1bb   : > { %s2976_s20 = smov %s2970_s25 }

// kernel: chessnet_forward.12
= control target key start
LH: loop header
LB: loop body
LE: loop exit
PB: predicated region body
PF: predicated region fallthrough
CT: control target
= control target key end

     0   :  { %s2367_s12 = smov 0   ;;  %s2369_s13 = smov 0   ;;  %s2634_s0 = inlined_call_operand.vmem [shape: bf16[9,128,256], index: 0, kind: input, shape index: {}]   ;;  %s2635_s1 = inlined_call_operand.vmem [shape: bf16[2,2304,128], index: 1, kind: input, shape index: {}]   ;;  %s2636_s2 = inlined_call_operand.vmem [shape: f32[1,256], index: 2, kind: input, shape index: {}]   ;;  %s2637_s3 = inlined_call_operand.vmem [shape: bf16[128,256], index: 3, kind: output, shape index: {}]  }
   0x1   :  { %s2371_s14 = smov 0   ;;  %s2373_s15 = smov 0  }
   0x2   :  { %s2375_s16 = smov 0   ;;  %s2377_s17 = smov 0  }
   0x3   :  { %s2379_s18 = smov 0  }
   0x4 LB: > { %s25_s19 = sadd.s32 1, %s2336_s16  ;;  %s28_s20 = sadd.s32 1, %s2340_s17  ;;  %s2344_s18 = sphi %s2379_s18, %s13_s18   ;;  %s2340_s17 = sphi %s2377_s17, %s2647_s17   ;;  %s2336_s16 = sphi %s2375_s16, %s2646_s16   ;;  %s2332_s15 = sphi %s2373_s15, %s2645_s15   ;;  %s2328_s14 = sphi %s2371_s14, %s2644_s14   ;;  %s2324_s13 = sphi %s2369_s13, %s2643_s13   ;;  %s2320_s12 = sphi %s2367_s12, %s2642_s12  }
   0x5   : > { %p26_p0 = scmp.ge.s32.totalorder %s25_s19, 3  ;;  %s1680_s21 = sadd.s32 4294967295, %s2344_s18  }
   0x6   : > { %p133_p1 = scmp.ne.s32.totalorder %s2324_s13, %s2320_s12  ;;  %p134_p2 = scmp.eq.s32.totalorder %s1680_s21, 5 }
   0x7   : > { %s2649_s19 = smov (%p26_p0, %s25_s19), 0  ;;  %s2651_s20 = smov (!%p26_p0, %s28_s20), %s2340_s17 }
   0x8   : > { %p1684_p3 = scmp.ge.s32.totalorder %s2344_s18, 1  ;;  %p30_p4 = scmp.ge.s32.totalorder %s2651_s20, 2 }
   0x9   : > { %p193_p5 = scmp.lt.s32.totalorder %s2344_s18, 7  ;;  %p2409_p6 = por %p134_p2, %p133_p1 }
   0xa   : > { %s2653_s20 = smov (%p30_p4, %s2651_s20), 0  ;;  %s123_s24 = sadd.s32 1, %s2324_s13 }
   0xb   : > { %2640 = sst [smem:[#allocation4_spill]] %s2653_s20  ;;  %p194_p7 = pnand %p1684_p3, %p193_p5 }
   0xc   : > { %s119_s23 = ssub.s32 %s2340_s17, %s2653_s20  ;;  %s231_s26 = sand.u32 (!%p194_p7), 1, %s2320_s12  }
   0xd   : > { %p121_p8 = scmp.eq.s32.totalorder %s119_s23, 0  ;;  %197 = sbr.rel (%p194_p7) target bundleno = 400 (0x190), region = 32 }
   0xe   : > { %s234_s27 = smul.u32 (!%p194_p7), 3, %s2328_s14  ;;  %s1685_s28 = sshll.u32 (!%p194_p7), %s231_s26, 6 }
   0xf   : > { %s2419_s25 = scalar_select %p121_p8, %s2324_s13, %s123_s24  }
  0x10   : > { %s247_s29 = smul.u32 (!%p194_p7), 96, %s2328_s14  ;;  %p236_p9 = scmp.lt.s32.totalorder (!%p194_p7), %s234_s27, 8 }
  0x11   : > { %p248_p10 = scmp.lt.s32.totalorder (!%p194_p7), %s2332_s15, 1  ;;  %s2442_s20 = scalar_lea.vmem (!%p194_p7), [#allocation3], %s1685_s28 }
  0x12   : > { %p250_p11 = scmp.lt.s32.totalorder (!%p194_p7), %s247_s29, 287  ;;  %p1689_p12 = scmp.ne.s32.totalorder (!%p194_p7), %s2328_s14, 0 }
  0x14   : > { %s2655_s27 = smov (!%p236_p9, %s234_s27), 8  ;;  %s2657_s29 = smov (!%p250_p11, %s247_s29), 287 }
  0x15   : > { %s2425_s30 = scalar_select %p248_p10, %s2332_s15, 1 }
  0x16   : > { %s1840_s4 = sshll.u32 %s2655_s27, 7  ;;  %265 = sbr.rel (%p1689_p12) target bundleno = 31 (0x1f), region = 36  ;;  %v2346_v0 = vmov (!%p1689_p12), 0.0  }
  0x17   : > { %s2430_s7 = scalar_lea.vmem %s2634_s0, %s1840_s4  ;;  %s2112_s8 = smul.u32 288, %s2425_s30  ;;  %266 = vst [vmem:[#allocation2] sm:$0xff] (!%p1689_p12), %v2346_v0  ;;  %267 = vst [vmem:[#allocation2 + $0x8] sm:$0xff] (!%p1689_p12), %v2346_v0 }
  0x18   : > { %s259_s11 = scalar_lea.vmem %s2636_s2, %s2425_s30  ;;  %268 = vst [vmem:[#allocation2 + $0x10] sm:$0xff] (!%p1689_p12), %v2346_v0  ;;  %269 = vst [vmem:[#allocation2 + $0x18] sm:$0xff] (!%p1689_p12), %v2346_v0 }
  0x19   : > { %s253_s12 = sadd.s32 %s2112_s8, %s2657_s29  ;;  %270 = vst [vmem:[#allocation2 + $0x20] sm:$0xff] (!%p1689_p12), %v2346_v0  ;;  %271 = vst [vmem:[#allocation2 + $0x28] sm:$0xff] (!%p1689_p12), %v2346_v0 }
  0x1a   : > { %s1688_s21 = sshll.u32 %s253_s12, 2  ;;  %272 = vst [vmem:[#allocation2 + $0x30] sm:$0xff] (!%p1689_p12), %v2346_v0  ;;  %273 = vst [vmem:[#allocation2 + $0x38] sm:$0xff] (!%p1689_p12), %v2346_v0 }
  0x1b   : > { %s2440_s26 = scalar_lea.vmem %s2635_s1, %s1688_s21  ;;  %274 = vst [vmem:[#allocation2 + $0x40] sm:$0xff] (!%p1689_p12), %v2346_v0  ;;  %275 = vst [vmem:[#allocation2 + $0x48] sm:$0xff] (!%p1689_p12), %v2346_v0 }
  0x1c   : > { %276 = vst [vmem:[#allocation2 + $0x50] sm:$0xff] (!%p1689_p12), %v2346_v0  ;;  %277 = vst [vmem:[#allocation2 + $0x58] sm:$0xff] (!%p1689_p12), %v2346_v0 }
  0x1d   : > { %278 = vst [vmem:[#allocation2 + $0x60] sm:$0xff] %v2346_v0  ;;  %279 = vst [vmem:[#allocation2 + $0x68] sm:$0xff] %v2346_v0 }
  0x1e   : > { %280 = vst [vmem:[#allocation2 + $0x70] sm:$0xff] %v2346_v0  ;;  %281 = vst [vmem:[#allocation2 + $0x78] sm:$0xff] %v2346_v0 }
  0x1f PF: > { %v2170_v1 = vld [vmem:[%s2440_s26 + $0x40] sm:$0xff]   ;;  %v2172_v3 = vld [vmem:[%s2440_s26 + $0x48] sm:$0xff]   ;;  %v2174_v5 = vld [vmem:[%s2440_s26 + $0x50] sm:$0xff]   ;;  %p1818_p13 = scmp.ne.s32.totalorder %s2328_s14, 2 }
  0x20   : > { %v2171_v2 = vld [vmem:[%s2440_s26] sm:$0xff]   ;;  %1904 = vmatprep.subr.bf16.mxu0 %v2170_v1  ;;  %2096 = vmatprep.subr.bf16.mxu1 %v2170_v1  ;;  %v2173_v4 = vld [vmem:[%s2440_s26 + $0x8] sm:$0xff]   ;;  %v2175_v6 = vld [vmem:[%s2440_s26 + $0x10] sm:$0xff]  }
  0x21   : > { %1905 = vmatpush3.bf16.msra.mxu0 %v2171_v2  ;;  %2104 = vmatpush3.bf16.msra.mxu1 %v2171_v2  ;;  %v2176_v7 = vld [vmem:[%s2440_s26 + $0x58] sm:$0xff]   ;;  %v2178_v9 = vld [vmem:[%s2440_s26 + $0x60] sm:$0xff]   ;;  %v2180_v11 = vld [vmem:[%s2440_s26 + $0x68] sm:$0xff]  }
  0x22   : > { %1906 = vmatprep.subr.bf16.mxu0 %v2172_v3  ;;  %2097 = vmatprep.subr.bf16.mxu1 %v2172_v3  ;;  %v2177_v8 = vld [vmem:[%s2440_s26 + $0x18] sm:$0xff]   ;;  %v2179_v10 = vld [vmem:[%s2440_s26 + $0x20] sm:$0xff]   ;;  %v2181_v14 = vld [vmem:[%s2440_s26 + $0x28] sm:$0xff]  }
  0x23   : > { %v2188_v12 = vld [vmem:[%s2430_s7 + $0x4] ss:$8 sps:$4 sm:$0xff]   ;;  %v2182_v15 = vld [vmem:[%s2440_s26 + $0x70] sm:$0xff]   ;;  %v2184_v17 = vld [vmem:[%s2440_s26 + $0x78] sm:$0xff]  }
  0x24   : > { %v2191_v13 = vld [vmem:[%s2430_s7 + $0x44] ss:$8 sps:$4 sm:$0xff]   ;;  %554 = vmatprep.mubr.bf16.mxu0 %v2188_v12  ;;  %v2183_v16 = vld [vmem:[%s2440_s26 + $0x30] sm:$0xff]   ;;  %v2185_v18 = vld [vmem:[%s2440_s26 + $0x38] sm:$0xff]  }
  0x25   : > { %1907 = vmatpush3.bf16.msra.mxu0 %v2173_v4  ;;  %2105 = vmatpush3.bf16.msra.mxu1 %v2173_v4  ;;  %v2186_v19 = vld [vmem:[%s2430_s7] ss:$8 sps:$4 sm:$0xff]   ;;  %v2200_v27 = vld [vmem:[%s2430_s7 + $0x14] ss:$8 sps:$4 sm:$0xff]   ;;  %v2204_v32 = vld [vmem:[%s2430_s7 + $0x10] ss:$8 sps:$4 sm:$0xff]  }
  0x26   : > { %1908 = vmatprep.subr.bf16.mxu0 %v2174_v5  ;;  %2098 = vmatprep.subr.bf16.mxu1 %v2174_v5  ;;  %v2189_v20 = vld [vmem:[%s2430_s7 + $0x40] ss:$8 sps:$4 sm:$0xff]   ;;  %v2202_v29 = vld [vmem:[%s2430_s7 + $0x54] ss:$8 sps:$4 sm:$0xff]   ;;  %v2205_v34 = vld [vmem:[%s2430_s7 + $0x50] ss:$8 sps:$4 sm:$0xff]  }
  0x27   : > { %586 = vmatprep.mubr.bf16.mxu1 %v2191_v13  ;;  %v2192_v21 = vld [vmem:[%s2440_s26 + $0xc0] sm:$0xff]   ;;  %v2196_v25 = vld [vmem:[%s2440_s26 + $0xc8] sm:$0xff]   ;;  %v2206_v31 = vld [vmem:[%s2440_s26 + $0xd0] sm:$0xff]  }
  0x28   : > { %v2193_v22 = vld [vmem:[%s2440_s26 + $0x140] sm:$0xff]   ;;  %v2197_v26 = vld [vmem:[%s2440_s26 + $0x148] sm:$0xff]   ;;  %v2207_v33 = vld [vmem:[%s2440_s26 + $0x150] sm:$0xff]  }
  0x29   : > { %1909 = vmatpush3.bf16.msra.mxu0 %v2175_v6  ;;  %2106 = vmatpush3.bf16.msra.mxu1 %v2175_v6  ;;  %v2194_v23 = vld [vmem:[%s2440_s26 + $0x80] sm:$0xff]   ;;  %v2198_v28 = vld [vmem:[%s2440_s26 + $0x88] sm:$0xff]   ;;  %v2208_v35 = vld [vmem:[%s2440_s26 + $0x90] sm:$0xff]  }
  0x2a   : > { %1910 = vmatprep.subr.bf16.mxu0 %v2176_v7  ;;  %2099 = vmatprep.subr.bf16.mxu1 %v2176_v7  ;;  %v2195_v24 = vld [vmem:[%s2440_s26 + $0x100] sm:$0xff]   ;;  %v2199_v30 = vld [vmem:[%s2440_s26 + $0x108] sm:$0xff]   ;;  %v2209_v36 = vld [vmem:[%s2440_s26 + $0x110] sm:$0xff]  }
  0x2b   : > { %v2210_v37 = vld [vmem:[%s2440_s26 + $0xd8] sm:$0xff]   ;;  %v2214_v39 = vld [vmem:[%s2430_s7 + $0x24] ss:$8 sps:$4 sm:$0xff]   ;;  %v2218_v44 = vld [vmem:[%s2430_s7 + $0x20] ss:$8 sps:$4 sm:$0xff]  }
  0x2c   : > { %v2211_v38 = vld [vmem:[%s2440_s26 + $0x158] sm:$0xff]   ;;  %v2216_v41 = vld [vmem:[%s2430_s7 + $0x64] ss:$8 sps:$4 sm:$0xff]   ;;  %v2219_v45 = vld [vmem:[%s2430_s7 + $0x60] ss:$8 sps:$4 sm:$0xff]  }
  0x2d   : > { %1911 = vmatpush3.bf16.msra.mxu0 %v2177_v8  ;;  %2107 = vmatpush3.bf16.msra.mxu1 %v2177_v8  ;;  %v2212_v40 = vld [vmem:[%s2440_s26 + $0x98] sm:$0xff]   ;;  %v2220_v43 = vld [vmem:[%s2440_s26 + $0xe0] sm:$0xff]   ;;  %v2224_v49 = vld [vmem:[%s2440_s26 + $0xe8] sm:$0xff]  }
  0x2e   : > { %1912 = vmatprep.subr.bf16.mxu0 %v2178_v9  ;;  %2100 = vmatprep.subr.bf16.mxu1 %v2178_v9  ;;  %v2213_v42 = vld [vmem:[%s2440_s26 + $0x118] sm:$0xff]   ;;  %v2221_v46 = vld [vmem:[%s2440_s26 + $0x160] sm:$0xff]   ;;  %v2225_v50 = vld [vmem:[%s2440_s26 + $0x168] sm:$0xff]  }
  0x2f   : > { %v2222_v47 = vld [vmem:[%s2440_s26 + $0xa0] sm:$0xff]   ;;  %v2228_v51 = vld [vmem:[%s2430_s7 + $0x34] ss:$8 sps:$4 sm:$0xff]   ;;  %v2226_v53 = vld [vmem:[%s2440_s26 + $0xa8] sm:$0xff]  }
  0x30   : > { %v2223_v48 = vld [vmem:[%s2440_s26 + $0x120] sm:$0xff]   ;;  %v2230_v52 = vld [vmem:[%s2430_s7 + $0x74] ss:$8 sps:$4 sm:$0xff]   ;;  %v2227_v54 = vld [vmem:[%s2440_s26 + $0x128] sm:$0xff]  }
  0x31   : > { %1913 = vmatpush3.bf16.msra.mxu0 %v2179_v10  ;;  %2108 = vmatpush3.bf16.msra.mxu1 %v2179_v10  ;;  %v2234_v55 = vld [vmem:[%s2440_s26 + $0xf0] sm:$0xff]   ;;  %v2238_v61 = vld [vmem:[%s2440_s26 + $0xf8] sm:$0xff]   ;;  %v2244_v1 = vld [vmem:[%s2430_s7 + $0x84] ss:$8 sps:$4 sm:$0xff]  }
  0x32   : > { %1914 = vmatprep.subr.bf16.mxu0 %v2180_v11  ;;  %2101 = vmatprep.subr.bf16.mxu1 %v2180_v11  ;;  %v2232_v56 = vld [vmem:[%s2430_s7 + $0x30] ss:$8 sps:$4 sm:$0xff]   ;;  %v2242_v2 = vld [vmem:[%s2430_s7 + $0x80] ss:$8 sps:$4 sm:$0xff]   ;;  %v2247_v3 = vld [vmem:[%s2430_s7 + $0x104] ss:$8 sps:$4 sm:$0xff]  }
  0x33   : > { %v2233_v57 = vld [vmem:[%s2430_s7 + $0x70] ss:$8 sps:$4 sm:$0xff]   ;;  %v2245_v4 = vld [vmem:[%s2430_s7 + $0x100] ss:$8 sps:$4 sm:$0xff]   ;;  %v2248_v5 = vld [vmem:[%s2430_s7 + $0x94] ss:$8 sps:$4 sm:$0xff]  }
  0x34   : > { %v2235_v58 = vld [vmem:[%s2440_s26 + $0x170] sm:$0xff]   ;;  %v2239_v62 = vld [vmem:[%s2440_s26 + $0x178] sm:$0xff]   ;;  %v2254_v9 = vld [vmem:[%s2430_s7 + $0xa4] ss:$8 sps:$4 sm:$0xff]  }
  0x35   : > { %1915 = vmatpush3.bf16.msra.mxu0 %v2181_v14  ;;  %2109 = vmatpush3.bf16.msra.mxu1 %v2181_v14  ;;  %v2236_v59 = vld [vmem:[%s2440_s26 + $0xb0] sm:$0xff]   ;;  %v2240_v63 = vld [vmem:[%s2440_s26 + $0xb8] sm:$0xff]   ;;  %v2256_v10 = vld [vmem:[%s2430_s7 + $0x124] ss:$8 sps:$4 sm:$0xff]  }
  0x36   : > { %1916 = vmatprep.subr.bf16.mxu0 %v2182_v15  ;;  %2102 = vmatprep.subr.bf16.mxu1 %v2182_v15  ;;  %v2237_v60 = vld [vmem:[%s2440_s26 + $0x130] sm:$0xff]   ;;  %v2241_v0 = vld [vmem:[%s2440_s26 + $0x138] sm:$0xff]   ;;  %v2258_v11 = vld [vmem:[%s2430_s7 + $0xa0] ss:$8 sps:$4 sm:$0xff]  }
  0x37   : > { %v2250_v6 = vld [vmem:[%s2430_s7 + $0x114] ss:$8 sps:$4 sm:$0xff]   ;;  %v2252_v7 = vld [vmem:[%s2430_s7 + $0x90] ss:$8 sps:$4 sm:$0xff]   ;;  %v2259_v12 = vld [vmem:[%s2430_s7 + $0x120] ss:$8 sps:$4 sm:$0xff]  }
  0x38   : > { %v2253_v8 = vld [vmem:[%s2430_s7 + $0x110] ss:$8 sps:$4 sm:$0xff]   ;;  %v2260_v13 = vld [vmem:[%s2430_s7 + $0xb4] ss:$8 sps:$4 sm:$0xff]  }
  0x39   : > { %1917 = vmatpush3.bf16.msra.mxu0 %v2183_v16  ;;  %2110 = vmatpush3.bf16.msra.mxu1 %v2183_v16  ;;  %v2262_v14 = vld [vmem:[%s2430_s7 + $0x134] ss:$8 sps:$4 sm:$0xff]   ;;  %v2264_v15 = vld [vmem:[%s2430_s7 + $0xb0] ss:$8 sps:$4 sm:$0xff]  }
  0x3a   : > { %1918 = vmatprep.subr.bf16.mxu0 %v2184_v17  ;;  %2103 = vmatprep.subr.bf16.mxu1 %v2184_v17  ;;  %v2265_v16 = vld [vmem:[%s2430_s7 + $0x130] ss:$8 sps:$4 sm:$0xff]   ;;  %v2266_v17 = vld [vmem:[%s2430_s7 + $0xc4] ss:$8 sps:$4 sm:$0xff]  }
  0x3d   : > { %1919 = vmatpush3.bf16.msra.mxu0 %v2185_v18  ;;  %2111 = vmatpush3.bf16.msra.mxu1 %v2185_v18  ;;  %v2268_v18 = vld [vmem:[%s2430_s7 + $0x144] ss:$8 sps:$4 sm:$0xff]  }
  0x3e   : > { %1968 = vmatprep.subr.bf16.mxu1 %v2192_v21  ;;  %2032 = vmatprep.subr.bf16.mxu0 %v2193_v22  ;;  %v2272_v21 = vld [vmem:[%s2430_s7 + $0xd4] ss:$8 sps:$4 sm:$0xff]  }
  0x3f   : > { %v2274_v22 = vld [vmem:[%s2430_s7 + $0x154] ss:$8 sps:$4 sm:$0xff]  }
  0x40   : > { %555 = vmatmul.mubr.bf16.vlgmr.msra.gmra.mrb[0].mxu0 %v2186_v19  ;;  %587 = vmatmul.mubr.bf16.vlgmr.msra.gmra.mrb[0].mxu1 %v2189_v20  ;;  %v2270_v19 = vld [vmem:[%s2430_s7 + $0xc0] ss:$8 sps:$4 sm:$0xff]  }
  0x41   : > { %1969 = vmatpush3.bf16.msra.mxu1 %v2194_v23  ;;  %2033 = vmatpush3.bf16.msra.mxu0 %v2195_v24  ;;  %v2271_v20 = vld [vmem:[%s2430_s7 + $0x140] ss:$8 sps:$4 sm:$0xff]   ;;  %v2276_v23 = vld [vmem:[%s2430_s7 + $0xd0] ss:$8 sps:$4 sm:$0xff]  }
  0x42   : > { %1970 = vmatprep.subr.bf16.mxu1 %v2196_v25  ;;  %2034 = vmatprep.subr.bf16.mxu0 %v2197_v26  ;;  %v2277_v24 = vld [vmem:[%s2430_s7 + $0x150] ss:$8 sps:$4 sm:$0xff]   ;;  %v2278_v25 = vld [vmem:[%s2430_s7 + $0xe4] ss:$8 sps:$4 sm:$0xff]  }
  0x43   : > { %562 = vmatprep.mubr.bf16.mxu0 %v2200_v27  ;;  %594 = vmatprep.mubr.bf16.mxu1 %v2202_v29  ;;  %v2280_v26 = vld [vmem:[%s2430_s7 + $0x164] ss:$8 sps:$4 sm:$0xff]   ;;  %v2282_v27 = vld [vmem:[%s2430_s7 + $0xe0] ss:$8 sps:$4 sm:$0xff]   ;;  %v2284_v29 = vld [vmem:[%s2430_s7 + $0xf4] ss:$8 sps:$4 sm:$0xff]  }
  0x45   : > { %1971 = vmatpush3.bf16.msra.mxu1 %v2198_v28  ;;  %2035 = vmatpush3.bf16.msra.mxu0 %v2199_v30  ;;  %v2283_v28 = vld [vmem:[%s2430_s7 + $0x160] ss:$8 sps:$4 sm:$0xff]   ;;  %v2286_v30 = vld [vmem:[%s2430_s7 + $0x174] ss:$8 sps:$4 sm:$0xff]  }
  0x46   : > { %1972 = vmatprep.subr.bf16.mxu1 %v2206_v31  ;;  %2036 = vmatprep.subr.bf16.mxu0 %v2207_v33  ;;  %v2288_v31 = vld [vmem:[%s2430_s7 + $0xf0] ss:$8 sps:$4 sm:$0xff]  }
  0x48   : > { %563 = vmatmul.mubr.bf16.gmra.mrb[4].mxu0 %v2204_v32  ;;  %595 = vmatmul.mubr.bf16.gmra.mrb[4].mxu1 %v2205_v34  ;;  %v2289_v32 = vld [vmem:[%s2430_s7 + $0x170] ss:$8 sps:$4 sm:$0xff]  }
  0x49   : > { %1973 = vmatpush3.bf16.msra.mxu1 %v2208_v35  ;;  %2037 = vmatpush3.bf16.msra.mxu0 %v2209_v36 }
  0x4a   : > { %1974 = vmatprep.subr.bf16.mxu1 %v2210_v37  ;;  %2038 = vmatprep.subr.bf16.mxu0 %v2211_v38 }
  0x4b   : > { %570 = vmatprep.mubr.bf16.mxu0 %v2214_v39  ;;  %602 = vmatprep.mubr.bf16.mxu1 %v2216_v41 }
  0x4d   : > { %1975 = vmatpush3.bf16.msra.mxu1 %v2212_v40  ;;  %2039 = vmatpush3.bf16.msra.mxu0 %v2213_v42 }
  0x4e   : > { %1976 = vmatprep.subr.bf16.mxu1 %v2220_v43  ;;  %2040 = vmatprep.subr.bf16.mxu0 %v2221_v46 }
  0x50   : > { %571 = vmatmul.mubr.bf16.gmra.mrb[8].mxu0 %v2218_v44  ;;  %603 = vmatmul.mubr.bf16.gmra.mrb[8].mxu1 %v2219_v45 }
  0x51   : > { %1977 = vmatpush3.bf16.msra.mxu1 %v2222_v47  ;;  %2041 = vmatpush3.bf16.msra.mxu0 %v2223_v48 }
  0x52   : > { %1978 = vmatprep.subr.bf16.mxu1 %v2224_v49  ;;  %2042 = vmatprep.subr.bf16.mxu0 %v2225_v50 }
  0x53   : > { %578 = vmatprep.mubr.bf16.mxu0 %v2228_v51  ;;  %610 = vmatprep.mubr.bf16.mxu1 %v2230_v52 }
  0x55   : > { %1979 = vmatpush3.bf16.msra.mxu1 %v2226_v53  ;;  %2043 = vmatpush3.bf16.msra.mxu0 %v2227_v54 }
  0x56   : > { %1980 = vmatprep.subr.bf16.mxu1 %v2234_v55  ;;  %2044 = vmatprep.subr.bf16.mxu0 %v2235_v58 }
  0x58   : > { %579 = vmatmul.mubr.bf16.gmra.mrb[12].mxu0 %v2232_v56  ;;  %611 = vmatmul.mubr.bf16.gmra.mrb[12].mxu1 %v2233_v57 }
  0x59   : > { %1981 = vmatpush3.bf16.msra.mxu1 %v2236_v59  ;;  %2045 = vmatpush3.bf16.msra.mxu0 %v2237_v60 }
  0x5a   : > { %1982 = vmatprep.subr.bf16.mxu1 %v2238_v61  ;;  %2046 = vmatprep.subr.bf16.mxu0 %v2239_v62 }
  0x5b   : > { %892 = vmatprep.mubr.bf16.mxu1 %v2244_v1  ;;  %1230 = vmatprep.mubr.bf16.mxu0 %v2247_v3 }
  0x5d   : > { %1983 = vmatpush3.bf16.msra.mxu1 %v2240_v63  ;;  %2047 = vmatpush3.bf16.msra.mxu0 %v2241_v0 }
  0x60   : > { %893 = vmatmul.mubr.bf16.vlgmr.msra.gmra.mrb[16].mxu1 %v2242_v2  ;;  %1231 = vmatmul.mubr.bf16.vlgmr.msra.gmra.mrb[16].mxu0 %v2245_v4 }
  0x61   : > { %900 = vmatprep.mubr.bf16.mxu1 %v2248_v5  ;;  %1238 = vmatprep.mubr.bf16.mxu0 %v2250_v6 }
  0x68   : > { %901 = vmatmul.mubr.bf16.gmra.mrb[20].mxu1 %v2252_v7  ;;  %1239 = vmatmul.mubr.bf16.gmra.mrb[20].mxu0 %v2253_v8 }
  0x69   : > { %908 = vmatprep.mubr.bf16.mxu1 %v2254_v9  ;;  %1246 = vmatprep.mubr.bf16.mxu0 %v2256_v10 }
  0x70   : > { %909 = vmatmul.mubr.bf16.gmra.mrb[24].mxu1 %v2258_v11  ;;  %1247 = vmatmul.mubr.bf16.gmra.mrb[24].mxu0 %v2259_v12 }
  0x71   : > { %916 = vmatprep.mubr.bf16.mxu1 %v2260_v13  ;;  %1254 = vmatprep.mubr.bf16.mxu0 %v2262_v14 }
  0x78   : > { %917 = vmatmul.mubr.bf16.gmra.mrb[28].mxu1 %v2264_v15  ;;  %1255 = vmatmul.mubr.bf16.gmra.mrb[28].mxu0 %v2265_v16 }
  0x79   : > { %924 = vmatprep.mubr.bf16.mxu1 %v2266_v17  ;;  %1262 = vmatprep.mubr.bf16.mxu0 %v2268_v18  ;;  %v282_v17 = vld [vmem:[#allocation2] sm:$0xff] }
  0x80   : > { %925 = vmatmul.mubr.bf16.gmra.mrb[32].mxu1 %v2270_v19  ;;  %1263 = vmatmul.mubr.bf16.gmra.mrb[32].mxu0 %v2271_v20  ;;  %v283_v20 = vld [vmem:[#allocation2 + $0x8] sm:$0xff] }
  0x81   : > { %932 = vmatprep.mubr.bf16.mxu1 %v2272_v21  ;;  %1270 = vmatprep.mubr.bf16.mxu0 %v2274_v22 }
  0x88   : > { %933 = vmatmul.mubr.bf16.gmra.mrb[36].mxu1 %v2276_v23  ;;  %1271 = vmatmul.mubr.bf16.gmra.mrb[36].mxu0 %v2277_v24 }
  0x89   : > { %940 = vmatprep.mubr.bf16.mxu1 %v2278_v25  ;;  %1278 = vmatprep.mubr.bf16.mxu0 %v2280_v26 }
  0x90   : > { %941 = vmatmul.mubr.bf16.gmra.mrb[40].mxu1 %v2282_v27  ;;  %1279 = vmatmul.mubr.bf16.gmra.mrb[40].mxu0 %v2283_v28 }
  0x91   : > { %948 = vmatprep.mubr.bf16.mxu1 %v2284_v29  ;;  %1286 = vmatprep.mubr.bf16.mxu0 %v2286_v30 }
  0x98   : > { %949 = vmatmul.mubr.bf16.gmra.mrb[44].mxu1 %v2288_v31  ;;  %1287 = vmatmul.mubr.bf16.gmra.mrb[44].mxu0 %v2289_v32 }
 0x113   : > { %v1920_v33 = vpop.f32.mrb[0].mxu0  ;;  %v1944_v34 = vpop.f32.mrb[0].mxu1 }
 0x114   : > { %v1921_v35 = vpop.f32.mrb[1].mxu0  ;;  %v1945_v36 = vpop.f32.mrb[1].mxu1 }
 0x115   : > { %v1922_v37 = vadd.f32 %v1921_v35, %v1920_v33  ;;  %v2541_v38 = vadd.f32 %v1945_v36, %v1944_v34  ;;  %v1923_v39 = vpop.f32.mrb[2].mxu0  ;;  %v1947_v40 = vpop.f32.mrb[2].mxu1  ;;  %v284_v36 = vld [vmem:[#allocation2 + $0x10] sm:$0xff] }
 0x116   : > { %v1924_v41 = vpop.f32.mrb[3].mxu0  ;;  %v1948_v42 = vpop.f32.mrb[3].mxu1 }
 0x117   : > { %v1925_v43 = vadd.f32 %v1924_v41, %v1923_v39  ;;  %v2543_v44 = vadd.f32 %v1948_v42, %v1947_v40  ;;  %v619_v23 = vadd.f32 %v1922_v37, %v282_v17  ;;  %v285_v42 = vld [vmem:[#allocation2 + $0x18] sm:$0xff] }
 0x119   : > { %v620_v30 = vadd.f32 %v1925_v43, %v283_v20 }
 0x11b   : > { %v1926_v45 = vpop.f32.mrb[4].mxu0  ;;  %v1950_v46 = vpop.f32.mrb[4].mxu1 }
 0x11c   : > { %v1927_v47 = vpop.f32.mrb[5].mxu0  ;;  %v1951_v48 = vpop.f32.mrb[5].mxu1 }
 0x11d   : > { %v1928_v49 = vadd.f32 %v1927_v47, %v1926_v45  ;;  %v2545_v50 = vadd.f32 %v1951_v48, %v1950_v46  ;;  %v1929_v51 = vpop.f32.mrb[6].mxu0  ;;  %v1953_v52 = vpop.f32.mrb[6].mxu1 }
 0x11e   : > { %v1930_v53 = vpop.f32.mrb[7].mxu0  ;;  %v1954_v54 = vpop.f32.mrb[7].mxu1 }
 0x11f   : > { %v1931_v55 = vadd.f32 %v1930_v53, %v1929_v51  ;;  %v2547_v56 = vadd.f32 %v1954_v54, %v1953_v52  ;;  %v621_v46 = vadd.f32 %v1928_v49, %v284_v36 }
 0x121   : > { %v622_v54 = vadd.f32 %v1931_v55, %v285_v42 }
 0x123   : > { %v1932_v57 = vpop.f32.mrb[8].mxu0  ;;  %v1956_v58 = vpop.f32.mrb[8].mxu1 }
 0x124   : > { %v1933_v59 = vpop.f32.mrb[9].mxu0  ;;  %v1957_v60 = vpop.f32.mrb[9].mxu1 }
 0x125   : > { %v2549_v61 = vadd.f32 %v1933_v59, %v1932_v57  ;;  %v2551_v62 = vadd.f32 %v1957_v60, %v1956_v58  ;;  %v1935_v63 = vpop.f32.mrb[10].mxu0  ;;  %v1959_v0 = vpop.f32.mrb[10].mxu1 }
 0x126   : > { %v1936_v1 = vpop.f32.mrb[11].mxu0  ;;  %v1960_v2 = vpop.f32.mrb[11].mxu1 }
 0x127   : > { %v2553_v3 = vadd.f32 %v1936_v1, %v1935_v63  ;;  %v2555_v4 = vadd.f32 %v1960_v2, %v1959_v0  ;;  %v286_v0 = vld [vmem:[#allocation2 + $0x20] sm:$0xff] }
 0x12b   : > { %v1938_v5 = vpop.f32.mrb[12].mxu0  ;;  %v1962_v6 = vpop.f32.mrb[12].mxu1 }
 0x12c   : > { %v1939_v7 = vpop.f32.mrb[13].mxu0  ;;  %v1963_v8 = vpop.f32.mrb[13].mxu1 }
 0x12d   : > { %v2557_v9 = vadd.f32 %v1939_v7, %v1938_v5  ;;  %v2559_v10 = vadd.f32 %v1963_v8, %v1962_v6  ;;  %v1941_v11 = vpop.f32.mrb[14].mxu0  ;;  %v1965_v12 = vpop.f32.mrb[14].mxu1  ;;  %v287_v6 = vld [vmem:[#allocation2 + $0x28] sm:$0xff]  ;;  %v623_v8 = vadd.f32 %v2549_v61, %v286_v0  ;;  %v289_v61 = vld [vmem:[#allocation2 + $0x38] sm:$0xff] }
 0x12e   : > { %v1942_v13 = vpop.f32.mrb[15].mxu0  ;;  %v1966_v14 = vpop.f32.mrb[15].mxu1 }
 0x12f   : > { %v2561_v15 = vadd.f32 %v1942_v13, %v1941_v11  ;;  %v2563_v16 = vadd.f32 %v1966_v14, %v1965_v12 }
 0x131   : > { %v626_v36 = vadd.f32 %v2561_v15, %v289_v61 }
 0x133   : > { %v1984_v18 = vpop.f32.mrb[16].mxu1  ;;  %v2048_v19 = vpop.f32.mrb[16].mxu0 }
 0x134   : > { %v1985_v21 = vpop.f32.mrb[17].mxu1  ;;  %v2049_v22 = vpop.f32.mrb[17].mxu0 }
 0x135   : > { %v1986_v24 = vadd.f32 %v1985_v21, %v1984_v18  ;;  %v2050_v25 = vadd.f32 %v2049_v22, %v2048_v19  ;;  %v1987_v26 = vpop.f32.mrb[18].mxu1  ;;  %v2051_v27 = vpop.f32.mrb[18].mxu0  ;;  %v624_v18 = vadd.f32 %v2553_v3, %v287_v6  ;;  %v292_v6 = vld [vmem:[#allocation2 + $0x50] sm:$0xff] }
 0x136   : > { %v1988_v28 = vpop.f32.mrb[19].mxu1  ;;  %v2052_v29 = vpop.f32.mrb[19].mxu0 }
 0x137   : > { %v957_v31 = vadd.f32 %v1986_v24, %v619_v23  ;;  %v1989_v32 = vadd.f32 %v1988_v28, %v1987_v26  ;;  %v2053_v33 = vadd.f32 %v2052_v29, %v2051_v27  ;;  %v288_v24 = vld [vmem:[#allocation2 + $0x30] sm:$0xff] }
 0x139   : > { %v1295_v34 = vadd.f32 %v2050_v25, %v957_v31  ;;  %v958_v35 = vadd.f32 %v1989_v32, %v620_v30  ;;  %v625_v30 = vadd.f32 %v2557_v9, %v288_v24  ;;  %v291_v9 = vld [vmem:[#allocation2 + $0x48] sm:$0xff] }
 0x13b   : > { %1311 = vst [vmem:[#allocation2] sm:$0xff] %v1295_v34  ;;  %v1296_v39 = vadd.f32 %v2053_v33, %v958_v35  ;;  %v1990_v40 = vpop.f32.mrb[20].mxu1  ;;  %v2054_v41 = vpop.f32.mrb[20].mxu0 }
 0x13c   : > { %v1991_v45 = vpop.f32.mrb[21].mxu1  ;;  %v2055_v37 = vpop.f32.mrb[21].mxu0 }
 0x13d   : > { %1312 = vst [vmem:[#allocation2 + $0x8] sm:$0xff] %v1296_v39  ;;  %v1992_v47 = vadd.f32 %v1991_v45, %v1990_v40  ;;  %v2056_v48 = vadd.f32 %v2055_v37, %v2054_v41  ;;  %v1993_v51 = vpop.f32.mrb[22].mxu1  ;;  %v2057_v52 = vpop.f32.mrb[22].mxu0  ;;  %v290_v37 = vld [vmem:[#allocation2 + $0x40] sm:$0xff] }
 0x13e   : > { %v1994_v43 = vpop.f32.mrb[23].mxu1  ;;  %v2058_v53 = vpop.f32.mrb[23].mxu0 }
 0x13f   : > { %v959_v57 = vadd.f32 %v1992_v47, %v621_v46  ;;  %v1995_v58 = vadd.f32 %v1994_v43, %v1993_v51  ;;  %v2059_v59 = vadd.f32 %v2058_v53, %v2057_v52  ;;  %v627_v43 = vadd.f32 %v2541_v38, %v290_v37  ;;  %v293_v38 = vld [vmem:[#allocation2 + $0x58] sm:$0xff]  ;;  %v296_v37 = vld [vmem:[#allocation2 + $0x70] sm:$0xff] }
 0x141   : > { %v1297_v60 = vadd.f32 %v2056_v48, %v959_v57  ;;  %v960_v63 = vadd.f32 %v1995_v58, %v622_v54 }
 0x143   : > { %1313 = vst [vmem:[#allocation2 + $0x10] sm:$0xff] %v1297_v60  ;;  %v1298_v1 = vadd.f32 %v2059_v59, %v960_v63  ;;  %v1996_v2 = vpop.f32.mrb[24].mxu1  ;;  %v2060_v5 = vpop.f32.mrb[24].mxu0  ;;  %v628_v60 = vadd.f32 %v2543_v44, %v291_v9 }
 0x144   : > { %v1997_v49 = vpop.f32.mrb[25].mxu1  ;;  %v2061_v7 = vpop.f32.mrb[25].mxu0 }
 0x145   : > { %1314 = vst [vmem:[#allocation2 + $0x18] sm:$0xff] %v1298_v1  ;;  %v1998_v11 = vadd.f32 %v1997_v49, %v1996_v2  ;;  %v2062_v12 = vadd.f32 %v2061_v7, %v2060_v5  ;;  %v1999_v13 = vpop.f32.mrb[26].mxu1  ;;  %v2063_v55 = vpop.f32.mrb[26].mxu0 }
 0x146   : > { %v2000_v14 = vpop.f32.mrb[27].mxu1  ;;  %v2064_v17 = vpop.f32.mrb[27].mxu0 }
 0x147   : > { %v961_v19 = vadd.f32 %v1998_v11, %v623_v8  ;;  %v2001_v20 = vadd.f32 %v2000_v14, %v1999_v13  ;;  %v2065_v21 = vadd.f32 %v2064_v17, %v2063_v55  ;;  %v629_v13 = vadd.f32 %v2545_v50, %v292_v6  ;;  %v295_v50 = vld [vmem:[#allocation2 + $0x68] sm:$0xff]  ;;  %v1819_v6 = vld [vmem:[%s259_s11] ss:$0 sm:$0xff] (!%p1818_p13) }
 0x149   : > { %v1299_v22 = vadd.f32 %v2062_v12, %v961_v19  ;;  %v962_v23 = vadd.f32 %v2001_v20, %v624_v18  ;;  %v630_v20 = vadd.f32 %v2547_v56, %v293_v38 }
 0x14b   : > { %1315 = vst [vmem:[#allocation2 + $0x20] sm:$0xff] %v1299_v22  ;;  %v1300_v25 = vadd.f32 %v2065_v21, %v962_v23  ;;  %v2002_v26 = vpop.f32.mrb[28].mxu1  ;;  %v2066_v27 = vpop.f32.mrb[28].mxu0 }
 0x14c   : > { %v2003_v28 = vpop.f32.mrb[29].mxu1  ;;  %v2067_v29 = vpop.f32.mrb[29].mxu0 }
 0x14d   : > { %1316 = vst [vmem:[#allocation2 + $0x28] sm:$0xff] %v1300_v25  ;;  %v2004_v31 = vadd.f32 %v2003_v28, %v2002_v26  ;;  %v2068_v32 = vadd.f32 %v2067_v29, %v2066_v27  ;;  %v2005_v33 = vpop.f32.mrb[30].mxu1  ;;  %v2069_v3 = vpop.f32.mrb[30].mxu0  ;;  %v294_v26 = vld [vmem:[#allocation2 + $0x60] sm:$0xff] }
 0x14e   : > { %v2006_v34 = vpop.f32.mrb[31].mxu1  ;;  %v2070_v35 = vpop.f32.mrb[31].mxu0 }
 0x14f   : > { %v963_v39 = vadd.f32 %v2004_v31, %v625_v30  ;;  %v2007_v40 = vadd.f32 %v2006_v34, %v2005_v33  ;;  %v2071_v41 = vadd.f32 %v2070_v35, %v2069_v3  ;;  %v631_v31 = vadd.f32 %v2551_v62, %v294_v26  ;;  %v297_v62 = vld [vmem:[#allocation2 + $0x78] sm:$0xff] }
 0x151   : > { %v1301_v42 = vadd.f32 %v2068_v32, %v963_v39  ;;  %v964_v45 = vadd.f32 %v2007_v40, %v626_v36  ;;  %v632_v36 = vadd.f32 %v2555_v4, %v295_v50 }
 0x152   : > { %v1335_v38 = vld [vmem:[#allocation2 + $0x20] sm:$0xff] (!%p1818_p13) }
 0x153   : > { %1317 = vst [vmem:[#allocation2 + $0x30] sm:$0xff] %v1301_v42  ;;  %v1302_v46 = vadd.f32 %v2071_v41, %v964_v45  ;;  %v2008_v47 = vpop.f32.mrb[32].mxu1  ;;  %v2072_v48 = vpop.f32.mrb[32].mxu0 }
 0x154   : > { %v2009_v51 = vpop.f32.mrb[33].mxu1  ;;  %v2073_v52 = vpop.f32.mrb[33].mxu0 }
 0x155   : > { %1318 = vst [vmem:[#allocation2 + $0x38] sm:$0xff] %v1302_v46  ;;  %v2010_v53 = vadd.f32 %v2009_v51, %v2008_v47  ;;  %v2074_v54 = vadd.f32 %v2073_v52, %v2072_v48  ;;  %v2011_v57 = vpop.f32.mrb[34].mxu1  ;;  %v2075_v15 = vpop.f32.mrb[34].mxu0  ;;  %v633_v52 = vadd.f32 %v2559_v10, %v296_v37  ;;  %v1331_v10 = vld [vmem:[#allocation2] sm:$0xff] (!%p1818_p13) }
 0x156   : > { %v2012_v58 = vpop.f32.mrb[35].mxu1  ;;  %v2076_v59 = vpop.f32.mrb[35].mxu0 }
 0x157   : > { %v965_v63 = vadd.f32 %v2010_v53, %v627_v43  ;;  %v2013_v0 = vadd.f32 %v2012_v58, %v2011_v57  ;;  %v2077_v1 = vadd.f32 %v2076_v59, %v2075_v15  ;;  %v634_v58 = vadd.f32 %v2563_v16, %v297_v62 }
 0x158   : > { %v1354_v16 = vadd.f32 (!%p1818_p13), %v1819_v6, %v1331_v10 }
 0x159   : > { %v1303_v2 = vadd.f32 %v2074_v54, %v965_v63  ;;  %v966_v5 = vadd.f32 %v2013_v0, %v628_v60 }
 0x15b   : > { %1319 = vst [vmem:[#allocation2 + $0x40] sm:$0xff] %v1303_v2  ;;  %v1304_v49 = vadd.f32 %v2077_v1, %v966_v5  ;;  %v2014_v7 = vpop.f32.mrb[36].mxu1  ;;  %v2078_v8 = vpop.f32.mrb[36].mxu0  ;;  %v1332_v5 = vld [vmem:[#allocation2 + $0x8] sm:$0xff] (!%p1818_p13) }
 0x15c   : > { %v2015_v11 = vpop.f32.mrb[37].mxu1  ;;  %v2079_v12 = vpop.f32.mrb[37].mxu0 }
 0x15d   : > { %1320 = vst [vmem:[#allocation2 + $0x48] sm:$0xff] %v1304_v49  ;;  %v2016_v55 = vadd.f32 %v2015_v11, %v2014_v7  ;;  %v2080_v14 = vadd.f32 %v2079_v12, %v2078_v8  ;;  %v2017_v17 = vpop.f32.mrb[38].mxu1  ;;  %v2081_v44 = vpop.f32.mrb[38].mxu0  ;;  %v1355_v49 = vadd.f32 (!%p1818_p13), %v1819_v6, %v1332_v5  ;;  %v1333_v7 = vld [vmem:[#allocation2 + $0x10] sm:$0xff] (!%p1818_p13)  ;;  %v1334_v8 = vld [vmem:[#allocation2 + $0x18] sm:$0xff] (!%p1818_p13) }
 0x15e   : > { %v2018_v18 = vpop.f32.mrb[39].mxu1  ;;  %v2082_v19 = vpop.f32.mrb[39].mxu0  ;;  %v1356_v11 = vadd.f32 (!%p1818_p13), %v1819_v6, %v1333_v7  ;;  %v1357_v12 = vadd.f32 (!%p1818_p13), %v1819_v6, %v1334_v8 }
 0x15f   : > { %v967_v21 = vadd.f32 %v2016_v55, %v629_v13  ;;  %v2019_v22 = vadd.f32 %v2018_v18, %v2017_v17  ;;  %v2083_v23 = vadd.f32 %v2082_v19, %v2081_v44  ;;  %v1336_v13 = vld [vmem:[#allocation2 + $0x28] sm:$0xff] (!%p1818_p13)  ;;  %v1358_v55 = vadd.f32 (!%p1818_p13), %v1819_v6, %v1335_v38  ;;  %v1338_v17 = vld [vmem:[#allocation2 + $0x38] sm:$0xff] (!%p1818_p13) }
 0x160   : > { %v1370_v44 = vmax.f32 (!%p1818_p13), %v1354_v16, 0.0  ;;  %v1371_v18 = vmax.f32 (!%p1818_p13), %v1355_v49, 0.0  ;;  %v1359_v19 = vadd.f32 (!%p1818_p13), %v1819_v6, %v1336_v13 }
 0x161   : > { %v1305_v24 = vadd.f32 %v2080_v14, %v967_v21  ;;  %v968_v25 = vadd.f32 %v2019_v22, %v630_v20  ;;  %v1337_v14 = vld [vmem:[#allocation2 + $0x30] sm:$0xff] (!%p1818_p13)  ;;  %v1374_v26 = vmax.f32 (!%p1818_p13), %v1358_v55, 0.0 }
 0x162   : > { %v1360_v20 = vadd.f32 (!%p1818_p13), %v1819_v6, %v1337_v14  ;;  %v1339_v21 = vld [vmem:[#allocation2 + $0x40] sm:$0xff] (!%p1818_p13)  ;;  %v1860_v50 = vpack.c.bf16 (!%p1818_p13), %v1371_v18, %v1370_v44 }
 0x163   : > { %1321 = vst [vmem:[#allocation2 + $0x50] sm:$0xff] %v1305_v24  ;;  %v1306_v27 = vadd.f32 %v2083_v23, %v968_v25  ;;  %v2020_v61 = vpop.f32.mrb[40].mxu1  ;;  %v2084_v28 = vpop.f32.mrb[40].mxu0  ;;  %v1372_v24 = vmax.f32 (!%p1818_p13), %v1356_v11, 0.0  ;;  %v1373_v25 = vmax.f32 (!%p1818_p13), %v1357_v12, 0.0 }
 0x164   : > { %v2021_v29 = vpop.f32.mrb[41].mxu1  ;;  %v2085_v30 = vpop.f32.mrb[41].mxu0  ;;  %v1340_v22 = vld [vmem:[#allocation2 + $0x48] sm:$0xff] (!%p1818_p13)  ;;  %1861 = vst [vmem:[%s2442_s20] sm:$0xff] (!%p1818_p13), %v1860_v50  }
 0x165   : > { %1322 = vst [vmem:[#allocation2 + $0x58] sm:$0xff] %v1306_v27  ;;  %v2022_v32 = vadd.f32 %v2021_v29, %v2020_v61  ;;  %v2086_v33 = vadd.f32 %v2085_v30, %v2084_v28  ;;  %v2023_v3 = vpop.f32.mrb[42].mxu1  ;;  %v2087_v56 = vpop.f32.mrb[42].mxu0  ;;  %v1361_v27 = vadd.f32 (!%p1818_p13), %v1819_v6, %v1338_v17  ;;  %v1375_v29 = vmax.f32 (!%p1818_p13), %v1359_v19, 0.0 }
 0x166   : > { %v2024_v34 = vpop.f32.mrb[43].mxu1  ;;  %v2088_v35 = vpop.f32.mrb[43].mxu0  ;;  %v1376_v30 = vmax.f32 (!%p1818_p13), %v1360_v20, 0.0 }
 0x167   : > { %v969_v39 = vadd.f32 %v2022_v32, %v631_v31  ;;  %v2025_v40 = vadd.f32 %v2024_v34, %v2023_v3  ;;  %v2089_v41 = vadd.f32 %v2088_v35, %v2087_v56  ;;  %v1362_v31 = vadd.f32 (!%p1818_p13), %v1819_v6, %v1339_v21 }
 0x168   : > { %v1377_v3 = vmax.f32 (!%p1818_p13), %v1361_v27, 0.0  ;;  %v1363_v56 = vadd.f32 (!%p1818_p13), %v1819_v6, %v1340_v22 }
 0x169   : > { %v1307_v42 = vadd.f32 %v2086_v33, %v969_v39  ;;  %v970_v45 = vadd.f32 %v2025_v40, %v632_v36  ;;  %v1865_v33 = vpack.c.bf16 (!%p1818_p13), %v1373_v25, %v1372_v24  ;;  %v1870_v39 = vpack.c.bf16 (!%p1818_p13), %v1375_v29, %v1374_v26 }
 0x16a   : > { %v1341_v23 = vld [vmem:[#allocation2 + $0x50] sm:$0xff] (!%p1818_p13)  ;;  %v1378_v40 = vmax.f32 (!%p1818_p13), %v1362_v31, 0.0  ;;  %v1379_v37 = vmax.f32 (!%p1818_p13), %v1363_v56, 0.0 }
 0x16b   : > { %1323 = vst [vmem:[#allocation2 + $0x60] sm:$0xff] %v1307_v42  ;;  %v1308_v46 = vadd.f32 %v2089_v41, %v970_v45  ;;  %v2026_v47 = vpop.f32.mrb[44].mxu1  ;;  %v2090_v48 = vpop.f32.mrb[44].mxu0  ;;  %v1364_v34 = vadd.f32 (!%p1818_p13), %v1819_v6, %v1341_v23  ;;  %1897 = vst [vmem:[%s2442_s20 + $0x8] sm:$0xff] (!%p1818_p13), %v1865_v33   ;;  %v1875_v45 = vpack.c.bf16 (!%p1818_p13), %v1377_v3, %v1376_v30 }
 0x16c   : > { %v2027_v9 = vpop.f32.mrb[45].mxu1  ;;  %v2091_v51 = vpop.f32.mrb[45].mxu0  ;;  %v1342_v61 = vld [vmem:[#allocation2 + $0x58] sm:$0xff] (!%p1818_p13)  ;;  %1898 = vst [vmem:[%s2442_s20 + $0x10] sm:$0xff] (!%p1818_p13), %v1870_v39  }
 0x16d   : > { %1324 = vst [vmem:[#allocation2 + $0x68] sm:$0xff] %v1308_v46  ;;  %v2028_v43 = vadd.f32 %v2027_v9, %v2026_v47  ;;  %v2092_v53 = vadd.f32 %v2091_v51, %v2090_v48  ;;  %v2029_v54 = vpop.f32.mrb[46].mxu1  ;;  %v2093_v4 = vpop.f32.mrb[46].mxu0  ;;  %v1365_v41 = vadd.f32 (!%p1818_p13), %v1819_v6, %v1342_v61  ;;  %v1380_v46 = vmax.f32 (!%p1818_p13), %v1364_v34, 0.0  ;;  %1899 = vst [vmem:[%s2442_s20 + $0x18] sm:$0xff] (!%p1818_p13), %v1875_v45  }
 0x16e   : > { %v2030_v57 = vpop.f32.mrb[47].mxu1  ;;  %v2094_v15 = vpop.f32.mrb[47].mxu0 }
 0x16f   : > { %v971_v59 = vadd.f32 %v2028_v43, %v633_v52  ;;  %v2031_v60 = vadd.f32 %v2030_v57, %v2029_v54  ;;  %v2095_v63 = vadd.f32 %v2094_v15, %v2093_v4  ;;  %1330 = sbr.rel (%p1818_p13) target bundleno = 388 (0x184), region = 40  ;;  %v1381_v48 = vmax.f32 (!%p1818_p13), %v1365_v41, 0.0 }
 0x170   : > { %v1880_v52 = vpack.c.bf16 (!%p1818_p13), %v1379_v37, %v1378_v40 }
 0x171   : > { %v1309_v0 = vadd.f32 %v2092_v53, %v971_v59  ;;  %v972_v1 = vadd.f32 %v2031_v60, %v634_v58  ;;  %v1885_v53 = vpack.c.bf16 (!%p1818_p13), %v1381_v48, %v1380_v46 }
 0x172   : > { %v1343_v28 = vld [vmem:[#allocation2 + $0x60] sm:$0xff] (!%p1818_p13)  ;;  %1900 = vst [vmem:[%s2442_s20 + $0x20] sm:$0xff] (!%p1818_p13), %v1880_v52  }
 0x173   : > { %1325 = vst [vmem:[#allocation2 + $0x70] sm:$0xff] %v1309_v0  ;;  %v1310_v2 = vadd.f32 %v2095_v63, %v972_v1  ;;  %v1366_v42 = vadd.f32 (!%p1818_p13), %v1819_v6, %v1343_v28  ;;  %1901 = vst [vmem:[%s2442_s20 + $0x28] sm:$0xff] (!%p1818_p13), %v1885_v53  }
 0x174   : > { %v1344_v32 = vld [vmem:[#allocation2 + $0x68] sm:$0xff] (!%p1818_p13) }
 0x175   : > { %1326 = vst [vmem:[#allocation2 + $0x78] sm:$0xff] %v1310_v2  ;;  %v1367_v47 = vadd.f32 (!%p1818_p13), %v1819_v6, %v1344_v32  ;;  %v1382_v62 = vmax.f32 (!%p1818_p13), %v1366_v42, 0.0 }
 0x177   : > { %v1383_v43 = vmax.f32 %v1367_v47, 0.0 }
 0x179   : > { %v1890_v57 = vpack.c.bf16 %v1383_v43, %v1382_v62 }
 0x17a   : > { %v1345_v35 = vld [vmem:[#allocation2 + $0x70] sm:$0xff] }
 0x17b   : > { %v1368_v9 = vadd.f32 %v1819_v6, %v1345_v35  ;;  %1902 = vst [vmem:[%s2442_s20 + $0x30] sm:$0xff] %v1890_v57  }
 0x17c   : > { %v1346_v36 = vld [vmem:[#allocation2 + $0x78] sm:$0xff] }
 0x17d   : > { %v1369_v51 = vadd.f32 %v1819_v6, %v1346_v36  ;;  %v1384_v54 = vmax.f32 %v1368_v9, 0.0 }
 0x17f   : > { %v1385_v4 = vmax.f32 %v1369_v51, 0.0 }
 0x181   : > { %v1895_v15 = vpack.c.bf16 %v1385_v4, %v1384_v54 }
 0x183   : > { %1903 = vst [vmem:[%s2442_s20 + $0x38] sm:$0xff] %v1895_v15  }
 0x184 PF: > { %1472 = sbr.rel (!%p2409_p6) target bundleno = 400 (0x190), region = 44  ;;  %s1837_s14 = sshll.u32 (%p2409_p6), %s2332_s15, 2  ;;  %v1493_v58 = vld [vmem:[%s2442_s20] sm:$0xf] (%p2409_p6)  ;;  %v1495_v59 = vld [vmem:[%s2442_s20 + $0x4] sm:$0xf] (%p2409_p6) }
 0x185   : > { %s1477_s4 = scalar_lea.vmem (%p2409_p6), %s2637_s3, %s1837_s14  ;;  %v1497_v60 = vld [vmem:[%s2442_s20 + $0x8] sm:$0xf] (%p2409_p6)  ;;  %v1499_v63 = vld [vmem:[%s2442_s20 + $0xc] sm:$0xf] (%p2409_p6)  ;;  %v1501_v0 = vld [vmem:[%s2442_s20 + $0x10] sm:$0xf] (%p2409_p6) }
 0x186   : > { %1494 = vst [vmem:[%s1477_s4] sm:$0xf] (%p2409_p6), %v1493_v58  ;;  %1496 = vst [vmem:[%s1477_s4 + $0x8] sm:$0xf] (%p2409_p6), %v1495_v59  ;;  %v1503_v1 = vld [vmem:[%s2442_s20 + $0x14] sm:$0xf] (%p2409_p6) }
 0x187   : > { %1498 = vst [vmem:[%s1477_s4 + $0x10] sm:$0xf] (%p2409_p6), %v1497_v60  ;;  %1500 = vst [vmem:[%s1477_s4 + $0x18] sm:$0xf] (%p2409_p6), %v1499_v63  ;;  %v1505_v2 = vld [vmem:[%s2442_s20 + $0x18] sm:$0xf] (%p2409_p6) }
 0x188   : > { %1502 = vst [vmem:[%s1477_s4 + $0x20] sm:$0xf] (%p2409_p6), %v1501_v0  ;;  %v1507_v10 = vld [vmem:[%s2442_s20 + $0x1c] sm:$0xf] (%p2409_p6)  ;;  %1504 = vst [vmem:[%s1477_s4 + $0x28] sm:$0xf] (%p2409_p6), %v1503_v1 }
 0x189   : > { %1506 = vst [vmem:[%s1477_s4 + $0x30] sm:$0xf] (%p2409_p6), %v1505_v2  ;;  %1508 = vst [vmem:[%s1477_s4 + $0x38] sm:$0xf] (%p2409_p6), %v1507_v10  ;;  %v1509_v5 = vld [vmem:[%s2442_s20 + $0x20] sm:$0xf] (%p2409_p6) }
 0x18a   : > { %v1511_v6 = vld [vmem:[%s2442_s20 + $0x24] sm:$0xf] (%p2409_p6)  ;;  %v1513_v16 = vld [vmem:[%s2442_s20 + $0x28] sm:$0xf] (%p2409_p6)  ;;  %1510 = vst [vmem:[%s1477_s4 + $0x40] sm:$0xf] (%p2409_p6), %v1509_v5 }
 0x18b   : > { %1512 = vst [vmem:[%s1477_s4 + $0x48] sm:$0xf] %v1511_v6  ;;  %1514 = vst [vmem:[%s1477_s4 + $0x50] sm:$0xf] %v1513_v16  ;;  %v1515_v49 = vld [vmem:[%s2442_s20 + $0x2c] sm:$0xf] }
 0x18c   : > { %v1517_v7 = vld [vmem:[%s2442_s20 + $0x30] sm:$0xf]  ;;  %v1519_v8 = vld [vmem:[%s2442_s20 + $0x34] sm:$0xf]  ;;  %1516 = vst [vmem:[%s1477_s4 + $0x58] sm:$0xf] %v1515_v49 }
 0x18d   : > { %1518 = vst [vmem:[%s1477_s4 + $0x60] sm:$0xf] %v1517_v7  ;;  %1520 = vst [vmem:[%s1477_s4 + $0x68] sm:$0xf] %v1519_v8  ;;  %v1521_v38 = vld [vmem:[%s2442_s20 + $0x38] sm:$0xf] }
 0x18e   : > { %v1523_v11 = vld [vmem:[%s2442_s20 + $0x3c] sm:$0xf]  ;;  %1522 = vst [vmem:[%s1477_s4 + $0x70] sm:$0xf] %v1521_v38 }
 0x18f   : > { %1524 = vst [vmem:[%s1477_s4 + $0x78] sm:$0xf] %v1523_v11 }
 0x190 PF: > { %s13_s18 = sadd.s32 1, %s2344_s18   ;;  %s2641_s22 = sld [smem:[#allocation4_spill]] }
 0x191   : > { %p10_p0 = scmp.ge.s32.totalorder %s13_s18, 8   ;;  %s2642_s12 = smov %s2324_s13 }
 0x192   : > { %s2643_s13 = smov %s2419_s25  ;;  %s2644_s14 = smov %s2336_s16 }
 0x193   : > { %s2645_s15 = smov %s2340_s17  ;;  %s2646_s16 = smov %s2649_s19 }
 0x194   :  { %12 = sbr.rel (!%p10_p0) target bundleno = 4 (0x4), region = 119 }
 0x196   : > { %s2647_s17 = smov %s2641_s22 }

// kernel: chessnet_forward.21
= control target key start
LH: loop header
LB: loop body
LE: loop exit
PB: predicated region body
PF: predicated region fallthrough
CT: control target
= control target key end

     0   :  { %8 = vsyncpa [#allocation4], 0  ;;  %s12522_s0 = inlined_call_operand.vmem [shape: bf16[1,8,8192], index: 0, kind: input, shape index: {}]   ;;  %s12523_s1 = inlined_call_operand.hbm [shape: bf16[19,8192,256], index: 1, kind: input, shape index: {}]   ;;  %s12524_s2 = inlined_call_operand.vmem [shape: f32[1,4864], index: 2, kind: input, shape index: {}]   ;;  %s12525_s3 = inlined_call_operand.vmem [shape: f32[8,4864], index: 3, kind: output, shape index: {}]  }
   0x1   :  { %10 = vsyncpa [#allocation4 + $0x1], 0  ;;  %s11022_s12 = smov 0   ;;  %s11024_s13 = smov 0  }
   0x2   :  { %s11026_s14 = smov 0   ;;  %s11028_s15 = smov 0  }
   0x3   :  { %s11030_s16 = smov 0   ;;  %s11032_s17 = smov 0  }
   0x4 LB: > { %s8156_s18 = sadd.s32 4294967295, %s10997_s17   ;;  %s31_s19 = sadd.s32 1, %s10993_s16  ;;  %s10997_s17 = sphi %s11032_s17, %s16_s17   ;;  %s10993_s16 = sphi %s11030_s16, %s12533_s16   ;;  %s10989_s15 = sphi %s11028_s15, %s12532_s15   ;;  %s10985_s14 = sphi %s11026_s14, %s12531_s14   ;;  %s10981_s13 = sphi %s11024_s13, %s12530_s13   ;;  %s10977_s12 = sphi %s11022_s12, %s12529_s12  }
   0x5   : > { %p33_p0 = scmp.ge.s32.totalorder %s31_s19, 19  ;;  %s72_s20 = sadd.s32 1, %s10985_s14 }
   0x6   : > { %p79_p1 = scmp.ne.s32.totalorder %s10985_s14, %s10981_s13  ;;  %p80_p2 = scmp.eq.s32.totalorder %s10997_s17, 0 }
   0x7   : > { %s12535_s19 = smov (%p33_p0, %s31_s19), 0  ;;  %p85_p4 = scmp.ne.s32.totalorder %s10981_s13, %s10977_s12 }
   0x8   : > { %p11058_p3 = por %p80_p2, %p79_p1  ;;  %s67_s22 = ssub.s32 %s10993_s16, %s12535_s19 }
   0x9   : > { %p86_p5 = scmp.eq.s32.totalorder %s8156_s18, 0  ;;  %p70_p6 = scmp.eq.s32.totalorder %s67_s22, 0 }
   0xa   : > { %p9266_p8 = scmp.lt.s32.totalorder %s10997_s17, 19  ;;  %s175_s25 = sand.u32 1, %s10985_s14  }
   0xb   : > { %p11065_p7 = por %p86_p5, %p85_p4  ;;  %s9259_s26 = sshll.u32 %s10993_s16, 17 }
   0xc   : > { %s11071_s24 = scalar_select %p70_p6, %s10985_s14, %s72_s20  }
   0xd   : > { %s8161_s27 = sshll.u32 %s175_s25, 13  ;;  %s11078_s30 = scalar_lea.hbm %s12523_s1, %s9259_s26 }
   0xe   : > { %s179_s4 = scalar_lea.vmem [#allocation3], %s8161_s27  ;;  %p11082_p9 = pnand %p9266_p8, %p11058_p3 }
   0xf   : > { %s189_s5 = sshll.u32 %s179_s4, 4  ;;  %s11088_s7 = scalar_lea.sflag [#allocation4], %s175_s25  ;;  %s11086_s5 = int_to_ptr.vmem [resolvable:$true] %s189_s5 }
  0x10   : > { %s10917_s8 = scalar_lea.hbm %s11078_s30, 131072  ;;  %p10919_p11 = pneg %p11082_p9 }
  0x11   : > { %p10918_p10 = scmp.ne.s32.totalorder %s11078_s30, %s10917_s8  ;;  %s10922_s11 = scalar_lea.hbm %s12523_s1, 2490368 }
  0x12   : > { %p10923_p0 = scmp.lt.u32.totalorder %s11078_s30, %s12523_s1  ;;  %p10924_p1 = scmp.lt.u32.totalorder %s10922_s11, %s10917_s8 }
  0x13   : > { %p10920_p12 = pnand %p10919_p11, %p10918_p10  ;;  %p10926_p3 = scmp.lt.u32.totalorder %s10917_s8, %s11078_s30 }
  0x14   : > { %p10925_p2 = por %p10924_p1, %p10923_p0 }
  0x15   : > { %p10921_p13 = pneg %p10920_p12 }
  0x16   : > { %p10927_p4 = por %p10926_p3, %p10925_p2 }
  0x18   : > { %p10928_p5 = pnand %p10927_p4, %p10921_p13 }
  0x1a   : > { %10931 = shalt.err (!%p10928_p5)
}
  0x1b   : > { %s10932_s20 = scalar_lea.vmem %s11086_s5, 131072  ;;  %s10999_s21 = smov [#allocation3]  }
  0x1c   : > { %p10933_p6 = scmp.ne.s32.totalorder %s11086_s5, %s10932_s20  ;;  %s10937_s22 = sshll.u32 %s10999_s21, 4  ;;  %s10938_s22 = int_to_ptr.vmem [resolvable:$false] %s10937_s22 }
  0x1d   : > { %s10939_s25 = scalar_lea.vmem %s10938_s22, 262144  ;;  %p10940_p12 = scmp.lt.s32.totalorder %s11086_s5, %s10938_s22 }
  0x1e   : > { %p10935_p8 = pnand %p10933_p6, %p10919_p11  ;;  %p10941_p0 = scmp.lt.s32.totalorder %s10939_s25, %s10932_s20 }
  0x20   : > { %p10936_p10 = pneg %p10935_p8  ;;  %p10942_p1 = por %p10941_p0, %p10940_p12 }
  0x22   : > { %p10943_p2 = pnand %p10942_p1, %p10936_p10 }
  0x24   : > { %10946 = shalt.err (!%p10943_p2)
}
  0x25   : > { %s11000_s26 = smov 128   ;;  %s11001_s27 = smov 8  }
  0x26   : > { %9265 = dma.hbm_to_vmem [thread:$0]  (!%p11082_p9), %s11078_s30, 131072, %s11086_s5, %s11088_s7, %s11000_s26, %s11000_s26, %s11001_s27  }
  0x27   : > { %p8164_p11 = scmp.ge.s32.totalorder %s10997_s17, 1  ;;  %p205_p13 = scmp.lt.s32.totalorder %s10997_s17, 20 }
  0x29   : > { %p206_p3 = pnand %p8164_p11, %p205_p13 }
  0x2a   : > { %s211_s28 = sand.u32 (!%p206_p3), 1, %s10981_s13  }
  0x2b   : > { %209 = sbr.rel (%p206_p3) target bundleno = 1296 (0x510), region = 32  ;;  %s8165_s29 = sshll.u32 (!%p206_p3), %s211_s28, 13 }
  0x2c   : > { %s212_s4 = scalar_lea.sflag (!%p206_p3), [#allocation4], %s211_s28  ;;  %s11119_s8 = scalar_lea.vmem (!%p206_p3), [#allocation3], %s8165_s29 }
  0x32   : > { %10972 = dma.done.wait (%p11065_p7), %s212_s4, 131072  }
  0x33   : > { %10974 = vsyncadd (%p11065_p7), %s212_s4, 4294836224  ;;  %v9317_v0 = vld [vmem:[%s11119_s8 + $0x4] ss:$8 sps:$4 sm:$0xff]   ;;  %v9321_v2 = vld [vmem:[%s11119_s8] ss:$8 sps:$4 sm:$0xff]  }
  0x34   : > { %v9319_v1 = vld [vmem:[%s11119_s8 + $0x104] ss:$8 sps:$4 sm:$0xff]   ;;  %6688 = vmatprep.subr.bf16.mxu0 %v9317_v0  ;;  %v9322_v3 = vld [vmem:[%s11119_s8 + $0x100] ss:$8 sps:$4 sm:$0xff]   ;;  %v9323_v4 = vld [vmem:[%s11119_s8 + $0x14] ss:$8 sps:$4 sm:$0xff]  }
  0x35   : > { %6729 = vmatprep.subr.bf16.mxu1 %v9319_v1  ;;  %6689 = vmatpush1.bf16.msra.mxu0 %v9321_v2  ;;  %v9325_v5 = vld [vmem:[%s11119_s8 + $0x114] ss:$8 sps:$4 sm:$0xff]   ;;  %v9327_v6 = vld [vmem:[%s11119_s8 + $0x10] ss:$8 sps:$4 sm:$0xff]   ;;  %v9329_v8 = vld [vmem:[%s11119_s8 + $0x24] ss:$8 sps:$4 sm:$0xff]  }
  0x36   : > { %6730 = vmatpush1.bf16.msra.mxu1 %v9322_v3  ;;  %6690 = vmatprep.subr.bf16.mxu0 %v9323_v4  ;;  %v9328_v7 = vld [vmem:[%s11119_s8 + $0x110] ss:$8 sps:$4 sm:$0xff]   ;;  %v9331_v9 = vld [vmem:[%s11119_s8 + $0x124] ss:$8 sps:$4 sm:$0xff]   ;;  %v9333_v10 = vld [vmem:[%s11119_s8 + $0x20] ss:$8 sps:$4 sm:$0xff]  }
  0x37   : > { %6731 = vmatprep.subr.bf16.mxu1 %v9325_v5  ;;  %v9334_v11 = vld [vmem:[%s11119_s8 + $0x120] ss:$8 sps:$4 sm:$0xff]   ;;  %v9335_v12 = vld [vmem:[%s11119_s8 + $0x34] ss:$8 sps:$4 sm:$0xff]   ;;  %v9339_v14 = vld [vmem:[%s11119_s8 + $0x30] ss:$8 sps:$4 sm:$0xff]  }
  0x38   : > { %v9337_v13 = vld [vmem:[%s11119_s8 + $0x134] ss:$8 sps:$4 sm:$0xff]   ;;  %v9340_v15 = vld [vmem:[%s11119_s8 + $0x130] ss:$8 sps:$4 sm:$0xff]   ;;  %v9341_v16 = vld [vmem:[%s11119_s8 + $0x44] ss:$8 sps:$4 sm:$0xff]  }
  0x39   : > { %6691 = vmatpush1.bf16.msra.mxu0 %v9327_v6  ;;  %v9343_v17 = vld [vmem:[%s11119_s8 + $0x144] ss:$8 sps:$4 sm:$0xff]   ;;  %v9345_v18 = vld [vmem:[%s11119_s8 + $0x40] ss:$8 sps:$4 sm:$0xff]   ;;  %v9347_v20 = vld [vmem:[%s11119_s8 + $0x54] ss:$8 sps:$4 sm:$0xff]  }
  0x3a   : > { %6732 = vmatpush1.bf16.msra.mxu1 %v9328_v7  ;;  %6692 = vmatprep.subr.bf16.mxu0 %v9329_v8  ;;  %v9346_v19 = vld [vmem:[%s11119_s8 + $0x140] ss:$8 sps:$4 sm:$0xff]   ;;  %v9349_v21 = vld [vmem:[%s11119_s8 + $0x154] ss:$8 sps:$4 sm:$0xff]   ;;  %v9351_v22 = vld [vmem:[%s11119_s8 + $0x50] ss:$8 sps:$4 sm:$0xff]  }
  0x3b   : > { %6733 = vmatprep.subr.bf16.mxu1 %v9331_v9  ;;  %v9352_v23 = vld [vmem:[%s11119_s8 + $0x150] ss:$8 sps:$4 sm:$0xff]   ;;  %v9353_v24 = vld [vmem:[%s11119_s8 + $0x64] ss:$8 sps:$4 sm:$0xff]   ;;  %v9357_v26 = vld [vmem:[%s11119_s8 + $0x60] ss:$8 sps:$4 sm:$0xff]  }
  0x3c   : > { %v9355_v25 = vld [vmem:[%s11119_s8 + $0x164] ss:$8 sps:$4 sm:$0xff]   ;;  %v9358_v27 = vld [vmem:[%s11119_s8 + $0x160] ss:$8 sps:$4 sm:$0xff]   ;;  %v9359_v28 = vld [vmem:[%s11119_s8 + $0x74] ss:$8 sps:$4 sm:$0xff]  }
  0x3d   : > { %6693 = vmatpush1.bf16.msra.mxu0 %v9333_v10  ;;  %v9361_v29 = vld [vmem:[%s11119_s8 + $0x174] ss:$8 sps:$4 sm:$0xff]   ;;  %v9363_v30 = vld [vmem:[%s11119_s8 + $0x70] ss:$8 sps:$4 sm:$0xff]   ;;  %v9365_v32 = vld [vmem:[%s11119_s8 + $0x84] ss:$8 sps:$4 sm:$0xff]  }
  0x3e   : > { %6734 = vmatpush1.bf16.msra.mxu1 %v9334_v11  ;;  %6694 = vmatprep.subr.bf16.mxu0 %v9335_v12  ;;  %v9364_v31 = vld [vmem:[%s11119_s8 + $0x170] ss:$8 sps:$4 sm:$0xff]   ;;  %v9367_v33 = vld [vmem:[%s11119_s8 + $0x184] ss:$8 sps:$4 sm:$0xff]   ;;  %v9369_v34 = vld [vmem:[%s11119_s8 + $0x80] ss:$8 sps:$4 sm:$0xff]  }
  0x3f   : > { %6735 = vmatprep.subr.bf16.mxu1 %v9337_v13  ;;  %v9370_v35 = vld [vmem:[%s11119_s8 + $0x180] ss:$8 sps:$4 sm:$0xff]   ;;  %v9371_v36 = vld [vmem:[%s11119_s8 + $0x94] ss:$8 sps:$4 sm:$0xff]   ;;  %v9375_v38 = vld [vmem:[%s11119_s8 + $0x90] ss:$8 sps:$4 sm:$0xff]  }
  0x40   : > { %v9373_v37 = vld [vmem:[%s11119_s8 + $0x194] ss:$8 sps:$4 sm:$0xff]   ;;  %v9376_v39 = vld [vmem:[%s11119_s8 + $0x190] ss:$8 sps:$4 sm:$0xff]   ;;  %v9377_v40 = vld [vmem:[%s11119_s8 + $0xa4] ss:$8 sps:$4 sm:$0xff]  }
  0x41   : > { %6695 = vmatpush1.bf16.msra.mxu0 %v9339_v14  ;;  %v9379_v41 = vld [vmem:[%s11119_s8 + $0x1a4] ss:$8 sps:$4 sm:$0xff]   ;;  %v9381_v42 = vld [vmem:[%s11119_s8 + $0xa0] ss:$8 sps:$4 sm:$0xff]   ;;  %v9383_v44 = vld [vmem:[%s11119_s8 + $0xb4] ss:$8 sps:$4 sm:$0xff]  }
  0x42   : > { %6736 = vmatpush1.bf16.msra.mxu1 %v9340_v15  ;;  %6696 = vmatprep.subr.bf16.mxu0 %v9341_v16  ;;  %v9382_v43 = vld [vmem:[%s11119_s8 + $0x1a0] ss:$8 sps:$4 sm:$0xff]   ;;  %v9385_v45 = vld [vmem:[%s11119_s8 + $0x1b4] ss:$8 sps:$4 sm:$0xff]   ;;  %v9387_v49 = vld [vmem:[%s11119_s8 + $0xb0] ss:$8 sps:$4 sm:$0xff]  }
  0x43   : > { %6737 = vmatprep.subr.bf16.mxu1 %v9343_v17  ;;  %v288_v46 = vld [vmem:[%s12522_s0] sm:$0xff]  ;;  %v289_v48 = vld [vmem:[%s12522_s0 + $0x8] sm:$0xff]  ;;  %v9388_v50 = vld [vmem:[%s11119_s8 + $0x1b0] ss:$8 sps:$4 sm:$0xff]  }
  0x44   : > { %v8170_v47 = vcombine.high %v288_v46, %v288_v46  ;;  %v8172_v51 = vcombine.high %v289_v48, %v289_v48  ;;  %v9389_v52 = vld [vmem:[%s11119_s8 + $0xc4] ss:$8 sps:$4 sm:$0xff]   ;;  %v9393_v54 = vld [vmem:[%s11119_s8 + $0xc0] ss:$8 sps:$4 sm:$0xff]   ;;  %v9395_v56 = vld [vmem:[%s11119_s8 + $0xd4] ss:$8 sps:$4 sm:$0xff]   ;;  %v8169_v6 = vcombine.low %v288_v46, %v288_v46  ;;  %v8171_v7 = vcombine.low %v289_v48, %v289_v48 }
  0x45   : > { %6697 = vmatpush1.bf16.msra.mxu0 %v9345_v18  ;;  %v9391_v53 = vld [vmem:[%s11119_s8 + $0x1c4] ss:$8 sps:$4 sm:$0xff]   ;;  %v9394_v55 = vld [vmem:[%s11119_s8 + $0x1c0] ss:$8 sps:$4 sm:$0xff]   ;;  %v9397_v57 = vld [vmem:[%s11119_s8 + $0x1d4] ss:$8 sps:$4 sm:$0xff]  }
  0x46   : > { %6738 = vmatpush1.bf16.msra.mxu1 %v9346_v19  ;;  %6698 = vmatprep.subr.bf16.mxu0 %v9347_v20  ;;  %v9399_v58 = vld [vmem:[%s11119_s8 + $0xd0] ss:$8 sps:$4 sm:$0xff]   ;;  %v9401_v60 = vld [vmem:[%s11119_s8 + $0xe4] ss:$8 sps:$4 sm:$0xff]   ;;  %v9405_v62 = vld [vmem:[%s11119_s8 + $0xe0] ss:$8 sps:$4 sm:$0xff]  }
  0x47   : > { %6739 = vmatprep.subr.bf16.mxu1 %v9349_v21  ;;  %6720 = vmatprep.mubr.bf16.mxu0 %v8170_v47  ;;  %v9400_v59 = vld [vmem:[%s11119_s8 + $0x1d0] ss:$8 sps:$4 sm:$0xff]   ;;  %v9403_v61 = vld [vmem:[%s11119_s8 + $0x1e4] ss:$8 sps:$4 sm:$0xff]   ;;  %v9406_v63 = vld [vmem:[%s11119_s8 + $0x1e0] ss:$8 sps:$4 sm:$0xff]  }
  0x48   : > { %6761 = vmatprep.mubr.bf16.mxu1 %v8172_v51  ;;  %v9407_v0 = vld [vmem:[%s11119_s8 + $0xf4] ss:$8 sps:$4 sm:$0xff]   ;;  %v9411_v2 = vld [vmem:[%s11119_s8 + $0xf0] ss:$8 sps:$4 sm:$0xff]   ;;  %v9419_v4 = vld [vmem:[%s11119_s8 + $0x204] ss:$8 sps:$4 sm:$0xff]  }
  0x49   : > { %6699 = vmatpush1.bf16.msra.mxu0 %v9351_v22  ;;  %v9409_v1 = vld [vmem:[%s11119_s8 + $0x1f4] ss:$8 sps:$4 sm:$0xff]   ;;  %v9412_v3 = vld [vmem:[%s11119_s8 + $0x1f0] ss:$8 sps:$4 sm:$0xff]   ;;  %v9422_v5 = vld [vmem:[%s11119_s8 + $0x304] ss:$8 sps:$4 sm:$0xff]  }
  0x4a   : > { %6740 = vmatpush1.bf16.msra.mxu1 %v9352_v23  ;;  %6700 = vmatprep.subr.bf16.mxu0 %v9353_v24  ;;  %v9417_v8 = vld [vmem:[%s11119_s8 + $0x200] ss:$8 sps:$4 sm:$0xff]   ;;  %v9425_v10 = vld [vmem:[%s11119_s8 + $0x214] ss:$8 sps:$4 sm:$0xff]   ;;  %v9423_v12 = vld [vmem:[%s11119_s8 + $0x210] ss:$8 sps:$4 sm:$0xff]  }
  0x4b   : > { %6741 = vmatprep.subr.bf16.mxu1 %v9355_v25  ;;  %v9420_v9 = vld [vmem:[%s11119_s8 + $0x300] ss:$8 sps:$4 sm:$0xff]   ;;  %v9428_v11 = vld [vmem:[%s11119_s8 + $0x314] ss:$8 sps:$4 sm:$0xff]   ;;  %v9426_v13 = vld [vmem:[%s11119_s8 + $0x310] ss:$8 sps:$4 sm:$0xff]  }
  0x4c   : > { %v9431_v14 = vld [vmem:[%s11119_s8 + $0x224] ss:$8 sps:$4 sm:$0xff]   ;;  %v9429_v16 = vld [vmem:[%s11119_s8 + $0x220] ss:$8 sps:$4 sm:$0xff]   ;;  %v9437_v18 = vld [vmem:[%s11119_s8 + $0x234] ss:$8 sps:$4 sm:$0xff]  }
  0x4d   : > { %6701 = vmatpush1.bf16.msra.mxu0 %v9357_v26  ;;  %v9434_v15 = vld [vmem:[%s11119_s8 + $0x324] ss:$8 sps:$4 sm:$0xff]   ;;  %v9432_v17 = vld [vmem:[%s11119_s8 + $0x320] ss:$8 sps:$4 sm:$0xff]   ;;  %v9440_v19 = vld [vmem:[%s11119_s8 + $0x334] ss:$8 sps:$4 sm:$0xff]  }
  0x4e   : > { %6742 = vmatpush1.bf16.msra.mxu1 %v9358_v27  ;;  %6702 = vmatprep.subr.bf16.mxu0 %v9359_v28  ;;  %v9435_v20 = vld [vmem:[%s11119_s8 + $0x230] ss:$8 sps:$4 sm:$0xff]   ;;  %v9443_v22 = vld [vmem:[%s11119_s8 + $0x244] ss:$8 sps:$4 sm:$0xff]   ;;  %v9441_v24 = vld [vmem:[%s11119_s8 + $0x240] ss:$8 sps:$4 sm:$0xff]  }
  0x4f   : > { %6743 = vmatprep.subr.bf16.mxu1 %v9361_v29  ;;  %v9438_v21 = vld [vmem:[%s11119_s8 + $0x330] ss:$8 sps:$4 sm:$0xff]   ;;  %v9446_v23 = vld [vmem:[%s11119_s8 + $0x344] ss:$8 sps:$4 sm:$0xff]   ;;  %v9444_v25 = vld [vmem:[%s11119_s8 + $0x340] ss:$8 sps:$4 sm:$0xff]  }
  0x50   : > { %v9449_v26 = vld [vmem:[%s11119_s8 + $0x254] ss:$8 sps:$4 sm:$0xff]   ;;  %v9447_v28 = vld [vmem:[%s11119_s8 + $0x250] ss:$8 sps:$4 sm:$0xff]   ;;  %v9482_v51 = vld [vmem:[%s11119_s8 + $0x3a4] ss:$8 sps:$4 sm:$0xff]  }
  0x51   : > { %6703 = vmatpush1.bf16.msra.mxu0 %v9363_v30  ;;  %v9452_v27 = vld [vmem:[%s11119_s8 + $0x354] ss:$8 sps:$4 sm:$0xff]   ;;  %v9450_v29 = vld [vmem:[%s11119_s8 + $0x350] ss:$8 sps:$4 sm:$0xff]   ;;  %v9455_v30 = vld [vmem:[%s11119_s8 + $0x264] ss:$8 sps:$4 sm:$0xff]  }
  0x52   : > { %6744 = vmatpush1.bf16.msra.mxu1 %v9364_v31  ;;  %6704 = vmatprep.subr.bf16.mxu0 %v9365_v32  ;;  %v9458_v31 = vld [vmem:[%s11119_s8 + $0x364] ss:$8 sps:$4 sm:$0xff]   ;;  %v11224_v32 = vld [vmem:[%s12522_s0 + $0x10] sm:$0xff] }
  0x53   : > { %6745 = vmatprep.subr.bf16.mxu1 %v9367_v33  ;;  %v11229_v33 = vld [vmem:[%s12522_s0 + $0x18] sm:$0xff] }
  0x54   : > { %v9473_v46 = vld [vmem:[%s11119_s8 + $0x294] ss:$8 sps:$4 sm:$0xff]   ;;  %v9471_v48 = vld [vmem:[%s11119_s8 + $0x290] ss:$8 sps:$4 sm:$0xff]  }
  0x55   : > { %6705 = vmatpush1.bf16.msra.mxu0 %v9369_v34  ;;  %v9453_v34 = vld [vmem:[%s11119_s8 + $0x260] ss:$8 sps:$4 sm:$0xff]   ;;  %v9476_v47 = vld [vmem:[%s11119_s8 + $0x394] ss:$8 sps:$4 sm:$0xff]  }
  0x56   : > { %6746 = vmatpush1.bf16.msra.mxu1 %v9370_v35  ;;  %6706 = vmatprep.subr.bf16.mxu0 %v9371_v36  ;;  %v9456_v35 = vld [vmem:[%s11119_s8 + $0x360] ss:$8 sps:$4 sm:$0xff]   ;;  %v8174_v36 = vcombine.high %v11224_v32, %v11224_v32 }
  0x57   : > { %6747 = vmatprep.subr.bf16.mxu1 %v9373_v37  ;;  %v8176_v37 = vcombine.high %v11229_v33, %v11229_v33 }
  0x59   : > { %6707 = vmatpush1.bf16.msra.mxu0 %v9375_v38  ;;  %v9461_v38 = vld [vmem:[%s11119_s8 + $0x274] ss:$8 sps:$4 sm:$0xff]  }
  0x5a   : > { %6748 = vmatpush1.bf16.msra.mxu1 %v9376_v39  ;;  %6708 = vmatprep.subr.bf16.mxu0 %v9377_v40  ;;  %v9464_v39 = vld [vmem:[%s11119_s8 + $0x374] ss:$8 sps:$4 sm:$0xff]   ;;  %v9459_v40 = vld [vmem:[%s11119_s8 + $0x270] ss:$8 sps:$4 sm:$0xff]  }
  0x5b   : > { %6749 = vmatprep.subr.bf16.mxu1 %v9379_v41  ;;  %v9462_v41 = vld [vmem:[%s11119_s8 + $0x370] ss:$8 sps:$4 sm:$0xff]  }
  0x5d   : > { %6709 = vmatpush1.bf16.msra.mxu0 %v9381_v42  ;;  %v9467_v42 = vld [vmem:[%s11119_s8 + $0x284] ss:$8 sps:$4 sm:$0xff]  }
  0x5e   : > { %6750 = vmatpush1.bf16.msra.mxu1 %v9382_v43  ;;  %6710 = vmatprep.subr.bf16.mxu0 %v9383_v44  ;;  %v9470_v43 = vld [vmem:[%s11119_s8 + $0x384] ss:$8 sps:$4 sm:$0xff]   ;;  %v9465_v44 = vld [vmem:[%s11119_s8 + $0x280] ss:$8 sps:$4 sm:$0xff]  }
  0x5f   : > { %6751 = vmatprep.subr.bf16.mxu1 %v9385_v45  ;;  %v9468_v45 = vld [vmem:[%s11119_s8 + $0x380] ss:$8 sps:$4 sm:$0xff]  }
  0x61   : > { %6711 = vmatpush1.bf16.msra.mxu0 %v9387_v49  ;;  %v9474_v49 = vld [vmem:[%s11119_s8 + $0x390] ss:$8 sps:$4 sm:$0xff]  }
  0x62   : > { %6752 = vmatpush1.bf16.msra.mxu1 %v9388_v50  ;;  %6712 = vmatprep.subr.bf16.mxu0 %v9389_v52  ;;  %v9479_v50 = vld [vmem:[%s11119_s8 + $0x2a4] ss:$8 sps:$4 sm:$0xff]   ;;  %v9477_v52 = vld [vmem:[%s11119_s8 + $0x2a0] ss:$8 sps:$4 sm:$0xff]  }
  0x63   : > { %6753 = vmatprep.subr.bf16.mxu1 %v9391_v53  ;;  %v9480_v53 = vld [vmem:[%s11119_s8 + $0x3a0] ss:$8 sps:$4 sm:$0xff]  }
  0x65   : > { %6713 = vmatpush1.bf16.msra.mxu0 %v9393_v54  ;;  %v9485_v54 = vld [vmem:[%s11119_s8 + $0x2b4] ss:$8 sps:$4 sm:$0xff]  }
  0x66   : > { %6754 = vmatpush1.bf16.msra.mxu1 %v9394_v55  ;;  %6714 = vmatprep.subr.bf16.mxu0 %v9395_v56  ;;  %v9488_v55 = vld [vmem:[%s11119_s8 + $0x3b4] ss:$8 sps:$4 sm:$0xff]   ;;  %v9483_v56 = vld [vmem:[%s11119_s8 + $0x2b0] ss:$8 sps:$4 sm:$0xff]  }
  0x67   : > { %6755 = vmatprep.subr.bf16.mxu1 %v9397_v57  ;;  %v9486_v57 = vld [vmem:[%s11119_s8 + $0x3b0] ss:$8 sps:$4 sm:$0xff]  }
  0x69   : > { %6715 = vmatpush1.bf16.msra.mxu0 %v9399_v58  ;;  %v9491_v58 = vld [vmem:[%s11119_s8 + $0x2c4] ss:$8 sps:$4 sm:$0xff]  }
  0x6a   : > { %6756 = vmatpush1.bf16.msra.mxu1 %v9400_v59  ;;  %6716 = vmatprep.subr.bf16.mxu0 %v9401_v60  ;;  %v9494_v59 = vld [vmem:[%s11119_s8 + $0x3c4] ss:$8 sps:$4 sm:$0xff]   ;;  %v9489_v60 = vld [vmem:[%s11119_s8 + $0x2c0] ss:$8 sps:$4 sm:$0xff]  }
  0x6b   : > { %6757 = vmatprep.subr.bf16.mxu1 %v9403_v61  ;;  %v9492_v61 = vld [vmem:[%s11119_s8 + $0x3c0] ss:$8 sps:$4 sm:$0xff]  }
  0x6d   : > { %6717 = vmatpush1.bf16.msra.mxu0 %v9405_v62  ;;  %v9497_v62 = vld [vmem:[%s11119_s8 + $0x2d4] ss:$8 sps:$4 sm:$0xff]  }
  0x6e   : > { %6758 = vmatpush1.bf16.msra.mxu1 %v9406_v63  ;;  %6718 = vmatprep.subr.bf16.mxu0 %v9407_v0  ;;  %v9500_v63 = vld [vmem:[%s11119_s8 + $0x3d4] ss:$8 sps:$4 sm:$0xff]   ;;  %v9495_v0 = vld [vmem:[%s11119_s8 + $0x2d0] ss:$8 sps:$4 sm:$0xff]  }
  0x6f   : > { %6759 = vmatprep.subr.bf16.mxu1 %v9409_v1  ;;  %v9498_v1 = vld [vmem:[%s11119_s8 + $0x3d0] ss:$8 sps:$4 sm:$0xff]  }
  0x71   : > { %6719 = vmatpush1.bf16.msra.mxu0 %v9411_v2  ;;  %v9503_v2 = vld [vmem:[%s11119_s8 + $0x2e4] ss:$8 sps:$4 sm:$0xff]  }
  0x72   : > { %6760 = vmatpush1.bf16.msra.mxu1 %v9412_v3  ;;  %6770 = vmatprep.subr.bf16.mxu0 %v9419_v4  ;;  %v9506_v3 = vld [vmem:[%s11119_s8 + $0x3e4] ss:$8 sps:$4 sm:$0xff]   ;;  %v9501_v4 = vld [vmem:[%s11119_s8 + $0x2e0] ss:$8 sps:$4 sm:$0xff]  }
  0x73   : > { %6811 = vmatprep.subr.bf16.mxu1 %v9422_v5  ;;  %v9504_v5 = vld [vmem:[%s11119_s8 + $0x3e0] ss:$8 sps:$4 sm:$0xff]  }
  0x74   : > { %6721 = vmatmul.mubr.bf16.vlgmr.msra.gmra.mrb[0].mxu0 %v8169_v6  ;;  %v9509_v6 = vld [vmem:[%s11119_s8 + $0x2f4] ss:$8 sps:$4 sm:$0xff]  }
  0x75   : > { %6762 = vmatmul.mubr.bf16.vlgmr.msra.gmra.mrb[0].mxu1 %v8171_v7  ;;  %6771 = vmatpush1.bf16.msra.mxu0 %v9417_v8  ;;  %v9512_v7 = vld [vmem:[%s11119_s8 + $0x3f4] ss:$8 sps:$4 sm:$0xff]   ;;  %v9507_v8 = vld [vmem:[%s11119_s8 + $0x2f0] ss:$8 sps:$4 sm:$0xff]  }
  0x76   : > { %6812 = vmatpush1.bf16.msra.mxu1 %v9420_v9  ;;  %6772 = vmatprep.subr.bf16.mxu0 %v9425_v10  ;;  %v9510_v9 = vld [vmem:[%s11119_s8 + $0x3f0] ss:$8 sps:$4 sm:$0xff]   ;;  %v9519_v10 = vld [vmem:[%s11119_s8 + $0x404] ss:$8 sps:$4 sm:$0xff]  }
  0x77   : > { %6813 = vmatprep.subr.bf16.mxu1 %v9428_v11  ;;  %6802 = vmatprep.mubr.bf16.mxu0 %v8174_v36  ;;  %v9522_v11 = vld [vmem:[%s11119_s8 + $0x504] ss:$8 sps:$4 sm:$0xff]   ;;  %v9549_v36 = vld [vmem:[%s11119_s8 + $0x454] ss:$8 sps:$4 sm:$0xff]  }
  0x78   : > { %6843 = vmatprep.mubr.bf16.mxu1 %v8176_v37  ;;  %v9552_v37 = vld [vmem:[%s11119_s8 + $0x554] ss:$8 sps:$4 sm:$0xff]  }
  0x79   : > { %6773 = vmatpush1.bf16.msra.mxu0 %v9423_v12  ;;  %v8173_v12 = vcombine.low %v11224_v32, %v11224_v32  ;;  %v9543_v32 = vld [vmem:[%s11119_s8 + $0x444] ss:$8 sps:$4 sm:$0xff]  }
  0x7a   : > { %6814 = vmatpush1.bf16.msra.mxu1 %v9426_v13  ;;  %6774 = vmatprep.subr.bf16.mxu0 %v9431_v14  ;;  %v8175_v13 = vcombine.low %v11229_v33, %v11229_v33  ;;  %v9517_v14 = vld [vmem:[%s11119_s8 + $0x400] ss:$8 sps:$4 sm:$0xff]   ;;  %v9546_v33 = vld [vmem:[%s11119_s8 + $0x544] ss:$8 sps:$4 sm:$0xff]  }
  0x7b   : > { %6815 = vmatprep.subr.bf16.mxu1 %v9434_v15  ;;  %v9520_v15 = vld [vmem:[%s11119_s8 + $0x500] ss:$8 sps:$4 sm:$0xff]  }
  0x7d   : > { %6775 = vmatpush1.bf16.msra.mxu0 %v9429_v16  ;;  %v9525_v16 = vld [vmem:[%s11119_s8 + $0x414] ss:$8 sps:$4 sm:$0xff]  }
  0x7e   : > { %6816 = vmatpush1.bf16.msra.mxu1 %v9432_v17  ;;  %6776 = vmatprep.subr.bf16.mxu0 %v9437_v18  ;;  %v9528_v17 = vld [vmem:[%s11119_s8 + $0x514] ss:$8 sps:$4 sm:$0xff]   ;;  %v11286_v18 = vld [vmem:[%s12522_s0 + $0x20] sm:$0xff] }
  0x7f   : > { %6817 = vmatprep.subr.bf16.mxu1 %v9440_v19  ;;  %v11291_v19 = vld [vmem:[%s12522_s0 + $0x28] sm:$0xff] }
  0x81   : > { %6777 = vmatpush1.bf16.msra.mxu0 %v9435_v20  ;;  %v8178_v20 = vcombine.high %v11286_v18, %v11286_v18 }
  0x82   : > { %6818 = vmatpush1.bf16.msra.mxu1 %v9438_v21  ;;  %6778 = vmatprep.subr.bf16.mxu0 %v9443_v22  ;;  %v8180_v21 = vcombine.high %v11291_v19, %v11291_v19  ;;  %v9523_v22 = vld [vmem:[%s11119_s8 + $0x410] ss:$8 sps:$4 sm:$0xff]  }
  0x83   : > { %6819 = vmatprep.subr.bf16.mxu1 %v9446_v23  ;;  %v9526_v23 = vld [vmem:[%s11119_s8 + $0x510] ss:$8 sps:$4 sm:$0xff]  }
  0x85   : > { %6779 = vmatpush1.bf16.msra.mxu0 %v9441_v24  ;;  %v9531_v24 = vld [vmem:[%s11119_s8 + $0x424] ss:$8 sps:$4 sm:$0xff]  }
  0x86   : > { %6820 = vmatpush1.bf16.msra.mxu1 %v9444_v25  ;;  %6780 = vmatprep.subr.bf16.mxu0 %v9449_v26  ;;  %v9534_v25 = vld [vmem:[%s11119_s8 + $0x524] ss:$8 sps:$4 sm:$0xff]   ;;  %v9529_v26 = vld [vmem:[%s11119_s8 + $0x420] ss:$8 sps:$4 sm:$0xff]  }
  0x87   : > { %6821 = vmatprep.subr.bf16.mxu1 %v9452_v27  ;;  %v9532_v27 = vld [vmem:[%s11119_s8 + $0x520] ss:$8 sps:$4 sm:$0xff]  }
  0x89   : > { %6781 = vmatpush1.bf16.msra.mxu0 %v9447_v28  ;;  %v9537_v28 = vld [vmem:[%s11119_s8 + $0x434] ss:$8 sps:$4 sm:$0xff]  }
  0x8a   : > { %6822 = vmatpush1.bf16.msra.mxu1 %v9450_v29  ;;  %6782 = vmatprep.subr.bf16.mxu0 %v9455_v30  ;;  %v9540_v29 = vld [vmem:[%s11119_s8 + $0x534] ss:$8 sps:$4 sm:$0xff]   ;;  %v9535_v30 = vld [vmem:[%s11119_s8 + $0x430] ss:$8 sps:$4 sm:$0xff]  }
  0x8b   : > { %6823 = vmatprep.subr.bf16.mxu1 %v9458_v31  ;;  %v9538_v31 = vld [vmem:[%s11119_s8 + $0x530] ss:$8 sps:$4 sm:$0xff]  }
  0x8d   : > { %6783 = vmatpush1.bf16.msra.mxu0 %v9453_v34  ;;  %v9541_v34 = vld [vmem:[%s11119_s8 + $0x440] ss:$8 sps:$4 sm:$0xff]  }
  0x8e   : > { %6824 = vmatpush1.bf16.msra.mxu1 %v9456_v35  ;;  %6784 = vmatprep.subr.bf16.mxu0 %v9461_v38  ;;  %v9544_v35 = vld [vmem:[%s11119_s8 + $0x540] ss:$8 sps:$4 sm:$0xff]   ;;  %v9547_v38 = vld [vmem:[%s11119_s8 + $0x450] ss:$8 sps:$4 sm:$0xff]  }
  0x8f   : > { %6825 = vmatprep.subr.bf16.mxu1 %v9464_v39  ;;  %v9550_v39 = vld [vmem:[%s11119_s8 + $0x550] ss:$8 sps:$4 sm:$0xff]  }
  0x91   : > { %6785 = vmatpush1.bf16.msra.mxu0 %v9459_v40  ;;  %v9555_v40 = vld [vmem:[%s11119_s8 + $0x464] ss:$8 sps:$4 sm:$0xff]  }
  0x92   : > { %6826 = vmatpush1.bf16.msra.mxu1 %v9462_v41  ;;  %6786 = vmatprep.subr.bf16.mxu0 %v9467_v42  ;;  %v9558_v41 = vld [vmem:[%s11119_s8 + $0x564] ss:$8 sps:$4 sm:$0xff]   ;;  %v9553_v42 = vld [vmem:[%s11119_s8 + $0x460] ss:$8 sps:$4 sm:$0xff]  }
  0x93   : > { %6827 = vmatprep.subr.bf16.mxu1 %v9470_v43  ;;  %v9556_v43 = vld [vmem:[%s11119_s8 + $0x560] ss:$8 sps:$4 sm:$0xff]  }
  0x95   : > { %6787 = vmatpush1.bf16.msra.mxu0 %v9465_v44  ;;  %v9561_v44 = vld [vmem:[%s11119_s8 + $0x474] ss:$8 sps:$4 sm:$0xff]  }
  0x96   : > { %6828 = vmatpush1.bf16.msra.mxu1 %v9468_v45  ;;  %6788 = vmatprep.subr.bf16.mxu0 %v9473_v46  ;;  %v9564_v45 = vld [vmem:[%s11119_s8 + $0x574] ss:$8 sps:$4 sm:$0xff]   ;;  %v9559_v46 = vld [vmem:[%s11119_s8 + $0x470] ss:$8 sps:$4 sm:$0xff]  }
  0x97   : > { %6829 = vmatprep.subr.bf16.mxu1 %v9476_v47  ;;  %v9562_v47 = vld [vmem:[%s11119_s8 + $0x570] ss:$8 sps:$4 sm:$0xff]  }
  0x99   : > { %6789 = vmatpush1.bf16.msra.mxu0 %v9471_v48  ;;  %v9567_v48 = vld [vmem:[%s11119_s8 + $0x484] ss:$8 sps:$4 sm:$0xff]  }
  0x9a   : > { %6830 = vmatpush1.bf16.msra.mxu1 %v9474_v49  ;;  %6790 = vmatprep.subr.bf16.mxu0 %v9479_v50  ;;  %v9570_v49 = vld [vmem:[%s11119_s8 + $0x584] ss:$8 sps:$4 sm:$0xff]   ;;  %v9565_v50 = vld [vmem:[%s11119_s8 + $0x480] ss:$8 sps:$4 sm:$0xff]  }
  0x9b   : > { %6831 = vmatprep.subr.bf16.mxu1 %v9482_v51  ;;  %v9568_v51 = vld [vmem:[%s11119_s8 + $0x580] ss:$8 sps:$4 sm:$0xff]  }
  0x9d   : > { %6791 = vmatpush1.bf16.msra.mxu0 %v9477_v52  ;;  %v9573_v52 = vld [vmem:[%s11119_s8 + $0x494] ss:$8 sps:$4 sm:$0xff]  }
  0x9e   : > { %6832 = vmatpush1.bf16.msra.mxu1 %v9480_v53  ;;  %6792 = vmatprep.subr.bf16.mxu0 %v9485_v54  ;;  %v9576_v53 = vld [vmem:[%s11119_s8 + $0x594] ss:$8 sps:$4 sm:$0xff]   ;;  %v9571_v54 = vld [vmem:[%s11119_s8 + $0x490] ss:$8 sps:$4 sm:$0xff]  }
  0x9f   : > { %6833 = vmatprep.subr.bf16.mxu1 %v9488_v55  ;;  %v9574_v55 = vld [vmem:[%s11119_s8 + $0x590] ss:$8 sps:$4 sm:$0xff]  }
  0xa1   : > { %6793 = vmatpush1.bf16.msra.mxu0 %v9483_v56  ;;  %v9579_v56 = vld [vmem:[%s11119_s8 + $0x4a4] ss:$8 sps:$4 sm:$0xff]  }
  0xa2   : > { %6834 = vmatpush1.bf16.msra.mxu1 %v9486_v57  ;;  %6794 = vmatprep.subr.bf16.mxu0 %v9491_v58  ;;  %v9582_v57 = vld [vmem:[%s11119_s8 + $0x5a4] ss:$8 sps:$4 sm:$0xff]   ;;  %v9577_v58 = vld [vmem:[%s11119_s8 + $0x4a0] ss:$8 sps:$4 sm:$0xff]  }
  0xa3   : > { %6835 = vmatprep.subr.bf16.mxu1 %v9494_v59  ;;  %v9580_v59 = vld [vmem:[%s11119_s8 + $0x5a0] ss:$8 sps:$4 sm:$0xff]  }
  0xa5   : > { %6795 = vmatpush1.bf16.msra.mxu0 %v9489_v60  ;;  %v9585_v60 = vld [vmem:[%s11119_s8 + $0x4b4] ss:$8 sps:$4 sm:$0xff]  }
  0xa6   : > { %6836 = vmatpush1.bf16.msra.mxu1 %v9492_v61  ;;  %6796 = vmatprep.subr.bf16.mxu0 %v9497_v62  ;;  %v9588_v61 = vld [vmem:[%s11119_s8 + $0x5b4] ss:$8 sps:$4 sm:$0xff]   ;;  %v9583_v62 = vld [vmem:[%s11119_s8 + $0x4b0] ss:$8 sps:$4 sm:$0xff]  }
  0xa7   : > { %6837 = vmatprep.subr.bf16.mxu1 %v9500_v63  ;;  %v9586_v63 = vld [vmem:[%s11119_s8 + $0x5b0] ss:$8 sps:$4 sm:$0xff]  }
  0xa9   : > { %6797 = vmatpush1.bf16.msra.mxu0 %v9495_v0  ;;  %v9591_v0 = vld [vmem:[%s11119_s8 + $0x4c4] ss:$8 sps:$4 sm:$0xff]  }
  0xaa   : > { %6838 = vmatpush1.bf16.msra.mxu1 %v9498_v1  ;;  %6798 = vmatprep.subr.bf16.mxu0 %v9503_v2  ;;  %v9594_v1 = vld [vmem:[%s11119_s8 + $0x5c4] ss:$8 sps:$4 sm:$0xff]   ;;  %v9589_v2 = vld [vmem:[%s11119_s8 + $0x4c0] ss:$8 sps:$4 sm:$0xff]  }
  0xab   : > { %6839 = vmatprep.subr.bf16.mxu1 %v9506_v3  ;;  %v9592_v3 = vld [vmem:[%s11119_s8 + $0x5c0] ss:$8 sps:$4 sm:$0xff]  }
  0xad   : > { %6799 = vmatpush1.bf16.msra.mxu0 %v9501_v4  ;;  %v9597_v4 = vld [vmem:[%s11119_s8 + $0x4d4] ss:$8 sps:$4 sm:$0xff]  }
  0xae   : > { %6840 = vmatpush1.bf16.msra.mxu1 %v9504_v5  ;;  %6800 = vmatprep.subr.bf16.mxu0 %v9509_v6  ;;  %v9600_v5 = vld [vmem:[%s11119_s8 + $0x5d4] ss:$8 sps:$4 sm:$0xff]   ;;  %v9595_v6 = vld [vmem:[%s11119_s8 + $0x4d0] ss:$8 sps:$4 sm:$0xff]  }
  0xaf   : > { %6841 = vmatprep.subr.bf16.mxu1 %v9512_v7  ;;  %v9598_v7 = vld [vmem:[%s11119_s8 + $0x5d0] ss:$8 sps:$4 sm:$0xff]  }
  0xb1   : > { %6801 = vmatpush1.bf16.msra.mxu0 %v9507_v8  ;;  %v9603_v8 = vld [vmem:[%s11119_s8 + $0x4e4] ss:$8 sps:$4 sm:$0xff]  }
  0xb2   : > { %6842 = vmatpush1.bf16.msra.mxu1 %v9510_v9  ;;  %6852 = vmatprep.subr.bf16.mxu0 %v9519_v10  ;;  %v9606_v9 = vld [vmem:[%s11119_s8 + $0x5e4] ss:$8 sps:$4 sm:$0xff]   ;;  %v9601_v10 = vld [vmem:[%s11119_s8 + $0x4e0] ss:$8 sps:$4 sm:$0xff]  }
  0xb3   : > { %6893 = vmatprep.subr.bf16.mxu1 %v9522_v11  ;;  %v9604_v11 = vld [vmem:[%s11119_s8 + $0x5e0] ss:$8 sps:$4 sm:$0xff]  }
  0xb4   : > { %6803 = vmatmul.mubr.bf16.vlgmr.msra.gmra.mrb[4].mxu0 %v8173_v12  ;;  %v9609_v12 = vld [vmem:[%s11119_s8 + $0x4f4] ss:$8 sps:$4 sm:$0xff]  }
  0xb5   : > { %6844 = vmatmul.mubr.bf16.vlgmr.msra.gmra.mrb[4].mxu1 %v8175_v13  ;;  %6853 = vmatpush1.bf16.msra.mxu0 %v9517_v14  ;;  %v9612_v13 = vld [vmem:[%s11119_s8 + $0x5f4] ss:$8 sps:$4 sm:$0xff]   ;;  %v9607_v14 = vld [vmem:[%s11119_s8 + $0x4f0] ss:$8 sps:$4 sm:$0xff]  }
  0xb6   : > { %6894 = vmatpush1.bf16.msra.mxu1 %v9520_v15  ;;  %6854 = vmatprep.subr.bf16.mxu0 %v9525_v16  ;;  %v9610_v15 = vld [vmem:[%s11119_s8 + $0x5f0] ss:$8 sps:$4 sm:$0xff]   ;;  %v9619_v16 = vld [vmem:[%s11119_s8 + $0x604] ss:$8 sps:$4 sm:$0xff]  }
  0xb7   : > { %6895 = vmatprep.subr.bf16.mxu1 %v9528_v17  ;;  %6884 = vmatprep.mubr.bf16.mxu0 %v8178_v20  ;;  %v9622_v17 = vld [vmem:[%s11119_s8 + $0x704] ss:$8 sps:$4 sm:$0xff]   ;;  %v9617_v20 = vld [vmem:[%s11119_s8 + $0x600] ss:$8 sps:$4 sm:$0xff]  }
  0xb8   : > { %6925 = vmatprep.mubr.bf16.mxu1 %v8180_v21  ;;  %v9620_v21 = vld [vmem:[%s11119_s8 + $0x700] ss:$8 sps:$4 sm:$0xff]  }
  0xb9   : > { %6855 = vmatpush1.bf16.msra.mxu0 %v9523_v22  ;;  %v8177_v22 = vcombine.low %v11286_v18, %v11286_v18  ;;  %v9628_v18 = vld [vmem:[%s11119_s8 + $0x714] ss:$8 sps:$4 sm:$0xff]  }
  0xba   : > { %6896 = vmatpush1.bf16.msra.mxu1 %v9526_v23  ;;  %6856 = vmatprep.subr.bf16.mxu0 %v9531_v24  ;;  %v8179_v23 = vcombine.low %v11291_v19, %v11291_v19  ;;  %v11366_v24 = vld [vmem:[%s12522_s0 + $0x30] sm:$0xff] }
  0xbb   : > { %6897 = vmatprep.subr.bf16.mxu1 %v9534_v25  ;;  %v11371_v25 = vld [vmem:[%s12522_s0 + $0x38] sm:$0xff]  ;;  %v8182_v19 = vcombine.high %v11366_v24, %v11366_v24 }
  0xbd   : > { %6857 = vmatpush1.bf16.msra.mxu0 %v9529_v26  ;;  %v9625_v26 = vld [vmem:[%s11119_s8 + $0x614] ss:$8 sps:$4 sm:$0xff]  }
  0xbe   : > { %6898 = vmatpush1.bf16.msra.mxu1 %v9532_v27  ;;  %6858 = vmatprep.subr.bf16.mxu0 %v9537_v28  ;;  %v8184_v27 = vcombine.high %v11371_v25, %v11371_v25  ;;  %v9623_v28 = vld [vmem:[%s11119_s8 + $0x610] ss:$8 sps:$4 sm:$0xff]  }
  0xbf   : > { %6899 = vmatprep.subr.bf16.mxu1 %v9540_v29  ;;  %v9626_v29 = vld [vmem:[%s11119_s8 + $0x710] ss:$8 sps:$4 sm:$0xff]  }
  0xc1   : > { %6859 = vmatpush1.bf16.msra.mxu0 %v9535_v30  ;;  %v9631_v30 = vld [vmem:[%s11119_s8 + $0x624] ss:$8 sps:$4 sm:$0xff]  }
  0xc2   : > { %6900 = vmatpush1.bf16.msra.mxu1 %v9538_v31  ;;  %6860 = vmatprep.subr.bf16.mxu0 %v9543_v32  ;;  %v9634_v31 = vld [vmem:[%s11119_s8 + $0x724] ss:$8 sps:$4 sm:$0xff]   ;;  %v9629_v32 = vld [vmem:[%s11119_s8 + $0x620] ss:$8 sps:$4 sm:$0xff]  }
  0xc3   : > { %6901 = vmatprep.subr.bf16.mxu1 %v9546_v33  ;;  %v9632_v33 = vld [vmem:[%s11119_s8 + $0x720] ss:$8 sps:$4 sm:$0xff]  }
  0xc5   : > { %6861 = vmatpush1.bf16.msra.mxu0 %v9541_v34  ;;  %v9637_v34 = vld [vmem:[%s11119_s8 + $0x634] ss:$8 sps:$4 sm:$0xff]  }
  0xc6   : > { %6902 = vmatpush1.bf16.msra.mxu1 %v9544_v35  ;;  %6862 = vmatprep.subr.bf16.mxu0 %v9549_v36  ;;  %v9640_v35 = vld [vmem:[%s11119_s8 + $0x734] ss:$8 sps:$4 sm:$0xff]   ;;  %v9635_v36 = vld [vmem:[%s11119_s8 + $0x630] ss:$8 sps:$4 sm:$0xff]  }
  0xc7   : > { %6903 = vmatprep.subr.bf16.mxu1 %v9552_v37  ;;  %v9638_v37 = vld [vmem:[%s11119_s8 + $0x730] ss:$8 sps:$4 sm:$0xff]  }
  0xc9   : > { %6863 = vmatpush1.bf16.msra.mxu0 %v9547_v38  ;;  %v9643_v38 = vld [vmem:[%s11119_s8 + $0x644] ss:$8 sps:$4 sm:$0xff]  }
  0xca   : > { %6904 = vmatpush1.bf16.msra.mxu1 %v9550_v39  ;;  %6864 = vmatprep.subr.bf16.mxu0 %v9555_v40  ;;  %v9646_v39 = vld [vmem:[%s11119_s8 + $0x744] ss:$8 sps:$4 sm:$0xff]   ;;  %v9641_v40 = vld [vmem:[%s11119_s8 + $0x640] ss:$8 sps:$4 sm:$0xff]  }
  0xcb   : > { %6905 = vmatprep.subr.bf16.mxu1 %v9558_v41  ;;  %v9644_v41 = vld [vmem:[%s11119_s8 + $0x740] ss:$8 sps:$4 sm:$0xff]  }
  0xcd   : > { %6865 = vmatpush1.bf16.msra.mxu0 %v9553_v42  ;;  %v9649_v42 = vld [vmem:[%s11119_s8 + $0x654] ss:$8 sps:$4 sm:$0xff]  }
  0xce   : > { %6906 = vmatpush1.bf16.msra.mxu1 %v9556_v43  ;;  %6866 = vmatprep.subr.bf16.mxu0 %v9561_v44  ;;  %v9652_v43 = vld [vmem:[%s11119_s8 + $0x754] ss:$8 sps:$4 sm:$0xff]   ;;  %v9647_v44 = vld [vmem:[%s11119_s8 + $0x650] ss:$8 sps:$4 sm:$0xff]  }
  0xcf   : > { %6907 = vmatprep.subr.bf16.mxu1 %v9564_v45  ;;  %v9650_v45 = vld [vmem:[%s11119_s8 + $0x750] ss:$8 sps:$4 sm:$0xff]  }
  0xd1   : > { %6867 = vmatpush1.bf16.msra.mxu0 %v9559_v46  ;;  %v9655_v46 = vld [vmem:[%s11119_s8 + $0x664] ss:$8 sps:$4 sm:$0xff]  }
  0xd2   : > { %6908 = vmatpush1.bf16.msra.mxu1 %v9562_v47  ;;  %6868 = vmatprep.subr.bf16.mxu0 %v9567_v48  ;;  %v9658_v47 = vld [vmem:[%s11119_s8 + $0x764] ss:$8 sps:$4 sm:$0xff]   ;;  %v9653_v48 = vld [vmem:[%s11119_s8 + $0x660] ss:$8 sps:$4 sm:$0xff]  }
  0xd3   : > { %6909 = vmatprep.subr.bf16.mxu1 %v9570_v49  ;;  %v9656_v49 = vld [vmem:[%s11119_s8 + $0x760] ss:$8 sps:$4 sm:$0xff]  }
  0xd5   : > { %6869 = vmatpush1.bf16.msra.mxu0 %v9565_v50  ;;  %v9661_v50 = vld [vmem:[%s11119_s8 + $0x674] ss:$8 sps:$4 sm:$0xff]  }
  0xd6   : > { %6910 = vmatpush1.bf16.msra.mxu1 %v9568_v51  ;;  %6870 = vmatprep.subr.bf16.mxu0 %v9573_v52  ;;  %v9664_v51 = vld [vmem:[%s11119_s8 + $0x774] ss:$8 sps:$4 sm:$0xff]   ;;  %v9659_v52 = vld [vmem:[%s11119_s8 + $0x670] ss:$8 sps:$4 sm:$0xff]  }
  0xd7   : > { %6911 = vmatprep.subr.bf16.mxu1 %v9576_v53  ;;  %v9662_v53 = vld [vmem:[%s11119_s8 + $0x770] ss:$8 sps:$4 sm:$0xff]  }
  0xd9   : > { %6871 = vmatpush1.bf16.msra.mxu0 %v9571_v54  ;;  %v9667_v54 = vld [vmem:[%s11119_s8 + $0x684] ss:$8 sps:$4 sm:$0xff]  }
  0xda   : > { %6912 = vmatpush1.bf16.msra.mxu1 %v9574_v55  ;;  %6872 = vmatprep.subr.bf16.mxu0 %v9579_v56  ;;  %v9670_v55 = vld [vmem:[%s11119_s8 + $0x784] ss:$8 sps:$4 sm:$0xff]   ;;  %v9665_v56 = vld [vmem:[%s11119_s8 + $0x680] ss:$8 sps:$4 sm:$0xff]  }
  0xdb   : > { %6913 = vmatprep.subr.bf16.mxu1 %v9582_v57  ;;  %v9668_v57 = vld [vmem:[%s11119_s8 + $0x780] ss:$8 sps:$4 sm:$0xff]  }
  0xdd   : > { %6873 = vmatpush1.bf16.msra.mxu0 %v9577_v58  ;;  %v9673_v58 = vld [vmem:[%s11119_s8 + $0x694] ss:$8 sps:$4 sm:$0xff]  }
  0xde   : > { %6914 = vmatpush1.bf16.msra.mxu1 %v9580_v59  ;;  %6874 = vmatprep.subr.bf16.mxu0 %v9585_v60  ;;  %v9676_v59 = vld [vmem:[%s11119_s8 + $0x794] ss:$8 sps:$4 sm:$0xff]   ;;  %v9671_v60 = vld [vmem:[%s11119_s8 + $0x690] ss:$8 sps:$4 sm:$0xff]  }
  0xdf   : > { %6915 = vmatprep.subr.bf16.mxu1 %v9588_v61  ;;  %v9674_v61 = vld [vmem:[%s11119_s8 + $0x790] ss:$8 sps:$4 sm:$0xff]  }
  0xe1   : > { %6875 = vmatpush1.bf16.msra.mxu0 %v9583_v62  ;;  %v9679_v62 = vld [vmem:[%s11119_s8 + $0x6a4] ss:$8 sps:$4 sm:$0xff]  }
  0xe2   : > { %6916 = vmatpush1.bf16.msra.mxu1 %v9586_v63  ;;  %6876 = vmatprep.subr.bf16.mxu0 %v9591_v0  ;;  %v9682_v63 = vld [vmem:[%s11119_s8 + $0x7a4] ss:$8 sps:$4 sm:$0xff]   ;;  %v9677_v0 = vld [vmem:[%s11119_s8 + $0x6a0] ss:$8 sps:$4 sm:$0xff]  }
  0xe3   : > { %6917 = vmatprep.subr.bf16.mxu1 %v9594_v1  ;;  %v9680_v1 = vld [vmem:[%s11119_s8 + $0x7a0] ss:$8 sps:$4 sm:$0xff]  }
  0xe5   : > { %6877 = vmatpush1.bf16.msra.mxu0 %v9589_v2  ;;  %v9685_v2 = vld [vmem:[%s11119_s8 + $0x6b4] ss:$8 sps:$4 sm:$0xff]  }
  0xe6   : > { %6918 = vmatpush1.bf16.msra.mxu1 %v9592_v3  ;;  %6878 = vmatprep.subr.bf16.mxu0 %v9597_v4  ;;  %v9688_v3 = vld [vmem:[%s11119_s8 + $0x7b4] ss:$8 sps:$4 sm:$0xff]   ;;  %v9683_v4 = vld [vmem:[%s11119_s8 + $0x6b0] ss:$8 sps:$4 sm:$0xff]  }
  0xe7   : > { %6919 = vmatprep.subr.bf16.mxu1 %v9600_v5  ;;  %v9686_v5 = vld [vmem:[%s11119_s8 + $0x7b0] ss:$8 sps:$4 sm:$0xff]  }
  0xe9   : > { %6879 = vmatpush1.bf16.msra.mxu0 %v9595_v6  ;;  %v9691_v6 = vld [vmem:[%s11119_s8 + $0x6c4] ss:$8 sps:$4 sm:$0xff]  }
  0xea   : > { %6920 = vmatpush1.bf16.msra.mxu1 %v9598_v7  ;;  %6880 = vmatprep.subr.bf16.mxu0 %v9603_v8  ;;  %v9694_v7 = vld [vmem:[%s11119_s8 + $0x7c4] ss:$8 sps:$4 sm:$0xff]   ;;  %v9689_v8 = vld [vmem:[%s11119_s8 + $0x6c0] ss:$8 sps:$4 sm:$0xff]  }
  0xeb   : > { %6921 = vmatprep.subr.bf16.mxu1 %v9606_v9  ;;  %v9692_v9 = vld [vmem:[%s11119_s8 + $0x7c0] ss:$8 sps:$4 sm:$0xff]  }
  0xed   : > { %6881 = vmatpush1.bf16.msra.mxu0 %v9601_v10  ;;  %v9697_v10 = vld [vmem:[%s11119_s8 + $0x6d4] ss:$8 sps:$4 sm:$0xff]  }
  0xee   : > { %6922 = vmatpush1.bf16.msra.mxu1 %v9604_v11  ;;  %6882 = vmatprep.subr.bf16.mxu0 %v9609_v12  ;;  %v9700_v11 = vld [vmem:[%s11119_s8 + $0x7d4] ss:$8 sps:$4 sm:$0xff]   ;;  %v9695_v12 = vld [vmem:[%s11119_s8 + $0x6d0] ss:$8 sps:$4 sm:$0xff]  }
  0xef   : > { %6923 = vmatprep.subr.bf16.mxu1 %v9612_v13  ;;  %v9698_v13 = vld [vmem:[%s11119_s8 + $0x7d0] ss:$8 sps:$4 sm:$0xff]  }
  0xf1   : > { %6883 = vmatpush1.bf16.msra.mxu0 %v9607_v14  ;;  %v9703_v14 = vld [vmem:[%s11119_s8 + $0x6e4] ss:$8 sps:$4 sm:$0xff]  }
  0xf2   : > { %6924 = vmatpush1.bf16.msra.mxu1 %v9610_v15  ;;  %6934 = vmatprep.subr.bf16.mxu0 %v9619_v16  ;;  %v9706_v15 = vld [vmem:[%s11119_s8 + $0x7e4] ss:$8 sps:$4 sm:$0xff]   ;;  %v9701_v16 = vld [vmem:[%s11119_s8 + $0x6e0] ss:$8 sps:$4 sm:$0xff]  }
  0xf3   : > { %6975 = vmatprep.subr.bf16.mxu1 %v9622_v17  ;;  %v9704_v17 = vld [vmem:[%s11119_s8 + $0x7e0] ss:$8 sps:$4 sm:$0xff]  }
  0xf4   : > { %6885 = vmatmul.mubr.bf16.vlgmr.msra.gmra.mrb[8].mxu0 %v8177_v22  ;;  %v9707_v22 = vld [vmem:[%s11119_s8 + $0x6f0] ss:$8 sps:$4 sm:$0xff]  }
  0xf5   : > { %6926 = vmatmul.mubr.bf16.vlgmr.msra.gmra.mrb[8].mxu1 %v8179_v23  ;;  %6935 = vmatpush1.bf16.msra.mxu0 %v9617_v20  ;;  %v9709_v20 = vld [vmem:[%s11119_s8 + $0x6f4] ss:$8 sps:$4 sm:$0xff]   ;;  %v9710_v23 = vld [vmem:[%s11119_s8 + $0x7f0] ss:$8 sps:$4 sm:$0xff]  }
  0xf6   : > { %6976 = vmatpush1.bf16.msra.mxu1 %v9620_v21  ;;  %6936 = vmatprep.subr.bf16.mxu0 %v9625_v26  ;;  %v9712_v21 = vld [vmem:[%s11119_s8 + $0x7f4] ss:$8 sps:$4 sm:$0xff]   ;;  %v9719_v26 = vld [vmem:[%s11119_s8 + $0x804] ss:$8 sps:$4 sm:$0xff]  }
  0xf7   : > { %6977 = vmatprep.subr.bf16.mxu1 %v9628_v18  ;;  %6966 = vmatprep.mubr.bf16.mxu0 %v8182_v19  ;;  %v9722_v18 = vld [vmem:[%s11119_s8 + $0x904] ss:$8 sps:$4 sm:$0xff]  }
  0xf8   : > { %7007 = vmatprep.mubr.bf16.mxu1 %v8184_v27  ;;  %v11442_v19 = vld [vmem:[%s12522_s0 + $0x40] sm:$0xff]  ;;  %v8181_v27 = vcombine.low %v11366_v24, %v11366_v24  ;;  %v9728_v24 = vld [vmem:[%s11119_s8 + $0x914] ss:$8 sps:$4 sm:$0xff]  }
  0xf9   : > { %6937 = vmatpush1.bf16.msra.mxu0 %v9623_v28  ;;  %v8183_v28 = vcombine.low %v11371_v25, %v11371_v25  ;;  %v8186_v25 = vcombine.high %v11442_v19, %v11442_v19 }
  0xfa   : > { %6978 = vmatpush1.bf16.msra.mxu1 %v9626_v29  ;;  %6938 = vmatprep.subr.bf16.mxu0 %v9631_v30  ;;  %v11451_v29 = vld [vmem:[%s12522_s0 + $0x48] sm:$0xff] }
  0xfb   : > { %6979 = vmatprep.subr.bf16.mxu1 %v9634_v31  ;;  %v9717_v30 = vld [vmem:[%s11119_s8 + $0x800] ss:$8 sps:$4 sm:$0xff]  }
  0xfc   : > { %v9720_v31 = vld [vmem:[%s11119_s8 + $0x900] ss:$8 sps:$4 sm:$0xff]  }
  0xfd   : > { %6939 = vmatpush1.bf16.msra.mxu0 %v9629_v32  ;;  %v9725_v32 = vld [vmem:[%s11119_s8 + $0x814] ss:$8 sps:$4 sm:$0xff]  }
  0xfe   : > { %6980 = vmatpush1.bf16.msra.mxu1 %v9632_v33  ;;  %6940 = vmatprep.subr.bf16.mxu0 %v9637_v34  ;;  %v8188_v33 = vcombine.high %v11451_v29, %v11451_v29  ;;  %v9723_v34 = vld [vmem:[%s11119_s8 + $0x810] ss:$8 sps:$4 sm:$0xff]  }
  0xff   : > { %6981 = vmatprep.subr.bf16.mxu1 %v9640_v35  ;;  %v9726_v35 = vld [vmem:[%s11119_s8 + $0x910] ss:$8 sps:$4 sm:$0xff]  }
 0x101   : > { %6941 = vmatpush1.bf16.msra.mxu0 %v9635_v36  ;;  %v9731_v36 = vld [vmem:[%s11119_s8 + $0x824] ss:$8 sps:$4 sm:$0xff]  }
 0x102   : > { %6982 = vmatpush1.bf16.msra.mxu1 %v9638_v37  ;;  %6942 = vmatprep.subr.bf16.mxu0 %v9643_v38  ;;  %v9734_v37 = vld [vmem:[%s11119_s8 + $0x924] ss:$8 sps:$4 sm:$0xff]   ;;  %v9729_v38 = vld [vmem:[%s11119_s8 + $0x820] ss:$8 sps:$4 sm:$0xff]  }
 0x103   : > { %6983 = vmatprep.subr.bf16.mxu1 %v9646_v39  ;;  %v9732_v39 = vld [vmem:[%s11119_s8 + $0x920] ss:$8 sps:$4 sm:$0xff]  }
 0x105   : > { %6943 = vmatpush1.bf16.msra.mxu0 %v9641_v40  ;;  %v9737_v40 = vld [vmem:[%s11119_s8 + $0x834] ss:$8 sps:$4 sm:$0xff]  }
 0x106   : > { %6984 = vmatpush1.bf16.msra.mxu1 %v9644_v41  ;;  %6944 = vmatprep.subr.bf16.mxu0 %v9649_v42  ;;  %v9740_v41 = vld [vmem:[%s11119_s8 + $0x934] ss:$8 sps:$4 sm:$0xff]   ;;  %v9735_v42 = vld [vmem:[%s11119_s8 + $0x830] ss:$8 sps:$4 sm:$0xff]  }
 0x107   : > { %6985 = vmatprep.subr.bf16.mxu1 %v9652_v43  ;;  %v9738_v43 = vld [vmem:[%s11119_s8 + $0x930] ss:$8 sps:$4 sm:$0xff]  }
 0x109   : > { %6945 = vmatpush1.bf16.msra.mxu0 %v9647_v44  ;;  %v9743_v44 = vld [vmem:[%s11119_s8 + $0x844] ss:$8 sps:$4 sm:$0xff]  }
 0x10a   : > { %6986 = vmatpush1.bf16.msra.mxu1 %v9650_v45  ;;  %6946 = vmatprep.subr.bf16.mxu0 %v9655_v46  ;;  %v9746_v45 = vld [vmem:[%s11119_s8 + $0x944] ss:$8 sps:$4 sm:$0xff]   ;;  %v9741_v46 = vld [vmem:[%s11119_s8 + $0x840] ss:$8 sps:$4 sm:$0xff]  }
 0x10b   : > { %6987 = vmatprep.subr.bf16.mxu1 %v9658_v47  ;;  %v9744_v47 = vld [vmem:[%s11119_s8 + $0x940] ss:$8 sps:$4 sm:$0xff]  }
 0x10d   : > { %6947 = vmatpush1.bf16.msra.mxu0 %v9653_v48  ;;  %v9749_v48 = vld [vmem:[%s11119_s8 + $0x854] ss:$8 sps:$4 sm:$0xff]  }
 0x10e   : > { %6988 = vmatpush1.bf16.msra.mxu1 %v9656_v49  ;;  %6948 = vmatprep.subr.bf16.mxu0 %v9661_v50  ;;  %v9752_v49 = vld [vmem:[%s11119_s8 + $0x954] ss:$8 sps:$4 sm:$0xff]   ;;  %v9747_v50 = vld [vmem:[%s11119_s8 + $0x850] ss:$8 sps:$4 sm:$0xff]  }
 0x10f   : > { %6989 = vmatprep.subr.bf16.mxu1 %v9664_v51  ;;  %v9750_v51 = vld [vmem:[%s11119_s8 + $0x950] ss:$8 sps:$4 sm:$0xff]  }
 0x111   : > { %6949 = vmatpush1.bf16.msra.mxu0 %v9659_v52  ;;  %v9755_v52 = vld [vmem:[%s11119_s8 + $0x864] ss:$8 sps:$4 sm:$0xff]  }
 0x112   : > { %6990 = vmatpush1.bf16.msra.mxu1 %v9662_v53  ;;  %6950 = vmatprep.subr.bf16.mxu0 %v9667_v54  ;;  %v9758_v53 = vld [vmem:[%s11119_s8 + $0x964] ss:$8 sps:$4 sm:$0xff]  }
 0x113   : > { %6991 = vmatprep.subr.bf16.mxu1 %v9670_v55 }
 0x115   : > { %6951 = vmatpush1.bf16.msra.mxu0 %v9665_v56  ;;  %v9753_v56 = vld [vmem:[%s11119_s8 + $0x860] ss:$8 sps:$4 sm:$0xff]  }
 0x116   : > { %6992 = vmatpush1.bf16.msra.mxu1 %v9668_v57  ;;  %6952 = vmatprep.subr.bf16.mxu0 %v9673_v58  ;;  %v9756_v57 = vld [vmem:[%s11119_s8 + $0x960] ss:$8 sps:$4 sm:$0xff]  }
 0x117   : > { %6993 = vmatprep.subr.bf16.mxu1 %v9676_v59 }
 0x119   : > { %6953 = vmatpush1.bf16.msra.mxu0 %v9671_v60 }
 0x11a   : > { %6994 = vmatpush1.bf16.msra.mxu1 %v9674_v61  ;;  %6954 = vmatprep.subr.bf16.mxu0 %v9679_v62 }
 0x11b   : > { %6995 = vmatprep.subr.bf16.mxu1 %v9682_v63 }
 0x11d   : > { %6955 = vmatpush1.bf16.msra.mxu0 %v9677_v0 }
 0x11e   : > { %6996 = vmatpush1.bf16.msra.mxu1 %v9680_v1  ;;  %6956 = vmatprep.subr.bf16.mxu0 %v9685_v2  ;;  %v9761_v2 = vld [vmem:[%s11119_s8 + $0x874] ss:$8 sps:$4 sm:$0xff]  }
 0x11f   : > { %6997 = vmatprep.subr.bf16.mxu1 %v9688_v3  ;;  %v9764_v3 = vld [vmem:[%s11119_s8 + $0x974] ss:$8 sps:$4 sm:$0xff]  }
 0x121   : > { %6957 = vmatpush1.bf16.msra.mxu0 %v9683_v4  ;;  %v9759_v4 = vld [vmem:[%s11119_s8 + $0x870] ss:$8 sps:$4 sm:$0xff]  }
 0x122   : > { %6998 = vmatpush1.bf16.msra.mxu1 %v9686_v5  ;;  %6958 = vmatprep.subr.bf16.mxu0 %v9691_v6  ;;  %v9762_v5 = vld [vmem:[%s11119_s8 + $0x970] ss:$8 sps:$4 sm:$0xff]   ;;  %v9767_v6 = vld [vmem:[%s11119_s8 + $0x884] ss:$8 sps:$4 sm:$0xff]  }
 0x123   : > { %6999 = vmatprep.subr.bf16.mxu1 %v9694_v7  ;;  %v9770_v7 = vld [vmem:[%s11119_s8 + $0x984] ss:$8 sps:$4 sm:$0xff]  }
 0x125   : > { %6959 = vmatpush1.bf16.msra.mxu0 %v9689_v8  ;;  %v9765_v8 = vld [vmem:[%s11119_s8 + $0x880] ss:$8 sps:$4 sm:$0xff]  }
 0x126   : > { %7000 = vmatpush1.bf16.msra.mxu1 %v9692_v9  ;;  %6960 = vmatprep.subr.bf16.mxu0 %v9697_v10  ;;  %v9768_v9 = vld [vmem:[%s11119_s8 + $0x980] ss:$8 sps:$4 sm:$0xff]   ;;  %v9773_v10 = vld [vmem:[%s11119_s8 + $0x894] ss:$8 sps:$4 sm:$0xff]  }
 0x127   : > { %7001 = vmatprep.subr.bf16.mxu1 %v9700_v11  ;;  %v9776_v11 = vld [vmem:[%s11119_s8 + $0x994] ss:$8 sps:$4 sm:$0xff]  }
 0x129   : > { %6961 = vmatpush1.bf16.msra.mxu0 %v9695_v12  ;;  %v9771_v12 = vld [vmem:[%s11119_s8 + $0x890] ss:$8 sps:$4 sm:$0xff]  }
 0x12a   : > { %7002 = vmatpush1.bf16.msra.mxu1 %v9698_v13  ;;  %6962 = vmatprep.subr.bf16.mxu0 %v9703_v14  ;;  %v9774_v13 = vld [vmem:[%s11119_s8 + $0x990] ss:$8 sps:$4 sm:$0xff]   ;;  %v9779_v14 = vld [vmem:[%s11119_s8 + $0x8a4] ss:$8 sps:$4 sm:$0xff]  }
 0x12b   : > { %7003 = vmatprep.subr.bf16.mxu1 %v9706_v15  ;;  %v9782_v15 = vld [vmem:[%s11119_s8 + $0x9a4] ss:$8 sps:$4 sm:$0xff]  }
 0x12d   : > { %6963 = vmatpush1.bf16.msra.mxu0 %v9701_v16  ;;  %v9777_v16 = vld [vmem:[%s11119_s8 + $0x8a0] ss:$8 sps:$4 sm:$0xff]  }
 0x12e   : > { %7004 = vmatpush1.bf16.msra.mxu1 %v9704_v17  ;;  %6964 = vmatprep.subr.bf16.mxu0 %v9709_v20  ;;  %v9780_v17 = vld [vmem:[%s11119_s8 + $0x9a0] ss:$8 sps:$4 sm:$0xff]   ;;  %v9785_v20 = vld [vmem:[%s11119_s8 + $0x8b4] ss:$8 sps:$4 sm:$0xff]  }
 0x12f   : > { %7005 = vmatprep.subr.bf16.mxu1 %v9712_v21  ;;  %v9788_v21 = vld [vmem:[%s11119_s8 + $0x9b4] ss:$8 sps:$4 sm:$0xff]  }
 0x131   : > { %6965 = vmatpush1.bf16.msra.mxu0 %v9707_v22  ;;  %v9783_v22 = vld [vmem:[%s11119_s8 + $0x8b0] ss:$8 sps:$4 sm:$0xff]  }
 0x132   : > { %7006 = vmatpush1.bf16.msra.mxu1 %v9710_v23  ;;  %7016 = vmatprep.subr.bf16.mxu0 %v9719_v26  ;;  %v9786_v23 = vld [vmem:[%s11119_s8 + $0x9b0] ss:$8 sps:$4 sm:$0xff]   ;;  %v9791_v26 = vld [vmem:[%s11119_s8 + $0x8c4] ss:$8 sps:$4 sm:$0xff]  }
 0x133   : > { %7057 = vmatprep.subr.bf16.mxu1 %v9722_v18  ;;  %v9794_v18 = vld [vmem:[%s11119_s8 + $0x9c4] ss:$8 sps:$4 sm:$0xff]  }
 0x134   : > { %6967 = vmatmul.mubr.bf16.vlgmr.msra.gmra.mrb[12].mxu0 %v8181_v27  ;;  %v9789_v27 = vld [vmem:[%s11119_s8 + $0x8c0] ss:$8 sps:$4 sm:$0xff]  }
 0x135   : > { %7008 = vmatmul.mubr.bf16.vlgmr.msra.gmra.mrb[12].mxu1 %v8183_v28  ;;  %7017 = vmatpush1.bf16.msra.mxu0 %v9717_v30  ;;  %v9792_v28 = vld [vmem:[%s11119_s8 + $0x9c0] ss:$8 sps:$4 sm:$0xff]   ;;  %v9797_v30 = vld [vmem:[%s11119_s8 + $0x8d4] ss:$8 sps:$4 sm:$0xff]  }
 0x136   : > { %7058 = vmatpush1.bf16.msra.mxu1 %v9720_v31  ;;  %7018 = vmatprep.subr.bf16.mxu0 %v9725_v32  ;;  %v9800_v31 = vld [vmem:[%s11119_s8 + $0x9d4] ss:$8 sps:$4 sm:$0xff]   ;;  %v9795_v32 = vld [vmem:[%s11119_s8 + $0x8d0] ss:$8 sps:$4 sm:$0xff]  }
 0x137   : > { %7059 = vmatprep.subr.bf16.mxu1 %v9728_v24  ;;  %7048 = vmatprep.mubr.bf16.mxu0 %v8186_v25  ;;  %v9798_v24 = vld [vmem:[%s11119_s8 + $0x9d0] ss:$8 sps:$4 sm:$0xff]   ;;  %v9803_v25 = vld [vmem:[%s11119_s8 + $0x8e4] ss:$8 sps:$4 sm:$0xff]  }
 0x138   : > { %7089 = vmatprep.mubr.bf16.mxu1 %v8188_v33  ;;  %v9806_v33 = vld [vmem:[%s11119_s8 + $0x9e4] ss:$8 sps:$4 sm:$0xff]  }
 0x139   : > { %7019 = vmatpush1.bf16.msra.mxu0 %v9723_v34  ;;  %v9801_v34 = vld [vmem:[%s11119_s8 + $0x8e0] ss:$8 sps:$4 sm:$0xff]  }
 0x13a   : > { %7060 = vmatpush1.bf16.msra.mxu1 %v9726_v35  ;;  %7020 = vmatprep.subr.bf16.mxu0 %v9731_v36  ;;  %v9804_v35 = vld [vmem:[%s11119_s8 + $0x9e0] ss:$8 sps:$4 sm:$0xff]   ;;  %v9809_v36 = vld [vmem:[%s11119_s8 + $0x8f4] ss:$8 sps:$4 sm:$0xff]  }
 0x13b   : > { %7061 = vmatprep.subr.bf16.mxu1 %v9734_v37  ;;  %v9812_v37 = vld [vmem:[%s11119_s8 + $0x9f4] ss:$8 sps:$4 sm:$0xff]  }
 0x13d   : > { %7021 = vmatpush1.bf16.msra.mxu0 %v9729_v38  ;;  %v9807_v38 = vld [vmem:[%s11119_s8 + $0x8f0] ss:$8 sps:$4 sm:$0xff]  }
 0x13e   : > { %7062 = vmatpush1.bf16.msra.mxu1 %v9732_v39  ;;  %7022 = vmatprep.subr.bf16.mxu0 %v9737_v40  ;;  %v9810_v39 = vld [vmem:[%s11119_s8 + $0x9f0] ss:$8 sps:$4 sm:$0xff]   ;;  %v9819_v40 = vld [vmem:[%s11119_s8 + $0xa04] ss:$8 sps:$4 sm:$0xff]  }
 0x13f   : > { %7063 = vmatprep.subr.bf16.mxu1 %v9740_v41  ;;  %v9822_v41 = vld [vmem:[%s11119_s8 + $0xb04] ss:$8 sps:$4 sm:$0xff]  }
 0x141   : > { %7023 = vmatpush1.bf16.msra.mxu0 %v9735_v42  ;;  %v9817_v42 = vld [vmem:[%s11119_s8 + $0xa00] ss:$8 sps:$4 sm:$0xff]  }
 0x142   : > { %7064 = vmatpush1.bf16.msra.mxu1 %v9738_v43  ;;  %7024 = vmatprep.subr.bf16.mxu0 %v9743_v44  ;;  %v9820_v43 = vld [vmem:[%s11119_s8 + $0xb00] ss:$8 sps:$4 sm:$0xff]   ;;  %v8185_v44 = vcombine.low %v11442_v19, %v11442_v19  ;;  %v9825_v19 = vld [vmem:[%s11119_s8 + $0xa14] ss:$8 sps:$4 sm:$0xff]  }
 0x143   : > { %7065 = vmatprep.subr.bf16.mxu1 %v9746_v45  ;;  %v8187_v45 = vcombine.low %v11451_v29, %v11451_v29 }
 0x145   : > { %7025 = vmatpush1.bf16.msra.mxu0 %v9741_v46  ;;  %v11534_v46 = vld [vmem:[%s12522_s0 + $0x50] sm:$0xff] }
 0x146   : > { %7066 = vmatpush1.bf16.msra.mxu1 %v9744_v47  ;;  %7026 = vmatprep.subr.bf16.mxu0 %v9749_v48  ;;  %v11539_v47 = vld [vmem:[%s12522_s0 + $0x58] sm:$0xff]  ;;  %v8190_v29 = vcombine.high %v11534_v46, %v11534_v46 }
 0x147   : > { %7067 = vmatprep.subr.bf16.mxu1 %v9752_v49  ;;  %v6722_v54 = vpop.f32.mrb[0].mxu0  ;;  %v9828_v48 = vld [vmem:[%s11119_s8 + $0xb14] ss:$8 sps:$4 sm:$0xff]   ;;  %v8192_v49 = vcombine.high %v11539_v47, %v11539_v47 }
 0x148   : > { %v6763_v55 = vpop.f32.mrb[0].mxu1  ;;  %v6724_v59 = vpop.f32.mrb[1].mxu0 }
 0x149   : > { %v11483_v58 = vadd.f32 %v6763_v55, %v6722_v54  ;;  %v6765_v60 = vpop.f32.mrb[1].mxu1  ;;  %v6726_v62 = vpop.f32.mrb[2].mxu0  ;;  %7027 = vmatpush1.bf16.msra.mxu0 %v9747_v50  ;;  %v9823_v50 = vld [vmem:[%s11119_s8 + $0xa10] ss:$8 sps:$4 sm:$0xff]   ;;  %v9829_v54 = vld [vmem:[%s11119_s8 + $0xa20] ss:$8 sps:$4 sm:$0xff]  }
 0x14a   : > { %v11485_v61 = vadd.f32 %v6765_v60, %v6724_v59  ;;  %v6767_v63 = vpop.f32.mrb[2].mxu1  ;;  %7068 = vmatpush1.bf16.msra.mxu1 %v9750_v51  ;;  %v6727_v0 = vpop.f32.mrb[3].mxu0  ;;  %7028 = vmatprep.subr.bf16.mxu0 %v9755_v52  ;;  %v9826_v51 = vld [vmem:[%s11119_s8 + $0xb10] ss:$8 sps:$4 sm:$0xff]   ;;  %v9831_v52 = vld [vmem:[%s11119_s8 + $0xa24] ss:$8 sps:$4 sm:$0xff]  }
 0x14b   : > { %v6768_v1 = vpop.f32.mrb[3].mxu1  ;;  %7069 = vmatprep.subr.bf16.mxu1 %v9758_v53  ;;  %v9834_v53 = vld [vmem:[%s11119_s8 + $0xb24] ss:$8 sps:$4 sm:$0xff]   ;;  %v9832_v55 = vld [vmem:[%s11119_s8 + $0xb20] ss:$8 sps:$4 sm:$0xff]  }
 0x14c   : > { %v9835_v59 = vld [vmem:[%s11119_s8 + $0xa30] ss:$8 sps:$4 sm:$0xff]   ;;  %v9843_v62 = vld [vmem:[%s11119_s8 + $0xa44] ss:$8 sps:$4 sm:$0xff]   ;;  %v9841_v0 = vld [vmem:[%s11119_s8 + $0xa40] ss:$8 sps:$4 sm:$0xff]  }
 0x14d   : > { %7029 = vmatpush1.bf16.msra.mxu0 %v9753_v56  ;;  %v9837_v56 = vld [vmem:[%s11119_s8 + $0xa34] ss:$8 sps:$4 sm:$0xff]   ;;  %v9838_v60 = vld [vmem:[%s11119_s8 + $0xb30] ss:$8 sps:$4 sm:$0xff]   ;;  %v9846_v63 = vld [vmem:[%s11119_s8 + $0xb44] ss:$8 sps:$4 sm:$0xff]  }
 0x14e   : > { %7070 = vmatpush1.bf16.msra.mxu1 %v9756_v57  ;;  %7030 = vmatprep.subr.bf16.mxu0 %v9761_v2  ;;  %v9840_v57 = vld [vmem:[%s11119_s8 + $0xb34] ss:$8 sps:$4 sm:$0xff]   ;;  %v9844_v1 = vld [vmem:[%s11119_s8 + $0xb40] ss:$8 sps:$4 sm:$0xff]  }
 0x14f   : > { %7071 = vmatprep.subr.bf16.mxu1 %v9764_v3  ;;  %v9849_v2 = vld [vmem:[%s11119_s8 + $0xa54] ss:$8 sps:$4 sm:$0xff]  }
 0x150   : > { %v9852_v3 = vld [vmem:[%s11119_s8 + $0xb54] ss:$8 sps:$4 sm:$0xff]  }
 0x151   : > { %7031 = vmatpush1.bf16.msra.mxu0 %v9759_v4  ;;  %v9847_v4 = vld [vmem:[%s11119_s8 + $0xa50] ss:$8 sps:$4 sm:$0xff]  }
 0x152   : > { %7072 = vmatpush1.bf16.msra.mxu1 %v9762_v5  ;;  %7032 = vmatprep.subr.bf16.mxu0 %v9767_v6  ;;  %v9850_v5 = vld [vmem:[%s11119_s8 + $0xb50] ss:$8 sps:$4 sm:$0xff]   ;;  %v9855_v6 = vld [vmem:[%s11119_s8 + $0xa64] ss:$8 sps:$4 sm:$0xff]  }
 0x153   : > { %7073 = vmatprep.subr.bf16.mxu1 %v9770_v7  ;;  %v9858_v7 = vld [vmem:[%s11119_s8 + $0xb64] ss:$8 sps:$4 sm:$0xff]  }
 0x155   : > { %7033 = vmatpush1.bf16.msra.mxu0 %v9765_v8 }
 0x156   : > { %7074 = vmatpush1.bf16.msra.mxu1 %v9768_v9  ;;  %7034 = vmatprep.subr.bf16.mxu0 %v9773_v10  ;;  %v9853_v10 = vld [vmem:[%s11119_s8 + $0xa60] ss:$8 sps:$4 sm:$0xff]  }
 0x157   : > { %7075 = vmatprep.subr.bf16.mxu1 %v9776_v11  ;;  %v9856_v11 = vld [vmem:[%s11119_s8 + $0xb60] ss:$8 sps:$4 sm:$0xff]  }
 0x159   : > { %7035 = vmatpush1.bf16.msra.mxu0 %v9771_v12 }
 0x15a   : > { %7076 = vmatpush1.bf16.msra.mxu1 %v9774_v13  ;;  %7036 = vmatprep.subr.bf16.mxu0 %v9779_v14 }
 0x15b   : > { %7077 = vmatprep.subr.bf16.mxu1 %v9782_v15 }
 0x15d   : > { %7037 = vmatpush1.bf16.msra.mxu0 %v9777_v16 }
 0x15e   : > { %7078 = vmatpush1.bf16.msra.mxu1 %v9780_v17  ;;  %7038 = vmatprep.subr.bf16.mxu0 %v9785_v20 }
 0x15f   : > { %7079 = vmatprep.subr.bf16.mxu1 %v9788_v21 }
 0x161   : > { %7039 = vmatpush1.bf16.msra.mxu0 %v9783_v22 }
 0x162   : > { %7080 = vmatpush1.bf16.msra.mxu1 %v9786_v23  ;;  %7040 = vmatprep.subr.bf16.mxu0 %v9791_v26  ;;  %v9864_v23 = vld [vmem:[%s11119_s8 + $0xb74] ss:$8 sps:$4 sm:$0xff]  }
 0x163   : > { %7081 = vmatprep.subr.bf16.mxu1 %v9794_v18  ;;  %v9862_v18 = vld [vmem:[%s11119_s8 + $0xb70] ss:$8 sps:$4 sm:$0xff]  }
 0x165   : > { %7041 = vmatpush1.bf16.msra.mxu0 %v9789_v27  ;;  %v9867_v27 = vld [vmem:[%s11119_s8 + $0xa84] ss:$8 sps:$4 sm:$0xff]  }
 0x166   : > { %7082 = vmatpush1.bf16.msra.mxu1 %v9792_v28  ;;  %7042 = vmatprep.subr.bf16.mxu0 %v9797_v30  ;;  %v9870_v28 = vld [vmem:[%s11119_s8 + $0xb84] ss:$8 sps:$4 sm:$0xff]   ;;  %v9865_v30 = vld [vmem:[%s11119_s8 + $0xa80] ss:$8 sps:$4 sm:$0xff]  }
 0x167   : > { %7083 = vmatprep.subr.bf16.mxu1 %v9800_v31  ;;  %v9868_v31 = vld [vmem:[%s11119_s8 + $0xb80] ss:$8 sps:$4 sm:$0xff]  }
 0x169   : > { %7043 = vmatpush1.bf16.msra.mxu0 %v9795_v32  ;;  %v9873_v32 = vld [vmem:[%s11119_s8 + $0xa94] ss:$8 sps:$4 sm:$0xff]  }
 0x16a   : > { %7084 = vmatpush1.bf16.msra.mxu1 %v9798_v24  ;;  %7044 = vmatprep.subr.bf16.mxu0 %v9803_v25  ;;  %v9876_v24 = vld [vmem:[%s11119_s8 + $0xb94] ss:$8 sps:$4 sm:$0xff]   ;;  %v9871_v25 = vld [vmem:[%s11119_s8 + $0xa90] ss:$8 sps:$4 sm:$0xff]  }
 0x16b   : > { %7085 = vmatprep.subr.bf16.mxu1 %v9806_v33  ;;  %v9874_v33 = vld [vmem:[%s11119_s8 + $0xb90] ss:$8 sps:$4 sm:$0xff]  }
 0x16d   : > { %7045 = vmatpush1.bf16.msra.mxu0 %v9801_v34  ;;  %v9879_v34 = vld [vmem:[%s11119_s8 + $0xaa4] ss:$8 sps:$4 sm:$0xff]  }
 0x16e   : > { %7086 = vmatpush1.bf16.msra.mxu1 %v9804_v35  ;;  %7046 = vmatprep.subr.bf16.mxu0 %v9809_v36  ;;  %v9882_v35 = vld [vmem:[%s11119_s8 + $0xba4] ss:$8 sps:$4 sm:$0xff]   ;;  %v9877_v36 = vld [vmem:[%s11119_s8 + $0xaa0] ss:$8 sps:$4 sm:$0xff]  }
 0x16f   : > { %7087 = vmatprep.subr.bf16.mxu1 %v9812_v37  ;;  %v9880_v37 = vld [vmem:[%s11119_s8 + $0xba0] ss:$8 sps:$4 sm:$0xff]  }
 0x171   : > { %7047 = vmatpush1.bf16.msra.mxu0 %v9807_v38  ;;  %v9885_v38 = vld [vmem:[%s11119_s8 + $0xab4] ss:$8 sps:$4 sm:$0xff]  }
 0x172   : > { %7088 = vmatpush1.bf16.msra.mxu1 %v9810_v39  ;;  %7098 = vmatprep.subr.bf16.mxu0 %v9819_v40  ;;  %v9888_v39 = vld [vmem:[%s11119_s8 + $0xbb4] ss:$8 sps:$4 sm:$0xff]   ;;  %v9883_v40 = vld [vmem:[%s11119_s8 + $0xab0] ss:$8 sps:$4 sm:$0xff]  }
 0x173   : > { %7139 = vmatprep.subr.bf16.mxu1 %v9822_v41  ;;  %v9886_v41 = vld [vmem:[%s11119_s8 + $0xbb0] ss:$8 sps:$4 sm:$0xff]  }
 0x174   : > { %7049 = vmatmul.mubr.bf16.vlgmr.msra.gmra.mrb[16].mxu0 %v8185_v44  ;;  %v9889_v44 = vld [vmem:[%s11119_s8 + $0xac0] ss:$8 sps:$4 sm:$0xff]  }
 0x175   : > { %7090 = vmatmul.mubr.bf16.vlgmr.msra.gmra.mrb[16].mxu1 %v8187_v45  ;;  %7099 = vmatpush1.bf16.msra.mxu0 %v9817_v42  ;;  %v9891_v42 = vld [vmem:[%s11119_s8 + $0xac4] ss:$8 sps:$4 sm:$0xff]   ;;  %v9892_v45 = vld [vmem:[%s11119_s8 + $0xbc0] ss:$8 sps:$4 sm:$0xff]  }
 0x176   : > { %7140 = vmatpush1.bf16.msra.mxu1 %v9820_v43  ;;  %7100 = vmatprep.subr.bf16.mxu0 %v9825_v19  ;;  %v9894_v43 = vld [vmem:[%s11119_s8 + $0xbc4] ss:$8 sps:$4 sm:$0xff]   ;;  %v9897_v19 = vld [vmem:[%s11119_s8 + $0xad4] ss:$8 sps:$4 sm:$0xff]  }
 0x177   : > { %7141 = vmatprep.subr.bf16.mxu1 %v9828_v48  ;;  %7130 = vmatprep.mubr.bf16.mxu0 %v8190_v29  ;;  %v9900_v48 = vld [vmem:[%s11119_s8 + $0xbd4] ss:$8 sps:$4 sm:$0xff]   ;;  %v9895_v29 = vld [vmem:[%s11119_s8 + $0xad0] ss:$8 sps:$4 sm:$0xff]  }
 0x178   : > { %7171 = vmatprep.mubr.bf16.mxu1 %v8192_v49  ;;  %v9898_v49 = vld [vmem:[%s11119_s8 + $0xbd0] ss:$8 sps:$4 sm:$0xff]  }
 0x179   : > { %7101 = vmatpush1.bf16.msra.mxu0 %v9823_v50  ;;  %v9903_v50 = vld [vmem:[%s11119_s8 + $0xae4] ss:$8 sps:$4 sm:$0xff]  }
 0x17a   : > { %7142 = vmatpush1.bf16.msra.mxu1 %v9826_v51  ;;  %7102 = vmatprep.subr.bf16.mxu0 %v9831_v52  ;;  %v9906_v51 = vld [vmem:[%s11119_s8 + $0xbe4] ss:$8 sps:$4 sm:$0xff]   ;;  %v9901_v52 = vld [vmem:[%s11119_s8 + $0xae0] ss:$8 sps:$4 sm:$0xff]  }
 0x17b   : > { %7143 = vmatprep.subr.bf16.mxu1 %v9834_v53  ;;  %v9904_v53 = vld [vmem:[%s11119_s8 + $0xbe0] ss:$8 sps:$4 sm:$0xff]  }
 0x17d   : > { %7103 = vmatpush1.bf16.msra.mxu0 %v9829_v54  ;;  %v9909_v54 = vld [vmem:[%s11119_s8 + $0xaf4] ss:$8 sps:$4 sm:$0xff]  }
 0x17e   : > { %7144 = vmatpush1.bf16.msra.mxu1 %v9832_v55  ;;  %7104 = vmatprep.subr.bf16.mxu0 %v9837_v56  ;;  %v9912_v55 = vld [vmem:[%s11119_s8 + $0xbf4] ss:$8 sps:$4 sm:$0xff]   ;;  %v9907_v56 = vld [vmem:[%s11119_s8 + $0xaf0] ss:$8 sps:$4 sm:$0xff]  }
 0x17f   : > { %7145 = vmatprep.subr.bf16.mxu1 %v9840_v57  ;;  %v9910_v57 = vld [vmem:[%s11119_s8 + $0xbf0] ss:$8 sps:$4 sm:$0xff]  }
 0x181   : > { %7105 = vmatpush1.bf16.msra.mxu0 %v9835_v59  ;;  %v9919_v59 = vld [vmem:[%s11119_s8 + $0xc04] ss:$8 sps:$4 sm:$0xff]  }
 0x182   : > { %7146 = vmatpush1.bf16.msra.mxu1 %v9838_v60  ;;  %7106 = vmatprep.subr.bf16.mxu0 %v9843_v62  ;;  %v9922_v60 = vld [vmem:[%s11119_s8 + $0xd04] ss:$8 sps:$4 sm:$0xff]   ;;  %v9917_v62 = vld [vmem:[%s11119_s8 + $0xc00] ss:$8 sps:$4 sm:$0xff]  }
 0x183   : > { %7147 = vmatprep.subr.bf16.mxu1 %v9846_v63  ;;  %v9920_v63 = vld [vmem:[%s11119_s8 + $0xd00] ss:$8 sps:$4 sm:$0xff]  }
 0x185   : > { %7107 = vmatpush1.bf16.msra.mxu0 %v9841_v0  ;;  %v8189_v0 = vcombine.low %v11534_v46, %v11534_v46  ;;  %v9925_v46 = vld [vmem:[%s11119_s8 + $0xc14] ss:$8 sps:$4 sm:$0xff]  }
 0x186   : > { %7148 = vmatpush1.bf16.msra.mxu1 %v9844_v1  ;;  %7108 = vmatprep.subr.bf16.mxu0 %v9849_v2  ;;  %v8191_v1 = vcombine.low %v11539_v47, %v11539_v47  ;;  %v11622_v2 = vld [vmem:[%s12522_s0 + $0x60] sm:$0xff] }
 0x187   : > { %7149 = vmatprep.subr.bf16.mxu1 %v9852_v3  ;;  %v6804_v8 = vpop.f32.mrb[4].mxu0  ;;  %v11627_v3 = vld [vmem:[%s12522_s0 + $0x68] sm:$0xff]  ;;  %v8194_v47 = vcombine.high %v11622_v2, %v11622_v2 }
 0x188   : > { %v6845_v9 = vpop.f32.mrb[4].mxu1  ;;  %v6805_v12 = vadd.f32 %v6804_v8, %v11483_v58  ;;  %v6806_v13 = vpop.f32.mrb[5].mxu0  ;;  %v9861_v58 = vld [vmem:[%s11119_s8 + $0xa74] ss:$8 sps:$4 sm:$0xff]   ;;  %v9931_v8 = vld [vmem:[%s11119_s8 + $0xc24] ss:$8 sps:$4 sm:$0xff]  }
 0x189   : > { %v6847_v14 = vpop.f32.mrb[5].mxu1  ;;  %v6807_v15 = vadd.f32 %v6806_v13, %v11485_v61  ;;  %v6808_v16 = vpop.f32.mrb[6].mxu0  ;;  %7109 = vmatpush1.bf16.msra.mxu0 %v9847_v4  ;;  %v9859_v61 = vld [vmem:[%s11119_s8 + $0xa70] ss:$8 sps:$4 sm:$0xff]   ;;  %v9928_v4 = vld [vmem:[%s11119_s8 + $0xd14] ss:$8 sps:$4 sm:$0xff]  }
 0x18a   : > { %v6849_v17 = vpop.f32.mrb[6].mxu1  ;;  %7150 = vmatpush1.bf16.msra.mxu1 %v9850_v5  ;;  %v11571_v20 = vadd.f32 %v6845_v9, %v6805_v12  ;;  %v6809_v21 = vpop.f32.mrb[7].mxu0  ;;  %7110 = vmatprep.subr.bf16.mxu0 %v9855_v6  ;;  %v8196_v5 = vcombine.high %v11627_v3, %v11627_v3  ;;  %v9923_v6 = vld [vmem:[%s11119_s8 + $0xc10] ss:$8 sps:$4 sm:$0xff]   ;;  %v9934_v9 = vld [vmem:[%s11119_s8 + $0xd24] ss:$8 sps:$4 sm:$0xff]  }
 0x18b   : > { %v6850_v22 = vpop.f32.mrb[7].mxu1  ;;  %7151 = vmatprep.subr.bf16.mxu1 %v9858_v7  ;;  %v11575_v26 = vadd.f32 %v6847_v14, %v6807_v15  ;;  %v9926_v7 = vld [vmem:[%s11119_s8 + $0xd10] ss:$8 sps:$4 sm:$0xff]   ;;  %v9937_v12 = vld [vmem:[%s11119_s8 + $0xc34] ss:$8 sps:$4 sm:$0xff]  }
 0x18c   : > { %v9940_v13 = vld [vmem:[%s11119_s8 + $0xd34] ss:$8 sps:$4 sm:$0xff]   ;;  %v9935_v14 = vld [vmem:[%s11119_s8 + $0xc30] ss:$8 sps:$4 sm:$0xff]   ;;  %v9943_v16 = vld [vmem:[%s11119_s8 + $0xc44] ss:$8 sps:$4 sm:$0xff]  }
 0x18d   : > { %7111 = vmatpush1.bf16.msra.mxu0 %v9853_v10  ;;  %v9929_v10 = vld [vmem:[%s11119_s8 + $0xc20] ss:$8 sps:$4 sm:$0xff]   ;;  %v9938_v15 = vld [vmem:[%s11119_s8 + $0xd30] ss:$8 sps:$4 sm:$0xff]   ;;  %v9946_v17 = vld [vmem:[%s11119_s8 + $0xd44] ss:$8 sps:$4 sm:$0xff]  }
 0x18e   : > { %7152 = vmatpush1.bf16.msra.mxu1 %v9856_v11  ;;  %7112 = vmatprep.subr.bf16.mxu0 %v9861_v58  ;;  %v9932_v11 = vld [vmem:[%s11119_s8 + $0xd20] ss:$8 sps:$4 sm:$0xff]   ;;  %v9949_v58 = vld [vmem:[%s11119_s8 + $0xc54] ss:$8 sps:$4 sm:$0xff]  }
 0x18f   : > { %7153 = vmatprep.subr.bf16.mxu1 %v9864_v23  ;;  %v9941_v21 = vld [vmem:[%s11119_s8 + $0xc40] ss:$8 sps:$4 sm:$0xff]   ;;  %v9952_v23 = vld [vmem:[%s11119_s8 + $0xd54] ss:$8 sps:$4 sm:$0xff]  }
 0x190   : > { %v9944_v22 = vld [vmem:[%s11119_s8 + $0xd40] ss:$8 sps:$4 sm:$0xff]  }
 0x191   : > { %7113 = vmatpush1.bf16.msra.mxu0 %v9859_v61  ;;  %v9947_v61 = vld [vmem:[%s11119_s8 + $0xc50] ss:$8 sps:$4 sm:$0xff]  }
 0x192   : > { %7154 = vmatpush1.bf16.msra.mxu1 %v9862_v18  ;;  %7114 = vmatprep.subr.bf16.mxu0 %v9867_v27  ;;  %v9950_v18 = vld [vmem:[%s11119_s8 + $0xd50] ss:$8 sps:$4 sm:$0xff]   ;;  %v9955_v27 = vld [vmem:[%s11119_s8 + $0xc64] ss:$8 sps:$4 sm:$0xff]  }
 0x193   : > { %7155 = vmatprep.subr.bf16.mxu1 %v9870_v28  ;;  %v9958_v28 = vld [vmem:[%s11119_s8 + $0xd64] ss:$8 sps:$4 sm:$0xff]  }
 0x195   : > { %7115 = vmatpush1.bf16.msra.mxu0 %v9865_v30 }
 0x196   : > { %7156 = vmatpush1.bf16.msra.mxu1 %v9868_v31  ;;  %7116 = vmatprep.subr.bf16.mxu0 %v9873_v32  ;;  %v9953_v32 = vld [vmem:[%s11119_s8 + $0xc60] ss:$8 sps:$4 sm:$0xff]  }
 0x197   : > { %7157 = vmatprep.subr.bf16.mxu1 %v9876_v24  ;;  %v9956_v24 = vld [vmem:[%s11119_s8 + $0xd60] ss:$8 sps:$4 sm:$0xff]  }
 0x199   : > { %7117 = vmatpush1.bf16.msra.mxu0 %v9871_v25 }
 0x19a   : > { %7158 = vmatpush1.bf16.msra.mxu1 %v9874_v33  ;;  %7118 = vmatprep.subr.bf16.mxu0 %v9879_v34 }
 0x19b   : > { %7159 = vmatprep.subr.bf16.mxu1 %v9882_v35 }
 0x19d   : > { %7119 = vmatpush1.bf16.msra.mxu0 %v9877_v36 }
 0x19e   : > { %7160 = vmatpush1.bf16.msra.mxu1 %v9880_v37  ;;  %7120 = vmatprep.subr.bf16.mxu0 %v9885_v38 }
 0x19f   : > { %7161 = vmatprep.subr.bf16.mxu1 %v9888_v39 }
 0x1a1   : > { %7121 = vmatpush1.bf16.msra.mxu0 %v9883_v40 }
 0x1a2   : > { %7162 = vmatpush1.bf16.msra.mxu1 %v9886_v41  ;;  %7122 = vmatprep.subr.bf16.mxu0 %v9891_v42  ;;  %v9964_v41 = vld [vmem:[%s11119_s8 + $0xd74] ss:$8 sps:$4 sm:$0xff]  }
 0x1a3   : > { %7163 = vmatprep.subr.bf16.mxu1 %v9894_v43  ;;  %v9962_v43 = vld [vmem:[%s11119_s8 + $0xd70] ss:$8 sps:$4 sm:$0xff]  }
 0x1a5   : > { %7123 = vmatpush1.bf16.msra.mxu0 %v9889_v44  ;;  %v9967_v44 = vld [vmem:[%s11119_s8 + $0xc84] ss:$8 sps:$4 sm:$0xff]  }
 0x1a6   : > { %7164 = vmatpush1.bf16.msra.mxu1 %v9892_v45  ;;  %7124 = vmatprep.subr.bf16.mxu0 %v9897_v19  ;;  %v9970_v45 = vld [vmem:[%s11119_s8 + $0xd84] ss:$8 sps:$4 sm:$0xff]   ;;  %v9965_v19 = vld [vmem:[%s11119_s8 + $0xc80] ss:$8 sps:$4 sm:$0xff]  }
 0x1a7   : > { %7165 = vmatprep.subr.bf16.mxu1 %v9900_v48  ;;  %v9968_v48 = vld [vmem:[%s11119_s8 + $0xd80] ss:$8 sps:$4 sm:$0xff]  }
 0x1a9   : > { %7125 = vmatpush1.bf16.msra.mxu0 %v9895_v29  ;;  %v9973_v29 = vld [vmem:[%s11119_s8 + $0xc94] ss:$8 sps:$4 sm:$0xff]  }
 0x1aa   : > { %7166 = vmatpush1.bf16.msra.mxu1 %v9898_v49  ;;  %7126 = vmatprep.subr.bf16.mxu0 %v9903_v50  ;;  %v9976_v49 = vld [vmem:[%s11119_s8 + $0xd94] ss:$8 sps:$4 sm:$0xff]   ;;  %v9971_v50 = vld [vmem:[%s11119_s8 + $0xc90] ss:$8 sps:$4 sm:$0xff]  }
 0x1ab   : > { %7167 = vmatprep.subr.bf16.mxu1 %v9906_v51  ;;  %v9974_v51 = vld [vmem:[%s11119_s8 + $0xd90] ss:$8 sps:$4 sm:$0xff]  }
 0x1ad   : > { %7127 = vmatpush1.bf16.msra.mxu0 %v9901_v52  ;;  %v9979_v52 = vld [vmem:[%s11119_s8 + $0xca4] ss:$8 sps:$4 sm:$0xff]  }
 0x1ae   : > { %7168 = vmatpush1.bf16.msra.mxu1 %v9904_v53  ;;  %7128 = vmatprep.subr.bf16.mxu0 %v9909_v54  ;;  %v9982_v53 = vld [vmem:[%s11119_s8 + $0xda4] ss:$8 sps:$4 sm:$0xff]   ;;  %v9977_v54 = vld [vmem:[%s11119_s8 + $0xca0] ss:$8 sps:$4 sm:$0xff]  }
 0x1af   : > { %7169 = vmatprep.subr.bf16.mxu1 %v9912_v55  ;;  %v9980_v55 = vld [vmem:[%s11119_s8 + $0xda0] ss:$8 sps:$4 sm:$0xff]  }
 0x1b1   : > { %7129 = vmatpush1.bf16.msra.mxu0 %v9907_v56  ;;  %v9985_v56 = vld [vmem:[%s11119_s8 + $0xcb4] ss:$8 sps:$4 sm:$0xff]  }
 0x1b2   : > { %7170 = vmatpush1.bf16.msra.mxu1 %v9910_v57  ;;  %7180 = vmatprep.subr.bf16.mxu0 %v9919_v59  ;;  %v9988_v57 = vld [vmem:[%s11119_s8 + $0xdb4] ss:$8 sps:$4 sm:$0xff]   ;;  %v9983_v59 = vld [vmem:[%s11119_s8 + $0xcb0] ss:$8 sps:$4 sm:$0xff]  }
 0x1b3   : > { %7221 = vmatprep.subr.bf16.mxu1 %v9922_v60  ;;  %v9986_v60 = vld [vmem:[%s11119_s8 + $0xdb0] ss:$8 sps:$4 sm:$0xff]  }
 0x1b4   : > { %7131 = vmatmul.mubr.bf16.vlgmr.msra.gmra.mrb[20].mxu0 %v8189_v0  ;;  %v9989_v0 = vld [vmem:[%s11119_s8 + $0xcc0] ss:$8 sps:$4 sm:$0xff]  }
 0x1b5   : > { %7172 = vmatmul.mubr.bf16.vlgmr.msra.gmra.mrb[20].mxu1 %v8191_v1  ;;  %7181 = vmatpush1.bf16.msra.mxu0 %v9917_v62  ;;  %v9991_v62 = vld [vmem:[%s11119_s8 + $0xcc4] ss:$8 sps:$4 sm:$0xff]   ;;  %v9992_v1 = vld [vmem:[%s11119_s8 + $0xdc0] ss:$8 sps:$4 sm:$0xff]  }
 0x1b6   : > { %7222 = vmatpush1.bf16.msra.mxu1 %v9920_v63  ;;  %7182 = vmatprep.subr.bf16.mxu0 %v9925_v46  ;;  %v9994_v63 = vld [vmem:[%s11119_s8 + $0xdc4] ss:$8 sps:$4 sm:$0xff]   ;;  %v9997_v46 = vld [vmem:[%s11119_s8 + $0xcd4] ss:$8 sps:$4 sm:$0xff]  }
 0x1b7   : > { %7223 = vmatprep.subr.bf16.mxu1 %v9928_v4  ;;  %7212 = vmatprep.mubr.bf16.mxu0 %v8194_v47  ;;  %v10000_v4 = vld [vmem:[%s11119_s8 + $0xdd4] ss:$8 sps:$4 sm:$0xff]   ;;  %v9995_v47 = vld [vmem:[%s11119_s8 + $0xcd0] ss:$8 sps:$4 sm:$0xff]  }
 0x1b8   : > { %7253 = vmatprep.mubr.bf16.mxu1 %v8196_v5  ;;  %v9998_v5 = vld [vmem:[%s11119_s8 + $0xdd0] ss:$8 sps:$4 sm:$0xff]  }
 0x1b9   : > { %7183 = vmatpush1.bf16.msra.mxu0 %v9923_v6  ;;  %v10003_v6 = vld [vmem:[%s11119_s8 + $0xce4] ss:$8 sps:$4 sm:$0xff]  }
 0x1ba   : > { %7224 = vmatpush1.bf16.msra.mxu1 %v9926_v7  ;;  %7184 = vmatprep.subr.bf16.mxu0 %v9931_v8  ;;  %v10006_v7 = vld [vmem:[%s11119_s8 + $0xde4] ss:$8 sps:$4 sm:$0xff]   ;;  %v10001_v8 = vld [vmem:[%s11119_s8 + $0xce0] ss:$8 sps:$4 sm:$0xff]  }
 0x1bb   : > { %7225 = vmatprep.subr.bf16.mxu1 %v9934_v9  ;;  %v10004_v9 = vld [vmem:[%s11119_s8 + $0xde0] ss:$8 sps:$4 sm:$0xff]  }
 0x1bd   : > { %7185 = vmatpush1.bf16.msra.mxu0 %v9929_v10  ;;  %v10009_v10 = vld [vmem:[%s11119_s8 + $0xcf4] ss:$8 sps:$4 sm:$0xff]  }
 0x1be   : > { %7226 = vmatpush1.bf16.msra.mxu1 %v9932_v11  ;;  %7186 = vmatprep.subr.bf16.mxu0 %v9937_v12  ;;  %v10012_v11 = vld [vmem:[%s11119_s8 + $0xdf4] ss:$8 sps:$4 sm:$0xff]   ;;  %v10007_v12 = vld [vmem:[%s11119_s8 + $0xcf0] ss:$8 sps:$4 sm:$0xff]  }
 0x1bf   : > { %7227 = vmatprep.subr.bf16.mxu1 %v9940_v13  ;;  %v10010_v13 = vld [vmem:[%s11119_s8 + $0xdf0] ss:$8 sps:$4 sm:$0xff]  }
 0x1c1   : > { %7187 = vmatpush1.bf16.msra.mxu0 %v9935_v14  ;;  %v10019_v14 = vld [vmem:[%s11119_s8 + $0xe04] ss:$8 sps:$4 sm:$0xff]  }
 0x1c2   : > { %7228 = vmatpush1.bf16.msra.mxu1 %v9938_v15  ;;  %7188 = vmatprep.subr.bf16.mxu0 %v9943_v16  ;;  %v10022_v15 = vld [vmem:[%s11119_s8 + $0xf04] ss:$8 sps:$4 sm:$0xff]   ;;  %v10017_v16 = vld [vmem:[%s11119_s8 + $0xe00] ss:$8 sps:$4 sm:$0xff]  }
 0x1c3   : > { %7229 = vmatprep.subr.bf16.mxu1 %v9946_v17  ;;  %v10020_v17 = vld [vmem:[%s11119_s8 + $0xf00] ss:$8 sps:$4 sm:$0xff]  }
 0x1c5   : > { %7189 = vmatpush1.bf16.msra.mxu0 %v9941_v21  ;;  %v8193_v21 = vcombine.low %v11622_v2, %v11622_v2  ;;  %v10025_v2 = vld [vmem:[%s11119_s8 + $0xe14] ss:$8 sps:$4 sm:$0xff]  }
 0x1c6   : > { %7230 = vmatpush1.bf16.msra.mxu1 %v9944_v22  ;;  %7190 = vmatprep.subr.bf16.mxu0 %v9949_v58  ;;  %v8195_v22 = vcombine.low %v11627_v3, %v11627_v3  ;;  %v11710_v58 = vld [vmem:[%s12522_s0 + $0x70] sm:$0xff] }
 0x1c7   : > { %7231 = vmatprep.subr.bf16.mxu1 %v9952_v23  ;;  %v6886_v30 = vpop.f32.mrb[8].mxu0  ;;  %v11715_v23 = vld [vmem:[%s12522_s0 + $0x78] sm:$0xff]  ;;  %v8198_v3 = vcombine.high %v11710_v58, %v11710_v58 }
 0x1c8   : > { %v6927_v31 = vpop.f32.mrb[8].mxu1  ;;  %v6887_v25 = vadd.f32 %v6886_v30, %v11571_v20  ;;  %v6888_v33 = vpop.f32.mrb[9].mxu0  ;;  %v9961_v20 = vld [vmem:[%s11119_s8 + $0xc74] ss:$8 sps:$4 sm:$0xff]   ;;  %v10031_v30 = vld [vmem:[%s11119_s8 + $0xe24] ss:$8 sps:$4 sm:$0xff]  }
 0x1c9   : > { %v6929_v34 = vpop.f32.mrb[9].mxu1  ;;  %v6889_v35 = vadd.f32 %v6888_v33, %v11575_v26  ;;  %v6890_v36 = vpop.f32.mrb[10].mxu0  ;;  %7191 = vmatpush1.bf16.msra.mxu0 %v9947_v61  ;;  %v9959_v26 = vld [vmem:[%s11119_s8 + $0xc70] ss:$8 sps:$4 sm:$0xff]   ;;  %v10028_v61 = vld [vmem:[%s11119_s8 + $0xf14] ss:$8 sps:$4 sm:$0xff]  }
 0x1ca   : > { %v6931_v37 = vpop.f32.mrb[10].mxu1  ;;  %7232 = vmatpush1.bf16.msra.mxu1 %v9950_v18  ;;  %v11659_v38 = vadd.f32 %v6927_v31, %v6887_v25  ;;  %v6891_v39 = vpop.f32.mrb[11].mxu0  ;;  %7192 = vmatprep.subr.bf16.mxu0 %v9955_v27  ;;  %v8200_v18 = vcombine.high %v11715_v23, %v11715_v23  ;;  %v10023_v27 = vld [vmem:[%s11119_s8 + $0xe10] ss:$8 sps:$4 sm:$0xff]   ;;  %v10034_v31 = vld [vmem:[%s11119_s8 + $0xf24] ss:$8 sps:$4 sm:$0xff]  }
 0x1cb   : > { %v6932_v40 = vpop.f32.mrb[11].mxu1  ;;  %7233 = vmatprep.subr.bf16.mxu1 %v9958_v28  ;;  %v11663_v42 = vadd.f32 %v6929_v34, %v6889_v35  ;;  %v10026_v28 = vld [vmem:[%s11119_s8 + $0xf10] ss:$8 sps:$4 sm:$0xff]   ;;  %v10037_v25 = vld [vmem:[%s11119_s8 + $0xe34] ss:$8 sps:$4 sm:$0xff]  }
 0x1cc   : > { %v10040_v33 = vld [vmem:[%s11119_s8 + $0xf34] ss:$8 sps:$4 sm:$0xff]   ;;  %v10035_v34 = vld [vmem:[%s11119_s8 + $0xe30] ss:$8 sps:$4 sm:$0xff]   ;;  %v10043_v36 = vld [vmem:[%s11119_s8 + $0xe44] ss:$8 sps:$4 sm:$0xff]  }
 0x1cd   : > { %7193 = vmatpush1.bf16.msra.mxu0 %v9953_v32  ;;  %v10029_v32 = vld [vmem:[%s11119_s8 + $0xe20] ss:$8 sps:$4 sm:$0xff]   ;;  %v10038_v35 = vld [vmem:[%s11119_s8 + $0xf30] ss:$8 sps:$4 sm:$0xff]   ;;  %v10046_v37 = vld [vmem:[%s11119_s8 + $0xf44] ss:$8 sps:$4 sm:$0xff]  }
 0x1ce   : > { %7234 = vmatpush1.bf16.msra.mxu1 %v9956_v24  ;;  %7194 = vmatprep.subr.bf16.mxu0 %v9961_v20  ;;  %v10032_v24 = vld [vmem:[%s11119_s8 + $0xf20] ss:$8 sps:$4 sm:$0xff]   ;;  %v10049_v20 = vld [vmem:[%s11119_s8 + $0xe54] ss:$8 sps:$4 sm:$0xff]  }
 0x1cf   : > { %7235 = vmatprep.subr.bf16.mxu1 %v9964_v41  ;;  %v10041_v39 = vld [vmem:[%s11119_s8 + $0xe40] ss:$8 sps:$4 sm:$0xff]   ;;  %v10052_v41 = vld [vmem:[%s11119_s8 + $0xf54] ss:$8 sps:$4 sm:$0xff]  }
 0x1d0   : > { %v10044_v40 = vld [vmem:[%s11119_s8 + $0xf40] ss:$8 sps:$4 sm:$0xff]  }
 0x1d1   : > { %7195 = vmatpush1.bf16.msra.mxu0 %v9959_v26  ;;  %v10047_v26 = vld [vmem:[%s11119_s8 + $0xe50] ss:$8 sps:$4 sm:$0xff]  }
 0x1d2   : > { %7236 = vmatpush1.bf16.msra.mxu1 %v9962_v43  ;;  %7196 = vmatprep.subr.bf16.mxu0 %v9967_v44  ;;  %v10050_v43 = vld [vmem:[%s11119_s8 + $0xf50] ss:$8 sps:$4 sm:$0xff]   ;;  %v10055_v44 = vld [vmem:[%s11119_s8 + $0xe64] ss:$8 sps:$4 sm:$0xff]  }
 0x1d3   : > { %7237 = vmatprep.subr.bf16.mxu1 %v9970_v45  ;;  %v10058_v45 = vld [vmem:[%s11119_s8 + $0xf64] ss:$8 sps:$4 sm:$0xff]  }
 0x1d5   : > { %7197 = vmatpush1.bf16.msra.mxu0 %v9965_v19 }
 0x1d6   : > { %7238 = vmatpush1.bf16.msra.mxu1 %v9968_v48  ;;  %7198 = vmatprep.subr.bf16.mxu0 %v9973_v29  ;;  %v10053_v29 = vld [vmem:[%s11119_s8 + $0xe60] ss:$8 sps:$4 sm:$0xff]  }
 0x1d7   : > { %7239 = vmatprep.subr.bf16.mxu1 %v9976_v49  ;;  %v10056_v49 = vld [vmem:[%s11119_s8 + $0xf60] ss:$8 sps:$4 sm:$0xff]  }
 0x1d9   : > { %7199 = vmatpush1.bf16.msra.mxu0 %v9971_v50 }
 0x1da   : > { %7240 = vmatpush1.bf16.msra.mxu1 %v9974_v51  ;;  %7200 = vmatprep.subr.bf16.mxu0 %v9979_v52 }
 0x1db   : > { %7241 = vmatprep.subr.bf16.mxu1 %v9982_v53 }
 0x1dd   : > { %7201 = vmatpush1.bf16.msra.mxu0 %v9977_v54 }
 0x1de   : > { %7242 = vmatpush1.bf16.msra.mxu1 %v9980_v55  ;;  %7202 = vmatprep.subr.bf16.mxu0 %v9985_v56 }
 0x1df   : > { %7243 = vmatprep.subr.bf16.mxu1 %v9988_v57 }
 0x1e1   : > { %7203 = vmatpush1.bf16.msra.mxu0 %v9983_v59 }
 0x1e2   : > { %7244 = vmatpush1.bf16.msra.mxu1 %v9986_v60  ;;  %7204 = vmatprep.subr.bf16.mxu0 %v9991_v62  ;;  %v10064_v60 = vld [vmem:[%s11119_s8 + $0xf74] ss:$8 sps:$4 sm:$0xff]  }
 0x1e3   : > { %7245 = vmatprep.subr.bf16.mxu1 %v9994_v63  ;;  %v10062_v63 = vld [vmem:[%s11119_s8 + $0xf70] ss:$8 sps:$4 sm:$0xff]  }
 0x1e5   : > { %7205 = vmatpush1.bf16.msra.mxu0 %v9989_v0  ;;  %v10067_v0 = vld [vmem:[%s11119_s8 + $0xe84] ss:$8 sps:$4 sm:$0xff]  }
 0x1e6   : > { %7246 = vmatpush1.bf16.msra.mxu1 %v9992_v1  ;;  %7206 = vmatprep.subr.bf16.mxu0 %v9997_v46  ;;  %v10070_v1 = vld [vmem:[%s11119_s8 + $0xf84] ss:$8 sps:$4 sm:$0xff]   ;;  %v10065_v46 = vld [vmem:[%s11119_s8 + $0xe80] ss:$8 sps:$4 sm:$0xff]  }
 0x1e7   : > { %7247 = vmatprep.subr.bf16.mxu1 %v10000_v4  ;;  %v10068_v4 = vld [vmem:[%s11119_s8 + $0xf80] ss:$8 sps:$4 sm:$0xff]  }
 0x1e9   : > { %7207 = vmatpush1.bf16.msra.mxu0 %v9995_v47  ;;  %v10073_v47 = vld [vmem:[%s11119_s8 + $0xe94] ss:$8 sps:$4 sm:$0xff]  }
 0x1ea   : > { %7248 = vmatpush1.bf16.msra.mxu1 %v9998_v5  ;;  %7208 = vmatprep.subr.bf16.mxu0 %v10003_v6  ;;  %v10076_v5 = vld [vmem:[%s11119_s8 + $0xf94] ss:$8 sps:$4 sm:$0xff]   ;;  %v10071_v6 = vld [vmem:[%s11119_s8 + $0xe90] ss:$8 sps:$4 sm:$0xff]  }
 0x1eb   : > { %7249 = vmatprep.subr.bf16.mxu1 %v10006_v7  ;;  %v10074_v7 = vld [vmem:[%s11119_s8 + $0xf90] ss:$8 sps:$4 sm:$0xff]  }
 0x1ed   : > { %7209 = vmatpush1.bf16.msra.mxu0 %v10001_v8  ;;  %v10079_v8 = vld [vmem:[%s11119_s8 + $0xea4] ss:$8 sps:$4 sm:$0xff]  }
 0x1ee   : > { %7250 = vmatpush1.bf16.msra.mxu1 %v10004_v9  ;;  %7210 = vmatprep.subr.bf16.mxu0 %v10009_v10  ;;  %v10082_v9 = vld [vmem:[%s11119_s8 + $0xfa4] ss:$8 sps:$4 sm:$0xff]   ;;  %v10077_v10 = vld [vmem:[%s11119_s8 + $0xea0] ss:$8 sps:$4 sm:$0xff]  }
 0x1ef   : > { %7251 = vmatprep.subr.bf16.mxu1 %v10012_v11  ;;  %v10080_v11 = vld [vmem:[%s11119_s8 + $0xfa0] ss:$8 sps:$4 sm:$0xff]  }
 0x1f1   : > { %7211 = vmatpush1.bf16.msra.mxu0 %v10007_v12  ;;  %v10085_v12 = vld [vmem:[%s11119_s8 + $0xeb4] ss:$8 sps:$4 sm:$0xff]  }
 0x1f2   : > { %7252 = vmatpush1.bf16.msra.mxu1 %v10010_v13  ;;  %7262 = vmatprep.subr.bf16.mxu0 %v10019_v14  ;;  %v10088_v13 = vld [vmem:[%s11119_s8 + $0xfb4] ss:$8 sps:$4 sm:$0xff]   ;;  %v10083_v14 = vld [vmem:[%s11119_s8 + $0xeb0] ss:$8 sps:$4 sm:$0xff]  }
 0x1f3   : > { %7303 = vmatprep.subr.bf16.mxu1 %v10022_v15  ;;  %v10086_v15 = vld [vmem:[%s11119_s8 + $0xfb0] ss:$8 sps:$4 sm:$0xff]  }
 0x1f4   : > { %7213 = vmatmul.mubr.bf16.vlgmr.msra.gmra.mrb[24].mxu0 %v8193_v21  ;;  %v10089_v21 = vld [vmem:[%s11119_s8 + $0xec0] ss:$8 sps:$4 sm:$0xff]  }
 0x1f5   : > { %7254 = vmatmul.mubr.bf16.vlgmr.msra.gmra.mrb[24].mxu1 %v8195_v22  ;;  %7263 = vmatpush1.bf16.msra.mxu0 %v10017_v16  ;;  %v10091_v16 = vld [vmem:[%s11119_s8 + $0xec4] ss:$8 sps:$4 sm:$0xff]   ;;  %v10092_v22 = vld [vmem:[%s11119_s8 + $0xfc0] ss:$8 sps:$4 sm:$0xff]  }
 0x1f6   : > { %7304 = vmatpush1.bf16.msra.mxu1 %v10020_v17  ;;  %7264 = vmatprep.subr.bf16.mxu0 %v10025_v2  ;;  %v10094_v17 = vld [vmem:[%s11119_s8 + $0xfc4] ss:$8 sps:$4 sm:$0xff]   ;;  %v10097_v2 = vld [vmem:[%s11119_s8 + $0xed4] ss:$8 sps:$4 sm:$0xff]  }
 0x1f7   : > { %7305 = vmatprep.subr.bf16.mxu1 %v10028_v61  ;;  %7294 = vmatprep.mubr.bf16.mxu0 %v8198_v3  ;;  %v10100_v61 = vld [vmem:[%s11119_s8 + $0xfd4] ss:$8 sps:$4 sm:$0xff]   ;;  %v10095_v3 = vld [vmem:[%s11119_s8 + $0xed0] ss:$8 sps:$4 sm:$0xff]  }
 0x1f8   : > { %7335 = vmatprep.mubr.bf16.mxu1 %v8200_v18  ;;  %v10098_v18 = vld [vmem:[%s11119_s8 + $0xfd0] ss:$8 sps:$4 sm:$0xff]  }
 0x1f9   : > { %7265 = vmatpush1.bf16.msra.mxu0 %v10023_v27  ;;  %v10103_v27 = vld [vmem:[%s11119_s8 + $0xee4] ss:$8 sps:$4 sm:$0xff]  }
 0x1fa   : > { %7306 = vmatpush1.bf16.msra.mxu1 %v10026_v28  ;;  %7266 = vmatprep.subr.bf16.mxu0 %v10031_v30  ;;  %v10106_v28 = vld [vmem:[%s11119_s8 + $0xfe4] ss:$8 sps:$4 sm:$0xff]   ;;  %v10101_v30 = vld [vmem:[%s11119_s8 + $0xee0] ss:$8 sps:$4 sm:$0xff]  }
 0x1fb   : > { %7307 = vmatprep.subr.bf16.mxu1 %v10034_v31  ;;  %v10104_v31 = vld [vmem:[%s11119_s8 + $0xfe0] ss:$8 sps:$4 sm:$0xff]  }
 0x1fd   : > { %7267 = vmatpush1.bf16.msra.mxu0 %v10029_v32  ;;  %v10109_v32 = vld [vmem:[%s11119_s8 + $0xef4] ss:$8 sps:$4 sm:$0xff]  }
 0x1fe   : > { %7308 = vmatpush1.bf16.msra.mxu1 %v10032_v24  ;;  %7268 = vmatprep.subr.bf16.mxu0 %v10037_v25  ;;  %v10112_v24 = vld [vmem:[%s11119_s8 + $0xff4] ss:$8 sps:$4 sm:$0xff]   ;;  %v10107_v25 = vld [vmem:[%s11119_s8 + $0xef0] ss:$8 sps:$4 sm:$0xff]  }
 0x1ff   : > { %7309 = vmatprep.subr.bf16.mxu1 %v10040_v33  ;;  %v10110_v33 = vld [vmem:[%s11119_s8 + $0xff0] ss:$8 sps:$4 sm:$0xff]  }
 0x201   : > { %7269 = vmatpush1.bf16.msra.mxu0 %v10035_v34  ;;  %v10119_v34 = vld [vmem:[%s11119_s8 + $0x1004] ss:$8 sps:$4 sm:$0xff]  }
 0x202   : > { %7310 = vmatpush1.bf16.msra.mxu1 %v10038_v35  ;;  %7270 = vmatprep.subr.bf16.mxu0 %v10043_v36  ;;  %v10122_v35 = vld [vmem:[%s11119_s8 + $0x1104] ss:$8 sps:$4 sm:$0xff]   ;;  %v10117_v36 = vld [vmem:[%s11119_s8 + $0x1000] ss:$8 sps:$4 sm:$0xff]  }
 0x203   : > { %7311 = vmatprep.subr.bf16.mxu1 %v10046_v37  ;;  %v10120_v37 = vld [vmem:[%s11119_s8 + $0x1100] ss:$8 sps:$4 sm:$0xff]  }
 0x205   : > { %7271 = vmatpush1.bf16.msra.mxu0 %v10041_v39  ;;  %v8197_v39 = vcombine.low %v11710_v58, %v11710_v58  ;;  %v10125_v58 = vld [vmem:[%s11119_s8 + $0x1014] ss:$8 sps:$4 sm:$0xff]  }
 0x206   : > { %7312 = vmatpush1.bf16.msra.mxu1 %v10044_v40  ;;  %7272 = vmatprep.subr.bf16.mxu0 %v10049_v20  ;;  %v8199_v40 = vcombine.low %v11715_v23, %v11715_v23  ;;  %v11798_v20 = vld [vmem:[%s12522_s0 + $0x80] sm:$0xff] }
 0x207   : > { %7313 = vmatprep.subr.bf16.mxu1 %v10052_v41  ;;  %v6968_v19 = vpop.f32.mrb[12].mxu0  ;;  %v11803_v41 = vld [vmem:[%s12522_s0 + $0x88] sm:$0xff]  ;;  %v8202_v23 = vcombine.high %v11798_v20, %v11798_v20 }
 0x208   : > { %v7009_v48 = vpop.f32.mrb[12].mxu1  ;;  %v6969_v50 = vadd.f32 %v6968_v19, %v11659_v38  ;;  %v6970_v51 = vpop.f32.mrb[13].mxu0  ;;  %v10061_v38 = vld [vmem:[%s11119_s8 + $0xe74] ss:$8 sps:$4 sm:$0xff]   ;;  %v10131_v19 = vld [vmem:[%s11119_s8 + $0x1024] ss:$8 sps:$4 sm:$0xff]  }
 0x209   : > { %v7011_v52 = vpop.f32.mrb[13].mxu1  ;;  %v6971_v53 = vadd.f32 %v6970_v51, %v11663_v42  ;;  %v6972_v54 = vpop.f32.mrb[14].mxu0  ;;  %7273 = vmatpush1.bf16.msra.mxu0 %v10047_v26  ;;  %v10059_v42 = vld [vmem:[%s11119_s8 + $0xe70] ss:$8 sps:$4 sm:$0xff]   ;;  %v10128_v26 = vld [vmem:[%s11119_s8 + $0x1114] ss:$8 sps:$4 sm:$0xff]  }
 0x20a   : > { %v7013_v55 = vpop.f32.mrb[14].mxu1  ;;  %7314 = vmatpush1.bf16.msra.mxu1 %v10050_v43  ;;  %v11747_v56 = vadd.f32 %v7009_v48, %v6969_v50  ;;  %v6973_v57 = vpop.f32.mrb[15].mxu0  ;;  %7274 = vmatprep.subr.bf16.mxu0 %v10055_v44  ;;  %v8204_v43 = vcombine.high %v11803_v41, %v11803_v41  ;;  %v10123_v44 = vld [vmem:[%s11119_s8 + $0x1010] ss:$8 sps:$4 sm:$0xff]   ;;  %v10134_v48 = vld [vmem:[%s11119_s8 + $0x1124] ss:$8 sps:$4 sm:$0xff]  }
 0x20b   : > { %v7014_v59 = vpop.f32.mrb[15].mxu1  ;;  %7315 = vmatprep.subr.bf16.mxu1 %v10058_v45  ;;  %v11751_v62 = vadd.f32 %v7011_v52, %v6971_v53  ;;  %v10126_v45 = vld [vmem:[%s11119_s8 + $0x1110] ss:$8 sps:$4 sm:$0xff]   ;;  %v10137_v50 = vld [vmem:[%s11119_s8 + $0x1034] ss:$8 sps:$4 sm:$0xff]  }
 0x20c   : > { %v10140_v51 = vld [vmem:[%s11119_s8 + $0x1134] ss:$8 sps:$4 sm:$0xff]   ;;  %v10135_v52 = vld [vmem:[%s11119_s8 + $0x1030] ss:$8 sps:$4 sm:$0xff]   ;;  %v10143_v54 = vld [vmem:[%s11119_s8 + $0x1044] ss:$8 sps:$4 sm:$0xff]  }
 0x20d   : > { %7275 = vmatpush1.bf16.msra.mxu0 %v10053_v29  ;;  %v10129_v29 = vld [vmem:[%s11119_s8 + $0x1020] ss:$8 sps:$4 sm:$0xff]   ;;  %v10138_v53 = vld [vmem:[%s11119_s8 + $0x1130] ss:$8 sps:$4 sm:$0xff]   ;;  %v10146_v55 = vld [vmem:[%s11119_s8 + $0x1144] ss:$8 sps:$4 sm:$0xff]  }
 0x20e   : > { %7316 = vmatpush1.bf16.msra.mxu1 %v10056_v49  ;;  %7276 = vmatprep.subr.bf16.mxu0 %v10061_v38  ;;  %v10132_v49 = vld [vmem:[%s11119_s8 + $0x1120] ss:$8 sps:$4 sm:$0xff]   ;;  %v10149_v38 = vld [vmem:[%s11119_s8 + $0x1054] ss:$8 sps:$4 sm:$0xff]  }
 0x20f   : > { %7317 = vmatprep.subr.bf16.mxu1 %v10064_v60  ;;  %v10141_v57 = vld [vmem:[%s11119_s8 + $0x1040] ss:$8 sps:$4 sm:$0xff]   ;;  %v10152_v60 = vld [vmem:[%s11119_s8 + $0x1154] ss:$8 sps:$4 sm:$0xff]  }
 0x210   : > { %v10144_v59 = vld [vmem:[%s11119_s8 + $0x1140] ss:$8 sps:$4 sm:$0xff]  }
 0x211   : > { %7277 = vmatpush1.bf16.msra.mxu0 %v10059_v42  ;;  %v10147_v42 = vld [vmem:[%s11119_s8 + $0x1050] ss:$8 sps:$4 sm:$0xff]  }
 0x212   : > { %7318 = vmatpush1.bf16.msra.mxu1 %v10062_v63  ;;  %7278 = vmatprep.subr.bf16.mxu0 %v10067_v0  ;;  %v10150_v63 = vld [vmem:[%s11119_s8 + $0x1150] ss:$8 sps:$4 sm:$0xff]   ;;  %v10155_v0 = vld [vmem:[%s11119_s8 + $0x1064] ss:$8 sps:$4 sm:$0xff]  }
 0x213   : > { %7319 = vmatprep.subr.bf16.mxu1 %v10070_v1  ;;  %v10158_v1 = vld [vmem:[%s11119_s8 + $0x1164] ss:$8 sps:$4 sm:$0xff]  }
 0x215   : > { %7279 = vmatpush1.bf16.msra.mxu0 %v10065_v46 }
 0x216   : > { %7320 = vmatpush1.bf16.msra.mxu1 %v10068_v4  ;;  %7280 = vmatprep.subr.bf16.mxu0 %v10073_v47  ;;  %v10153_v47 = vld [vmem:[%s11119_s8 + $0x1060] ss:$8 sps:$4 sm:$0xff]  }
 0x217   : > { %7321 = vmatprep.subr.bf16.mxu1 %v10076_v5  ;;  %v10156_v5 = vld [vmem:[%s11119_s8 + $0x1160] ss:$8 sps:$4 sm:$0xff]  }
 0x219   : > { %7281 = vmatpush1.bf16.msra.mxu0 %v10071_v6 }
 0x21a   : > { %7322 = vmatpush1.bf16.msra.mxu1 %v10074_v7  ;;  %7282 = vmatprep.subr.bf16.mxu0 %v10079_v8 }
 0x21b   : > { %7323 = vmatprep.subr.bf16.mxu1 %v10082_v9 }
 0x21d   : > { %7283 = vmatpush1.bf16.msra.mxu0 %v10077_v10 }
 0x21e   : > { %7324 = vmatpush1.bf16.msra.mxu1 %v10080_v11  ;;  %7284 = vmatprep.subr.bf16.mxu0 %v10085_v12 }
 0x21f   : > { %7325 = vmatprep.subr.bf16.mxu1 %v10088_v13 }
 0x221   : > { %7285 = vmatpush1.bf16.msra.mxu0 %v10083_v14 }
 0x222   : > { %7326 = vmatpush1.bf16.msra.mxu1 %v10086_v15  ;;  %7286 = vmatprep.subr.bf16.mxu0 %v10091_v16  ;;  %v10164_v15 = vld [vmem:[%s11119_s8 + $0x1174] ss:$8 sps:$4 sm:$0xff]  }
 0x223   : > { %7327 = vmatprep.subr.bf16.mxu1 %v10094_v17  ;;  %v10162_v17 = vld [vmem:[%s11119_s8 + $0x1170] ss:$8 sps:$4 sm:$0xff]  }
 0x225   : > { %7287 = vmatpush1.bf16.msra.mxu0 %v10089_v21  ;;  %v10167_v21 = vld [vmem:[%s11119_s8 + $0x1084] ss:$8 sps:$4 sm:$0xff]  }
 0x226   : > { %7328 = vmatpush1.bf16.msra.mxu1 %v10092_v22  ;;  %7288 = vmatprep.subr.bf16.mxu0 %v10097_v2  ;;  %v10170_v22 = vld [vmem:[%s11119_s8 + $0x1184] ss:$8 sps:$4 sm:$0xff]   ;;  %v10165_v2 = vld [vmem:[%s11119_s8 + $0x1080] ss:$8 sps:$4 sm:$0xff]  }
 0x227   : > { %7329 = vmatprep.subr.bf16.mxu1 %v10100_v61  ;;  %v10168_v61 = vld [vmem:[%s11119_s8 + $0x1180] ss:$8 sps:$4 sm:$0xff]  }
 0x229   : > { %7289 = vmatpush1.bf16.msra.mxu0 %v10095_v3  ;;  %v10173_v3 = vld [vmem:[%s11119_s8 + $0x1094] ss:$8 sps:$4 sm:$0xff]  }
 0x22a   : > { %7330 = vmatpush1.bf16.msra.mxu1 %v10098_v18  ;;  %7290 = vmatprep.subr.bf16.mxu0 %v10103_v27  ;;  %v10176_v18 = vld [vmem:[%s11119_s8 + $0x1194] ss:$8 sps:$4 sm:$0xff]   ;;  %v10171_v27 = vld [vmem:[%s11119_s8 + $0x1090] ss:$8 sps:$4 sm:$0xff]  }
 0x22b   : > { %7331 = vmatprep.subr.bf16.mxu1 %v10106_v28  ;;  %v10174_v28 = vld [vmem:[%s11119_s8 + $0x1190] ss:$8 sps:$4 sm:$0xff]  }
 0x22d   : > { %7291 = vmatpush1.bf16.msra.mxu0 %v10101_v30  ;;  %v10179_v30 = vld [vmem:[%s11119_s8 + $0x10a4] ss:$8 sps:$4 sm:$0xff]  }
 0x22e   : > { %7332 = vmatpush1.bf16.msra.mxu1 %v10104_v31  ;;  %7292 = vmatprep.subr.bf16.mxu0 %v10109_v32  ;;  %v10182_v31 = vld [vmem:[%s11119_s8 + $0x11a4] ss:$8 sps:$4 sm:$0xff]   ;;  %v10177_v32 = vld [vmem:[%s11119_s8 + $0x10a0] ss:$8 sps:$4 sm:$0xff]  }
 0x22f   : > { %7333 = vmatprep.subr.bf16.mxu1 %v10112_v24  ;;  %v10180_v24 = vld [vmem:[%s11119_s8 + $0x11a0] ss:$8 sps:$4 sm:$0xff]  }
 0x231   : > { %7293 = vmatpush1.bf16.msra.mxu0 %v10107_v25  ;;  %v10185_v25 = vld [vmem:[%s11119_s8 + $0x10b4] ss:$8 sps:$4 sm:$0xff]  }
 0x232   : > { %7334 = vmatpush1.bf16.msra.mxu1 %v10110_v33  ;;  %7344 = vmatprep.subr.bf16.mxu0 %v10119_v34  ;;  %v10188_v33 = vld [vmem:[%s11119_s8 + $0x11b4] ss:$8 sps:$4 sm:$0xff]   ;;  %v10183_v34 = vld [vmem:[%s11119_s8 + $0x10b0] ss:$8 sps:$4 sm:$0xff]  }
 0x233   : > { %7385 = vmatprep.subr.bf16.mxu1 %v10122_v35  ;;  %v10186_v35 = vld [vmem:[%s11119_s8 + $0x11b0] ss:$8 sps:$4 sm:$0xff]  }
 0x234   : > { %7295 = vmatmul.mubr.bf16.vlgmr.msra.gmra.mrb[28].mxu0 %v8197_v39  ;;  %v10189_v39 = vld [vmem:[%s11119_s8 + $0x10c0] ss:$8 sps:$4 sm:$0xff]  }
 0x235   : > { %7336 = vmatmul.mubr.bf16.vlgmr.msra.gmra.mrb[28].mxu1 %v8199_v40  ;;  %7345 = vmatpush1.bf16.msra.mxu0 %v10117_v36  ;;  %v10191_v36 = vld [vmem:[%s11119_s8 + $0x10c4] ss:$8 sps:$4 sm:$0xff]   ;;  %v10192_v40 = vld [vmem:[%s11119_s8 + $0x11c0] ss:$8 sps:$4 sm:$0xff]  }
 0x236   : > { %7386 = vmatpush1.bf16.msra.mxu1 %v10120_v37  ;;  %7346 = vmatprep.subr.bf16.mxu0 %v10125_v58  ;;  %v10194_v37 = vld [vmem:[%s11119_s8 + $0x11c4] ss:$8 sps:$4 sm:$0xff]   ;;  %v10197_v58 = vld [vmem:[%s11119_s8 + $0x10d4] ss:$8 sps:$4 sm:$0xff]  }
 0x237   : > { %7387 = vmatprep.subr.bf16.mxu1 %v10128_v26  ;;  %7376 = vmatprep.mubr.bf16.mxu0 %v8202_v23  ;;  %v10200_v26 = vld [vmem:[%s11119_s8 + $0x11d4] ss:$8 sps:$4 sm:$0xff]   ;;  %v10195_v23 = vld [vmem:[%s11119_s8 + $0x10d0] ss:$8 sps:$4 sm:$0xff]  }
 0x238   : > { %7417 = vmatprep.mubr.bf16.mxu1 %v8204_v43  ;;  %v10198_v43 = vld [vmem:[%s11119_s8 + $0x11d0] ss:$8 sps:$4 sm:$0xff]  }
 0x239   : > { %7347 = vmatpush1.bf16.msra.mxu0 %v10123_v44  ;;  %v10203_v44 = vld [vmem:[%s11119_s8 + $0x10e4] ss:$8 sps:$4 sm:$0xff]  }
 0x23a   : > { %7388 = vmatpush1.bf16.msra.mxu1 %v10126_v45  ;;  %7348 = vmatprep.subr.bf16.mxu0 %v10131_v19  ;;  %v10206_v45 = vld [vmem:[%s11119_s8 + $0x11e4] ss:$8 sps:$4 sm:$0xff]   ;;  %v10201_v19 = vld [vmem:[%s11119_s8 + $0x10e0] ss:$8 sps:$4 sm:$0xff]  }
 0x23b   : > { %7389 = vmatprep.subr.bf16.mxu1 %v10134_v48  ;;  %v10204_v48 = vld [vmem:[%s11119_s8 + $0x11e0] ss:$8 sps:$4 sm:$0xff]  }
 0x23d   : > { %7349 = vmatpush1.bf16.msra.mxu0 %v10129_v29  ;;  %v10209_v29 = vld [vmem:[%s11119_s8 + $0x10f4] ss:$8 sps:$4 sm:$0xff]  }
 0x23e   : > { %7390 = vmatpush1.bf16.msra.mxu1 %v10132_v49  ;;  %7350 = vmatprep.subr.bf16.mxu0 %v10137_v50  ;;  %v10212_v49 = vld [vmem:[%s11119_s8 + $0x11f4] ss:$8 sps:$4 sm:$0xff]   ;;  %v10207_v50 = vld [vmem:[%s11119_s8 + $0x10f0] ss:$8 sps:$4 sm:$0xff]  }
 0x23f   : > { %7391 = vmatprep.subr.bf16.mxu1 %v10140_v51  ;;  %v10210_v51 = vld [vmem:[%s11119_s8 + $0x11f0] ss:$8 sps:$4 sm:$0xff]  }
 0x241   : > { %7351 = vmatpush1.bf16.msra.mxu0 %v10135_v52  ;;  %v10219_v52 = vld [vmem:[%s11119_s8 + $0x1204] ss:$8 sps:$4 sm:$0xff]  }
 0x242   : > { %7392 = vmatpush1.bf16.msra.mxu1 %v10138_v53  ;;  %7352 = vmatprep.subr.bf16.mxu0 %v10143_v54  ;;  %v10222_v53 = vld [vmem:[%s11119_s8 + $0x1304] ss:$8 sps:$4 sm:$0xff]   ;;  %v10217_v54 = vld [vmem:[%s11119_s8 + $0x1200] ss:$8 sps:$4 sm:$0xff]  }
 0x243   : > { %7393 = vmatprep.subr.bf16.mxu1 %v10146_v55  ;;  %v10220_v55 = vld [vmem:[%s11119_s8 + $0x1300] ss:$8 sps:$4 sm:$0xff]  }
 0x245   : > { %7353 = vmatpush1.bf16.msra.mxu0 %v10141_v57  ;;  %v8201_v57 = vcombine.low %v11798_v20, %v11798_v20  ;;  %v10225_v20 = vld [vmem:[%s11119_s8 + $0x1214] ss:$8 sps:$4 sm:$0xff]  }
 0x246   : > { %7394 = vmatpush1.bf16.msra.mxu1 %v10144_v59  ;;  %7354 = vmatprep.subr.bf16.mxu0 %v10149_v38  ;;  %v8203_v59 = vcombine.low %v11803_v41, %v11803_v41  ;;  %v11886_v38 = vld [vmem:[%s12522_s0 + $0x90] sm:$0xff] }
 0x247   : > { %7395 = vmatprep.subr.bf16.mxu1 %v10152_v60  ;;  %v7050_v46 = vpop.f32.mrb[16].mxu0  ;;  %v11891_v60 = vld [vmem:[%s12522_s0 + $0x98] sm:$0xff]  ;;  %v8206_v41 = vcombine.high %v11886_v38, %v11886_v38 }
 0x248   : > { %v7091_v4 = vpop.f32.mrb[16].mxu1  ;;  %v7051_v6 = vadd.f32 %v7050_v46, %v11747_v56  ;;  %v7052_v7 = vpop.f32.mrb[17].mxu0  ;;  %v10161_v56 = vld [vmem:[%s11119_s8 + $0x1074] ss:$8 sps:$4 sm:$0xff]   ;;  %v10231_v46 = vld [vmem:[%s11119_s8 + $0x1224] ss:$8 sps:$4 sm:$0xff]  }
 0x249   : > { %v7093_v8 = vpop.f32.mrb[17].mxu1  ;;  %v7053_v9 = vadd.f32 %v7052_v7, %v11751_v62  ;;  %v7054_v10 = vpop.f32.mrb[18].mxu0  ;;  %7355 = vmatpush1.bf16.msra.mxu0 %v10147_v42  ;;  %v10159_v62 = vld [vmem:[%s11119_s8 + $0x1070] ss:$8 sps:$4 sm:$0xff]   ;;  %v10228_v42 = vld [vmem:[%s11119_s8 + $0x1314] ss:$8 sps:$4 sm:$0xff]  }
 0x24a   : > { %v7095_v11 = vpop.f32.mrb[18].mxu1  ;;  %7396 = vmatpush1.bf16.msra.mxu1 %v10150_v63  ;;  %v11835_v12 = vadd.f32 %v7091_v4, %v7051_v6  ;;  %v7055_v13 = vpop.f32.mrb[19].mxu0  ;;  %7356 = vmatprep.subr.bf16.mxu0 %v10155_v0  ;;  %v8208_v63 = vcombine.high %v11891_v60, %v11891_v60  ;;  %v10223_v0 = vld [vmem:[%s11119_s8 + $0x1210] ss:$8 sps:$4 sm:$0xff]   ;;  %v10234_v4 = vld [vmem:[%s11119_s8 + $0x1324] ss:$8 sps:$4 sm:$0xff]  }
 0x24b   : > { %v7096_v14 = vpop.f32.mrb[19].mxu1  ;;  %7397 = vmatprep.subr.bf16.mxu1 %v10158_v1  ;;  %v11839_v16 = vadd.f32 %v7093_v8, %v7053_v9  ;;  %v10226_v1 = vld [vmem:[%s11119_s8 + $0x1310] ss:$8 sps:$4 sm:$0xff]   ;;  %v10237_v6 = vld [vmem:[%s11119_s8 + $0x1234] ss:$8 sps:$4 sm:$0xff]  }
 0x24c   : > { %v10240_v7 = vld [vmem:[%s11119_s8 + $0x1334] ss:$8 sps:$4 sm:$0xff]   ;;  %v10235_v8 = vld [vmem:[%s11119_s8 + $0x1230] ss:$8 sps:$4 sm:$0xff]   ;;  %v10243_v10 = vld [vmem:[%s11119_s8 + $0x1244] ss:$8 sps:$4 sm:$0xff]  }
 0x24d   : > { %7357 = vmatpush1.bf16.msra.mxu0 %v10153_v47  ;;  %v10229_v47 = vld [vmem:[%s11119_s8 + $0x1220] ss:$8 sps:$4 sm:$0xff]   ;;  %v10238_v9 = vld [vmem:[%s11119_s8 + $0x1330] ss:$8 sps:$4 sm:$0xff]   ;;  %v10246_v11 = vld [vmem:[%s11119_s8 + $0x1344] ss:$8 sps:$4 sm:$0xff]  }
 0x24e   : > { %7398 = vmatpush1.bf16.msra.mxu1 %v10156_v5  ;;  %7358 = vmatprep.subr.bf16.mxu0 %v10161_v56  ;;  %v10232_v5 = vld [vmem:[%s11119_s8 + $0x1320] ss:$8 sps:$4 sm:$0xff]   ;;  %v10249_v56 = vld [vmem:[%s11119_s8 + $0x1254] ss:$8 sps:$4 sm:$0xff]  }
 0x24f   : > { %7399 = vmatprep.subr.bf16.mxu1 %v10164_v15  ;;  %v10241_v13 = vld [vmem:[%s11119_s8 + $0x1240] ss:$8 sps:$4 sm:$0xff]   ;;  %v10252_v15 = vld [vmem:[%s11119_s8 + $0x1354] ss:$8 sps:$4 sm:$0xff]  }
 0x250   : > { %v10244_v14 = vld [vmem:[%s11119_s8 + $0x1340] ss:$8 sps:$4 sm:$0xff]  }
 0x251   : > { %7359 = vmatpush1.bf16.msra.mxu0 %v10159_v62  ;;  %v10247_v62 = vld [vmem:[%s11119_s8 + $0x1250] ss:$8 sps:$4 sm:$0xff]  }
 0x252   : > { %7400 = vmatpush1.bf16.msra.mxu1 %v10162_v17  ;;  %7360 = vmatprep.subr.bf16.mxu0 %v10167_v21  ;;  %v10250_v17 = vld [vmem:[%s11119_s8 + $0x1350] ss:$8 sps:$4 sm:$0xff]   ;;  %v10255_v21 = vld [vmem:[%s11119_s8 + $0x1264] ss:$8 sps:$4 sm:$0xff]  }
 0x253   : > { %7401 = vmatprep.subr.bf16.mxu1 %v10170_v22  ;;  %v10258_v22 = vld [vmem:[%s11119_s8 + $0x1364] ss:$8 sps:$4 sm:$0xff]  }
 0x255   : > { %7361 = vmatpush1.bf16.msra.mxu0 %v10165_v2 }
 0x256   : > { %7402 = vmatpush1.bf16.msra.mxu1 %v10168_v61  ;;  %7362 = vmatprep.subr.bf16.mxu0 %v10173_v3 }
 0x257   : > { %7403 = vmatprep.subr.bf16.mxu1 %v10176_v18 }
 0x259   : > { %7363 = vmatpush1.bf16.msra.mxu0 %v10171_v27 }
 0x25a   : > { %7404 = vmatpush1.bf16.msra.mxu1 %v10174_v28  ;;  %7364 = vmatprep.subr.bf16.mxu0 %v10179_v30 }
 0x25b   : > { %7405 = vmatprep.subr.bf16.mxu1 %v10182_v31 }
 0x25d   : > { %7365 = vmatpush1.bf16.msra.mxu0 %v10177_v32  ;;  %v10253_v32 = vld [vmem:[%s11119_s8 + $0x1260] ss:$8 sps:$4 sm:$0xff]  }
 0x25e   : > { %7406 = vmatpush1.bf16.msra.mxu1 %v10180_v24  ;;  %7366 = vmatprep.subr.bf16.mxu0 %v10185_v25  ;;  %v10256_v24 = vld [vmem:[%s11119_s8 + $0x1360] ss:$8 sps:$4 sm:$0xff]  }
 0x25f   : > { %7407 = vmatprep.subr.bf16.mxu1 %v10188_v33 }
 0x261   : > { %7367 = vmatpush1.bf16.msra.mxu0 %v10183_v34 }
 0x262   : > { %7408 = vmatpush1.bf16.msra.mxu1 %v10186_v35  ;;  %7368 = vmatprep.subr.bf16.mxu0 %v10191_v36  ;;  %v10259_v36 = vld [vmem:[%s11119_s8 + $0x1270] ss:$8 sps:$4 sm:$0xff]  }
 0x263   : > { %7409 = vmatprep.subr.bf16.mxu1 %v10194_v37  ;;  %v10262_v37 = vld [vmem:[%s11119_s8 + $0x1370] ss:$8 sps:$4 sm:$0xff]  }
 0x265   : > { %7369 = vmatpush1.bf16.msra.mxu0 %v10189_v39  ;;  %v10267_v39 = vld [vmem:[%s11119_s8 + $0x1284] ss:$8 sps:$4 sm:$0xff]  }
 0x266   : > { %7410 = vmatpush1.bf16.msra.mxu1 %v10192_v40  ;;  %7370 = vmatprep.subr.bf16.mxu0 %v10197_v58  ;;  %v10270_v40 = vld [vmem:[%s11119_s8 + $0x1384] ss:$8 sps:$4 sm:$0xff]   ;;  %v10265_v58 = vld [vmem:[%s11119_s8 + $0x1280] ss:$8 sps:$4 sm:$0xff]  }
 0x267   : > { %7411 = vmatprep.subr.bf16.mxu1 %v10200_v26  ;;  %v10268_v26 = vld [vmem:[%s11119_s8 + $0x1380] ss:$8 sps:$4 sm:$0xff]  }
 0x269   : > { %7371 = vmatpush1.bf16.msra.mxu0 %v10195_v23  ;;  %v10273_v23 = vld [vmem:[%s11119_s8 + $0x1294] ss:$8 sps:$4 sm:$0xff]  }
 0x26a   : > { %7412 = vmatpush1.bf16.msra.mxu1 %v10198_v43  ;;  %7372 = vmatprep.subr.bf16.mxu0 %v10203_v44  ;;  %v10276_v43 = vld [vmem:[%s11119_s8 + $0x1394] ss:$8 sps:$4 sm:$0xff]   ;;  %v10271_v44 = vld [vmem:[%s11119_s8 + $0x1290] ss:$8 sps:$4 sm:$0xff]  }
 0x26b   : > { %7413 = vmatprep.subr.bf16.mxu1 %v10206_v45  ;;  %v10274_v45 = vld [vmem:[%s11119_s8 + $0x1390] ss:$8 sps:$4 sm:$0xff]  }
 0x26d   : > { %7373 = vmatpush1.bf16.msra.mxu0 %v10201_v19  ;;  %v10279_v19 = vld [vmem:[%s11119_s8 + $0x12a4] ss:$8 sps:$4 sm:$0xff]  }
 0x26e   : > { %7414 = vmatpush1.bf16.msra.mxu1 %v10204_v48  ;;  %7374 = vmatprep.subr.bf16.mxu0 %v10209_v29  ;;  %v10282_v48 = vld [vmem:[%s11119_s8 + $0x13a4] ss:$8 sps:$4 sm:$0xff]   ;;  %v10277_v29 = vld [vmem:[%s11119_s8 + $0x12a0] ss:$8 sps:$4 sm:$0xff]  }
 0x26f   : > { %7415 = vmatprep.subr.bf16.mxu1 %v10212_v49  ;;  %v10280_v49 = vld [vmem:[%s11119_s8 + $0x13a0] ss:$8 sps:$4 sm:$0xff]  }
 0x271   : > { %7375 = vmatpush1.bf16.msra.mxu0 %v10207_v50  ;;  %v10285_v50 = vld [vmem:[%s11119_s8 + $0x12b4] ss:$8 sps:$4 sm:$0xff]  }
 0x272   : > { %7416 = vmatpush1.bf16.msra.mxu1 %v10210_v51  ;;  %7426 = vmatprep.subr.bf16.mxu0 %v10219_v52  ;;  %v10288_v51 = vld [vmem:[%s11119_s8 + $0x13b4] ss:$8 sps:$4 sm:$0xff]   ;;  %v10283_v52 = vld [vmem:[%s11119_s8 + $0x12b0] ss:$8 sps:$4 sm:$0xff]  }
 0x273   : > { %7467 = vmatprep.subr.bf16.mxu1 %v10222_v53  ;;  %v10286_v53 = vld [vmem:[%s11119_s8 + $0x13b0] ss:$8 sps:$4 sm:$0xff]  }
 0x274   : > { %7377 = vmatmul.mubr.bf16.vlgmr.msra.gmra.mrb[32].mxu0 %v8201_v57  ;;  %v10289_v57 = vld [vmem:[%s11119_s8 + $0x12c0] ss:$8 sps:$4 sm:$0xff]  }
 0x275   : > { %7418 = vmatmul.mubr.bf16.vlgmr.msra.gmra.mrb[32].mxu1 %v8203_v59  ;;  %7427 = vmatpush1.bf16.msra.mxu0 %v10217_v54  ;;  %v10291_v54 = vld [vmem:[%s11119_s8 + $0x12c4] ss:$8 sps:$4 sm:$0xff]   ;;  %v10292_v59 = vld [vmem:[%s11119_s8 + $0x13c0] ss:$8 sps:$4 sm:$0xff]  }
 0x276   : > { %7468 = vmatpush1.bf16.msra.mxu1 %v10220_v55  ;;  %7428 = vmatprep.subr.bf16.mxu0 %v10225_v20  ;;  %v10294_v55 = vld [vmem:[%s11119_s8 + $0x13c4] ss:$8 sps:$4 sm:$0xff]   ;;  %v10297_v20 = vld [vmem:[%s11119_s8 + $0x12d4] ss:$8 sps:$4 sm:$0xff]  }
 0x277   : > { %7469 = vmatprep.subr.bf16.mxu1 %v10228_v42  ;;  %7458 = vmatprep.mubr.bf16.mxu0 %v8206_v41  ;;  %v10300_v42 = vld [vmem:[%s11119_s8 + $0x13d4] ss:$8 sps:$4 sm:$0xff]   ;;  %v10295_v41 = vld [vmem:[%s11119_s8 + $0x12d0] ss:$8 sps:$4 sm:$0xff]  }
 0x278   : > { %7499 = vmatprep.mubr.bf16.mxu1 %v8208_v63  ;;  %v10298_v63 = vld [vmem:[%s11119_s8 + $0x13d0] ss:$8 sps:$4 sm:$0xff]  }
 0x279   : > { %7429 = vmatpush1.bf16.msra.mxu0 %v10223_v0  ;;  %v10303_v0 = vld [vmem:[%s11119_s8 + $0x12e4] ss:$8 sps:$4 sm:$0xff]  }
 0x27a   : > { %7470 = vmatpush1.bf16.msra.mxu1 %v10226_v1  ;;  %7430 = vmatprep.subr.bf16.mxu0 %v10231_v46  ;;  %v10306_v1 = vld [vmem:[%s11119_s8 + $0x13e4] ss:$8 sps:$4 sm:$0xff]   ;;  %v10301_v46 = vld [vmem:[%s11119_s8 + $0x12e0] ss:$8 sps:$4 sm:$0xff]  }
 0x27b   : > { %7471 = vmatprep.subr.bf16.mxu1 %v10234_v4  ;;  %v10304_v4 = vld [vmem:[%s11119_s8 + $0x13e0] ss:$8 sps:$4 sm:$0xff]  }
 0x27d   : > { %7431 = vmatpush1.bf16.msra.mxu0 %v10229_v47  ;;  %v10309_v47 = vld [vmem:[%s11119_s8 + $0x12f4] ss:$8 sps:$4 sm:$0xff]  }
 0x27e   : > { %7472 = vmatpush1.bf16.msra.mxu1 %v10232_v5  ;;  %7432 = vmatprep.subr.bf16.mxu0 %v10237_v6  ;;  %v10312_v5 = vld [vmem:[%s11119_s8 + $0x13f4] ss:$8 sps:$4 sm:$0xff]   ;;  %v10307_v6 = vld [vmem:[%s11119_s8 + $0x12f0] ss:$8 sps:$4 sm:$0xff]  }
 0x27f   : > { %7473 = vmatprep.subr.bf16.mxu1 %v10240_v7  ;;  %v10310_v7 = vld [vmem:[%s11119_s8 + $0x13f0] ss:$8 sps:$4 sm:$0xff]  }
 0x281   : > { %7433 = vmatpush1.bf16.msra.mxu0 %v10235_v8  ;;  %v10319_v8 = vld [vmem:[%s11119_s8 + $0x1404] ss:$8 sps:$4 sm:$0xff]  }
 0x282   : > { %7474 = vmatpush1.bf16.msra.mxu1 %v10238_v9  ;;  %7434 = vmatprep.subr.bf16.mxu0 %v10243_v10  ;;  %v10322_v9 = vld [vmem:[%s11119_s8 + $0x1504] ss:$8 sps:$4 sm:$0xff]   ;;  %v8205_v10 = vcombine.low %v11886_v38, %v11886_v38  ;;  %v10320_v38 = vld [vmem:[%s11119_s8 + $0x1500] ss:$8 sps:$4 sm:$0xff]  }
 0x283   : > { %7475 = vmatprep.subr.bf16.mxu1 %v10246_v11  ;;  %v8207_v11 = vcombine.low %v11891_v60, %v11891_v60  ;;  %v10325_v60 = vld [vmem:[%s11119_s8 + $0x1414] ss:$8 sps:$4 sm:$0xff]  }
 0x285   : > { %7435 = vmatpush1.bf16.msra.mxu0 %v10241_v13  ;;  %v11972_v13 = vld [vmem:[%s12522_s0 + $0xa0] sm:$0xff] }
 0x286   : > { %7476 = vmatpush1.bf16.msra.mxu1 %v10244_v14  ;;  %7436 = vmatprep.subr.bf16.mxu0 %v10249_v56  ;;  %v11977_v14 = vld [vmem:[%s12522_s0 + $0xa8] sm:$0xff] }
 0x287   : > { %7477 = vmatprep.subr.bf16.mxu1 %v10252_v15  ;;  %v7132_v2 = vpop.f32.mrb[20].mxu0  ;;  %v10317_v56 = vld [vmem:[%s11119_s8 + $0x1400] ss:$8 sps:$4 sm:$0xff]   ;;  %v10328_v15 = vld [vmem:[%s11119_s8 + $0x1514] ss:$8 sps:$4 sm:$0xff]  }
 0x288   : > { %v7173_v61 = vpop.f32.mrb[20].mxu1  ;;  %v7133_v3 = vadd.f32 %v7132_v2, %v11835_v12  ;;  %v7134_v18 = vpop.f32.mrb[21].mxu0  ;;  %v10261_v12 = vld [vmem:[%s11119_s8 + $0x1274] ss:$8 sps:$4 sm:$0xff]   ;;  %v10331_v2 = vld [vmem:[%s11119_s8 + $0x1424] ss:$8 sps:$4 sm:$0xff]  }
 0x289   : > { %v7175_v27 = vpop.f32.mrb[21].mxu1  ;;  %v7135_v28 = vadd.f32 %v7134_v18, %v11839_v16  ;;  %v7136_v30 = vpop.f32.mrb[22].mxu0  ;;  %7437 = vmatpush1.bf16.msra.mxu0 %v10247_v62  ;;  %v10264_v16 = vld [vmem:[%s11119_s8 + $0x1374] ss:$8 sps:$4 sm:$0xff]   ;;  %v8210_v62 = vcombine.high %v11972_v13, %v11972_v13  ;;  %v10332_v18 = vld [vmem:[%s11119_s8 + $0x1520] ss:$8 sps:$4 sm:$0xff]  }
 0x28a   : > { %v7177_v31 = vpop.f32.mrb[22].mxu1  ;;  %7478 = vmatpush1.bf16.msra.mxu1 %v10250_v17  ;;  %v11923_v25 = vadd.f32 %v7173_v61, %v7133_v3  ;;  %v7137_v33 = vpop.f32.mrb[23].mxu0  ;;  %7438 = vmatprep.subr.bf16.mxu0 %v10255_v21  ;;  %v8212_v17 = vcombine.high %v11977_v14, %v11977_v14  ;;  %v10323_v21 = vld [vmem:[%s11119_s8 + $0x1410] ss:$8 sps:$4 sm:$0xff]   ;;  %v10334_v61 = vld [vmem:[%s11119_s8 + $0x1524] ss:$8 sps:$4 sm:$0xff]  }
 0x28b   : > { %v7178_v34 = vpop.f32.mrb[23].mxu1  ;;  %7479 = vmatprep.subr.bf16.mxu1 %v10258_v22  ;;  %v11927_v35 = vadd.f32 %v7175_v27, %v7135_v28  ;;  %v10326_v22 = vld [vmem:[%s11119_s8 + $0x1510] ss:$8 sps:$4 sm:$0xff]   ;;  %v10329_v3 = vld [vmem:[%s11119_s8 + $0x1420] ss:$8 sps:$4 sm:$0xff]  }
 0x28c   : > { %v10337_v27 = vld [vmem:[%s11119_s8 + $0x1434] ss:$8 sps:$4 sm:$0xff]   ;;  %v10335_v30 = vld [vmem:[%s11119_s8 + $0x1430] ss:$8 sps:$4 sm:$0xff]   ;;  %v10341_v33 = vld [vmem:[%s11119_s8 + $0x1440] ss:$8 sps:$4 sm:$0xff]  }
 0x28d   : > { %7439 = vmatpush1.bf16.msra.mxu0 %v10253_v32  ;;  %v10340_v28 = vld [vmem:[%s11119_s8 + $0x1534] ss:$8 sps:$4 sm:$0xff]   ;;  %v10338_v31 = vld [vmem:[%s11119_s8 + $0x1530] ss:$8 sps:$4 sm:$0xff]   ;;  %v10343_v32 = vld [vmem:[%s11119_s8 + $0x1444] ss:$8 sps:$4 sm:$0xff]  }
 0x28e   : > { %7480 = vmatpush1.bf16.msra.mxu1 %v10256_v24  ;;  %7440 = vmatprep.subr.bf16.mxu0 %v10261_v12  ;;  %v10346_v24 = vld [vmem:[%s11119_s8 + $0x1544] ss:$8 sps:$4 sm:$0xff]   ;;  %v10344_v34 = vld [vmem:[%s11119_s8 + $0x1540] ss:$8 sps:$4 sm:$0xff]   ;;  %v10349_v12 = vld [vmem:[%s11119_s8 + $0x1454] ss:$8 sps:$4 sm:$0xff]  }
 0x28f   : > { %7481 = vmatprep.subr.bf16.mxu1 %v10264_v16  ;;  %v10352_v16 = vld [vmem:[%s11119_s8 + $0x1554] ss:$8 sps:$4 sm:$0xff]  }
 0x291   : > { %7441 = vmatpush1.bf16.msra.mxu0 %v10259_v36  ;;  %v10347_v36 = vld [vmem:[%s11119_s8 + $0x1450] ss:$8 sps:$4 sm:$0xff]  }
 0x292   : > { %7482 = vmatpush1.bf16.msra.mxu1 %v10262_v37  ;;  %7442 = vmatprep.subr.bf16.mxu0 %v10267_v39  ;;  %v10350_v37 = vld [vmem:[%s11119_s8 + $0x1550] ss:$8 sps:$4 sm:$0xff]   ;;  %v10355_v39 = vld [vmem:[%s11119_s8 + $0x1464] ss:$8 sps:$4 sm:$0xff]  }
 0x293   : > { %7483 = vmatprep.subr.bf16.mxu1 %v10270_v40  ;;  %v10358_v40 = vld [vmem:[%s11119_s8 + $0x1564] ss:$8 sps:$4 sm:$0xff]  }
 0x295   : > { %7443 = vmatpush1.bf16.msra.mxu0 %v10265_v58 }
 0x296   : > { %7484 = vmatpush1.bf16.msra.mxu1 %v10268_v26  ;;  %7444 = vmatprep.subr.bf16.mxu0 %v10273_v23 }
 0x297   : > { %7485 = vmatprep.subr.bf16.mxu1 %v10276_v43 }
 0x299   : > { %7445 = vmatpush1.bf16.msra.mxu0 %v10271_v44 }
 0x29a   : > { %7486 = vmatpush1.bf16.msra.mxu1 %v10274_v45  ;;  %7446 = vmatprep.subr.bf16.mxu0 %v10279_v19 }
 0x29b   : > { %7487 = vmatprep.subr.bf16.mxu1 %v10282_v48 }
 0x29d   : > { %7447 = vmatpush1.bf16.msra.mxu0 %v10277_v29  ;;  %v10353_v29 = vld [vmem:[%s11119_s8 + $0x1460] ss:$8 sps:$4 sm:$0xff]  }
 0x29e   : > { %7488 = vmatpush1.bf16.msra.mxu1 %v10280_v49  ;;  %7448 = vmatprep.subr.bf16.mxu0 %v10285_v50  ;;  %v10356_v49 = vld [vmem:[%s11119_s8 + $0x1560] ss:$8 sps:$4 sm:$0xff]  }
 0x29f   : > { %7489 = vmatprep.subr.bf16.mxu1 %v10288_v51 }
 0x2a1   : > { %7449 = vmatpush1.bf16.msra.mxu0 %v10283_v52 }
 0x2a2   : > { %7490 = vmatpush1.bf16.msra.mxu1 %v10286_v53  ;;  %7450 = vmatprep.subr.bf16.mxu0 %v10291_v54  ;;  %v10359_v54 = vld [vmem:[%s11119_s8 + $0x1470] ss:$8 sps:$4 sm:$0xff]  }
 0x2a3   : > { %7491 = vmatprep.subr.bf16.mxu1 %v10294_v55  ;;  %v10362_v55 = vld [vmem:[%s11119_s8 + $0x1570] ss:$8 sps:$4 sm:$0xff]  }
 0x2a5   : > { %7451 = vmatpush1.bf16.msra.mxu0 %v10289_v57  ;;  %v10367_v57 = vld [vmem:[%s11119_s8 + $0x1484] ss:$8 sps:$4 sm:$0xff]  }
 0x2a6   : > { %7492 = vmatpush1.bf16.msra.mxu1 %v10292_v59  ;;  %7452 = vmatprep.subr.bf16.mxu0 %v10297_v20  ;;  %v10370_v59 = vld [vmem:[%s11119_s8 + $0x1584] ss:$8 sps:$4 sm:$0xff]   ;;  %v10365_v20 = vld [vmem:[%s11119_s8 + $0x1480] ss:$8 sps:$4 sm:$0xff]  }
 0x2a7   : > { %7493 = vmatprep.subr.bf16.mxu1 %v10300_v42  ;;  %v10368_v42 = vld [vmem:[%s11119_s8 + $0x1580] ss:$8 sps:$4 sm:$0xff]  }
 0x2a9   : > { %7453 = vmatpush1.bf16.msra.mxu0 %v10295_v41  ;;  %v10373_v41 = vld [vmem:[%s11119_s8 + $0x1494] ss:$8 sps:$4 sm:$0xff]  }
 0x2aa   : > { %7494 = vmatpush1.bf16.msra.mxu1 %v10298_v63  ;;  %7454 = vmatprep.subr.bf16.mxu0 %v10303_v0  ;;  %v10376_v63 = vld [vmem:[%s11119_s8 + $0x1594] ss:$8 sps:$4 sm:$0xff]   ;;  %v10371_v0 = vld [vmem:[%s11119_s8 + $0x1490] ss:$8 sps:$4 sm:$0xff]  }
 0x2ab   : > { %7495 = vmatprep.subr.bf16.mxu1 %v10306_v1  ;;  %v10374_v1 = vld [vmem:[%s11119_s8 + $0x1590] ss:$8 sps:$4 sm:$0xff]  }
 0x2ad   : > { %7455 = vmatpush1.bf16.msra.mxu0 %v10301_v46  ;;  %v10379_v46 = vld [vmem:[%s11119_s8 + $0x14a4] ss:$8 sps:$4 sm:$0xff]  }
 0x2ae   : > { %7496 = vmatpush1.bf16.msra.mxu1 %v10304_v4  ;;  %7456 = vmatprep.subr.bf16.mxu0 %v10309_v47  ;;  %v10382_v4 = vld [vmem:[%s11119_s8 + $0x15a4] ss:$8 sps:$4 sm:$0xff]   ;;  %v10377_v47 = vld [vmem:[%s11119_s8 + $0x14a0] ss:$8 sps:$4 sm:$0xff]  }
 0x2af   : > { %7497 = vmatprep.subr.bf16.mxu1 %v10312_v5  ;;  %v10380_v5 = vld [vmem:[%s11119_s8 + $0x15a0] ss:$8 sps:$4 sm:$0xff]  }
 0x2b1   : > { %7457 = vmatpush1.bf16.msra.mxu0 %v10307_v6  ;;  %v10385_v6 = vld [vmem:[%s11119_s8 + $0x14b4] ss:$8 sps:$4 sm:$0xff]  }
 0x2b2   : > { %7498 = vmatpush1.bf16.msra.mxu1 %v10310_v7  ;;  %7508 = vmatprep.subr.bf16.mxu0 %v10319_v8  ;;  %v10388_v7 = vld [vmem:[%s11119_s8 + $0x15b4] ss:$8 sps:$4 sm:$0xff]   ;;  %v10383_v8 = vld [vmem:[%s11119_s8 + $0x14b0] ss:$8 sps:$4 sm:$0xff]  }
 0x2b3   : > { %7549 = vmatprep.subr.bf16.mxu1 %v10322_v9  ;;  %v10386_v9 = vld [vmem:[%s11119_s8 + $0x15b0] ss:$8 sps:$4 sm:$0xff]  }
 0x2b4   : > { %7459 = vmatmul.mubr.bf16.vlgmr.msra.gmra.mrb[36].mxu0 %v8205_v10  ;;  %v10391_v10 = vld [vmem:[%s11119_s8 + $0x14c4] ss:$8 sps:$4 sm:$0xff]  }
 0x2b5   : > { %7500 = vmatmul.mubr.bf16.vlgmr.msra.gmra.mrb[36].mxu1 %v8207_v11  ;;  %7509 = vmatpush1.bf16.msra.mxu0 %v10317_v56  ;;  %v10394_v11 = vld [vmem:[%s11119_s8 + $0x15c4] ss:$8 sps:$4 sm:$0xff]   ;;  %v10389_v56 = vld [vmem:[%s11119_s8 + $0x14c0] ss:$8 sps:$4 sm:$0xff]  }
 0x2b6   : > { %7550 = vmatpush1.bf16.msra.mxu1 %v10320_v38  ;;  %7510 = vmatprep.subr.bf16.mxu0 %v10325_v60  ;;  %v10392_v38 = vld [vmem:[%s11119_s8 + $0x15c0] ss:$8 sps:$4 sm:$0xff]   ;;  %v10397_v60 = vld [vmem:[%s11119_s8 + $0x14d4] ss:$8 sps:$4 sm:$0xff]  }
 0x2b7   : > { %7551 = vmatprep.subr.bf16.mxu1 %v10328_v15  ;;  %7540 = vmatprep.mubr.bf16.mxu0 %v8210_v62  ;;  %v10400_v15 = vld [vmem:[%s11119_s8 + $0x15d4] ss:$8 sps:$4 sm:$0xff]   ;;  %v10395_v62 = vld [vmem:[%s11119_s8 + $0x14d0] ss:$8 sps:$4 sm:$0xff]  }
 0x2b8   : > { %7581 = vmatprep.mubr.bf16.mxu1 %v8212_v17  ;;  %v10398_v17 = vld [vmem:[%s11119_s8 + $0x15d0] ss:$8 sps:$4 sm:$0xff]  }
 0x2b9   : > { %7511 = vmatpush1.bf16.msra.mxu0 %v10323_v21  ;;  %v10403_v21 = vld [vmem:[%s11119_s8 + $0x14e4] ss:$8 sps:$4 sm:$0xff]  }
 0x2ba   : > { %7552 = vmatpush1.bf16.msra.mxu1 %v10326_v22  ;;  %7512 = vmatprep.subr.bf16.mxu0 %v10331_v2  ;;  %v10406_v22 = vld [vmem:[%s11119_s8 + $0x15e4] ss:$8 sps:$4 sm:$0xff]   ;;  %v10401_v2 = vld [vmem:[%s11119_s8 + $0x14e0] ss:$8 sps:$4 sm:$0xff]  }
 0x2bb   : > { %7553 = vmatprep.subr.bf16.mxu1 %v10334_v61  ;;  %v10404_v61 = vld [vmem:[%s11119_s8 + $0x15e0] ss:$8 sps:$4 sm:$0xff]  }
 0x2bd   : > { %7513 = vmatpush1.bf16.msra.mxu0 %v10329_v3  ;;  %v10409_v3 = vld [vmem:[%s11119_s8 + $0x14f4] ss:$8 sps:$4 sm:$0xff]  }
 0x2be   : > { %7554 = vmatpush1.bf16.msra.mxu1 %v10332_v18  ;;  %7514 = vmatprep.subr.bf16.mxu0 %v10337_v27  ;;  %v10412_v18 = vld [vmem:[%s11119_s8 + $0x15f4] ss:$8 sps:$4 sm:$0xff]   ;;  %v10407_v27 = vld [vmem:[%s11119_s8 + $0x14f0] ss:$8 sps:$4 sm:$0xff]  }
 0x2bf   : > { %7555 = vmatprep.subr.bf16.mxu1 %v10340_v28  ;;  %v10410_v28 = vld [vmem:[%s11119_s8 + $0x15f0] ss:$8 sps:$4 sm:$0xff]  }
 0x2c1   : > { %7515 = vmatpush1.bf16.msra.mxu0 %v10335_v30  ;;  %v10419_v30 = vld [vmem:[%s11119_s8 + $0x1604] ss:$8 sps:$4 sm:$0xff]  }
 0x2c2   : > { %7556 = vmatpush1.bf16.msra.mxu1 %v10338_v31  ;;  %7516 = vmatprep.subr.bf16.mxu0 %v10343_v32  ;;  %v10422_v31 = vld [vmem:[%s11119_s8 + $0x1704] ss:$8 sps:$4 sm:$0xff]   ;;  %v8209_v32 = vcombine.low %v11972_v13, %v11972_v13  ;;  %v10420_v13 = vld [vmem:[%s11119_s8 + $0x1700] ss:$8 sps:$4 sm:$0xff]  }
 0x2c3   : > { %7557 = vmatprep.subr.bf16.mxu1 %v10346_v24  ;;  %v8211_v24 = vcombine.low %v11977_v14, %v11977_v14  ;;  %v10425_v14 = vld [vmem:[%s11119_s8 + $0x1614] ss:$8 sps:$4 sm:$0xff]  }
 0x2c5   : > { %7517 = vmatpush1.bf16.msra.mxu0 %v10341_v33  ;;  %v12060_v33 = vld [vmem:[%s12522_s0 + $0xb0] sm:$0xff] }
 0x2c6   : > { %7558 = vmatpush1.bf16.msra.mxu1 %v10344_v34  ;;  %7518 = vmatprep.subr.bf16.mxu0 %v10349_v12  ;;  %v12065_v34 = vld [vmem:[%s12522_s0 + $0xb8] sm:$0xff]  ;;  %v10417_v12 = vld [vmem:[%s11119_s8 + $0x1600] ss:$8 sps:$4 sm:$0xff]  }
 0x2c7   : > { %7559 = vmatprep.subr.bf16.mxu1 %v10352_v16  ;;  %v7214_v58 = vpop.f32.mrb[24].mxu0  ;;  %v10428_v16 = vld [vmem:[%s11119_s8 + $0x1714] ss:$8 sps:$4 sm:$0xff]  }
 0x2c8   : > { %v7255_v26 = vpop.f32.mrb[24].mxu1  ;;  %v7215_v23 = vadd.f32 %v7214_v58, %v11923_v25  ;;  %v7216_v43 = vpop.f32.mrb[25].mxu0  ;;  %v10361_v25 = vld [vmem:[%s11119_s8 + $0x1474] ss:$8 sps:$4 sm:$0xff]   ;;  %v10431_v58 = vld [vmem:[%s11119_s8 + $0x1624] ss:$8 sps:$4 sm:$0xff]  }
 0x2c9   : > { %v7257_v44 = vpop.f32.mrb[25].mxu1  ;;  %v7217_v45 = vadd.f32 %v7216_v43, %v11927_v35  ;;  %v7218_v19 = vpop.f32.mrb[26].mxu0  ;;  %7519 = vmatpush1.bf16.msra.mxu0 %v10347_v36  ;;  %v10364_v35 = vld [vmem:[%s11119_s8 + $0x1574] ss:$8 sps:$4 sm:$0xff]   ;;  %v8214_v36 = vcombine.high %v12060_v33, %v12060_v33  ;;  %v10432_v43 = vld [vmem:[%s11119_s8 + $0x1720] ss:$8 sps:$4 sm:$0xff]  }
 0x2ca   : > { %v7259_v48 = vpop.f32.mrb[26].mxu1  ;;  %7560 = vmatpush1.bf16.msra.mxu1 %v10350_v37  ;;  %v12011_v50 = vadd.f32 %v7255_v26, %v7215_v23  ;;  %v7219_v51 = vpop.f32.mrb[27].mxu0  ;;  %7520 = vmatprep.subr.bf16.mxu0 %v10355_v39  ;;  %v8216_v37 = vcombine.high %v12065_v34, %v12065_v34  ;;  %v10423_v39 = vld [vmem:[%s11119_s8 + $0x1610] ss:$8 sps:$4 sm:$0xff]   ;;  %v10434_v26 = vld [vmem:[%s11119_s8 + $0x1724] ss:$8 sps:$4 sm:$0xff]  }
 0x2cb   : > { %v7260_v52 = vpop.f32.mrb[27].mxu1  ;;  %7561 = vmatprep.subr.bf16.mxu1 %v10358_v40  ;;  %v12015_v53 = vadd.f32 %v7257_v44, %v7217_v45  ;;  %v10426_v40 = vld [vmem:[%s11119_s8 + $0x1710] ss:$8 sps:$4 sm:$0xff]   ;;  %v10429_v23 = vld [vmem:[%s11119_s8 + $0x1620] ss:$8 sps:$4 sm:$0xff]  }
 0x2cc   : > { %v10437_v44 = vld [vmem:[%s11119_s8 + $0x1634] ss:$8 sps:$4 sm:$0xff]   ;;  %v10435_v19 = vld [vmem:[%s11119_s8 + $0x1630] ss:$8 sps:$4 sm:$0xff]   ;;  %v10441_v51 = vld [vmem:[%s11119_s8 + $0x1640] ss:$8 sps:$4 sm:$0xff]  }
 0x2cd   : > { %7521 = vmatpush1.bf16.msra.mxu0 %v10353_v29  ;;  %v10440_v45 = vld [vmem:[%s11119_s8 + $0x1734] ss:$8 sps:$4 sm:$0xff]   ;;  %v10438_v48 = vld [vmem:[%s11119_s8 + $0x1730] ss:$8 sps:$4 sm:$0xff]   ;;  %v10443_v29 = vld [vmem:[%s11119_s8 + $0x1644] ss:$8 sps:$4 sm:$0xff]  }
 0x2ce   : > { %7562 = vmatpush1.bf16.msra.mxu1 %v10356_v49  ;;  %7522 = vmatprep.subr.bf16.mxu0 %v10361_v25  ;;  %v10446_v49 = vld [vmem:[%s11119_s8 + $0x1744] ss:$8 sps:$4 sm:$0xff]   ;;  %v10444_v52 = vld [vmem:[%s11119_s8 + $0x1740] ss:$8 sps:$4 sm:$0xff]   ;;  %v10449_v25 = vld [vmem:[%s11119_s8 + $0x1654] ss:$8 sps:$4 sm:$0xff]  }
 0x2cf   : > { %7563 = vmatprep.subr.bf16.mxu1 %v10364_v35  ;;  %v10452_v35 = vld [vmem:[%s11119_s8 + $0x1754] ss:$8 sps:$4 sm:$0xff]  }
 0x2d1   : > { %7523 = vmatpush1.bf16.msra.mxu0 %v10359_v54  ;;  %v10447_v54 = vld [vmem:[%s11119_s8 + $0x1650] ss:$8 sps:$4 sm:$0xff]  }
 0x2d2   : > { %7564 = vmatpush1.bf16.msra.mxu1 %v10362_v55  ;;  %7524 = vmatprep.subr.bf16.mxu0 %v10367_v57  ;;  %v10450_v55 = vld [vmem:[%s11119_s8 + $0x1750] ss:$8 sps:$4 sm:$0xff]   ;;  %v10455_v57 = vld [vmem:[%s11119_s8 + $0x1664] ss:$8 sps:$4 sm:$0xff]  }
 0x2d3   : > { %7565 = vmatprep.subr.bf16.mxu1 %v10370_v59  ;;  %v10458_v59 = vld [vmem:[%s11119_s8 + $0x1764] ss:$8 sps:$4 sm:$0xff]  }
 0x2d5   : > { %7525 = vmatpush1.bf16.msra.mxu0 %v10365_v20 }
 0x2d6   : > { %7566 = vmatpush1.bf16.msra.mxu1 %v10368_v42  ;;  %7526 = vmatprep.subr.bf16.mxu0 %v10373_v41 }
 0x2d7   : > { %7567 = vmatprep.subr.bf16.mxu1 %v10376_v63 }
 0x2d9   : > { %7527 = vmatpush1.bf16.msra.mxu0 %v10371_v0 }
 0x2da   : > { %7568 = vmatpush1.bf16.msra.mxu1 %v10374_v1  ;;  %7528 = vmatprep.subr.bf16.mxu0 %v10379_v46 }
 0x2db   : > { %7569 = vmatprep.subr.bf16.mxu1 %v10382_v4 }
 0x2dd   : > { %7529 = vmatpush1.bf16.msra.mxu0 %v10377_v47  ;;  %v10453_v47 = vld [vmem:[%s11119_s8 + $0x1660] ss:$8 sps:$4 sm:$0xff]  }
 0x2de   : > { %7570 = vmatpush1.bf16.msra.mxu1 %v10380_v5  ;;  %7530 = vmatprep.subr.bf16.mxu0 %v10385_v6  ;;  %v10456_v5 = vld [vmem:[%s11119_s8 + $0x1760] ss:$8 sps:$4 sm:$0xff]  }
 0x2df   : > { %7571 = vmatprep.subr.bf16.mxu1 %v10388_v7 }
 0x2e1   : > { %7531 = vmatpush1.bf16.msra.mxu0 %v10383_v8 }
 0x2e2   : > { %7572 = vmatpush1.bf16.msra.mxu1 %v10386_v9  ;;  %7532 = vmatprep.subr.bf16.mxu0 %v10391_v10  ;;  %v10459_v10 = vld [vmem:[%s11119_s8 + $0x1670] ss:$8 sps:$4 sm:$0xff]  }
 0x2e3   : > { %7573 = vmatprep.subr.bf16.mxu1 %v10394_v11  ;;  %v10462_v11 = vld [vmem:[%s11119_s8 + $0x1770] ss:$8 sps:$4 sm:$0xff]  }
 0x2e5   : > { %7533 = vmatpush1.bf16.msra.mxu0 %v10389_v56  ;;  %v10467_v56 = vld [vmem:[%s11119_s8 + $0x1684] ss:$8 sps:$4 sm:$0xff]  }
 0x2e6   : > { %7574 = vmatpush1.bf16.msra.mxu1 %v10392_v38  ;;  %7534 = vmatprep.subr.bf16.mxu0 %v10397_v60  ;;  %v10470_v38 = vld [vmem:[%s11119_s8 + $0x1784] ss:$8 sps:$4 sm:$0xff]   ;;  %v10465_v60 = vld [vmem:[%s11119_s8 + $0x1680] ss:$8 sps:$4 sm:$0xff]  }
 0x2e7   : > { %7575 = vmatprep.subr.bf16.mxu1 %v10400_v15  ;;  %v10468_v15 = vld [vmem:[%s11119_s8 + $0x1780] ss:$8 sps:$4 sm:$0xff]  }
 0x2e9   : > { %7535 = vmatpush1.bf16.msra.mxu0 %v10395_v62  ;;  %v10473_v62 = vld [vmem:[%s11119_s8 + $0x1694] ss:$8 sps:$4 sm:$0xff]  }
 0x2ea   : > { %7576 = vmatpush1.bf16.msra.mxu1 %v10398_v17  ;;  %7536 = vmatprep.subr.bf16.mxu0 %v10403_v21  ;;  %v10476_v17 = vld [vmem:[%s11119_s8 + $0x1794] ss:$8 sps:$4 sm:$0xff]   ;;  %v10471_v21 = vld [vmem:[%s11119_s8 + $0x1690] ss:$8 sps:$4 sm:$0xff]  }
 0x2eb   : > { %7577 = vmatprep.subr.bf16.mxu1 %v10406_v22  ;;  %v10474_v22 = vld [vmem:[%s11119_s8 + $0x1790] ss:$8 sps:$4 sm:$0xff]  }
 0x2ed   : > { %7537 = vmatpush1.bf16.msra.mxu0 %v10401_v2  ;;  %v10479_v2 = vld [vmem:[%s11119_s8 + $0x16a4] ss:$8 sps:$4 sm:$0xff]  }
 0x2ee   : > { %7578 = vmatpush1.bf16.msra.mxu1 %v10404_v61  ;;  %7538 = vmatprep.subr.bf16.mxu0 %v10409_v3  ;;  %v10482_v61 = vld [vmem:[%s11119_s8 + $0x17a4] ss:$8 sps:$4 sm:$0xff]   ;;  %v10477_v3 = vld [vmem:[%s11119_s8 + $0x16a0] ss:$8 sps:$4 sm:$0xff]  }
 0x2ef   : > { %7579 = vmatprep.subr.bf16.mxu1 %v10412_v18  ;;  %v10480_v18 = vld [vmem:[%s11119_s8 + $0x17a0] ss:$8 sps:$4 sm:$0xff]  }
 0x2f1   : > { %7539 = vmatpush1.bf16.msra.mxu0 %v10407_v27  ;;  %v10485_v27 = vld [vmem:[%s11119_s8 + $0x16b4] ss:$8 sps:$4 sm:$0xff]  }
 0x2f2   : > { %7580 = vmatpush1.bf16.msra.mxu1 %v10410_v28  ;;  %7590 = vmatprep.subr.bf16.mxu0 %v10419_v30  ;;  %v10488_v28 = vld [vmem:[%s11119_s8 + $0x17b4] ss:$8 sps:$4 sm:$0xff]   ;;  %v10483_v30 = vld [vmem:[%s11119_s8 + $0x16b0] ss:$8 sps:$4 sm:$0xff]  }
 0x2f3   : > { %7631 = vmatprep.subr.bf16.mxu1 %v10422_v31  ;;  %v10486_v31 = vld [vmem:[%s11119_s8 + $0x17b0] ss:$8 sps:$4 sm:$0xff]  }
 0x2f4   : > { %7541 = vmatmul.mubr.bf16.vlgmr.msra.gmra.mrb[40].mxu0 %v8209_v32  ;;  %v10491_v32 = vld [vmem:[%s11119_s8 + $0x16c4] ss:$8 sps:$4 sm:$0xff]  }
 0x2f5   : > { %7582 = vmatmul.mubr.bf16.vlgmr.msra.gmra.mrb[40].mxu1 %v8211_v24  ;;  %7591 = vmatpush1.bf16.msra.mxu0 %v10417_v12  ;;  %v10494_v24 = vld [vmem:[%s11119_s8 + $0x17c4] ss:$8 sps:$4 sm:$0xff]   ;;  %v10489_v12 = vld [vmem:[%s11119_s8 + $0x16c0] ss:$8 sps:$4 sm:$0xff]  }
 0x2f6   : > { %7632 = vmatpush1.bf16.msra.mxu1 %v10420_v13  ;;  %7592 = vmatprep.subr.bf16.mxu0 %v10425_v14  ;;  %v10492_v13 = vld [vmem:[%s11119_s8 + $0x17c0] ss:$8 sps:$4 sm:$0xff]   ;;  %v10497_v14 = vld [vmem:[%s11119_s8 + $0x16d4] ss:$8 sps:$4 sm:$0xff]  }
 0x2f7   : > { %7633 = vmatprep.subr.bf16.mxu1 %v10428_v16  ;;  %7622 = vmatprep.mubr.bf16.mxu0 %v8214_v36  ;;  %v10500_v16 = vld [vmem:[%s11119_s8 + $0x17d4] ss:$8 sps:$4 sm:$0xff]   ;;  %v10495_v36 = vld [vmem:[%s11119_s8 + $0x16d0] ss:$8 sps:$4 sm:$0xff]  }
 0x2f8   : > { %7663 = vmatprep.mubr.bf16.mxu1 %v8216_v37  ;;  %v10498_v37 = vld [vmem:[%s11119_s8 + $0x17d0] ss:$8 sps:$4 sm:$0xff]  }
 0x2f9   : > { %7593 = vmatpush1.bf16.msra.mxu0 %v10423_v39  ;;  %v10503_v39 = vld [vmem:[%s11119_s8 + $0x16e4] ss:$8 sps:$4 sm:$0xff]  }
 0x2fa   : > { %7634 = vmatpush1.bf16.msra.mxu1 %v10426_v40  ;;  %7594 = vmatprep.subr.bf16.mxu0 %v10431_v58  ;;  %v10506_v40 = vld [vmem:[%s11119_s8 + $0x17e4] ss:$8 sps:$4 sm:$0xff]   ;;  %v10501_v58 = vld [vmem:[%s11119_s8 + $0x16e0] ss:$8 sps:$4 sm:$0xff]  }
 0x2fb   : > { %7635 = vmatprep.subr.bf16.mxu1 %v10434_v26  ;;  %v10504_v26 = vld [vmem:[%s11119_s8 + $0x17e0] ss:$8 sps:$4 sm:$0xff]  }
 0x2fd   : > { %7595 = vmatpush1.bf16.msra.mxu0 %v10429_v23  ;;  %v10509_v23 = vld [vmem:[%s11119_s8 + $0x16f4] ss:$8 sps:$4 sm:$0xff]  }
 0x2fe   : > { %7636 = vmatpush1.bf16.msra.mxu1 %v10432_v43  ;;  %7596 = vmatprep.subr.bf16.mxu0 %v10437_v44  ;;  %v10512_v43 = vld [vmem:[%s11119_s8 + $0x17f4] ss:$8 sps:$4 sm:$0xff]   ;;  %v10507_v44 = vld [vmem:[%s11119_s8 + $0x16f0] ss:$8 sps:$4 sm:$0xff]  }
 0x2ff   : > { %7637 = vmatprep.subr.bf16.mxu1 %v10440_v45  ;;  %v10510_v45 = vld [vmem:[%s11119_s8 + $0x17f0] ss:$8 sps:$4 sm:$0xff]  }
 0x301   : > { %7597 = vmatpush1.bf16.msra.mxu0 %v10435_v19  ;;  %v10519_v19 = vld [vmem:[%s11119_s8 + $0x1804] ss:$8 sps:$4 sm:$0xff]  }
 0x302   : > { %7638 = vmatpush1.bf16.msra.mxu1 %v10438_v48  ;;  %7598 = vmatprep.subr.bf16.mxu0 %v10443_v29  ;;  %v10522_v48 = vld [vmem:[%s11119_s8 + $0x1904] ss:$8 sps:$4 sm:$0xff]   ;;  %v8213_v29 = vcombine.low %v12060_v33, %v12060_v33  ;;  %v10520_v33 = vld [vmem:[%s11119_s8 + $0x1900] ss:$8 sps:$4 sm:$0xff]  }
 0x303   : > { %7639 = vmatprep.subr.bf16.mxu1 %v10446_v49  ;;  %v8215_v49 = vcombine.low %v12065_v34, %v12065_v34  ;;  %v10525_v34 = vld [vmem:[%s11119_s8 + $0x1814] ss:$8 sps:$4 sm:$0xff]  }
 0x305   : > { %7599 = vmatpush1.bf16.msra.mxu0 %v10441_v51  ;;  %v12148_v51 = vld [vmem:[%s12522_s0 + $0xc0] sm:$0xff] }
 0x306   : > { %7640 = vmatpush1.bf16.msra.mxu1 %v10444_v52  ;;  %7600 = vmatprep.subr.bf16.mxu0 %v10449_v25  ;;  %v12153_v52 = vld [vmem:[%s12522_s0 + $0xc8] sm:$0xff] }
 0x307   : > { %7641 = vmatprep.subr.bf16.mxu1 %v10452_v35  ;;  %v7296_v20 = vpop.f32.mrb[28].mxu0  ;;  %v10517_v25 = vld [vmem:[%s11119_s8 + $0x1800] ss:$8 sps:$4 sm:$0xff]   ;;  %v10528_v35 = vld [vmem:[%s11119_s8 + $0x1914] ss:$8 sps:$4 sm:$0xff]  }
 0x308   : > { %v7337_v42 = vpop.f32.mrb[28].mxu1  ;;  %v7297_v41 = vadd.f32 %v7296_v20, %v12011_v50  ;;  %v7298_v63 = vpop.f32.mrb[29].mxu0  ;;  %v10461_v50 = vld [vmem:[%s11119_s8 + $0x1674] ss:$8 sps:$4 sm:$0xff]   ;;  %v10531_v20 = vld [vmem:[%s11119_s8 + $0x1824] ss:$8 sps:$4 sm:$0xff]  }
 0x309   : > { %v7339_v0 = vpop.f32.mrb[29].mxu1  ;;  %v7299_v1 = vadd.f32 %v7298_v63, %v12015_v53  ;;  %v7300_v46 = vpop.f32.mrb[30].mxu0  ;;  %7601 = vmatpush1.bf16.msra.mxu0 %v10447_v54  ;;  %v10464_v53 = vld [vmem:[%s11119_s8 + $0x1774] ss:$8 sps:$4 sm:$0xff]   ;;  %v8218_v54 = vcombine.high %v12148_v51, %v12148_v51  ;;  %v10532_v63 = vld [vmem:[%s11119_s8 + $0x1920] ss:$8 sps:$4 sm:$0xff]  }
 0x30a   : > { %v7341_v4 = vpop.f32.mrb[30].mxu1  ;;  %7642 = vmatpush1.bf16.msra.mxu1 %v10450_v55  ;;  %v12099_v6 = vadd.f32 %v7337_v42, %v7297_v41  ;;  %v7301_v7 = vpop.f32.mrb[31].mxu0  ;;  %7602 = vmatprep.subr.bf16.mxu0 %v10455_v57  ;;  %v8220_v55 = vcombine.high %v12153_v52, %v12153_v52  ;;  %v10523_v57 = vld [vmem:[%s11119_s8 + $0x1810] ss:$8 sps:$4 sm:$0xff]   ;;  %v10534_v42 = vld [vmem:[%s11119_s8 + $0x1924] ss:$8 sps:$4 sm:$0xff]  }
 0x30b   : > { %v7342_v8 = vpop.f32.mrb[31].mxu1  ;;  %7643 = vmatprep.subr.bf16.mxu1 %v10458_v59  ;;  %v12103_v9 = vadd.f32 %v7339_v0, %v7299_v1  ;;  %v10526_v59 = vld [vmem:[%s11119_s8 + $0x1910] ss:$8 sps:$4 sm:$0xff]   ;;  %v10529_v41 = vld [vmem:[%s11119_s8 + $0x1820] ss:$8 sps:$4 sm:$0xff]  }
 0x30c   : > { %v10537_v0 = vld [vmem:[%s11119_s8 + $0x1834] ss:$8 sps:$4 sm:$0xff]   ;;  %v10535_v46 = vld [vmem:[%s11119_s8 + $0x1830] ss:$8 sps:$4 sm:$0xff]   ;;  %v10541_v7 = vld [vmem:[%s11119_s8 + $0x1840] ss:$8 sps:$4 sm:$0xff]  }
 0x30d   : > { %7603 = vmatpush1.bf16.msra.mxu0 %v10453_v47  ;;  %v10540_v1 = vld [vmem:[%s11119_s8 + $0x1934] ss:$8 sps:$4 sm:$0xff]   ;;  %v10538_v4 = vld [vmem:[%s11119_s8 + $0x1930] ss:$8 sps:$4 sm:$0xff]   ;;  %v10543_v47 = vld [vmem:[%s11119_s8 + $0x1844] ss:$8 sps:$4 sm:$0xff]  }
 0x30e   : > { %7644 = vmatpush1.bf16.msra.mxu1 %v10456_v5  ;;  %7604 = vmatprep.subr.bf16.mxu0 %v10461_v50  ;;  %v10546_v5 = vld [vmem:[%s11119_s8 + $0x1944] ss:$8 sps:$4 sm:$0xff]   ;;  %v10544_v8 = vld [vmem:[%s11119_s8 + $0x1940] ss:$8 sps:$4 sm:$0xff]   ;;  %v10549_v50 = vld [vmem:[%s11119_s8 + $0x1854] ss:$8 sps:$4 sm:$0xff]  }
 0x30f   : > { %7645 = vmatprep.subr.bf16.mxu1 %v10464_v53  ;;  %v10552_v53 = vld [vmem:[%s11119_s8 + $0x1954] ss:$8 sps:$4 sm:$0xff]  }
 0x311   : > { %7605 = vmatpush1.bf16.msra.mxu0 %v10459_v10  ;;  %v10547_v10 = vld [vmem:[%s11119_s8 + $0x1850] ss:$8 sps:$4 sm:$0xff]  }
 0x312   : > { %7646 = vmatpush1.bf16.msra.mxu1 %v10462_v11  ;;  %7606 = vmatprep.subr.bf16.mxu0 %v10467_v56  ;;  %v10550_v11 = vld [vmem:[%s11119_s8 + $0x1950] ss:$8 sps:$4 sm:$0xff]   ;;  %v10555_v56 = vld [vmem:[%s11119_s8 + $0x1864] ss:$8 sps:$4 sm:$0xff]  }
 0x313   : > { %7647 = vmatprep.subr.bf16.mxu1 %v10470_v38  ;;  %v10558_v38 = vld [vmem:[%s11119_s8 + $0x1964] ss:$8 sps:$4 sm:$0xff]  }
 0x315   : > { %7607 = vmatpush1.bf16.msra.mxu0 %v10465_v60 }
 0x316   : > { %7648 = vmatpush1.bf16.msra.mxu1 %v10468_v15  ;;  %7608 = vmatprep.subr.bf16.mxu0 %v10473_v62 }
 0x317   : > { %7649 = vmatprep.subr.bf16.mxu1 %v10476_v17 }
 0x319   : > { %7609 = vmatpush1.bf16.msra.mxu0 %v10471_v21 }
 0x31a   : > { %7650 = vmatpush1.bf16.msra.mxu1 %v10474_v22  ;;  %7610 = vmatprep.subr.bf16.mxu0 %v10479_v2 }
 0x31b   : > { %7651 = vmatprep.subr.bf16.mxu1 %v10482_v61 }
 0x31d   : > { %7611 = vmatpush1.bf16.msra.mxu0 %v10477_v3  ;;  %v10553_v3 = vld [vmem:[%s11119_s8 + $0x1860] ss:$8 sps:$4 sm:$0xff]  }
 0x31e   : > { %7652 = vmatpush1.bf16.msra.mxu1 %v10480_v18  ;;  %7612 = vmatprep.subr.bf16.mxu0 %v10485_v27  ;;  %v10556_v18 = vld [vmem:[%s11119_s8 + $0x1960] ss:$8 sps:$4 sm:$0xff]  }
 0x31f   : > { %7653 = vmatprep.subr.bf16.mxu1 %v10488_v28 }
 0x321   : > { %7613 = vmatpush1.bf16.msra.mxu0 %v10483_v30 }
 0x322   : > { %7654 = vmatpush1.bf16.msra.mxu1 %v10486_v31  ;;  %7614 = vmatprep.subr.bf16.mxu0 %v10491_v32  ;;  %v10559_v32 = vld [vmem:[%s11119_s8 + $0x1870] ss:$8 sps:$4 sm:$0xff]  }
 0x323   : > { %7655 = vmatprep.subr.bf16.mxu1 %v10494_v24  ;;  %v10562_v24 = vld [vmem:[%s11119_s8 + $0x1970] ss:$8 sps:$4 sm:$0xff]  }
 0x325   : > { %7615 = vmatpush1.bf16.msra.mxu0 %v10489_v12  ;;  %v10567_v12 = vld [vmem:[%s11119_s8 + $0x1884] ss:$8 sps:$4 sm:$0xff]  }
 0x326   : > { %7656 = vmatpush1.bf16.msra.mxu1 %v10492_v13  ;;  %7616 = vmatprep.subr.bf16.mxu0 %v10497_v14  ;;  %v10570_v13 = vld [vmem:[%s11119_s8 + $0x1984] ss:$8 sps:$4 sm:$0xff]   ;;  %v10565_v14 = vld [vmem:[%s11119_s8 + $0x1880] ss:$8 sps:$4 sm:$0xff]  }
 0x327   : > { %7657 = vmatprep.subr.bf16.mxu1 %v10500_v16  ;;  %v10568_v16 = vld [vmem:[%s11119_s8 + $0x1980] ss:$8 sps:$4 sm:$0xff]  }
 0x329   : > { %7617 = vmatpush1.bf16.msra.mxu0 %v10495_v36  ;;  %v10573_v36 = vld [vmem:[%s11119_s8 + $0x1894] ss:$8 sps:$4 sm:$0xff]  }
 0x32a   : > { %7658 = vmatpush1.bf16.msra.mxu1 %v10498_v37  ;;  %7618 = vmatprep.subr.bf16.mxu0 %v10503_v39  ;;  %v10576_v37 = vld [vmem:[%s11119_s8 + $0x1994] ss:$8 sps:$4 sm:$0xff]   ;;  %v10571_v39 = vld [vmem:[%s11119_s8 + $0x1890] ss:$8 sps:$4 sm:$0xff]  }
 0x32b   : > { %7659 = vmatprep.subr.bf16.mxu1 %v10506_v40  ;;  %v10574_v40 = vld [vmem:[%s11119_s8 + $0x1990] ss:$8 sps:$4 sm:$0xff]  }
 0x32d   : > { %7619 = vmatpush1.bf16.msra.mxu0 %v10501_v58  ;;  %v10579_v58 = vld [vmem:[%s11119_s8 + $0x18a4] ss:$8 sps:$4 sm:$0xff]  }
 0x32e   : > { %7660 = vmatpush1.bf16.msra.mxu1 %v10504_v26  ;;  %7620 = vmatprep.subr.bf16.mxu0 %v10509_v23  ;;  %v10582_v26 = vld [vmem:[%s11119_s8 + $0x19a4] ss:$8 sps:$4 sm:$0xff]   ;;  %v10577_v23 = vld [vmem:[%s11119_s8 + $0x18a0] ss:$8 sps:$4 sm:$0xff]  }
 0x32f   : > { %7661 = vmatprep.subr.bf16.mxu1 %v10512_v43  ;;  %v10580_v43 = vld [vmem:[%s11119_s8 + $0x19a0] ss:$8 sps:$4 sm:$0xff]  }
 0x331   : > { %7621 = vmatpush1.bf16.msra.mxu0 %v10507_v44  ;;  %v10585_v44 = vld [vmem:[%s11119_s8 + $0x18b4] ss:$8 sps:$4 sm:$0xff]  }
 0x332   : > { %7662 = vmatpush1.bf16.msra.mxu1 %v10510_v45  ;;  %7672 = vmatprep.subr.bf16.mxu0 %v10519_v19  ;;  %v10588_v45 = vld [vmem:[%s11119_s8 + $0x19b4] ss:$8 sps:$4 sm:$0xff]   ;;  %v10583_v19 = vld [vmem:[%s11119_s8 + $0x18b0] ss:$8 sps:$4 sm:$0xff]  }
 0x333   : > { %7713 = vmatprep.subr.bf16.mxu1 %v10522_v48  ;;  %v10586_v48 = vld [vmem:[%s11119_s8 + $0x19b0] ss:$8 sps:$4 sm:$0xff]  }
 0x334   : > { %7623 = vmatmul.mubr.bf16.vlgmr.msra.gmra.mrb[44].mxu0 %v8213_v29  ;;  %v10591_v29 = vld [vmem:[%s11119_s8 + $0x18c4] ss:$8 sps:$4 sm:$0xff]  }
 0x335   : > { %7664 = vmatmul.mubr.bf16.vlgmr.msra.gmra.mrb[44].mxu1 %v8215_v49  ;;  %7673 = vmatpush1.bf16.msra.mxu0 %v10517_v25  ;;  %v10594_v49 = vld [vmem:[%s11119_s8 + $0x19c4] ss:$8 sps:$4 sm:$0xff]   ;;  %v10589_v25 = vld [vmem:[%s11119_s8 + $0x18c0] ss:$8 sps:$4 sm:$0xff]  }
 0x336   : > { %7714 = vmatpush1.bf16.msra.mxu1 %v10520_v33  ;;  %7674 = vmatprep.subr.bf16.mxu0 %v10525_v34  ;;  %v10592_v33 = vld [vmem:[%s11119_s8 + $0x19c0] ss:$8 sps:$4 sm:$0xff]   ;;  %v10597_v34 = vld [vmem:[%s11119_s8 + $0x18d4] ss:$8 sps:$4 sm:$0xff]  }
 0x337   : > { %7715 = vmatprep.subr.bf16.mxu1 %v10528_v35  ;;  %7704 = vmatprep.mubr.bf16.mxu0 %v8218_v54  ;;  %v10600_v35 = vld [vmem:[%s11119_s8 + $0x19d4] ss:$8 sps:$4 sm:$0xff]   ;;  %v10595_v54 = vld [vmem:[%s11119_s8 + $0x18d0] ss:$8 sps:$4 sm:$0xff]  }
 0x338   : > { %7745 = vmatprep.mubr.bf16.mxu1 %v8220_v55  ;;  %v10598_v55 = vld [vmem:[%s11119_s8 + $0x19d0] ss:$8 sps:$4 sm:$0xff]  }
 0x339   : > { %7675 = vmatpush1.bf16.msra.mxu0 %v10523_v57  ;;  %v10603_v57 = vld [vmem:[%s11119_s8 + $0x18e4] ss:$8 sps:$4 sm:$0xff]  }
 0x33a   : > { %7716 = vmatpush1.bf16.msra.mxu1 %v10526_v59  ;;  %7676 = vmatprep.subr.bf16.mxu0 %v10531_v20  ;;  %v10606_v59 = vld [vmem:[%s11119_s8 + $0x19e4] ss:$8 sps:$4 sm:$0xff]   ;;  %v10601_v20 = vld [vmem:[%s11119_s8 + $0x18e0] ss:$8 sps:$4 sm:$0xff]  }
 0x33b   : > { %7717 = vmatprep.subr.bf16.mxu1 %v10534_v42  ;;  %v10604_v42 = vld [vmem:[%s11119_s8 + $0x19e0] ss:$8 sps:$4 sm:$0xff]  }
 0x33d   : > { %7677 = vmatpush1.bf16.msra.mxu0 %v10529_v41  ;;  %v10609_v41 = vld [vmem:[%s11119_s8 + $0x18f4] ss:$8 sps:$4 sm:$0xff]  }
 0x33e   : > { %7718 = vmatpush1.bf16.msra.mxu1 %v10532_v63  ;;  %7678 = vmatprep.subr.bf16.mxu0 %v10537_v0  ;;  %v10612_v63 = vld [vmem:[%s11119_s8 + $0x19f4] ss:$8 sps:$4 sm:$0xff]   ;;  %v10607_v0 = vld [vmem:[%s11119_s8 + $0x18f0] ss:$8 sps:$4 sm:$0xff]  }
 0x33f   : > { %7719 = vmatprep.subr.bf16.mxu1 %v10540_v1  ;;  %v10610_v1 = vld [vmem:[%s11119_s8 + $0x19f0] ss:$8 sps:$4 sm:$0xff]  }
 0x341   : > { %7679 = vmatpush1.bf16.msra.mxu0 %v10535_v46  ;;  %v10619_v46 = vld [vmem:[%s11119_s8 + $0x1a04] ss:$8 sps:$4 sm:$0xff]  }
 0x342   : > { %7720 = vmatpush1.bf16.msra.mxu1 %v10538_v4  ;;  %7680 = vmatprep.subr.bf16.mxu0 %v10543_v47  ;;  %v10622_v4 = vld [vmem:[%s11119_s8 + $0x1b04] ss:$8 sps:$4 sm:$0xff]   ;;  %v8217_v47 = vcombine.low %v12148_v51, %v12148_v51  ;;  %v10620_v51 = vld [vmem:[%s11119_s8 + $0x1b00] ss:$8 sps:$4 sm:$0xff]  }
 0x343   : > { %7721 = vmatprep.subr.bf16.mxu1 %v10546_v5  ;;  %v8219_v5 = vcombine.low %v12153_v52, %v12153_v52  ;;  %v10625_v52 = vld [vmem:[%s11119_s8 + $0x1a14] ss:$8 sps:$4 sm:$0xff]  }
 0x345   : > { %7681 = vmatpush1.bf16.msra.mxu0 %v10541_v7  ;;  %v12236_v7 = vld [vmem:[%s12522_s0 + $0xd0] sm:$0xff] }
 0x346   : > { %7722 = vmatpush1.bf16.msra.mxu1 %v10544_v8  ;;  %7682 = vmatprep.subr.bf16.mxu0 %v10549_v50  ;;  %v12241_v8 = vld [vmem:[%s12522_s0 + $0xd8] sm:$0xff]  ;;  %v10617_v50 = vld [vmem:[%s11119_s8 + $0x1a00] ss:$8 sps:$4 sm:$0xff]  }
 0x347   : > { %7723 = vmatprep.subr.bf16.mxu1 %v10552_v53  ;;  %v7378_v60 = vpop.f32.mrb[32].mxu0  ;;  %v10628_v53 = vld [vmem:[%s11119_s8 + $0x1b14] ss:$8 sps:$4 sm:$0xff]  }
 0x348   : > { %v7419_v15 = vpop.f32.mrb[32].mxu1  ;;  %v7379_v62 = vadd.f32 %v7378_v60, %v12099_v6  ;;  %v7380_v17 = vpop.f32.mrb[33].mxu0  ;;  %v10561_v6 = vld [vmem:[%s11119_s8 + $0x1874] ss:$8 sps:$4 sm:$0xff]   ;;  %v10631_v60 = vld [vmem:[%s11119_s8 + $0x1a24] ss:$8 sps:$4 sm:$0xff]  }
 0x349   : > { %v7421_v21 = vpop.f32.mrb[33].mxu1  ;;  %v7381_v22 = vadd.f32 %v7380_v17, %v12103_v9  ;;  %v7382_v2 = vpop.f32.mrb[34].mxu0  ;;  %7683 = vmatpush1.bf16.msra.mxu0 %v10547_v10  ;;  %v10564_v9 = vld [vmem:[%s11119_s8 + $0x1974] ss:$8 sps:$4 sm:$0xff]   ;;  %v8222_v10 = vcombine.high %v12236_v7, %v12236_v7  ;;  %v10632_v17 = vld [vmem:[%s11119_s8 + $0x1b20] ss:$8 sps:$4 sm:$0xff]  }
 0x34a   : > { %v7423_v61 = vpop.f32.mrb[34].mxu1  ;;  %7724 = vmatpush1.bf16.msra.mxu1 %v10550_v11  ;;  %v12187_v27 = vadd.f32 %v7419_v15, %v7379_v62  ;;  %v7383_v28 = vpop.f32.mrb[35].mxu0  ;;  %7684 = vmatprep.subr.bf16.mxu0 %v10555_v56  ;;  %v8224_v11 = vcombine.high %v12241_v8, %v12241_v8  ;;  %v10623_v56 = vld [vmem:[%s11119_s8 + $0x1a10] ss:$8 sps:$4 sm:$0xff]   ;;  %v10634_v15 = vld [vmem:[%s11119_s8 + $0x1b24] ss:$8 sps:$4 sm:$0xff]  }
 0x34b   : > { %v7424_v30 = vpop.f32.mrb[35].mxu1  ;;  %7725 = vmatprep.subr.bf16.mxu1 %v10558_v38  ;;  %v12191_v31 = vadd.f32 %v7421_v21, %v7381_v22  ;;  %v10626_v38 = vld [vmem:[%s11119_s8 + $0x1b10] ss:$8 sps:$4 sm:$0xff]   ;;  %v10629_v62 = vld [vmem:[%s11119_s8 + $0x1a20] ss:$8 sps:$4 sm:$0xff]  }
 0x34c   : > { %v10637_v21 = vld [vmem:[%s11119_s8 + $0x1a34] ss:$8 sps:$4 sm:$0xff]   ;;  %v10635_v2 = vld [vmem:[%s11119_s8 + $0x1a30] ss:$8 sps:$4 sm:$0xff]   ;;  %v10641_v28 = vld [vmem:[%s11119_s8 + $0x1a40] ss:$8 sps:$4 sm:$0xff]  }
 0x34d   : > { %7685 = vmatpush1.bf16.msra.mxu0 %v10553_v3  ;;  %v10640_v22 = vld [vmem:[%s11119_s8 + $0x1b34] ss:$8 sps:$4 sm:$0xff]   ;;  %v10638_v61 = vld [vmem:[%s11119_s8 + $0x1b30] ss:$8 sps:$4 sm:$0xff]   ;;  %v10643_v3 = vld [vmem:[%s11119_s8 + $0x1a44] ss:$8 sps:$4 sm:$0xff]  }
 0x34e   : > { %7726 = vmatpush1.bf16.msra.mxu1 %v10556_v18  ;;  %7686 = vmatprep.subr.bf16.mxu0 %v10561_v6  ;;  %v10646_v18 = vld [vmem:[%s11119_s8 + $0x1b44] ss:$8 sps:$4 sm:$0xff]   ;;  %v10644_v30 = vld [vmem:[%s11119_s8 + $0x1b40] ss:$8 sps:$4 sm:$0xff]   ;;  %v10649_v6 = vld [vmem:[%s11119_s8 + $0x1a54] ss:$8 sps:$4 sm:$0xff]  }
 0x34f   : > { %7727 = vmatprep.subr.bf16.mxu1 %v10564_v9  ;;  %v10652_v9 = vld [vmem:[%s11119_s8 + $0x1b54] ss:$8 sps:$4 sm:$0xff]  }
 0x351   : > { %7687 = vmatpush1.bf16.msra.mxu0 %v10559_v32  ;;  %v10647_v32 = vld [vmem:[%s11119_s8 + $0x1a50] ss:$8 sps:$4 sm:$0xff]  }
 0x352   : > { %7728 = vmatpush1.bf16.msra.mxu1 %v10562_v24  ;;  %7688 = vmatprep.subr.bf16.mxu0 %v10567_v12  ;;  %v10650_v24 = vld [vmem:[%s11119_s8 + $0x1b50] ss:$8 sps:$4 sm:$0xff]   ;;  %v10655_v12 = vld [vmem:[%s11119_s8 + $0x1a64] ss:$8 sps:$4 sm:$0xff]  }
 0x353   : > { %7729 = vmatprep.subr.bf16.mxu1 %v10570_v13  ;;  %v10658_v13 = vld [vmem:[%s11119_s8 + $0x1b64] ss:$8 sps:$4 sm:$0xff]  }
 0x355   : > { %7689 = vmatpush1.bf16.msra.mxu0 %v10565_v14 }
 0x356   : > { %7730 = vmatpush1.bf16.msra.mxu1 %v10568_v16  ;;  %7690 = vmatprep.subr.bf16.mxu0 %v10573_v36 }
 0x357   : > { %7731 = vmatprep.subr.bf16.mxu1 %v10576_v37 }
 0x359   : > { %7691 = vmatpush1.bf16.msra.mxu0 %v10571_v39 }
 0x35a   : > { %7732 = vmatpush1.bf16.msra.mxu1 %v10574_v40  ;;  %7692 = vmatprep.subr.bf16.mxu0 %v10579_v58 }
 0x35b   : > { %7733 = vmatprep.subr.bf16.mxu1 %v10582_v26 }
 0x35d   : > { %7693 = vmatpush1.bf16.msra.mxu0 %v10577_v23  ;;  %v10653_v23 = vld [vmem:[%s11119_s8 + $0x1a60] ss:$8 sps:$4 sm:$0xff]  }
 0x35e   : > { %7734 = vmatpush1.bf16.msra.mxu1 %v10580_v43  ;;  %7694 = vmatprep.subr.bf16.mxu0 %v10585_v44  ;;  %v10656_v43 = vld [vmem:[%s11119_s8 + $0x1b60] ss:$8 sps:$4 sm:$0xff]  }
 0x35f   : > { %7735 = vmatprep.subr.bf16.mxu1 %v10588_v45 }
 0x361   : > { %7695 = vmatpush1.bf16.msra.mxu0 %v10583_v19 }
 0x362   : > { %7736 = vmatpush1.bf16.msra.mxu1 %v10586_v48  ;;  %7696 = vmatprep.subr.bf16.mxu0 %v10591_v29  ;;  %v10659_v29 = vld [vmem:[%s11119_s8 + $0x1a70] ss:$8 sps:$4 sm:$0xff]  }
 0x363   : > { %7737 = vmatprep.subr.bf16.mxu1 %v10594_v49  ;;  %v10662_v49 = vld [vmem:[%s11119_s8 + $0x1b70] ss:$8 sps:$4 sm:$0xff]  }
 0x365   : > { %7697 = vmatpush1.bf16.msra.mxu0 %v10589_v25  ;;  %v10667_v25 = vld [vmem:[%s11119_s8 + $0x1a84] ss:$8 sps:$4 sm:$0xff]  }
 0x366   : > { %7738 = vmatpush1.bf16.msra.mxu1 %v10592_v33  ;;  %7698 = vmatprep.subr.bf16.mxu0 %v10597_v34  ;;  %v10670_v33 = vld [vmem:[%s11119_s8 + $0x1b84] ss:$8 sps:$4 sm:$0xff]   ;;  %v10665_v34 = vld [vmem:[%s11119_s8 + $0x1a80] ss:$8 sps:$4 sm:$0xff]  }
 0x367   : > { %7739 = vmatprep.subr.bf16.mxu1 %v10600_v35  ;;  %v10668_v35 = vld [vmem:[%s11119_s8 + $0x1b80] ss:$8 sps:$4 sm:$0xff]  }
 0x369   : > { %7699 = vmatpush1.bf16.msra.mxu0 %v10595_v54  ;;  %v10673_v54 = vld [vmem:[%s11119_s8 + $0x1a94] ss:$8 sps:$4 sm:$0xff]  }
 0x36a   : > { %7740 = vmatpush1.bf16.msra.mxu1 %v10598_v55  ;;  %7700 = vmatprep.subr.bf16.mxu0 %v10603_v57  ;;  %v10676_v55 = vld [vmem:[%s11119_s8 + $0x1b94] ss:$8 sps:$4 sm:$0xff]   ;;  %v10671_v57 = vld [vmem:[%s11119_s8 + $0x1a90] ss:$8 sps:$4 sm:$0xff]  }
 0x36b   : > { %7741 = vmatprep.subr.bf16.mxu1 %v10606_v59  ;;  %v10674_v59 = vld [vmem:[%s11119_s8 + $0x1b90] ss:$8 sps:$4 sm:$0xff]  }
 0x36d   : > { %7701 = vmatpush1.bf16.msra.mxu0 %v10601_v20  ;;  %v10679_v20 = vld [vmem:[%s11119_s8 + $0x1aa4] ss:$8 sps:$4 sm:$0xff]  }
 0x36e   : > { %7742 = vmatpush1.bf16.msra.mxu1 %v10604_v42  ;;  %7702 = vmatprep.subr.bf16.mxu0 %v10609_v41  ;;  %v10682_v42 = vld [vmem:[%s11119_s8 + $0x1ba4] ss:$8 sps:$4 sm:$0xff]   ;;  %v10677_v41 = vld [vmem:[%s11119_s8 + $0x1aa0] ss:$8 sps:$4 sm:$0xff]  }
 0x36f   : > { %7743 = vmatprep.subr.bf16.mxu1 %v10612_v63  ;;  %v10680_v63 = vld [vmem:[%s11119_s8 + $0x1ba0] ss:$8 sps:$4 sm:$0xff]  }
 0x371   : > { %7703 = vmatpush1.bf16.msra.mxu0 %v10607_v0  ;;  %v10685_v0 = vld [vmem:[%s11119_s8 + $0x1ab4] ss:$8 sps:$4 sm:$0xff]  }
 0x372   : > { %7744 = vmatpush1.bf16.msra.mxu1 %v10610_v1  ;;  %7754 = vmatprep.subr.bf16.mxu0 %v10619_v46  ;;  %v10688_v1 = vld [vmem:[%s11119_s8 + $0x1bb4] ss:$8 sps:$4 sm:$0xff]   ;;  %v10683_v46 = vld [vmem:[%s11119_s8 + $0x1ab0] ss:$8 sps:$4 sm:$0xff]  }
 0x373   : > { %7795 = vmatprep.subr.bf16.mxu1 %v10622_v4  ;;  %v10686_v4 = vld [vmem:[%s11119_s8 + $0x1bb0] ss:$8 sps:$4 sm:$0xff]  }
 0x374   : > { %7705 = vmatmul.mubr.bf16.vlgmr.msra.gmra.mrb[48].mxu0 %v8217_v47  ;;  %v10691_v47 = vld [vmem:[%s11119_s8 + $0x1ac4] ss:$8 sps:$4 sm:$0xff]  }
 0x375   : > { %7746 = vmatmul.mubr.bf16.vlgmr.msra.gmra.mrb[48].mxu1 %v8219_v5  ;;  %7755 = vmatpush1.bf16.msra.mxu0 %v10617_v50  ;;  %v10694_v5 = vld [vmem:[%s11119_s8 + $0x1bc4] ss:$8 sps:$4 sm:$0xff]   ;;  %v10689_v50 = vld [vmem:[%s11119_s8 + $0x1ac0] ss:$8 sps:$4 sm:$0xff]  }
 0x376   : > { %7796 = vmatpush1.bf16.msra.mxu1 %v10620_v51  ;;  %7756 = vmatprep.subr.bf16.mxu0 %v10625_v52  ;;  %v10692_v51 = vld [vmem:[%s11119_s8 + $0x1bc0] ss:$8 sps:$4 sm:$0xff]   ;;  %v10697_v52 = vld [vmem:[%s11119_s8 + $0x1ad4] ss:$8 sps:$4 sm:$0xff]  }
 0x377   : > { %7797 = vmatprep.subr.bf16.mxu1 %v10628_v53  ;;  %7786 = vmatprep.mubr.bf16.mxu0 %v8222_v10  ;;  %v10700_v53 = vld [vmem:[%s11119_s8 + $0x1bd4] ss:$8 sps:$4 sm:$0xff]   ;;  %v10695_v10 = vld [vmem:[%s11119_s8 + $0x1ad0] ss:$8 sps:$4 sm:$0xff]  }
 0x378   : > { %7827 = vmatprep.mubr.bf16.mxu1 %v8224_v11  ;;  %v10698_v11 = vld [vmem:[%s11119_s8 + $0x1bd0] ss:$8 sps:$4 sm:$0xff]  }
 0x379   : > { %7757 = vmatpush1.bf16.msra.mxu0 %v10623_v56  ;;  %v10703_v56 = vld [vmem:[%s11119_s8 + $0x1ae4] ss:$8 sps:$4 sm:$0xff]  }
 0x37a   : > { %7798 = vmatpush1.bf16.msra.mxu1 %v10626_v38  ;;  %7758 = vmatprep.subr.bf16.mxu0 %v10631_v60  ;;  %v10706_v38 = vld [vmem:[%s11119_s8 + $0x1be4] ss:$8 sps:$4 sm:$0xff]   ;;  %v10701_v60 = vld [vmem:[%s11119_s8 + $0x1ae0] ss:$8 sps:$4 sm:$0xff]  }
 0x37b   : > { %7799 = vmatprep.subr.bf16.mxu1 %v10634_v15  ;;  %v10704_v15 = vld [vmem:[%s11119_s8 + $0x1be0] ss:$8 sps:$4 sm:$0xff]  }
 0x37d   : > { %7759 = vmatpush1.bf16.msra.mxu0 %v10629_v62  ;;  %v10709_v62 = vld [vmem:[%s11119_s8 + $0x1af4] ss:$8 sps:$4 sm:$0xff]  }
 0x37e   : > { %7800 = vmatpush1.bf16.msra.mxu1 %v10632_v17  ;;  %7760 = vmatprep.subr.bf16.mxu0 %v10637_v21  ;;  %v10712_v17 = vld [vmem:[%s11119_s8 + $0x1bf4] ss:$8 sps:$4 sm:$0xff]   ;;  %v10707_v21 = vld [vmem:[%s11119_s8 + $0x1af0] ss:$8 sps:$4 sm:$0xff]  }
 0x37f   : > { %7801 = vmatprep.subr.bf16.mxu1 %v10640_v22  ;;  %v10710_v22 = vld [vmem:[%s11119_s8 + $0x1bf0] ss:$8 sps:$4 sm:$0xff]  }
 0x381   : > { %7761 = vmatpush1.bf16.msra.mxu0 %v10635_v2  ;;  %v10719_v2 = vld [vmem:[%s11119_s8 + $0x1c04] ss:$8 sps:$4 sm:$0xff]  }
 0x382   : > { %7802 = vmatpush1.bf16.msra.mxu1 %v10638_v61  ;;  %7762 = vmatprep.subr.bf16.mxu0 %v10643_v3  ;;  %v10722_v61 = vld [vmem:[%s11119_s8 + $0x1d04] ss:$8 sps:$4 sm:$0xff]   ;;  %v8221_v3 = vcombine.low %v12236_v7, %v12236_v7  ;;  %v10720_v7 = vld [vmem:[%s11119_s8 + $0x1d00] ss:$8 sps:$4 sm:$0xff]  }
 0x383   : > { %7803 = vmatprep.subr.bf16.mxu1 %v10646_v18  ;;  %v8223_v18 = vcombine.low %v12241_v8, %v12241_v8  ;;  %v10725_v8 = vld [vmem:[%s11119_s8 + $0x1c14] ss:$8 sps:$4 sm:$0xff]  }
 0x385   : > { %7763 = vmatpush1.bf16.msra.mxu0 %v10641_v28  ;;  %v12324_v28 = vld [vmem:[%s12522_s0 + $0xe0] sm:$0xff] }
 0x386   : > { %7804 = vmatpush1.bf16.msra.mxu1 %v10644_v30  ;;  %7764 = vmatprep.subr.bf16.mxu0 %v10649_v6  ;;  %v12329_v30 = vld [vmem:[%s12522_s0 + $0xe8] sm:$0xff] }
 0x387   : > { %7805 = vmatprep.subr.bf16.mxu1 %v10652_v9  ;;  %v7460_v14 = vpop.f32.mrb[36].mxu0  ;;  %v10717_v6 = vld [vmem:[%s11119_s8 + $0x1c00] ss:$8 sps:$4 sm:$0xff]   ;;  %v10728_v9 = vld [vmem:[%s11119_s8 + $0x1d14] ss:$8 sps:$4 sm:$0xff]  }
 0x388   : > { %v7501_v16 = vpop.f32.mrb[36].mxu1  ;;  %v7461_v36 = vadd.f32 %v7460_v14, %v12187_v27  ;;  %v7462_v37 = vpop.f32.mrb[37].mxu0  ;;  %v10661_v27 = vld [vmem:[%s11119_s8 + $0x1a74] ss:$8 sps:$4 sm:$0xff]   ;;  %v10731_v14 = vld [vmem:[%s11119_s8 + $0x1c24] ss:$8 sps:$4 sm:$0xff]  }
 0x389   : > { %v7503_v39 = vpop.f32.mrb[37].mxu1  ;;  %v7463_v40 = vadd.f32 %v7462_v37, %v12191_v31  ;;  %v7464_v58 = vpop.f32.mrb[38].mxu0  ;;  %7765 = vmatpush1.bf16.msra.mxu0 %v10647_v32  ;;  %v10664_v31 = vld [vmem:[%s11119_s8 + $0x1b74] ss:$8 sps:$4 sm:$0xff]   ;;  %v8226_v32 = vcombine.high %v12324_v28, %v12324_v28  ;;  %v10732_v37 = vld [vmem:[%s11119_s8 + $0x1d20] ss:$8 sps:$4 sm:$0xff]  }
 0x38a   : > { %v7505_v26 = vpop.f32.mrb[38].mxu1  ;;  %7806 = vmatpush1.bf16.msra.mxu1 %v10650_v24  ;;  %v12275_v44 = vadd.f32 %v7501_v16, %v7461_v36  ;;  %v7465_v45 = vpop.f32.mrb[39].mxu0  ;;  %7766 = vmatprep.subr.bf16.mxu0 %v10655_v12  ;;  %v8228_v24 = vcombine.high %v12329_v30, %v12329_v30  ;;  %v10723_v12 = vld [vmem:[%s11119_s8 + $0x1c10] ss:$8 sps:$4 sm:$0xff]   ;;  %v10734_v16 = vld [vmem:[%s11119_s8 + $0x1d24] ss:$8 sps:$4 sm:$0xff]  }
 0x38b   : > { %v7506_v19 = vpop.f32.mrb[39].mxu1  ;;  %7807 = vmatprep.subr.bf16.mxu1 %v10658_v13  ;;  %v12279_v48 = vadd.f32 %v7503_v39, %v7463_v40  ;;  %v10726_v13 = vld [vmem:[%s11119_s8 + $0x1d10] ss:$8 sps:$4 sm:$0xff]   ;;  %v10729_v36 = vld [vmem:[%s11119_s8 + $0x1c20] ss:$8 sps:$4 sm:$0xff]  }
 0x38c   : > { %v10737_v39 = vld [vmem:[%s11119_s8 + $0x1c34] ss:$8 sps:$4 sm:$0xff]   ;;  %v10735_v58 = vld [vmem:[%s11119_s8 + $0x1c30] ss:$8 sps:$4 sm:$0xff]   ;;  %v10741_v45 = vld [vmem:[%s11119_s8 + $0x1c40] ss:$8 sps:$4 sm:$0xff]  }
 0x38d   : > { %7767 = vmatpush1.bf16.msra.mxu0 %v10653_v23  ;;  %v10740_v40 = vld [vmem:[%s11119_s8 + $0x1d34] ss:$8 sps:$4 sm:$0xff]   ;;  %v10738_v26 = vld [vmem:[%s11119_s8 + $0x1d30] ss:$8 sps:$4 sm:$0xff]   ;;  %v10743_v23 = vld [vmem:[%s11119_s8 + $0x1c44] ss:$8 sps:$4 sm:$0xff]  }
 0x38e   : > { %7808 = vmatpush1.bf16.msra.mxu1 %v10656_v43  ;;  %7768 = vmatprep.subr.bf16.mxu0 %v10661_v27  ;;  %v10746_v43 = vld [vmem:[%s11119_s8 + $0x1d44] ss:$8 sps:$4 sm:$0xff]   ;;  %v10744_v19 = vld [vmem:[%s11119_s8 + $0x1d40] ss:$8 sps:$4 sm:$0xff]   ;;  %v10749_v27 = vld [vmem:[%s11119_s8 + $0x1c54] ss:$8 sps:$4 sm:$0xff]  }
 0x38f   : > { %7809 = vmatprep.subr.bf16.mxu1 %v10664_v31  ;;  %v10752_v31 = vld [vmem:[%s11119_s8 + $0x1d54] ss:$8 sps:$4 sm:$0xff]  }
 0x391   : > { %7769 = vmatpush1.bf16.msra.mxu0 %v10659_v29  ;;  %v10747_v29 = vld [vmem:[%s11119_s8 + $0x1c50] ss:$8 sps:$4 sm:$0xff]  }
 0x392   : > { %7810 = vmatpush1.bf16.msra.mxu1 %v10662_v49  ;;  %7770 = vmatprep.subr.bf16.mxu0 %v10667_v25  ;;  %v10750_v49 = vld [vmem:[%s11119_s8 + $0x1d50] ss:$8 sps:$4 sm:$0xff]   ;;  %v10755_v25 = vld [vmem:[%s11119_s8 + $0x1c64] ss:$8 sps:$4 sm:$0xff]  }
 0x393   : > { %7811 = vmatprep.subr.bf16.mxu1 %v10670_v33  ;;  %v10758_v33 = vld [vmem:[%s11119_s8 + $0x1d64] ss:$8 sps:$4 sm:$0xff]  }
 0x395   : > { %7771 = vmatpush1.bf16.msra.mxu0 %v10665_v34 }
 0x396   : > { %7812 = vmatpush1.bf16.msra.mxu1 %v10668_v35  ;;  %7772 = vmatprep.subr.bf16.mxu0 %v10673_v54 }
 0x397   : > { %7813 = vmatprep.subr.bf16.mxu1 %v10676_v55 }
 0x399   : > { %7773 = vmatpush1.bf16.msra.mxu0 %v10671_v57 }
 0x39a   : > { %7814 = vmatpush1.bf16.msra.mxu1 %v10674_v59  ;;  %7774 = vmatprep.subr.bf16.mxu0 %v10679_v20 }
 0x39b   : > { %7815 = vmatprep.subr.bf16.mxu1 %v10682_v42 }
 0x39d   : > { %7775 = vmatpush1.bf16.msra.mxu0 %v10677_v41  ;;  %v10753_v41 = vld [vmem:[%s11119_s8 + $0x1c60] ss:$8 sps:$4 sm:$0xff]  }
 0x39e   : > { %7816 = vmatpush1.bf16.msra.mxu1 %v10680_v63  ;;  %7776 = vmatprep.subr.bf16.mxu0 %v10685_v0  ;;  %v10756_v63 = vld [vmem:[%s11119_s8 + $0x1d60] ss:$8 sps:$4 sm:$0xff]  }
 0x39f   : > { %7817 = vmatprep.subr.bf16.mxu1 %v10688_v1 }
 0x3a1   : > { %7777 = vmatpush1.bf16.msra.mxu0 %v10683_v46 }
 0x3a2   : > { %7818 = vmatpush1.bf16.msra.mxu1 %v10686_v4  ;;  %7778 = vmatprep.subr.bf16.mxu0 %v10691_v47  ;;  %v10759_v47 = vld [vmem:[%s11119_s8 + $0x1c70] ss:$8 sps:$4 sm:$0xff]  }
 0x3a3   : > { %7819 = vmatprep.subr.bf16.mxu1 %v10694_v5  ;;  %v10762_v5 = vld [vmem:[%s11119_s8 + $0x1d70] ss:$8 sps:$4 sm:$0xff]  }
 0x3a5   : > { %7779 = vmatpush1.bf16.msra.mxu0 %v10689_v50  ;;  %v10767_v50 = vld [vmem:[%s11119_s8 + $0x1c84] ss:$8 sps:$4 sm:$0xff]  }
 0x3a6   : > { %7820 = vmatpush1.bf16.msra.mxu1 %v10692_v51  ;;  %7780 = vmatprep.subr.bf16.mxu0 %v10697_v52  ;;  %v10770_v51 = vld [vmem:[%s11119_s8 + $0x1d84] ss:$8 sps:$4 sm:$0xff]   ;;  %v10765_v52 = vld [vmem:[%s11119_s8 + $0x1c80] ss:$8 sps:$4 sm:$0xff]  }
 0x3a7   : > { %7821 = vmatprep.subr.bf16.mxu1 %v10700_v53  ;;  %v10768_v53 = vld [vmem:[%s11119_s8 + $0x1d80] ss:$8 sps:$4 sm:$0xff]  }
 0x3a9   : > { %7781 = vmatpush1.bf16.msra.mxu0 %v10695_v10  ;;  %v10773_v10 = vld [vmem:[%s11119_s8 + $0x1c94] ss:$8 sps:$4 sm:$0xff]  }
 0x3aa   : > { %7822 = vmatpush1.bf16.msra.mxu1 %v10698_v11  ;;  %7782 = vmatprep.subr.bf16.mxu0 %v10703_v56  ;;  %v10776_v11 = vld [vmem:[%s11119_s8 + $0x1d94] ss:$8 sps:$4 sm:$0xff]   ;;  %v10771_v56 = vld [vmem:[%s11119_s8 + $0x1c90] ss:$8 sps:$4 sm:$0xff]  }
 0x3ab   : > { %7823 = vmatprep.subr.bf16.mxu1 %v10706_v38  ;;  %v10774_v38 = vld [vmem:[%s11119_s8 + $0x1d90] ss:$8 sps:$4 sm:$0xff]  }
 0x3ad   : > { %7783 = vmatpush1.bf16.msra.mxu0 %v10701_v60  ;;  %v10779_v60 = vld [vmem:[%s11119_s8 + $0x1ca4] ss:$8 sps:$4 sm:$0xff]  }
 0x3ae   : > { %7824 = vmatpush1.bf16.msra.mxu1 %v10704_v15  ;;  %7784 = vmatprep.subr.bf16.mxu0 %v10709_v62  ;;  %v10782_v15 = vld [vmem:[%s11119_s8 + $0x1da4] ss:$8 sps:$4 sm:$0xff]   ;;  %v10777_v62 = vld [vmem:[%s11119_s8 + $0x1ca0] ss:$8 sps:$4 sm:$0xff]  }
 0x3af   : > { %7825 = vmatprep.subr.bf16.mxu1 %v10712_v17  ;;  %v10780_v17 = vld [vmem:[%s11119_s8 + $0x1da0] ss:$8 sps:$4 sm:$0xff]  }
 0x3b1   : > { %7785 = vmatpush1.bf16.msra.mxu0 %v10707_v21  ;;  %v10785_v21 = vld [vmem:[%s11119_s8 + $0x1cb4] ss:$8 sps:$4 sm:$0xff]  }
 0x3b2   : > { %7826 = vmatpush1.bf16.msra.mxu1 %v10710_v22  ;;  %7836 = vmatprep.subr.bf16.mxu0 %v10719_v2  ;;  %v10788_v22 = vld [vmem:[%s11119_s8 + $0x1db4] ss:$8 sps:$4 sm:$0xff]   ;;  %v10783_v2 = vld [vmem:[%s11119_s8 + $0x1cb0] ss:$8 sps:$4 sm:$0xff]  }
 0x3b3   : > { %7877 = vmatprep.subr.bf16.mxu1 %v10722_v61  ;;  %v10786_v61 = vld [vmem:[%s11119_s8 + $0x1db0] ss:$8 sps:$4 sm:$0xff]  }
 0x3b4   : > { %7787 = vmatmul.mubr.bf16.vlgmr.msra.gmra.mrb[52].mxu0 %v8221_v3  ;;  %v10791_v3 = vld [vmem:[%s11119_s8 + $0x1cc4] ss:$8 sps:$4 sm:$0xff]  }
 0x3b5   : > { %7828 = vmatmul.mubr.bf16.vlgmr.msra.gmra.mrb[52].mxu1 %v8223_v18  ;;  %7837 = vmatpush1.bf16.msra.mxu0 %v10717_v6  ;;  %v10794_v18 = vld [vmem:[%s11119_s8 + $0x1dc4] ss:$8 sps:$4 sm:$0xff]   ;;  %v10789_v6 = vld [vmem:[%s11119_s8 + $0x1cc0] ss:$8 sps:$4 sm:$0xff]  }
 0x3b6   : > { %7878 = vmatpush1.bf16.msra.mxu1 %v10720_v7  ;;  %7838 = vmatprep.subr.bf16.mxu0 %v10725_v8  ;;  %v10792_v7 = vld [vmem:[%s11119_s8 + $0x1dc0] ss:$8 sps:$4 sm:$0xff]   ;;  %v10797_v8 = vld [vmem:[%s11119_s8 + $0x1cd4] ss:$8 sps:$4 sm:$0xff]  }
 0x3b7   : > { %7879 = vmatprep.subr.bf16.mxu1 %v10728_v9  ;;  %7868 = vmatprep.mubr.bf16.mxu0 %v8226_v32  ;;  %v10800_v9 = vld [vmem:[%s11119_s8 + $0x1dd4] ss:$8 sps:$4 sm:$0xff]   ;;  %v10795_v32 = vld [vmem:[%s11119_s8 + $0x1cd0] ss:$8 sps:$4 sm:$0xff]  }
 0x3b8   : > { %7909 = vmatprep.mubr.bf16.mxu1 %v8228_v24  ;;  %v10798_v24 = vld [vmem:[%s11119_s8 + $0x1dd0] ss:$8 sps:$4 sm:$0xff]  }
 0x3b9   : > { %7839 = vmatpush1.bf16.msra.mxu0 %v10723_v12  ;;  %v10803_v12 = vld [vmem:[%s11119_s8 + $0x1ce4] ss:$8 sps:$4 sm:$0xff]  }
 0x3ba   : > { %7880 = vmatpush1.bf16.msra.mxu1 %v10726_v13  ;;  %7840 = vmatprep.subr.bf16.mxu0 %v10731_v14  ;;  %v10806_v13 = vld [vmem:[%s11119_s8 + $0x1de4] ss:$8 sps:$4 sm:$0xff]   ;;  %v10801_v14 = vld [vmem:[%s11119_s8 + $0x1ce0] ss:$8 sps:$4 sm:$0xff]  }
 0x3bb   : > { %7881 = vmatprep.subr.bf16.mxu1 %v10734_v16  ;;  %v10804_v16 = vld [vmem:[%s11119_s8 + $0x1de0] ss:$8 sps:$4 sm:$0xff]  }
 0x3bd   : > { %7841 = vmatpush1.bf16.msra.mxu0 %v10729_v36  ;;  %v10809_v36 = vld [vmem:[%s11119_s8 + $0x1cf4] ss:$8 sps:$4 sm:$0xff]  }
 0x3be   : > { %7882 = vmatpush1.bf16.msra.mxu1 %v10732_v37  ;;  %7842 = vmatprep.subr.bf16.mxu0 %v10737_v39  ;;  %v10812_v37 = vld [vmem:[%s11119_s8 + $0x1df4] ss:$8 sps:$4 sm:$0xff]   ;;  %v10807_v39 = vld [vmem:[%s11119_s8 + $0x1cf0] ss:$8 sps:$4 sm:$0xff]  }
 0x3bf   : > { %7883 = vmatprep.subr.bf16.mxu1 %v10740_v40  ;;  %v10810_v40 = vld [vmem:[%s11119_s8 + $0x1df0] ss:$8 sps:$4 sm:$0xff]  }
 0x3c1   : > { %7843 = vmatpush1.bf16.msra.mxu0 %v10735_v58  ;;  %v10819_v58 = vld [vmem:[%s11119_s8 + $0x1e04] ss:$8 sps:$4 sm:$0xff]  }
 0x3c2   : > { %7884 = vmatpush1.bf16.msra.mxu1 %v10738_v26  ;;  %7844 = vmatprep.subr.bf16.mxu0 %v10743_v23  ;;  %v10822_v26 = vld [vmem:[%s11119_s8 + $0x1f04] ss:$8 sps:$4 sm:$0xff]   ;;  %v8225_v23 = vcombine.low %v12324_v28, %v12324_v28  ;;  %v10820_v28 = vld [vmem:[%s11119_s8 + $0x1f00] ss:$8 sps:$4 sm:$0xff]  }
 0x3c3   : > { %7885 = vmatprep.subr.bf16.mxu1 %v10746_v43  ;;  %v8227_v43 = vcombine.low %v12329_v30, %v12329_v30  ;;  %v10825_v30 = vld [vmem:[%s11119_s8 + $0x1e14] ss:$8 sps:$4 sm:$0xff]  }
 0x3c5   : > { %7845 = vmatpush1.bf16.msra.mxu0 %v10741_v45  ;;  %v12412_v45 = vld [vmem:[%s12522_s0 + $0xf0] sm:$0xff] }
 0x3c6   : > { %7886 = vmatpush1.bf16.msra.mxu1 %v10744_v19  ;;  %7846 = vmatprep.subr.bf16.mxu0 %v10749_v27  ;;  %v12417_v19 = vld [vmem:[%s12522_s0 + $0xf8] sm:$0xff]  ;;  %v10817_v27 = vld [vmem:[%s11119_s8 + $0x1e00] ss:$8 sps:$4 sm:$0xff]  }
 0x3c7   : > { %7887 = vmatprep.subr.bf16.mxu1 %v10752_v31  ;;  %v7542_v34 = vpop.f32.mrb[40].mxu0  ;;  %v10828_v31 = vld [vmem:[%s11119_s8 + $0x1f14] ss:$8 sps:$4 sm:$0xff]  }
 0x3c8   : > { %v7583_v35 = vpop.f32.mrb[40].mxu1  ;;  %v7543_v54 = vadd.f32 %v7542_v34, %v12275_v44  ;;  %v7544_v55 = vpop.f32.mrb[41].mxu0  ;;  %v10761_v44 = vld [vmem:[%s11119_s8 + $0x1c74] ss:$8 sps:$4 sm:$0xff]   ;;  %v10831_v34 = vld [vmem:[%s11119_s8 + $0x1e24] ss:$8 sps:$4 sm:$0xff]  }
 0x3c9   : > { %v7585_v57 = vpop.f32.mrb[41].mxu1  ;;  %v7545_v59 = vadd.f32 %v7544_v55, %v12279_v48  ;;  %v7546_v20 = vpop.f32.mrb[42].mxu0  ;;  %7847 = vmatpush1.bf16.msra.mxu0 %v10747_v29  ;;  %v10764_v48 = vld [vmem:[%s11119_s8 + $0x1d74] ss:$8 sps:$4 sm:$0xff]   ;;  %v8230_v29 = vcombine.high %v12412_v45, %v12412_v45  ;;  %v10832_v55 = vld [vmem:[%s11119_s8 + $0x1f20] ss:$8 sps:$4 sm:$0xff]  }
 0x3ca   : > { %v7587_v42 = vpop.f32.mrb[42].mxu1  ;;  %7888 = vmatpush1.bf16.msra.mxu1 %v10750_v49  ;;  %v12363_v0 = vadd.f32 %v7583_v35, %v7543_v54  ;;  %v7547_v1 = vpop.f32.mrb[43].mxu0  ;;  %7848 = vmatprep.subr.bf16.mxu0 %v10755_v25  ;;  %v8232_v49 = vcombine.high %v12417_v19, %v12417_v19  ;;  %v10823_v25 = vld [vmem:[%s11119_s8 + $0x1e10] ss:$8 sps:$4 sm:$0xff]   ;;  %v10834_v35 = vld [vmem:[%s11119_s8 + $0x1f24] ss:$8 sps:$4 sm:$0xff]  }
 0x3cb   : > { %v7588_v46 = vpop.f32.mrb[43].mxu1  ;;  %7889 = vmatprep.subr.bf16.mxu1 %v10758_v33  ;;  %v12367_v4 = vadd.f32 %v7585_v57, %v7545_v59  ;;  %v10826_v33 = vld [vmem:[%s11119_s8 + $0x1f10] ss:$8 sps:$4 sm:$0xff]   ;;  %v10829_v54 = vld [vmem:[%s11119_s8 + $0x1e20] ss:$8 sps:$4 sm:$0xff]  }
 0x3cc   : > { %v10837_v57 = vld [vmem:[%s11119_s8 + $0x1e34] ss:$8 sps:$4 sm:$0xff]   ;;  %v10835_v20 = vld [vmem:[%s11119_s8 + $0x1e30] ss:$8 sps:$4 sm:$0xff]   ;;  %v10841_v1 = vld [vmem:[%s11119_s8 + $0x1e40] ss:$8 sps:$4 sm:$0xff]  }
 0x3cd   : > { %7849 = vmatpush1.bf16.msra.mxu0 %v10753_v41  ;;  %v10840_v59 = vld [vmem:[%s11119_s8 + $0x1f34] ss:$8 sps:$4 sm:$0xff]   ;;  %v10838_v42 = vld [vmem:[%s11119_s8 + $0x1f30] ss:$8 sps:$4 sm:$0xff]   ;;  %v10843_v41 = vld [vmem:[%s11119_s8 + $0x1e44] ss:$8 sps:$4 sm:$0xff]  }
 0x3ce   : > { %7890 = vmatpush1.bf16.msra.mxu1 %v10756_v63  ;;  %7850 = vmatprep.subr.bf16.mxu0 %v10761_v44  ;;  %v10846_v63 = vld [vmem:[%s11119_s8 + $0x1f44] ss:$8 sps:$4 sm:$0xff]   ;;  %v10844_v46 = vld [vmem:[%s11119_s8 + $0x1f40] ss:$8 sps:$4 sm:$0xff]   ;;  %v10849_v44 = vld [vmem:[%s11119_s8 + $0x1e54] ss:$8 sps:$4 sm:$0xff]  }
 0x3cf   : > { %7891 = vmatprep.subr.bf16.mxu1 %v10764_v48  ;;  %v10852_v48 = vld [vmem:[%s11119_s8 + $0x1f54] ss:$8 sps:$4 sm:$0xff]  }
 0x3d1   : > { %7851 = vmatpush1.bf16.msra.mxu0 %v10759_v47  ;;  %v10847_v47 = vld [vmem:[%s11119_s8 + $0x1e50] ss:$8 sps:$4 sm:$0xff]  }
 0x3d2   : > { %7892 = vmatpush1.bf16.msra.mxu1 %v10762_v5  ;;  %7852 = vmatprep.subr.bf16.mxu0 %v10767_v50  ;;  %v10850_v5 = vld [vmem:[%s11119_s8 + $0x1f50] ss:$8 sps:$4 sm:$0xff]   ;;  %v10855_v50 = vld [vmem:[%s11119_s8 + $0x1e64] ss:$8 sps:$4 sm:$0xff]  }
 0x3d3   : > { %7893 = vmatprep.subr.bf16.mxu1 %v10770_v51  ;;  %v10858_v51 = vld [vmem:[%s11119_s8 + $0x1f64] ss:$8 sps:$4 sm:$0xff]  }
 0x3d5   : > { %7853 = vmatpush1.bf16.msra.mxu0 %v10765_v52 }
 0x3d6   : > { %7894 = vmatpush1.bf16.msra.mxu1 %v10768_v53  ;;  %7854 = vmatprep.subr.bf16.mxu0 %v10773_v10 }
 0x3d7   : > { %7895 = vmatprep.subr.bf16.mxu1 %v10776_v11 }
 0x3d9   : > { %7855 = vmatpush1.bf16.msra.mxu0 %v10771_v56 }
 0x3da   : > { %7896 = vmatpush1.bf16.msra.mxu1 %v10774_v38  ;;  %7856 = vmatprep.subr.bf16.mxu0 %v10779_v60 }
 0x3db   : > { %7897 = vmatprep.subr.bf16.mxu1 %v10782_v15 }
 0x3dd   : > { %7857 = vmatpush1.bf16.msra.mxu0 %v10777_v62  ;;  %v10853_v62 = vld [vmem:[%s11119_s8 + $0x1e60] ss:$8 sps:$4 sm:$0xff]  }
 0x3de   : > { %7898 = vmatpush1.bf16.msra.mxu1 %v10780_v17  ;;  %7858 = vmatprep.subr.bf16.mxu0 %v10785_v21  ;;  %v10856_v17 = vld [vmem:[%s11119_s8 + $0x1f60] ss:$8 sps:$4 sm:$0xff]  }
 0x3df   : > { %7899 = vmatprep.subr.bf16.mxu1 %v10788_v22 }
 0x3e1   : > { %7859 = vmatpush1.bf16.msra.mxu0 %v10783_v2 }
 0x3e2   : > { %7900 = vmatpush1.bf16.msra.mxu1 %v10786_v61  ;;  %7860 = vmatprep.subr.bf16.mxu0 %v10791_v3  ;;  %v10859_v3 = vld [vmem:[%s11119_s8 + $0x1e70] ss:$8 sps:$4 sm:$0xff]  }
 0x3e3   : > { %7901 = vmatprep.subr.bf16.mxu1 %v10794_v18  ;;  %v10862_v18 = vld [vmem:[%s11119_s8 + $0x1f70] ss:$8 sps:$4 sm:$0xff]  }
 0x3e5   : > { %7861 = vmatpush1.bf16.msra.mxu0 %v10789_v6  ;;  %v10867_v6 = vld [vmem:[%s11119_s8 + $0x1e84] ss:$8 sps:$4 sm:$0xff]  }
 0x3e6   : > { %7902 = vmatpush1.bf16.msra.mxu1 %v10792_v7  ;;  %7862 = vmatprep.subr.bf16.mxu0 %v10797_v8  ;;  %v10870_v7 = vld [vmem:[%s11119_s8 + $0x1f84] ss:$8 sps:$4 sm:$0xff]   ;;  %v10865_v8 = vld [vmem:[%s11119_s8 + $0x1e80] ss:$8 sps:$4 sm:$0xff]  }
 0x3e7   : > { %7903 = vmatprep.subr.bf16.mxu1 %v10800_v9  ;;  %v10868_v9 = vld [vmem:[%s11119_s8 + $0x1f80] ss:$8 sps:$4 sm:$0xff]  }
 0x3e9   : > { %7863 = vmatpush1.bf16.msra.mxu0 %v10795_v32  ;;  %v10873_v32 = vld [vmem:[%s11119_s8 + $0x1e94] ss:$8 sps:$4 sm:$0xff]  }
 0x3ea   : > { %7904 = vmatpush1.bf16.msra.mxu1 %v10798_v24  ;;  %7864 = vmatprep.subr.bf16.mxu0 %v10803_v12  ;;  %v10876_v24 = vld [vmem:[%s11119_s8 + $0x1f94] ss:$8 sps:$4 sm:$0xff]   ;;  %v10871_v12 = vld [vmem:[%s11119_s8 + $0x1e90] ss:$8 sps:$4 sm:$0xff]  }
 0x3eb   : > { %7905 = vmatprep.subr.bf16.mxu1 %v10806_v13  ;;  %v10874_v13 = vld [vmem:[%s11119_s8 + $0x1f90] ss:$8 sps:$4 sm:$0xff]  }
 0x3ed   : > { %7865 = vmatpush1.bf16.msra.mxu0 %v10801_v14  ;;  %v10879_v14 = vld [vmem:[%s11119_s8 + $0x1ea4] ss:$8 sps:$4 sm:$0xff]  }
 0x3ee   : > { %7906 = vmatpush1.bf16.msra.mxu1 %v10804_v16  ;;  %7866 = vmatprep.subr.bf16.mxu0 %v10809_v36  ;;  %v10882_v16 = vld [vmem:[%s11119_s8 + $0x1fa4] ss:$8 sps:$4 sm:$0xff]   ;;  %v10877_v36 = vld [vmem:[%s11119_s8 + $0x1ea0] ss:$8 sps:$4 sm:$0xff]  }
 0x3ef   : > { %7907 = vmatprep.subr.bf16.mxu1 %v10812_v37  ;;  %v10880_v37 = vld [vmem:[%s11119_s8 + $0x1fa0] ss:$8 sps:$4 sm:$0xff]  }
 0x3f1   : > { %7867 = vmatpush1.bf16.msra.mxu0 %v10807_v39  ;;  %v10885_v39 = vld [vmem:[%s11119_s8 + $0x1eb4] ss:$8 sps:$4 sm:$0xff]  }
 0x3f2   : > { %7908 = vmatpush1.bf16.msra.mxu1 %v10810_v40  ;;  %7918 = vmatprep.subr.bf16.mxu0 %v10819_v58  ;;  %v10888_v40 = vld [vmem:[%s11119_s8 + $0x1fb4] ss:$8 sps:$4 sm:$0xff]   ;;  %v10883_v58 = vld [vmem:[%s11119_s8 + $0x1eb0] ss:$8 sps:$4 sm:$0xff]  }
 0x3f3   : > { %7959 = vmatprep.subr.bf16.mxu1 %v10822_v26  ;;  %v10886_v26 = vld [vmem:[%s11119_s8 + $0x1fb0] ss:$8 sps:$4 sm:$0xff]  }
 0x3f4   : > { %7869 = vmatmul.mubr.bf16.vlgmr.msra.gmra.mrb[56].mxu0 %v8225_v23  ;;  %v10891_v23 = vld [vmem:[%s11119_s8 + $0x1ec4] ss:$8 sps:$4 sm:$0xff]  }
 0x3f5   : > { %7910 = vmatmul.mubr.bf16.vlgmr.msra.gmra.mrb[56].mxu1 %v8227_v43  ;;  %7919 = vmatpush1.bf16.msra.mxu0 %v10817_v27  ;;  %v10894_v43 = vld [vmem:[%s11119_s8 + $0x1fc4] ss:$8 sps:$4 sm:$0xff]   ;;  %v10889_v27 = vld [vmem:[%s11119_s8 + $0x1ec0] ss:$8 sps:$4 sm:$0xff]  }
 0x3f6   : > { %7960 = vmatpush1.bf16.msra.mxu1 %v10820_v28  ;;  %7920 = vmatprep.subr.bf16.mxu0 %v10825_v30  ;;  %v10892_v28 = vld [vmem:[%s11119_s8 + $0x1fc0] ss:$8 sps:$4 sm:$0xff]   ;;  %v10897_v30 = vld [vmem:[%s11119_s8 + $0x1ed4] ss:$8 sps:$4 sm:$0xff]  }
 0x3f7   : > { %7961 = vmatprep.subr.bf16.mxu1 %v10828_v31  ;;  %7950 = vmatprep.mubr.bf16.mxu0 %v8230_v29  ;;  %v10900_v31 = vld [vmem:[%s11119_s8 + $0x1fd4] ss:$8 sps:$4 sm:$0xff]   ;;  %v10895_v29 = vld [vmem:[%s11119_s8 + $0x1ed0] ss:$8 sps:$4 sm:$0xff]  }
 0x3f8   : > { %7991 = vmatprep.mubr.bf16.mxu1 %v8232_v49  ;;  %v10898_v49 = vld [vmem:[%s11119_s8 + $0x1fd0] ss:$8 sps:$4 sm:$0xff]  }
 0x3f9   : > { %7921 = vmatpush1.bf16.msra.mxu0 %v10823_v25  ;;  %v10903_v25 = vld [vmem:[%s11119_s8 + $0x1ee4] ss:$8 sps:$4 sm:$0xff]  }
 0x3fa   : > { %7962 = vmatpush1.bf16.msra.mxu1 %v10826_v33  ;;  %7922 = vmatprep.subr.bf16.mxu0 %v10831_v34  ;;  %v10906_v33 = vld [vmem:[%s11119_s8 + $0x1fe4] ss:$8 sps:$4 sm:$0xff]   ;;  %v10901_v34 = vld [vmem:[%s11119_s8 + $0x1ee0] ss:$8 sps:$4 sm:$0xff]  }
 0x3fb   : > { %7963 = vmatprep.subr.bf16.mxu1 %v10834_v35  ;;  %v10904_v35 = vld [vmem:[%s11119_s8 + $0x1fe0] ss:$8 sps:$4 sm:$0xff]  }
 0x3fd   : > { %7923 = vmatpush1.bf16.msra.mxu0 %v10829_v54  ;;  %v10909_v54 = vld [vmem:[%s11119_s8 + $0x1ef4] ss:$8 sps:$4 sm:$0xff]  }
 0x3fe   : > { %7964 = vmatpush1.bf16.msra.mxu1 %v10832_v55  ;;  %7924 = vmatprep.subr.bf16.mxu0 %v10837_v57  ;;  %v10912_v55 = vld [vmem:[%s11119_s8 + $0x1ff4] ss:$8 sps:$4 sm:$0xff]   ;;  %v10907_v57 = vld [vmem:[%s11119_s8 + $0x1ef0] ss:$8 sps:$4 sm:$0xff]  }
 0x3ff   : > { %7965 = vmatprep.subr.bf16.mxu1 %v10840_v59  ;;  %v10910_v59 = vld [vmem:[%s11119_s8 + $0x1ff0] ss:$8 sps:$4 sm:$0xff]  }
 0x401   : > { %7925 = vmatpush1.bf16.msra.mxu0 %v10835_v20  ;;  %v8229_v20 = vcombine.low %v12412_v45, %v12412_v45 }
 0x402   : > { %7966 = vmatpush1.bf16.msra.mxu1 %v10838_v42  ;;  %7926 = vmatprep.subr.bf16.mxu0 %v10843_v41  ;;  %v8231_v42 = vcombine.low %v12417_v19, %v12417_v19 }
 0x403   : > { %7967 = vmatprep.subr.bf16.mxu1 %v10846_v63 }
 0x405   : > { %7927 = vmatpush1.bf16.msra.mxu0 %v10841_v1 }
 0x406   : > { %7968 = vmatpush1.bf16.msra.mxu1 %v10844_v46  ;;  %7928 = vmatprep.subr.bf16.mxu0 %v10849_v44 }
 0x407   : > { %7969 = vmatprep.subr.bf16.mxu1 %v10852_v48  ;;  %v7624_v52 = vpop.f32.mrb[44].mxu0 }
 0x408   : > { %v7665_v53 = vpop.f32.mrb[44].mxu1  ;;  %v7625_v10 = vadd.f32 %v7624_v52, %v12363_v0  ;;  %v7626_v11 = vpop.f32.mrb[45].mxu0  ;;  %v10861_v0 = vld [vmem:[%s11119_s8 + $0x1e74] ss:$8 sps:$4 sm:$0xff]  }
 0x409   : > { %v7667_v56 = vpop.f32.mrb[45].mxu1  ;;  %v7627_v38 = vadd.f32 %v7626_v11, %v12367_v4  ;;  %v7628_v60 = vpop.f32.mrb[46].mxu0  ;;  %7929 = vmatpush1.bf16.msra.mxu0 %v10847_v47  ;;  %v10864_v4 = vld [vmem:[%s11119_s8 + $0x1f74] ss:$8 sps:$4 sm:$0xff]   ;;  %s8166_s8 = sshll.u32 %s10989_s15, 1 }
 0x40a   : > { %v7669_v15 = vpop.f32.mrb[46].mxu1  ;;  %7970 = vmatpush1.bf16.msra.mxu1 %v10850_v5  ;;  %v12451_v21 = vadd.f32 %v7665_v53, %v7625_v10  ;;  %v7629_v22 = vpop.f32.mrb[47].mxu0  ;;  %7930 = vmatprep.subr.bf16.mxu0 %v10855_v50  ;;  %p266_p7 = scmp.lt.s32.totalorder %s8166_s8, 37 }
 0x40b   : > { %v7670_v2 = vpop.f32.mrb[47].mxu1  ;;  %7971 = vmatprep.subr.bf16.mxu1 %v10858_v51  ;;  %v12455_v61 = vadd.f32 %v7667_v56, %v7627_v38 }
 0x40c   : > { %s12537_s8 = smov (!%p266_p7, %s8166_s8), 37 }
 0x40d   : > { %7931 = vmatpush1.bf16.msra.mxu0 %v10853_v62  ;;  %s268_s18 = scalar_lea.vmem %s12524_s2, %s12537_s8  ;;  %s8168_s20 = sshll.u32 %s12537_s8, 3 }
 0x40e   : > { %7972 = vmatpush1.bf16.msra.mxu1 %v10856_v17  ;;  %7932 = vmatprep.subr.bf16.mxu0 %v10861_v0  ;;  %s278_s22 = scalar_lea.vmem %s12525_s3, %s8168_s20 }
 0x40f   : > { %7973 = vmatprep.subr.bf16.mxu1 %v10864_v4 }
 0x411   : > { %7933 = vmatpush1.bf16.msra.mxu0 %v10859_v3 }
 0x412   : > { %7974 = vmatpush1.bf16.msra.mxu1 %v10862_v18  ;;  %7934 = vmatprep.subr.bf16.mxu0 %v10867_v6 }
 0x413   : > { %7975 = vmatprep.subr.bf16.mxu1 %v10870_v7 }
 0x415   : > { %7935 = vmatpush1.bf16.msra.mxu0 %v10865_v8 }
 0x416   : > { %7976 = vmatpush1.bf16.msra.mxu1 %v10868_v9  ;;  %7936 = vmatprep.subr.bf16.mxu0 %v10873_v32 }
 0x417   : > { %7977 = vmatprep.subr.bf16.mxu1 %v10876_v24 }
 0x419   : > { %7937 = vmatpush1.bf16.msra.mxu0 %v10871_v12  ;;  %v8011_v12 = vlaneseq }
 0x41a   : > { %7978 = vmatpush1.bf16.msra.mxu1 %v10874_v13  ;;  %7938 = vmatprep.subr.bf16.mxu0 %v10879_v14 }
 0x41b   : > { %7979 = vmatprep.subr.bf16.mxu1 %v10882_v16  ;;  %v8012_v13 = vshrl.u32 %v8011_v12, 7  ;;  %v8009_v16 = vld [vmem:[%s268_s18] sm:$0x3] }
 0x41d   : > { %7939 = vmatpush1.bf16.msra.mxu0 %v10877_v36  ;;  %v8013_v14 = vsub.s32 0, %v8012_v13  ;;  %v8017_v36 = vsub.s32 1, %v8012_v13 }
 0x41e   : > { %7980 = vmatpush1.bf16.msra.mxu1 %v10880_v37  ;;  %7940 = vmatprep.subr.bf16.mxu0 %v10885_v39 }
 0x41f   : > { %7981 = vmatprep.subr.bf16.mxu1 %v10888_v40 }
 0x421   : > { %7941 = vmatpush1.bf16.msra.mxu0 %v10883_v58  ;;  %v8014_v58 = vrot.slane %v8009_v16, %v8013_v14 }
 0x422   : > { %7982 = vmatpush1.bf16.msra.mxu1 %v10886_v26  ;;  %7942 = vmatprep.subr.bf16.mxu0 %v10891_v23 }
 0x423   : > { %7983 = vmatprep.subr.bf16.mxu1 %v10894_v43 }
 0x425   : > { %7943 = vmatpush1.bf16.msra.mxu0 %v10889_v27  ;;  %v8018_v27 = vrot.slane %v8009_v16, %v8017_v36 }
 0x426   : > { %7984 = vmatpush1.bf16.msra.mxu1 %v10892_v28  ;;  %7944 = vmatprep.subr.bf16.mxu0 %v10897_v30 }
 0x427   : > { %7985 = vmatprep.subr.bf16.mxu1 %v10900_v31 }
 0x429   : > { %7945 = vmatpush1.bf16.msra.mxu0 %v10895_v29 }
 0x42a   : > { %7986 = vmatpush1.bf16.msra.mxu1 %v10898_v49  ;;  %7946 = vmatprep.subr.bf16.mxu0 %v10903_v25 }
 0x42b   : > { %7987 = vmatprep.subr.bf16.mxu1 %v10906_v33 }
 0x42d   : > { %7947 = vmatpush1.bf16.msra.mxu0 %v10901_v34 }
 0x42e   : > { %7988 = vmatpush1.bf16.msra.mxu1 %v10904_v35  ;;  %7948 = vmatprep.subr.bf16.mxu0 %v10909_v54 }
 0x42f   : > { %7989 = vmatprep.subr.bf16.mxu1 %v10912_v55 }
 0x431   : > { %7949 = vmatpush1.bf16.msra.mxu0 %v10907_v57 }
 0x432   : > { %7990 = vmatpush1.bf16.msra.mxu1 %v10910_v59 }
 0x434   : > { %7951 = vmatmul.mubr.bf16.vlgmr.msra.gmra.mrb[60].mxu0 %v8229_v20 }
 0x435   : > { %7992 = vmatmul.mubr.bf16.vlgmr.msra.gmra.mrb[60].mxu1 %v8231_v42 }
 0x447   : > { %v7706_v41 = vpop.f32.mrb[48].mxu0 }
 0x448   : > { %v7747_v63 = vpop.f32.mrb[48].mxu1  ;;  %v7707_v1 = vadd.f32 %v7706_v41, %v12451_v21  ;;  %v7708_v46 = vpop.f32.mrb[49].mxu0 }
 0x449   : > { %v7749_v44 = vpop.f32.mrb[49].mxu1  ;;  %v7709_v48 = vadd.f32 %v7708_v46, %v12455_v61  ;;  %v7710_v47 = vpop.f32.mrb[50].mxu0 }
 0x44a   : > { %v7751_v5 = vpop.f32.mrb[50].mxu1  ;;  %v7748_v50 = vadd.f32 %v7747_v63, %v7707_v1  ;;  %v7711_v51 = vpop.f32.mrb[51].mxu0 }
 0x44b   : > { %v7752_v45 = vpop.f32.mrb[51].mxu1  ;;  %v7750_v52 = vadd.f32 %v7749_v44, %v7709_v48 }
 0x487   : > { %v7788_v53 = vpop.f32.mrb[52].mxu0 }
 0x488   : > { %v7829_v19 = vpop.f32.mrb[52].mxu1  ;;  %v7789_v10 = vadd.f32 %v7788_v53, %v7748_v50  ;;  %v7790_v11 = vpop.f32.mrb[53].mxu0 }
 0x489   : > { %v7831_v56 = vpop.f32.mrb[53].mxu1  ;;  %v7791_v38 = vadd.f32 %v7790_v11, %v7750_v52  ;;  %v7792_v60 = vpop.f32.mrb[54].mxu0 }
 0x48a   : > { %v7833_v15 = vpop.f32.mrb[54].mxu1  ;;  %v7830_v62 = vadd.f32 %v7829_v19, %v7789_v10  ;;  %v7793_v17 = vpop.f32.mrb[55].mxu0 }
 0x48b   : > { %v7834_v21 = vpop.f32.mrb[55].mxu1  ;;  %v7832_v22 = vadd.f32 %v7831_v56, %v7791_v38 }
 0x4c7   : > { %v7870_v2 = vpop.f32.mrb[56].mxu0 }
 0x4c8   : > { %v7911_v0 = vpop.f32.mrb[56].mxu1  ;;  %v7871_v4 = vadd.f32 %v7870_v2, %v7830_v62  ;;  %v7872_v61 = vpop.f32.mrb[57].mxu0 }
 0x4c9   : > { %v7913_v3 = vpop.f32.mrb[57].mxu1  ;;  %v7873_v18 = vadd.f32 %v7872_v61, %v7832_v22  ;;  %v7874_v6 = vpop.f32.mrb[58].mxu0 }
 0x4ca   : > { %v7915_v7 = vpop.f32.mrb[58].mxu1  ;;  %v7912_v8 = vadd.f32 %v7911_v0, %v7871_v4  ;;  %v7875_v9 = vpop.f32.mrb[59].mxu0 }
 0x4cb   : > { %v7916_v32 = vpop.f32.mrb[59].mxu1  ;;  %v7914_v24 = vadd.f32 %v7913_v3, %v7873_v18 }
 0x507   : > { %v7952_v37 = vpop.f32.mrb[60].mxu0 }
 0x508   : > { %v7993_v39 = vpop.f32.mrb[60].mxu1  ;;  %v7953_v40 = vadd.f32 %v7952_v37, %v7912_v8  ;;  %v7954_v26 = vpop.f32.mrb[61].mxu0 }
 0x509   : > { %v7995_v23 = vpop.f32.mrb[61].mxu1  ;;  %v7955_v43 = vadd.f32 %v7954_v26, %v7914_v24  ;;  %v7956_v28 = vpop.f32.mrb[62].mxu0 }
 0x50a   : > { %v7997_v30 = vpop.f32.mrb[62].mxu1  ;;  %v7994_v31 = vadd.f32 %v7993_v39, %v7953_v40  ;;  %v7957_v29 = vpop.f32.mrb[63].mxu0 }
 0x50b   : > { %v7998_v49 = vpop.f32.mrb[63].mxu1  ;;  %v7996_v25 = vadd.f32 %v7995_v23, %v7955_v43 }
 0x50c   : > { %v8021_v33 = vadd.f32 %v8014_v58, %v7994_v31 }
 0x50d   : > { %v8022_v34 = vadd.f32 %v8018_v27, %v7996_v25 }
 0x50e   : > { %8023 = vst [vmem:[%s278_s22] sm:$0xff] %v8021_v33 }
 0x50f   : > { %8024 = vst [vmem:[%s278_s22 + $0x8] sm:$0xff] %v8022_v34 }
 0x510 PF: > { %s16_s17 = sadd.s32 1, %s10997_s17   ;;  %s12529_s12 = smov %s10981_s13 }
 0x511   : > { %p13_p9 = scmp.ge.s32.totalorder %s16_s17, 21   ;;  %s12530_s13 = smov %s10985_s14 }
 0x512   : > { %s12531_s14 = smov %s11071_s24  ;;  %s12532_s15 = smov %s10993_s16 }
 0x513   : > { %s12533_s16 = smov %s12535_s19  ;;  %15 = sbr.rel (!%p13_p9) target bundleno = 4 (0x4), region = 86 }
 0x51a   :  { %8055 = vsyncpa [#allocation4], 1 }
 0x51b   :  { %8057 = vsyncpa [#allocation4 + $0x1], 1 }

</bundles_post_ra>
